<compile_context>
chip_gen: v6e
topology: v6e:2x2x1
jax: 0.10.0
libtpu: 0.0.40
codegen_flags: <defaults>
</compile_context>

<pallas_src>
import functools

import jax
import jax.numpy as jnp
from jax import lax
from jax.experimental import pallas as pl
from jax.experimental.pallas import tpu as pltpu

HIDDEN = 256
GATES = 4 * HIDDEN
NUM_LSTM_LAYERS = 6
OUT_PAD = 128  # lane-dense padded output width (ACTION_DIM << 128)


# ----------------------------------------------------------------------------
# Fused Pallas kernel: one grid step = one stacked-LSTM layer; the MLP head
# runs inside the last grid step.
# ----------------------------------------------------------------------------
def _actor_con_kernel(T, B,
                      x_ref, wih_ref, whh_ref, b_ref,
                      w1_ref, b1_ref, w2_ref, b2_ref, w3_ref, b3_ref,
                      o_ref, act_scr, xw_scr):
    """
    x_ref  : (T*B, H)       f32   padded/flattened input (resident; used at layer 0)
    wih_ref: (1, H, 4H)     bf16  this layer's W_ih (layer 0 zero-padded to H rows)
    whh_ref: (1, H, 4H)     bf16  this layer's W_hh
    b_ref  : (1, 1, 4H)     f32   this layer's combined bias (b_ih + b_hh)
    w1..b3 : MLP head (resident; W in bf16, b in f32; W3/b3 padded to OUT_PAD)
    o_ref  : (T*B, OUT_PAD) f32   lane-dense padded MLP output
    act_scr: (T*B, H)       f32   layer activations, carried across grid steps
    xw_scr : (T*B, 4H)      f32   hoisted input projection for the whole sequence
    """
    H = HIDDEN
    layer = pl.program_id(0)

    @pl.when(layer == 0)
    def _():
        act_scr[...] = x_ref[...]

    # Weights arrive as bf16 (halved HBM traffic); compute in f32.  The upcasts
    # happen once per grid step (hoisted above the unrolled recurrence).
    w_ih = wih_ref[0].astype(jnp.float32)   # (H, 4H)
    w_hh = whh_ref[0].astype(jnp.float32)   # (H, 4H)
    bias = b_ref[0]                         # (1, 4H)

    # Hoisted input projection + bias for the whole sequence: one big MXU
    # matmul per layer instead of T tiny ones (and no per-step broadcast).
    xw_scr[...] = (
        jnp.dot(act_scr[...], w_ih, preferred_element_type=jnp.float32) + bias
    )

    h = jnp.zeros((B, H), jnp.float32)
    c = jnp.zeros((B, H), jnp.float32)

    # Fully-unrolled recurrence (T static & small): per step only h @ W_hh.
    # Row slices are static multiples of B=8 -> sublane-aligned loads/stores.
    for t in range(T):
        rows = pl.ds(t * B, B)
        gates = xw_scr[rows, :] + jnp.dot(
            h, w_hh, preferred_element_type=jnp.float32)        # (B, 4H)
        i_g = jax.nn.sigmoid(gates[:, 0 * H:1 * H])
        f_g = jax.nn.sigmoid(gates[:, 1 * H:2 * H])
        g_g = jnp.tanh(gates[:, 2 * H:3 * H])
        o_g = jax.nn.sigmoid(gates[:, 3 * H:4 * H])
        c = f_g * c + i_g * g_g
        h = o_g * jnp.tanh(c)
        act_scr[rows, :] = h                                     # this layer's y_t

    # Fused MLP head on the final layer's output (stays entirely in VMEM).
    @pl.when(layer == NUM_LSTM_LAYERS - 1)
    def _():
        y = act_scr[...]
        y = jnp.tanh(jnp.dot(y, w1_ref[...].astype(jnp.float32),
                             preferred_element_type=jnp.float32) + b1_ref[...])
        y = jnp.tanh(jnp.dot(y, w2_ref[...].astype(jnp.float32),
                             preferred_element_type=jnp.float32) + b2_ref[...])
        o_ref[...] = jnp.tanh(jnp.dot(y, w3_ref[...].astype(jnp.float32),
                                      preferred_element_type=jnp.float32)
                              + b3_ref[...])


# ----------------------------------------------------------------------------
# Wrappers
# ----------------------------------------------------------------------------
def pack_params(params, state_dim, action_dim):
    """Pre-pack weights for the fused kernel (bf16 W, stacked over layers)."""
    wih_list, whh_list, b_list = [], [], []
    for i, (w_ih, w_hh, b) in enumerate(params["lstm"]):
        if i == 0:  # zero-pad layer-0 W_ih rows so every layer has (H, 4H)
            w_ih = jnp.zeros((HIDDEN, GATES), jnp.float32).at[:state_dim].set(w_ih)
        wih_list.append(w_ih)
        whh_list.append(w_hh)
        b_list.append(b)
    wih_stack = jnp.stack(wih_list).astype(jnp.bfloat16)   # (L, H, 4H)
    whh_stack = jnp.stack(whh_list).astype(jnp.bfloat16)   # (L, H, 4H)
    b_stack = jnp.stack(b_list)                            # (L, 1, 4H) f32

    w1, b1, w2, b2, w3, b3 = params["mlp"]
    w3p = jnp.zeros((HIDDEN, OUT_PAD), jnp.float32).at[:, :action_dim].set(w3)
    b3p = jnp.zeros((1, OUT_PAD), jnp.float32).at[:, :action_dim].set(b3)
    return {
        "wih": wih_stack, "whh": whh_stack, "b": b_stack,
        "w1": w1.astype(jnp.bfloat16), "b1": b1,
        "w2": w2.astype(jnp.bfloat16), "b2": b2,
        "w3": w3p.astype(jnp.bfloat16), "b3": b3p,
    }


@functools.partial(jax.jit, static_argnames=("action_dim",))
def actor_con_forward(x, packed, *, action_dim):
    """ActorCon.forward:  y, _ = lstm(x);  for layer in layers: y = tanh(layer(y))."""
    T, B, state_dim = x.shape
    x_flat = x.reshape(T * B, state_dim)
    x_pad = jnp.zeros((T * B, HIDDEN), jnp.float32).at[:, :state_dim].set(x_flat)

    kernel = functools.partial(_actor_con_kernel, T, B)
    out_pad = pl.pallas_call(
        kernel,
        out_shape=jax.ShapeDtypeStruct((T * B, OUT_PAD), jnp.float32),
        grid=(NUM_LSTM_LAYERS,),
        in_specs=[
            pl.BlockSpec((T * B, HIDDEN), lambda l: (0, 0)),        # x (resident)
            pl.BlockSpec((1, HIDDEN, GATES), lambda l: (l, 0, 0)),  # W_ih[l]
            pl.BlockSpec((1, HIDDEN, GATES), lambda l: (l, 0, 0)),  # W_hh[l]
            pl.BlockSpec((1, 1, GATES), lambda l: (l, 0, 0)),       # b[l]
            pl.BlockSpec((HIDDEN, HIDDEN), lambda l: (0, 0)),       # MLP W1
            pl.BlockSpec((1, HIDDEN), lambda l: (0, 0)),            # MLP b1
            pl.BlockSpec((HIDDEN, HIDDEN), lambda l: (0, 0)),       # MLP W2
            pl.BlockSpec((1, HIDDEN), lambda l: (0, 0)),            # MLP b2
            pl.BlockSpec((HIDDEN, OUT_PAD), lambda l: (0, 0)),      # MLP W3 (padded)
            pl.BlockSpec((1, OUT_PAD), lambda l: (0, 0)),           # MLP b3 (padded)
        ],
        out_specs=pl.BlockSpec((T * B, OUT_PAD), lambda l: (0, 0)),
        scratch_shapes=[
            pltpu.VMEM((T * B, HIDDEN), jnp.float32),   # activation carry
            pltpu.VMEM((T * B, GATES), jnp.float32),    # hoisted x @ W_ih + b
        ],
        compiler_params=pltpu.CompilerParams(
            dimension_semantics=("arbitrary",),          # layers are sequential
            vmem_limit_bytes=32 * 1024 * 1024,           # safe on v5e/v6e/v7x
        ),
    )(x_pad, packed["wih"], packed["whh"], packed["b"],
      packed["w1"], packed["b1"], packed["w2"], packed["b2"],
      packed["w3"], packed["b3"])

    return out_pad[:, :action_dim].reshape(T, B, action_dim)


# ----------------------------------------------------------------------------
# Deterministic parameter construction (mirrors module __init__ shapes)
# ----------------------------------------------------------------------------
def make_params(key, state_dim, action_dim):
    lstm_params = []
    in_dim = state_dim
    for _ in range(NUM_LSTM_LAYERS):
        key, k1, k2, k3 = jax.random.split(key, 4)
        scale = 1.0 / jnp.sqrt(HIDDEN)
        # stored pre-transposed: (in_dim, 4H) / (H, 4H); gate order i,f,g,o
        w_ih = jax.random.uniform(k1, (in_dim, GATES), jnp.float32, -scale, scale)
        w_hh = jax.random.uniform(k2, (HIDDEN, GATES), jnp.float32, -scale, scale)
        b = jax.random.uniform(k3, (1, GATES), jnp.float32, -scale, scale)
        lstm_params.append((w_ih, w_hh, b))
        in_dim = HIDDEN

    def xavier_normal(k, fan_in, fan_out, gain):
        std = gain * jnp.sqrt(2.0 / (fan_in + fan_out))
        return std * jax.random.normal(k, (fan_in, fan_out), jnp.float32)

    tanh_gain = 5.0 / 3.0
    key, k1, k2, k3 = jax.random.split(key, 4)
    w1 = xavier_normal(k1, HIDDEN, HIDDEN, tanh_gain)
    b1 = jnp.zeros((1, HIDDEN), jnp.float32)
    w2 = xavier_normal(k2, HIDDEN, HIDDEN, tanh_gain)
    b2 = jnp.zeros((1, HIDDEN), jnp.float32)
    w3 = xavier_normal(k3, HIDDEN, action_dim, tanh_gain)
    b3 = jnp.zeros((1, action_dim), jnp.float32)

    # log_std parameter exists in the module but is unused in forward().
    log_std = jnp.zeros((1, action_dim), jnp.float32)
    return {"lstm": lstm_params, "mlp": (w1, b1, w2, b2, w3, b3),
            "log_std": log_std}


# ----------------------------------------------------------------------------
# Pure-JAX reference (same bf16-rounded weights, f32 math) for correctness
# ----------------------------------------------------------------------------
def _ref_forward(x, params):
    def bf16_round(w):
        return w.astype(jnp.bfloat16).astype(jnp.float32)

    h = x
    for (w_ih, w_hh, b) in params["lstm"]:
        w_ih_r, w_hh_r = bf16_round(w_ih), bf16_round(w_hh)
        T, B, _ = h.shape

        def step(carry, x_t, w_ih_r=w_ih_r, w_hh_r=w_hh_r, b=b):
            hh, cc = carry
            gates = x_t @ w_ih_r + hh @ w_hh_r + b
            i_g = jax.nn.sigmoid(gates[:, 0 * HIDDEN:1 * HIDDEN])
            f_g = jax.nn.sigmoid(gates[:, 1 * HIDDEN:2 * HIDDEN])
            g_g = jnp.tanh(gates[:, 2 * HIDDEN:3 * HIDDEN])
            o_g = jax.nn.sigmoid(gates[:, 3 * HIDDEN:4 * HIDDEN])
            cc = f_g * cc + i_g * g_g
            hh = o_g * jnp.tanh(cc)
            return (hh, cc), hh

        init = (jnp.zeros((B, HIDDEN), jnp.float32),
                jnp.zeros((B, HIDDEN), jnp.float32))
        _, h = lax.scan(step, init, h)

    w1, b1, w2, b2, w3, b3 = params["mlp"]
    h = jnp.tanh(h @ bf16_round(w1) + b1)
    h = jnp.tanh(h @ bf16_round(w2) + b2)
    return jnp.tanh(h @ bf16_round(w3) + b3)


# ----------------------------------------------------------------------------
if __name__ == "__main__":
    T, B = 8, 8            # seq_len, batch (seq-first layout, as nn.LSTM default)
    STATE_DIM = 16
    ACTION_DIM = 4

    key = jax.random.PRNGKey(0)
    key, pkey, xkey = jax.random.split(key, 3)
    params = make_params(pkey, STATE_DIM, ACTION_DIM)
    packed = pack_params(params, STATE_DIM, ACTION_DIM)
    x = jax.random.normal(xkey, (T, B, STATE_DIM), jnp.float32)

    out = actor_con_forward(x, packed, action_dim=ACTION_DIM)
    out = jax.block_until_ready(out)

    ref = _ref_forward(x, params)
    assert out.shape == (T, B, ACTION_DIM)
    assert jnp.allclose(out, ref, rtol=2e-3, atol=2e-3), "mismatch vs reference"

    print("KERNEL_OK")
</pallas_src>

<mosaic_0001>
module attributes {stable_mosaic.version = 11 : i64} {
  func.func @_actor_con_kernel(%arg0: i32, %arg1: memref<64x256xf32, #tpu.memory_space<vmem>>, %arg2: memref<1x256x1024xbf16, #tpu.memory_space<vmem>>, %arg3: memref<1x256x1024xbf16, #tpu.memory_space<vmem>>, %arg4: memref<1x1x1024xf32, #tpu.memory_space<vmem>>, %arg5: memref<256x256xbf16, #tpu.memory_space<vmem>>, %arg6: memref<1x256xf32, #tpu.memory_space<vmem>>, %arg7: memref<256x256xbf16, #tpu.memory_space<vmem>>, %arg8: memref<1x256xf32, #tpu.memory_space<vmem>>, %arg9: memref<256x128xbf16, #tpu.memory_space<vmem>>, %arg10: memref<1x128xf32, #tpu.memory_space<vmem>>, %arg11: memref<64x128xf32, #tpu.memory_space<vmem>>, %arg12: memref<64x256xf32, #tpu.memory_space<vmem>>, %arg13: memref<64x1024xf32, #tpu.memory_space<vmem>>) attributes {dimension_semantics = [#tpu.dimension_semantics<arbitrary>], iteration_bounds = array<i64: 6>, scalar_prefetch = 0 : i64, scratch_operands = 2 : i64, tpu.core_type = #tpu.core_type<tc>, window_params = [{pipeline_mode = #tpu.pipeline_mode<synchronous>, transform_indices = @transform_0, window_bounds = array<i64: 64, 256>}, {transform_indices = @transform_1, window_bounds = array<i64: 1, 256, 1024>}, {transform_indices = @transform_2, window_bounds = array<i64: 1, 256, 1024>}, {transform_indices = @transform_3, window_bounds = array<i64: 1, 1, 1024>}, {pipeline_mode = #tpu.pipeline_mode<synchronous>, transform_indices = @transform_4, window_bounds = array<i64: 256, 256>}, {pipeline_mode = #tpu.pipeline_mode<synchronous>, transform_indices = @transform_5, window_bounds = array<i64: 1, 256>}, {pipeline_mode = #tpu.pipeline_mode<synchronous>, transform_indices = @transform_6, window_bounds = array<i64: 256, 256>}, {pipeline_mode = #tpu.pipeline_mode<synchronous>, transform_indices = @transform_7, window_bounds = array<i64: 1, 256>}, {pipeline_mode = #tpu.pipeline_mode<synchronous>, transform_indices = @transform_8, window_bounds = array<i64: 256, 128>}, {pipeline_mode = #tpu.pipeline_mode<synchronous>, transform_indices = @transform_9, window_bounds = array<i64: 1, 128>}, {pipeline_mode = #tpu.pipeline_mode<synchronous>, transform_indices = @transform_10, window_bounds = array<i64: 64, 128>}]} {
    %c0_i32 = arith.constant 0 : i32
    %0 = arith.cmpi eq, %arg0, %c0_i32 : i32
    %1 = arith.extui %0 : i1 to i32
    %c0_i32_0 = arith.constant 0 : i32
    %2 = arith.cmpi ne, %1, %c0_i32_0 : i32
    scf.if %2 {
      %c0_73 = arith.constant 0 : index
      %c0_74 = arith.constant 0 : index
      %253 = vector.load %arg1[%c0_73, %c0_74] : memref<64x256xf32, #tpu.memory_space<vmem>>, vector<64x256xf32>
      %c0_75 = arith.constant 0 : index
      %c0_76 = arith.constant 0 : index
      %254 = vector.load %arg12[%c0_75, %c0_76] : memref<64x256xf32, #tpu.memory_space<vmem>>, vector<64x256xf32>
      tpu.vector_store %arg12[%c0_75, %c0_76], %253 {strides = array<i32>} : memref<64x256xf32, #tpu.memory_space<vmem>>, vector<64x256xf32>,
    } else {
    }
    %c0 = arith.constant 0 : index
    %c0_1 = arith.constant 0 : index
    %c0_2 = arith.constant 0 : index
    %3 = vector.load %arg2[%c0, %c0_1, %c0_2] : memref<1x256x1024xbf16, #tpu.memory_space<vmem>>, vector<1x256x1024xbf16>
    %4 = vector.shape_cast %3 : vector<1x256x1024xbf16> to vector<256x1024xbf16>
    %5 = arith.extf %4 : vector<256x1024xbf16> to vector<256x1024xf32>
    %c0_3 = arith.constant 0 : index
    %c0_4 = arith.constant 0 : index
    %c0_5 = arith.constant 0 : index
    %6 = vector.load %arg3[%c0_3, %c0_4, %c0_5] : memref<1x256x1024xbf16, #tpu.memory_space<vmem>>, vector<1x256x1024xbf16>
    %7 = vector.shape_cast %6 : vector<1x256x1024xbf16> to vector<256x1024xbf16>
    %8 = arith.extf %7 : vector<256x1024xbf16> to vector<256x1024xf32>
    %c0_6 = arith.constant 0 : index
    %c0_7 = arith.constant 0 : index
    %c0_8 = arith.constant 0 : index
    %9 = vector.load %arg4[%c0_6, %c0_7, %c0_8] : memref<1x1x1024xf32, #tpu.memory_space<vmem>>, vector<1x1x1024xf32>
    %10 = vector.shape_cast %9 : vector<1x1x1024xf32> to vector<1x1024xf32>
    %c0_9 = arith.constant 0 : index
    %c0_10 = arith.constant 0 : index
    %11 = vector.load %arg12[%c0_9, %c0_10] : memref<64x256xf32, #tpu.memory_space<vmem>>, vector<64x256xf32>
    %cst = arith.constant dense<0.000000e+00> : vector<64x1024xf32>
    %12 = tpu.matmul %11, %5, %cst {dimension_numbers = #tpu.dot_dimension_numbers<[1], [0], [0], [1], [0, 0, 1, 1], [], []>} : vector<64x256xf32>, vector<256x1024xf32>, vector<64x1024xf32> -> vector<64x1024xf32>
    %13 = vector.broadcast %10 : vector<1x1024xf32> to vector<64x1024xf32>
    %14 = arith.addf %12, %13 : vector<64x1024xf32>
    %c0_11 = arith.constant 0 : index
    %c0_12 = arith.constant 0 : index
    %15 = vector.load %arg13[%c0_11, %c0_12] : memref<64x1024xf32, #tpu.memory_space<vmem>>, vector<64x1024xf32>
    tpu.vector_store %arg13[%c0_11, %c0_12], %14 {strides = array<i32>} : memref<64x1024xf32, #tpu.memory_space<vmem>>, vector<64x1024xf32>,
    %cst_13 = arith.constant 0.000000e+00 : f32
    %16 = vector.broadcast %cst_13 : f32 to vector<8x256xf32>
    %cst_14 = arith.constant 0.000000e+00 : f32
    %17 = vector.broadcast %cst_14 : f32 to vector<8x256xf32>
    %c0_15 = arith.constant 0 : index
    %c0_16 = arith.constant 0 : index
    %18 = vector.load %arg13[%c0_15, %c0_16] : memref<64x1024xf32, #tpu.memory_space<vmem>>, vector<8x1024xf32>
    %cst_17 = arith.constant dense<0.000000e+00> : vector<8x1024xf32>
    %19 = tpu.matmul %16, %8, %cst_17 {dimension_numbers = #tpu.dot_dimension_numbers<[1], [0], [0], [1], [0, 0, 1, 1], [], []>} : vector<8x256xf32>, vector<256x1024xf32>, vector<8x1024xf32> -> vector<8x1024xf32>
    %20 = arith.addf %18, %19 : vector<8x1024xf32>
    %21 = vector.extract_strided_slice %20 {offsets = [0, 0], sizes = [8, 256], strides = [1, 1]} : vector<8x1024xf32> to vector<8x256xf32>
    %22 = arith.negf %21 : vector<8x256xf32>
    %23 = math.exp %22 : vector<8x256xf32>
    %cst_18 = arith.constant 1.000000e+00 : f32
    %24 = vector.broadcast %cst_18 : f32 to vector<8x256xf32>
    %25 = arith.addf %24, %23 : vector<8x256xf32>
    %26 = arith.divf %24, %25 : vector<8x256xf32>
    %27 = vector.extract_strided_slice %20 {offsets = [0, 256], sizes = [8, 256], strides = [1, 1]} : vector<8x1024xf32> to vector<8x256xf32>
    %28 = arith.negf %27 : vector<8x256xf32>
    %29 = math.exp %28 : vector<8x256xf32>
    %cst_19 = arith.constant 1.000000e+00 : f32
    %30 = vector.broadcast %cst_19 : f32 to vector<8x256xf32>
    %31 = arith.addf %30, %29 : vector<8x256xf32>
    %32 = arith.divf %30, %31 : vector<8x256xf32>
    %33 = vector.extract_strided_slice %20 {offsets = [0, 512], sizes = [8, 256], strides = [1, 1]} : vector<8x1024xf32> to vector<8x256xf32>
    %34 = math.tanh %33 : vector<8x256xf32>
    %35 = vector.extract_strided_slice %20 {offsets = [0, 768], sizes = [8, 256], strides = [1, 1]} : vector<8x1024xf32> to vector<8x256xf32>
    %36 = arith.negf %35 : vector<8x256xf32>
    %37 = math.exp %36 : vector<8x256xf32>
    %cst_20 = arith.constant 1.000000e+00 : f32
    %38 = vector.broadcast %cst_20 : f32 to vector<8x256xf32>
    %39 = arith.addf %38, %37 : vector<8x256xf32>
    %40 = arith.divf %38, %39 : vector<8x256xf32>
    %41 = arith.mulf %32, %17 : vector<8x256xf32>
    %42 = arith.mulf %26, %34 : vector<8x256xf32>
    %43 = arith.addf %41, %42 : vector<8x256xf32>
    %44 = math.tanh %43 : vector<8x256xf32>
    %45 = arith.mulf %40, %44 : vector<8x256xf32>
    %c0_21 = arith.constant 0 : index
    %c0_22 = arith.constant 0 : index
    %46 = vector.load %arg12[%c0_21, %c0_22] : memref<64x256xf32, #tpu.memory_space<vmem>>, vector<8x256xf32>
    tpu.vector_store %arg12[%c0_21, %c0_22], %45 {strides = array<i32>} : memref<64x256xf32, #tpu.memory_space<vmem>>, vector<8x256xf32>,
    %c8 = arith.constant 8 : index
    %c0_23 = arith.constant 0 : index
    %47 = vector.load %arg13[%c8, %c0_23] : memref<64x1024xf32, #tpu.memory_space<vmem>>, vector<8x1024xf32>
    %cst_24 = arith.constant dense<0.000000e+00> : vector<8x1024xf32>
    %48 = tpu.matmul %45, %8, %cst_24 {dimension_numbers = #tpu.dot_dimension_numbers<[1], [0], [0], [1], [0, 0, 1, 1], [], []>} : vector<8x256xf32>, vector<256x1024xf32>, vector<8x1024xf32> -> vector<8x1024xf32>
    %49 = arith.addf %47, %48 : vector<8x1024xf32>
    %50 = vector.extract_strided_slice %49 {offsets = [0, 0], sizes = [8, 256], strides = [1, 1]} : vector<8x1024xf32> to vector<8x256xf32>
    %51 = arith.negf %50 : vector<8x256xf32>
    %52 = math.exp %51 : vector<8x256xf32>
    %cst_25 = arith.constant 1.000000e+00 : f32
    %53 = vector.broadcast %cst_25 : f32 to vector<8x256xf32>
    %54 = arith.addf %53, %52 : vector<8x256xf32>
    %55 = arith.divf %53, %54 : vector<8x256xf32>
    %56 = vector.extract_strided_slice %49 {offsets = [0, 256], sizes = [8, 256], strides = [1, 1]} : vector<8x1024xf32> to vector<8x256xf32>
    %57 = arith.negf %56 : vector<8x256xf32>
    %58 = math.exp %57 : vector<8x256xf32>
    %cst_26 = arith.constant 1.000000e+00 : f32
    %59 = vector.broadcast %cst_26 : f32 to vector<8x256xf32>
    %60 = arith.addf %59, %58 : vector<8x256xf32>
    %61 = arith.divf %59, %60 : vector<8x256xf32>
    %62 = vector.extract_strided_slice %49 {offsets = [0, 512], sizes = [8, 256], strides = [1, 1]} : vector<8x1024xf32> to vector<8x256xf32>
    %63 = math.tanh %62 : vector<8x256xf32>
    %64 = vector.extract_strided_slice %49 {offsets = [0, 768], sizes = [8, 256], strides = [1, 1]} : vector<8x1024xf32> to vector<8x256xf32>
    %65 = arith.negf %64 : vector<8x256xf32>
    %66 = math.exp %65 : vector<8x256xf32>
    %cst_27 = arith.constant 1.000000e+00 : f32
    %67 = vector.broadcast %cst_27 : f32 to vector<8x256xf32>
    %68 = arith.addf %67, %66 : vector<8x256xf32>
    %69 = arith.divf %67, %68 : vector<8x256xf32>
    %70 = arith.mulf %61, %43 : vector<8x256xf32>
    %71 = arith.mulf %55, %63 : vector<8x256xf32>
    %72 = arith.addf %70, %71 : vector<8x256xf32>
    %73 = math.tanh %72 : vector<8x256xf32>
    %74 = arith.mulf %69, %73 : vector<8x256xf32>
    %c8_28 = arith.constant 8 : index
    %c0_29 = arith.constant 0 : index
    %75 = vector.load %arg12[%c8_28, %c0_29] : memref<64x256xf32, #tpu.memory_space<vmem>>, vector<8x256xf32>
    tpu.vector_store %arg12[%c8_28, %c0_29], %74 {strides = array<i32>} : memref<64x256xf32, #tpu.memory_space<vmem>>, vector<8x256xf32>,
    %c16 = arith.constant 16 : index
    %c0_30 = arith.constant 0 : index
    %76 = vector.load %arg13[%c16, %c0_30] : memref<64x1024xf32, #tpu.memory_space<vmem>>, vector<8x1024xf32>
    %cst_31 = arith.constant dense<0.000000e+00> : vector<8x1024xf32>
    %77 = tpu.matmul %74, %8, %cst_31 {dimension_numbers = #tpu.dot_dimension_numbers<[1], [0], [0], [1], [0, 0, 1, 1], [], []>} : vector<8x256xf32>, vector<256x1024xf32>, vector<8x1024xf32> -> vector<8x1024xf32>
    %78 = arith.addf %76, %77 : vector<8x1024xf32>
    %79 = vector.extract_strided_slice %78 {offsets = [0, 0], sizes = [8, 256], strides = [1, 1]} : vector<8x1024xf32> to vector<8x256xf32>
    %80 = arith.negf %79 : vector<8x256xf32>
    %81 = math.exp %80 : vector<8x256xf32>
    %cst_32 = arith.constant 1.000000e+00 : f32
    %82 = vector.broadcast %cst_32 : f32 to vector<8x256xf32>
    %83 = arith.addf %82, %81 : vector<8x256xf32>
    %84 = arith.divf %82, %83 : vector<8x256xf32>
    %85 = vector.extract_strided_slice %78 {offsets = [0, 256], sizes = [8, 256], strides = [1, 1]} : vector<8x1024xf32> to vector<8x256xf32>
    %86 = arith.negf %85 : vector<8x256xf32>
    %87 = math.exp %86 : vector<8x256xf32>
    %cst_33 = arith.constant 1.000000e+00 : f32
    %88 = vector.broadcast %cst_33 : f32 to vector<8x256xf32>
    %89 = arith.addf %88, %87 : vector<8x256xf32>
    %90 = arith.divf %88, %89 : vector<8x256xf32>
    %91 = vector.extract_strided_slice %78 {offsets = [0, 512], sizes = [8, 256], strides = [1, 1]} : vector<8x1024xf32> to vector<8x256xf32>
    %92 = math.tanh %91 : vector<8x256xf32>
    %93 = vector.extract_strided_slice %78 {offsets = [0, 768], sizes = [8, 256], strides = [1, 1]} : vector<8x1024xf32> to vector<8x256xf32>
    %94 = arith.negf %93 : vector<8x256xf32>
    %95 = math.exp %94 : vector<8x256xf32>
    %cst_34 = arith.constant 1.000000e+00 : f32
    %96 = vector.broadcast %cst_34 : f32 to vector<8x256xf32>
    %97 = arith.addf %96, %95 : vector<8x256xf32>
    %98 = arith.divf %96, %97 : vector<8x256xf32>
    %99 = arith.mulf %90, %72 : vector<8x256xf32>
    %100 = arith.mulf %84, %92 : vector<8x256xf32>
    %101 = arith.addf %99, %100 : vector<8x256xf32>
    %102 = math.tanh %101 : vector<8x256xf32>
    %103 = arith.mulf %98, %102 : vector<8x256xf32>
    %c16_35 = arith.constant 16 : index
    %c0_36 = arith.constant 0 : index
    %104 = vector.load %arg12[%c16_35, %c0_36] : memref<64x256xf32, #tpu.memory_space<vmem>>, vector<8x256xf32>
    tpu.vector_store %arg12[%c16_35, %c0_36], %103 {strides = array<i32>} : memref<64x256xf32, #tpu.memory_space<vmem>>, vector<8x256xf32>,
    %c24 = arith.constant 24 : index
    %c0_37 = arith.constant 0 : index
    %105 = vector.load %arg13[%c24, %c0_37] : memref<64x1024xf32, #tpu.memory_space<vmem>>, vector<8x1024xf32>
    %cst_38 = arith.constant dense<0.000000e+00> : vector<8x1024xf32>
    %106 = tpu.matmul %103, %8, %cst_38 {dimension_numbers = #tpu.dot_dimension_numbers<[1], [0], [0], [1], [0, 0, 1, 1], [], []>} : vector<8x256xf32>, vector<256x1024xf32>, vector<8x1024xf32> -> vector<8x1024xf32>
    %107 = arith.addf %105, %106 : vector<8x1024xf32>
    %108 = vector.extract_strided_slice %107 {offsets = [0, 0], sizes = [8, 256], strides = [1, 1]} : vector<8x1024xf32> to vector<8x256xf32>
    %109 = arith.negf %108 : vector<8x256xf32>
    %110 = math.exp %109 : vector<8x256xf32>
    %cst_39 = arith.constant 1.000000e+00 : f32
    %111 = vector.broadcast %cst_39 : f32 to vector<8x256xf32>
    %112 = arith.addf %111, %110 : vector<8x256xf32>
    %113 = arith.divf %111, %112 : vector<8x256xf32>
    %114 = vector.extract_strided_slice %107 {offsets = [0, 256], sizes = [8, 256], strides = [1, 1]} : vector<8x1024xf32> to vector<8x256xf32>
    %115 = arith.negf %114 : vector<8x256xf32>
    %116 = math.exp %115 : vector<8x256xf32>
    %cst_40 = arith.constant 1.000000e+00 : f32
    %117 = vector.broadcast %cst_40 : f32 to vector<8x256xf32>
    %118 = arith.addf %117, %116 : vector<8x256xf32>
    %119 = arith.divf %117, %118 : vector<8x256xf32>
    %120 = vector.extract_strided_slice %107 {offsets = [0, 512], sizes = [8, 256], strides = [1, 1]} : vector<8x1024xf32> to vector<8x256xf32>
    %121 = math.tanh %120 : vector<8x256xf32>
    %122 = vector.extract_strided_slice %107 {offsets = [0, 768], sizes = [8, 256], strides = [1, 1]} : vector<8x1024xf32> to vector<8x256xf32>
    %123 = arith.negf %122 : vector<8x256xf32>
    %124 = math.exp %123 : vector<8x256xf32>
    %cst_41 = arith.constant 1.000000e+00 : f32
    %125 = vector.broadcast %cst_41 : f32 to vector<8x256xf32>
    %126 = arith.addf %125, %124 : vector<8x256xf32>
    %127 = arith.divf %125, %126 : vector<8x256xf32>
    %128 = arith.mulf %119, %101 : vector<8x256xf32>
    %129 = arith.mulf %113, %121 : vector<8x256xf32>
    %130 = arith.addf %128, %129 : vector<8x256xf32>
    %131 = math.tanh %130 : vector<8x256xf32>
    %132 = arith.mulf %127, %131 : vector<8x256xf32>
    %c24_42 = arith.constant 24 : index
    %c0_43 = arith.constant 0 : index
    %133 = vector.load %arg12[%c24_42, %c0_43] : memref<64x256xf32, #tpu.memory_space<vmem>>, vector<8x256xf32>
    tpu.vector_store %arg12[%c24_42, %c0_43], %132 {strides = array<i32>} : memref<64x256xf32, #tpu.memory_space<vmem>>, vector<8x256xf32>,
    %c32 = arith.constant 32 : index
    %c0_44 = arith.constant 0 : index
    %134 = vector.load %arg13[%c32, %c0_44] : memref<64x1024xf32, #tpu.memory_space<vmem>>, vector<8x1024xf32>
    %cst_45 = arith.constant dense<0.000000e+00> : vector<8x1024xf32>
    %135 = tpu.matmul %132, %8, %cst_45 {dimension_numbers = #tpu.dot_dimension_numbers<[1], [0], [0], [1], [0, 0, 1, 1], [], []>} : vector<8x256xf32>, vector<256x1024xf32>, vector<8x1024xf32> -> vector<8x1024xf32>
    %136 = arith.addf %134, %135 : vector<8x1024xf32>
    %137 = vector.extract_strided_slice %136 {offsets = [0, 0], sizes = [8, 256], strides = [1, 1]} : vector<8x1024xf32> to vector<8x256xf32>
    %138 = arith.negf %137 : vector<8x256xf32>
    %139 = math.exp %138 : vector<8x256xf32>
    %cst_46 = arith.constant 1.000000e+00 : f32
    %140 = vector.broadcast %cst_46 : f32 to vector<8x256xf32>
    %141 = arith.addf %140, %139 : vector<8x256xf32>
    %142 = arith.divf %140, %141 : vector<8x256xf32>
    %143 = vector.extract_strided_slice %136 {offsets = [0, 256], sizes = [8, 256], strides = [1, 1]} : vector<8x1024xf32> to vector<8x256xf32>
    %144 = arith.negf %143 : vector<8x256xf32>
    %145 = math.exp %144 : vector<8x256xf32>
    %cst_47 = arith.constant 1.000000e+00 : f32
    %146 = vector.broadcast %cst_47 : f32 to vector<8x256xf32>
    %147 = arith.addf %146, %145 : vector<8x256xf32>
    %148 = arith.divf %146, %147 : vector<8x256xf32>
    %149 = vector.extract_strided_slice %136 {offsets = [0, 512], sizes = [8, 256], strides = [1, 1]} : vector<8x1024xf32> to vector<8x256xf32>
    %150 = math.tanh %149 : vector<8x256xf32>
    %151 = vector.extract_strided_slice %136 {offsets = [0, 768], sizes = [8, 256], strides = [1, 1]} : vector<8x1024xf32> to vector<8x256xf32>
    %152 = arith.negf %151 : vector<8x256xf32>
    %153 = math.exp %152 : vector<8x256xf32>
    %cst_48 = arith.constant 1.000000e+00 : f32
    %154 = vector.broadcast %cst_48 : f32 to vector<8x256xf32>
    %155 = arith.addf %154, %153 : vector<8x256xf32>
    %156 = arith.divf %154, %155 : vector<8x256xf32>
    %157 = arith.mulf %148, %130 : vector<8x256xf32>
    %158 = arith.mulf %142, %150 : vector<8x256xf32>
    %159 = arith.addf %157, %158 : vector<8x256xf32>
    %160 = math.tanh %159 : vector<8x256xf32>
    %161 = arith.mulf %156, %160 : vector<8x256xf32>
    %c32_49 = arith.constant 32 : index
    %c0_50 = arith.constant 0 : index
    %162 = vector.load %arg12[%c32_49, %c0_50] : memref<64x256xf32, #tpu.memory_space<vmem>>, vector<8x256xf32>
    tpu.vector_store %arg12[%c32_49, %c0_50], %161 {strides = array<i32>} : memref<64x256xf32, #tpu.memory_space<vmem>>, vector<8x256xf32>,
    %c40 = arith.constant 40 : index
    %c0_51 = arith.constant 0 : index
    %163 = vector.load %arg13[%c40, %c0_51] : memref<64x1024xf32, #tpu.memory_space<vmem>>, vector<8x1024xf32>
    %cst_52 = arith.constant dense<0.000000e+00> : vector<8x1024xf32>
    %164 = tpu.matmul %161, %8, %cst_52 {dimension_numbers = #tpu.dot_dimension_numbers<[1], [0], [0], [1], [0, 0, 1, 1], [], []>} : vector<8x256xf32>, vector<256x1024xf32>, vector<8x1024xf32> -> vector<8x1024xf32>
    %165 = arith.addf %163, %164 : vector<8x1024xf32>
    %166 = vector.extract_strided_slice %165 {offsets = [0, 0], sizes = [8, 256], strides = [1, 1]} : vector<8x1024xf32> to vector<8x256xf32>
    %167 = arith.negf %166 : vector<8x256xf32>
    %168 = math.exp %167 : vector<8x256xf32>
    %cst_53 = arith.constant 1.000000e+00 : f32
    %169 = vector.broadcast %cst_53 : f32 to vector<8x256xf32>
    %170 = arith.addf %169, %168 : vector<8x256xf32>
    %171 = arith.divf %169, %170 : vector<8x256xf32>
    %172 = vector.extract_strided_slice %165 {offsets = [0, 256], sizes = [8, 256], strides = [1, 1]} : vector<8x1024xf32> to vector<8x256xf32>
    %173 = arith.negf %172 : vector<8x256xf32>
    %174 = math.exp %173 : vector<8x256xf32>
    %cst_54 = arith.constant 1.000000e+00 : f32
    %175 = vector.broadcast %cst_54 : f32 to vector<8x256xf32>
    %176 = arith.addf %175, %174 : vector<8x256xf32>
    %177 = arith.divf %175, %176 : vector<8x256xf32>
    %178 = vector.extract_strided_slice %165 {offsets = [0, 512], sizes = [8, 256], strides = [1, 1]} : vector<8x1024xf32> to vector<8x256xf32>
    %179 = math.tanh %178 : vector<8x256xf32>
    %180 = vector.extract_strided_slice %165 {offsets = [0, 768], sizes = [8, 256], strides = [1, 1]} : vector<8x1024xf32> to vector<8x256xf32>
    %181 = arith.negf %180 : vector<8x256xf32>
    %182 = math.exp %181 : vector<8x256xf32>
    %cst_55 = arith.constant 1.000000e+00 : f32
    %183 = vector.broadcast %cst_55 : f32 to vector<8x256xf32>
    %184 = arith.addf %183, %182 : vector<8x256xf32>
    %185 = arith.divf %183, %184 : vector<8x256xf32>
    %186 = arith.mulf %177, %159 : vector<8x256xf32>
    %187 = arith.mulf %171, %179 : vector<8x256xf32>
    %188 = arith.addf %186, %187 : vector<8x256xf32>
    %189 = math.tanh %188 : vector<8x256xf32>
    %190 = arith.mulf %185, %189 : vector<8x256xf32>
    %c40_56 = arith.constant 40 : index
    %c0_57 = arith.constant 0 : index
    %191 = vector.load %arg12[%c40_56, %c0_57] : memref<64x256xf32, #tpu.memory_space<vmem>>, vector<8x256xf32>
    tpu.vector_store %arg12[%c40_56, %c0_57], %190 {strides = array<i32>} : memref<64x256xf32, #tpu.memory_space<vmem>>, vector<8x256xf32>,
    %c48 = arith.constant 48 : index
    %c0_58 = arith.constant 0 : index
    %192 = vector.load %arg13[%c48, %c0_58] : memref<64x1024xf32, #tpu.memory_space<vmem>>, vector<8x1024xf32>
    %cst_59 = arith.constant dense<0.000000e+00> : vector<8x1024xf32>
    %193 = tpu.matmul %190, %8, %cst_59 {dimension_numbers = #tpu.dot_dimension_numbers<[1], [0], [0], [1], [0, 0, 1, 1], [], []>} : vector<8x256xf32>, vector<256x1024xf32>, vector<8x1024xf32> -> vector<8x1024xf32>
    %194 = arith.addf %192, %193 : vector<8x1024xf32>
    %195 = vector.extract_strided_slice %194 {offsets = [0, 0], sizes = [8, 256], strides = [1, 1]} : vector<8x1024xf32> to vector<8x256xf32>
    %196 = arith.negf %195 : vector<8x256xf32>
    %197 = math.exp %196 : vector<8x256xf32>
    %cst_60 = arith.constant 1.000000e+00 : f32
    %198 = vector.broadcast %cst_60 : f32 to vector<8x256xf32>
    %199 = arith.addf %198, %197 : vector<8x256xf32>
    %200 = arith.divf %198, %199 : vector<8x256xf32>
    %201 = vector.extract_strided_slice %194 {offsets = [0, 256], sizes = [8, 256], strides = [1, 1]} : vector<8x1024xf32> to vector<8x256xf32>
    %202 = arith.negf %201 : vector<8x256xf32>
    %203 = math.exp %202 : vector<8x256xf32>
    %cst_61 = arith.constant 1.000000e+00 : f32
    %204 = vector.broadcast %cst_61 : f32 to vector<8x256xf32>
    %205 = arith.addf %204, %203 : vector<8x256xf32>
    %206 = arith.divf %204, %205 : vector<8x256xf32>
    %207 = vector.extract_strided_slice %194 {offsets = [0, 512], sizes = [8, 256], strides = [1, 1]} : vector<8x1024xf32> to vector<8x256xf32>
    %208 = math.tanh %207 : vector<8x256xf32>
    %209 = vector.extract_strided_slice %194 {offsets = [0, 768], sizes = [8, 256], strides = [1, 1]} : vector<8x1024xf32> to vector<8x256xf32>
    %210 = arith.negf %209 : vector<8x256xf32>
    %211 = math.exp %210 : vector<8x256xf32>
    %cst_62 = arith.constant 1.000000e+00 : f32
    %212 = vector.broadcast %cst_62 : f32 to vector<8x256xf32>
    %213 = arith.addf %212, %211 : vector<8x256xf32>
    %214 = arith.divf %212, %213 : vector<8x256xf32>
    %215 = arith.mulf %206, %188 : vector<8x256xf32>
    %216 = arith.mulf %200, %208 : vector<8x256xf32>
    %217 = arith.addf %215, %216 : vector<8x256xf32>
    %218 = math.tanh %217 : vector<8x256xf32>
    %219 = arith.mulf %214, %218 : vector<8x256xf32>
    %c48_63 = arith.constant 48 : index
    %c0_64 = arith.constant 0 : index
    %220 = vector.load %arg12[%c48_63, %c0_64] : memref<64x256xf32, #tpu.memory_space<vmem>>, vector<8x256xf32>
    tpu.vector_store %arg12[%c48_63, %c0_64], %219 {strides = array<i32>} : memref<64x256xf32, #tpu.memory_space<vmem>>, vector<8x256xf32>,
    %c56 = arith.constant 56 : index
    %c0_65 = arith.constant 0 : index
    %221 = vector.load %arg13[%c56, %c0_65] : memref<64x1024xf32, #tpu.memory_space<vmem>>, vector<8x1024xf32>
    %cst_66 = arith.constant dense<0.000000e+00> : vector<8x1024xf32>
    %222 = tpu.matmul %219, %8, %cst_66 {dimension_numbers = #tpu.dot_dimension_numbers<[1], [0], [0], [1], [0, 0, 1, 1], [], []>} : vector<8x256xf32>, vector<256x1024xf32>, vector<8x1024xf32> -> vector<8x1024xf32>
    %223 = arith.addf %221, %222 : vector<8x1024xf32>
    %224 = vector.extract_strided_slice %223 {offsets = [0, 0], sizes = [8, 256], strides = [1, 1]} : vector<8x1024xf32> to vector<8x256xf32>
    %225 = arith.negf %224 : vector<8x256xf32>
    %226 = math.exp %225 : vector<8x256xf32>
    %cst_67 = arith.constant 1.000000e+00 : f32
    %227 = vector.broadcast %cst_67 : f32 to vector<8x256xf32>
    %228 = arith.addf %227, %226 : vector<8x256xf32>
    %229 = arith.divf %227, %228 : vector<8x256xf32>
    %230 = vector.extract_strided_slice %223 {offsets = [0, 256], sizes = [8, 256], strides = [1, 1]} : vector<8x1024xf32> to vector<8x256xf32>
    %231 = arith.negf %230 : vector<8x256xf32>
    %232 = math.exp %231 : vector<8x256xf32>
    %cst_68 = arith.constant 1.000000e+00 : f32
    %233 = vector.broadcast %cst_68 : f32 to vector<8x256xf32>
    %234 = arith.addf %233, %232 : vector<8x256xf32>
    %235 = arith.divf %233, %234 : vector<8x256xf32>
    %236 = vector.extract_strided_slice %223 {offsets = [0, 512], sizes = [8, 256], strides = [1, 1]} : vector<8x1024xf32> to vector<8x256xf32>
    %237 = math.tanh %236 : vector<8x256xf32>
    %238 = vector.extract_strided_slice %223 {offsets = [0, 768], sizes = [8, 256], strides = [1, 1]} : vector<8x1024xf32> to vector<8x256xf32>
    %239 = arith.negf %238 : vector<8x256xf32>
    %240 = math.exp %239 : vector<8x256xf32>
    %cst_69 = arith.constant 1.000000e+00 : f32
    %241 = vector.broadcast %cst_69 : f32 to vector<8x256xf32>
    %242 = arith.addf %241, %240 : vector<8x256xf32>
    %243 = arith.divf %241, %242 : vector<8x256xf32>
    %244 = arith.mulf %235, %217 : vector<8x256xf32>
    %245 = arith.mulf %229, %237 : vector<8x256xf32>
    %246 = arith.addf %244, %245 : vector<8x256xf32>
    %247 = math.tanh %246 : vector<8x256xf32>
    %248 = arith.mulf %243, %247 : vector<8x256xf32>
    %c56_70 = arith.constant 56 : index
    %c0_71 = arith.constant 0 : index
    %249 = vector.load %arg12[%c56_70, %c0_71] : memref<64x256xf32, #tpu.memory_space<vmem>>, vector<8x256xf32>
    tpu.vector_store %arg12[%c56_70, %c0_71], %248 {strides = array<i32>} : memref<64x256xf32, #tpu.memory_space<vmem>>, vector<8x256xf32>,
    %c5_i32 = arith.constant 5 : i32
    %250 = arith.cmpi eq, %arg0, %c5_i32 : i32
    %251 = arith.extui %250 : i1 to i32
    %c0_i32_72 = arith.constant 0 : i32
    %252 = arith.cmpi ne, %251, %c0_i32_72 : i32
    scf.if %252 {
      %c0_73 = arith.constant 0 : index
      %c0_74 = arith.constant 0 : index
      %253 = vector.load %arg12[%c0_73, %c0_74] : memref<64x256xf32, #tpu.memory_space<vmem>>, vector<64x256xf32>
      %c0_75 = arith.constant 0 : index
      %c0_76 = arith.constant 0 : index
      %254 = vector.load %arg5[%c0_75, %c0_76] : memref<256x256xbf16, #tpu.memory_space<vmem>>, vector<256x256xbf16>
      %255 = arith.extf %254 : vector<256x256xbf16> to vector<256x256xf32>
      %cst_77 = arith.constant dense<0.000000e+00> : vector<64x256xf32>
      %256 = tpu.matmul %253, %255, %cst_77 {dimension_numbers = #tpu.dot_dimension_numbers<[1], [0], [0], [1], [0, 0, 1, 1], [], []>} : vector<64x256xf32>, vector<256x256xf32>, vector<64x256xf32> -> vector<64x256xf32>
      %c0_78 = arith.constant 0 : index
      %c0_79 = arith.constant 0 : index
      %257 = vector.load %arg6[%c0_78, %c0_79] : memref<1x256xf32, #tpu.memory_space<vmem>>, vector<1x256xf32>
      %258 = vector.broadcast %257 : vector<1x256xf32> to vector<64x256xf32>
      %259 = arith.addf %256, %258 : vector<64x256xf32>
      %260 = math.tanh %259 : vector<64x256xf32>
      %c0_80 = arith.constant 0 : index
      %c0_81 = arith.constant 0 : index
      %261 = vector.load %arg7[%c0_80, %c0_81] : memref<256x256xbf16, #tpu.memory_space<vmem>>, vector<256x256xbf16>
      %262 = arith.extf %261 : vector<256x256xbf16> to vector<256x256xf32>
      %cst_82 = arith.constant dense<0.000000e+00> : vector<64x256xf32>
      %263 = tpu.matmul %260, %262, %cst_82 {dimension_numbers = #tpu.dot_dimension_numbers<[1], [0], [0], [1], [0, 0, 1, 1], [], []>} : vector<64x256xf32>, vector<256x256xf32>, vector<64x256xf32> -> vector<64x256xf32>
      %c0_83 = arith.constant 0 : index
      %c0_84 = arith.constant 0 : index
      %264 = vector.load %arg8[%c0_83, %c0_84] : memref<1x256xf32, #tpu.memory_space<vmem>>, vector<1x256xf32>
      %265 = vector.broadcast %264 : vector<1x256xf32> to vector<64x256xf32>
      %266 = arith.addf %263, %265 : vector<64x256xf32>
      %267 = math.tanh %266 : vector<64x256xf32>
      %c0_85 = arith.constant 0 : index
      %c0_86 = arith.constant 0 : index
      %268 = vector.load %arg9[%c0_85, %c0_86] : memref<256x128xbf16, #tpu.memory_space<vmem>>, vector<256x128xbf16>
      %269 = arith.extf %268 : vector<256x128xbf16> to vector<256x128xf32>
      %cst_87 = arith.constant dense<0.000000e+00> : vector<64x128xf32>
      %270 = tpu.matmul %267, %269, %cst_87 {dimension_numbers = #tpu.dot_dimension_numbers<[1], [0], [0], [1], [0, 0, 1, 1], [], []>} : vector<64x256xf32>, vector<256x128xf32>, vector<64x128xf32> -> vector<64x128xf32>
      %c0_88 = arith.constant 0 : index
      %c0_89 = arith.constant 0 : index
      %271 = vector.load %arg10[%c0_88, %c0_89] : memref<1x128xf32, #tpu.memory_space<vmem>>, vector<1x128xf32>
      %272 = vector.broadcast %271 : vector<1x128xf32> to vector<64x128xf32>
      %273 = arith.addf %270, %272 : vector<64x128xf32>
      %274 = math.tanh %273 : vector<64x128xf32>
      %c0_90 = arith.constant 0 : index
      %c0_91 = arith.constant 0 : index
      %275 = vector.load %arg11[%c0_90, %c0_91] : memref<64x128xf32, #tpu.memory_space<vmem>>, vector<64x128xf32>
      tpu.vector_store %arg11[%c0_90, %c0_91], %274 {strides = array<i32>} : memref<64x128xf32, #tpu.memory_space<vmem>>, vector<64x128xf32>,
    } else {
    }
    return
  }
  func.func @transform_0(%arg0: i32) -> (i32, i32) {
    %c0_i32 = arith.constant 0 : i32
    %c0_i32_0 = arith.constant 0 : i32
    %c0_i32_1 = arith.constant 0 : i32
    return %c0_i32, %c0_i32_0 : i32, i32
  }
  func.func @transform_1(%arg0: i32) -> (i32, i32, i32) {
    %c0_i32 = arith.constant 0 : i32
    %c0_i32_0 = arith.constant 0 : i32
    %c0_i32_1 = arith.constant 0 : i32
    return %arg0, %c0_i32, %c0_i32_0 : i32, i32, i32
  }
  func.func @transform_2(%arg0: i32) -> (i32, i32, i32) {
    %c0_i32 = arith.constant 0 : i32
    %c0_i32_0 = arith.constant 0 : i32
    %c0_i32_1 = arith.constant 0 : i32
    return %arg0, %c0_i32, %c0_i32_0 : i32, i32, i32
  }
  func.func @transform_3(%arg0: i32) -> (i32, i32, i32) {
    %c0_i32 = arith.constant 0 : i32
    %c0_i32_0 = arith.constant 0 : i32
    %c0_i32_1 = arith.constant 0 : i32
    return %arg0, %c0_i32, %c0_i32_0 : i32, i32, i32
  }
  func.func @transform_4(%arg0: i32) -> (i32, i32) {
    %c0_i32 = arith.constant 0 : i32
    %c0_i32_0 = arith.constant 0 : i32
    %c0_i32_1 = arith.constant 0 : i32
    return %c0_i32, %c0_i32_0 : i32, i32
  }
  func.func @transform_5(%arg0: i32) -> (i32, i32) {
    %c0_i32 = arith.constant 0 : i32
    %c0_i32_0 = arith.constant 0 : i32
    %c0_i32_1 = arith.constant 0 : i32
    return %c0_i32, %c0_i32_0 : i32, i32
  }
  func.func @transform_6(%arg0: i32) -> (i32, i32) {
    %c0_i32 = arith.constant 0 : i32
    %c0_i32_0 = arith.constant 0 : i32
    %c0_i32_1 = arith.constant 0 : i32
    return %c0_i32, %c0_i32_0 : i32, i32
  }
  func.func @transform_7(%arg0: i32) -> (i32, i32) {
    %c0_i32 = arith.constant 0 : i32
    %c0_i32_0 = arith.constant 0 : i32
    %c0_i32_1 = arith.constant 0 : i32
    return %c0_i32, %c0_i32_0 : i32, i32
  }
  func.func @transform_8(%arg0: i32) -> (i32, i32) {
    %c0_i32 = arith.constant 0 : i32
    %c0_i32_0 = arith.constant 0 : i32
    %c0_i32_1 = arith.constant 0 : i32
    return %c0_i32, %c0_i32_0 : i32, i32
  }
  func.func @transform_9(%arg0: i32) -> (i32, i32) {
    %c0_i32 = arith.constant 0 : i32
    %c0_i32_0 = arith.constant 0 : i32
    %c0_i32_1 = arith.constant 0 : i32
    return %c0_i32, %c0_i32_0 : i32, i32
  }
  func.func @transform_10(%arg0: i32) -> (i32, i32) {
    %c0_i32 = arith.constant 0 : i32
    %c0_i32_0 = arith.constant 0 : i32
    %c0_i32_1 = arith.constant 0 : i32
    return %c0_i32, %c0_i32_0 : i32, i32
  }
}

</mosaic_0001>

<bundles_post_ra>
// kernel: actor_con_forward.1
= control target key start
LH: loop header
LB: loop body
LE: loop exit
PB: predicated region body
PF: predicated region fallthrough
CT: control target
= control target key end

     0   :  { %s10338_s0 = inlined_call_operand.vmem [shape: f32[64,256], index: 0, kind: input, shape index: {}]   ;;  %s10339_s1 = inlined_call_operand.hbm [shape: bf16[6,256,1024], index: 1, kind: input, shape index: {}]   ;;  %s10340_s2 = inlined_call_operand.hbm [shape: bf16[6,256,1024], index: 2, kind: input, shape index: {}]   ;;  %s10341_s3 = inlined_call_operand.hbm [shape: f32[6,1,1024], index: 3, kind: input, shape index: {}]   ;;  %s10342_s4 = inlined_call_operand.hbm [shape: bf16[256,256], index: 4, kind: input, shape index: {}]   ;;  %s10343_s5 = inlined_call_operand.hbm [shape: f32[1,256], index: 5, kind: input, shape index: {}]   ;;  %s10344_s6 = inlined_call_operand.hbm [shape: bf16[256,256], index: 6, kind: input, shape index: {}]   ;;  %s10345_s7 = inlined_call_operand.hbm [shape: f32[1,256], index: 7, kind: input, shape index: {}]   ;;  %s10346_s8 = inlined_call_operand.hbm [shape: bf16[256,128], index: 8, kind: input, shape index: {}]   ;;  %s10347_s9 = inlined_call_operand.hbm [shape: f32[1,128], index: 9, kind: input, shape index: {}]   ;;  %s10348_s10 = inlined_call_operand.vmem [shape: f32[64,128], index: 10, kind: output, shape index: {}]  }
   0x1   :  { %10922 = sst [smem:[#allocation345_spill]] %s10339_s1 }
   0x2   :  { %10923 = sst [smem:[#allocation346_spill]] %s10340_s2 }
   0x3   :  { %10924 = sst [smem:[#allocation347_spill]] %s10342_s4 }
   0x4   :  { %10925 = sst [smem:[#allocation348_spill]] %s10343_s5 }
   0x5   :  { %10926 = sst [smem:[#allocation349_spill]] %s10344_s6 }
   0x6   :  { %10927 = sst [smem:[#allocation350_spill]] %s10345_s7 }
   0x7   :  { %10928 = sst [smem:[#allocation351_spill]] %s10346_s8 }
   0x8   :  { %15 = vsyncpa [#allocation5], 0 }
   0x9   :  { %17 = vsyncpa [#allocation5 + $0x1], 0 }
   0xa   :  { %18 = vsyncpa [#allocation7], 0 }
   0xb   :  { %20 = vsyncpa [#allocation7 + $0x1], 0 }
   0xc   :  { %21 = vsyncpa [#allocation10], 0 }
   0xd   :  { %22 = vsyncpa [#allocation13], 0 }
   0xe   :  { %23 = vsyncpa [#allocation16], 0  ;;  %s6591_s13 = smov 0   ;;  %s6593_s14 = smov 0  }
   0xf   :  { %s6595_s15 = smov 0   ;;  %s6597_s16 = smov 0  }
  0x10 LB: > { %10929 = sst [smem:[#allocation23_spill]] %s6514_s15  ;;  %s6520_s17 = smov [#allocation9]   ;;  %s6518_s16 = sphi %s6597_s16, %s12863_s16   ;;  %s6514_s15 = sphi %s6595_s15, %s12860_s15   ;;  %s6510_s14 = sphi %s6593_s14, %s12862_s14   ;;  %s6506_s13 = sphi %s6591_s13, %s12861_s13  }
  0x11   : > { %s295_s18 = sshll.u32 %s6520_s17, 4  ;;  %s6612_s19 = sadd.s32 4294967295, %s6518_s16   ;;  %s296_s18 = int_to_ptr.vmem [resolvable:$true] %s295_s18 }
  0x12   : > { %p5525_p0 = scmp.ge.s32.totalorder %s6518_s16, 1  ;;  %p10351_p1 = scmp.eq.s32.totalorder %s6612_s19, 0 }
  0x13   : > { %p280_p2 = scmp.lt.s32.totalorder %s6518_s16, 7  ;;  %s6521_s21 = smov [#allocation12]  }
  0x14   : > { %s319_s22 = sshll.u32 %s6521_s21, 4  ;;  %s6522_s24 = smov [#allocation15]   ;;  %s6630_s22 = int_to_ptr.vmem [resolvable:$true] %s319_s22 }
  0x15   : > { %p6618_p4 = pnand %p5525_p0, %p280_p2  ;;  %s343_s25 = sshll.u32 %s6522_s24, 4  ;;  %s6632_s25 = int_to_ptr.vmem [resolvable:$true] %s343_s25 }
  0x16   : > { %s6239_s27 = scalar_lea.vmem %s296_s18, 4096  ;;  %p6247_p11 = scmp.lt.s32.totalorder %s296_s18, %s296_s18 }
  0x17   : > { %s10930_s20 = scalar_select %p6618_p4, 1, 0 }
  0x18   : > { %p5805_p5 = pneg %p6618_p4  ;;  %p6240_p8 = scmp.ne.s32.totalorder %s296_s18, %s6239_s27 }
  0x19   : > { %p6248_p12 = scmp.lt.s32.totalorder %s6239_s27, %s6239_s27 }
  0x1a   : > { %p6626_p6 = pnand %p5805_p5, %p10351_p1 }
  0x1b   : > { %p6249_p13 = por %p6248_p12, %p6247_p11 }
  0x1c   : > { %s10931_s23 = scalar_select %p6626_p6, 1, 0 }
  0x1d   : > { %p6636_p7 = pneg %p6626_p6 }
  0x1f   : > { %s10932_s26 = scalar_select %p6636_p7, 1, 0 }
  0x20   : > { %p6242_p9 = pnand %p6240_p8, %p6636_p7 }
  0x22   : > { %p6243_p10 = pneg %p6242_p9 }
  0x24   : > { %p6250_p0 = pnand %p6249_p13, %p6243_p10 }
  0x26   : > { %6253 = shalt.err (!%p6250_p0)
}
  0x27   : > { %s6523_s28 = smov 128   ;;  %s6524_s29 = smov 8  }
  0x28   : > { %s10933_s4 = sld [smem:[#allocation347_spill]]  ;;  %s6265_s12 = scalar_lea.vmem %s6630_s22, 4096 }
  0x29   : > { %p6266_p2 = scmp.ne.s32.totalorder %s6630_s22, %s6265_s12  ;;  %p6273_p9 = scmp.lt.s32.totalorder %s6630_s22, %s6630_s22 }
  0x2a   : > { %p6274_p10 = scmp.lt.s32.totalorder %s6265_s12, %s6265_s12 }
  0x2b   : > { %p6268_p5 = pnand %p6266_p2, %p6636_p7 }
  0x2c   : > { %p6275_p11 = por %p6274_p10, %p6273_p9 }
  0x2d   : > { %p6269_p8 = pneg %p6268_p5 }
  0x2e   : > { %5808 = dma.hbm_to_vmem [thread:$0]  (!%p6626_p6), %s10933_s4, 4096, %s296_s18, [#allocation10], %s6523_s28, %s6523_s28, %s6524_s29  }
  0x2f   : > { %p6276_p12 = pnand %p6275_p11, %p6269_p8 }
  0x31   : > { %6279 = shalt.err (!%p6276_p12)
}
  0x32   : > { %s10934_s6 = sld [smem:[#allocation349_spill]]  ;;  %s6291_s18 = scalar_lea.vmem %s6632_s25, 2048 }
  0x33   : > { %p6292_p13 = scmp.ne.s32.totalorder %s6632_s25, %s6291_s18  ;;  %p6299_p5 = scmp.lt.s32.totalorder %s6632_s25, %s6632_s25 }
  0x34   : > { %p6300_p8 = scmp.lt.s32.totalorder %s6291_s18, %s6291_s18 }
  0x35   : > { %p6294_p0 = pnand %p6292_p13, %p6636_p7 }
  0x36   : > { %p6301_p9 = por %p6300_p8, %p6299_p5 }
  0x37   : > { %p6295_p2 = pneg %p6294_p0 }
  0x38   : > { %5814 = dma.hbm_to_vmem [thread:$0]  (!%p6626_p6), %s10934_s6, 4096, %s6630_s22, [#allocation13], %s6523_s28, %s6523_s28, %s6524_s29  }
  0x39   : > { %p6302_p10 = pnand %p6301_p9, %p6295_p2 }
  0x3b   : > { %6305 = shalt.err (!%p6302_p10)
}
  0x3c   : > { %s6525_s24 = smov 64   ;;  %s6526_s22 = smov 4  }
  0x3d   : > { %s10935_s8 = sld [smem:[#allocation351_spill]]  ;;  %s6672_s29 = sadd.s32 1, %s6518_s16  }
  0x3e   : > { %s54_s30 = ssub.s32 %s6518_s16, %s6672_s29  ;;  %s57_s11 = sadd.s32 1, %s6514_s15 }
  0x3f   : > { %p55_p11 = scmp.eq.s32.totalorder %s54_s30, 0  ;;  %p64_p12 = scmp.ne.s32.totalorder %s6514_s15, %s6510_s14 }
  0x40   : > { %p65_p13 = scmp.eq.s32.totalorder %s6518_s16, 0  ;;  %p70_p0 = scmp.ne.s32.totalorder %s6510_s14, %s6506_s13 }
  0x41   : > { %s6683_s12 = scalar_select %p55_p11, %s6514_s15, %s57_s11  }
  0x42   : > { %p66_p2 = por %p65_p13, %p64_p12  ;;  %p6687_p5 = por %p10351_p1, %p70_p0 }
  0x43   : > { %5820 = dma.hbm_to_vmem [thread:$0]  (!%p6626_p6), %s10935_s8, 2048, %s6632_s25, [#allocation16], %s6525_s24, %s6525_s24, %s6526_s22  }
  0x44   : > { %10936 = sst [smem:[#allocation24_spill]] %s6683_s12  ;;  %p5840_p8 = scmp.lt.s32.totalorder %s6518_s16, 6 }
  0x45   : > { %s10937_s17 = scalar_select %p6687_p5, 1, 0 }
  0x46   : > { %s6693_s25 = sand.u32 1, %s6514_s15   ;;  %s10350_s18 = sshll.u32 %s6518_s16, 14 }
  0x47   : > { %s10349_s21 = sshll.u32 %s6693_s25, 10  ;;  %p6697_p9 = pnand %p5840_p8, %p66_p2 }
  0x48   : > { %s389_s13 = sand.u32 1, %s6518_s16   ;;  %s10939_s2 = sld [smem:[#allocation346_spill]] }
  0x49   : > { %s10938_s24 = scalar_select %p6697_p9, 1, 0 }
  0x4a   : > { %s393_s30 = scalar_lea.vmem [#allocation6], %s10349_s21  ;;  %s6527_s4 = smov [#allocation11]  }
  0x4b   : > { %s400_s11 = sshll.u32 %s393_s30, 4  ;;  %s6713_s6 = sshll.u32 %s6527_s4, 4  ;;  %s6711_s11 = int_to_ptr.vmem [resolvable:$true] %s400_s11  ;;  %s310_s6 = int_to_ptr.vmem [resolvable:$true] %s6713_s6 }
  0x4c   : > { %s6715_s8 = scalar_lea.sflag [#allocation7], %s389_s13  ;;  %p6721_p11 = pneg %p6697_p9 }
  0x4e   : > { %s6707_s28 = scalar_lea.hbm %s10939_s2, %s10350_s18  ;;  %s6311_s21 = scalar_lea.hbm %s10939_s2, 98304 }
  0x4f   : > { %s6306_s12 = scalar_lea.hbm %s6707_s28, 16384  ;;  %p6312_p0 = scmp.lt.s32.totalorder %s6707_s28, %s10939_s2 }
  0x50   : > { %p6307_p10 = scmp.ne.s32.totalorder %s6707_s28, %s6306_s12  ;;  %p6313_p2 = scmp.lt.s32.totalorder %s6311_s21, %s6306_s12 }
  0x52   : > { %p6309_p12 = pnand %p6721_p11, %p6307_p10  ;;  %p6314_p8 = por %p6313_p2, %p6312_p0 }
  0x54   : > { %p6310_p13 = pneg %p6309_p12 }
  0x56   : > { %p6315_p3 = pnand %p6314_p8, %p6310_p13 }
  0x58   : > { %6318 = shalt.err (!%p6315_p3)
}
  0x59   : > { %s6319_s13 = scalar_lea.vmem %s6711_s11, 16384  ;;  %s6528_s15 = smov [#allocation6]  }
  0x5a   : > { %p6320_p1 = scmp.ne.s32.totalorder %s6711_s11, %s6319_s13  ;;  %s6324_s27 = sshll.u32 %s6528_s15, 4  ;;  %s6325_s27 = int_to_ptr.vmem [resolvable:$false] %s6324_s27 }
  0x5b   : > { %s6326_s30 = scalar_lea.vmem %s6325_s27, 32768  ;;  %p6327_p5 = scmp.lt.s32.totalorder %s6711_s11, %s6325_s27 }
  0x5c   : > { %p6322_p10 = pnand %p6320_p1, %p6721_p11  ;;  %p6328_p4 = scmp.lt.s32.totalorder %s6326_s30, %s6319_s13 }
  0x5e   : > { %p6323_p12 = pneg %p6322_p10  ;;  %p6329_p6 = por %p6328_p4, %p6327_p5 }
  0x60   : > { %p6330_p7 = pnand %p6329_p6, %p6323_p12 }
  0x62   : > { %6333 = shalt.err (!%p6330_p7)
}
  0x63   : > { %s10361_s12 = smov 512   ;;  %s6530_s21 = smov 32  }
  0x64   : > { %5830 = dma.hbm_to_vmem [thread:$0]  (!%p6697_p9), %s6707_s28, 16384, %s6711_s11, %s6715_s8, %s10361_s12, %s10361_s12, %s6530_s21  }
  0x65   : > { %s6345_s15 = scalar_lea.vmem %s310_s6, 32  ;;  %p10941_p3 = scmp.ne.s32.totalorder %s10932_s26, 0 }
  0x66   : > { %p6346_p1 = scmp.ne.s32.totalorder %s310_s6, %s6345_s15  ;;  %p6353_p7 = scmp.lt.s32.totalorder %s310_s6, %s310_s6 }
  0x67   : > { %p6354_p5 = scmp.lt.s32.totalorder %s6345_s15, %s6345_s15 }
  0x68   : > { %p6348_p4 = pnand %p6346_p1, %p10941_p3 }
  0x69   : > { %p6355_p13 = por %p6354_p5, %p6353_p7 }
  0x6a   : > { %p6349_p6 = pneg %p6348_p4 }
  0x6c   : > { %p6356_p0 = pnand %p6355_p13, %p6349_p6 }
  0x6e   : > { %6359 = shalt.err (!%p6356_p0)
}
  0x6f   : > { %p10942_p2 = scmp.ne.s32.totalorder %s10931_s23, 0  ;;  %s10943_s5 = sld [smem:[#allocation348_spill]] }
  0x70   : > { %s6531_s13 = smov [#allocation14]   ;;  %s6532_s11 = smov [#allocation17]  }
  0x71   : > { %s333_s28 = sshll.u32 %s6531_s13, 4  ;;  %s357_s27 = sshll.u32 %s6532_s11, 4  ;;  %s334_s28 = int_to_ptr.vmem [resolvable:$true] %s333_s28  ;;  %s358_s27 = int_to_ptr.vmem [resolvable:$true] %s357_s27 }
  0x72   : > { %s6371_s30 = scalar_lea.vmem %s334_s28, 32  ;;  %p6379_p1 = scmp.lt.s32.totalorder %s334_s28, %s334_s28 }
  0x73   : > { %p6372_p8 = scmp.ne.s32.totalorder %s334_s28, %s6371_s30  ;;  %p6380_p4 = scmp.lt.s32.totalorder %s6371_s30, %s6371_s30 }
  0x75   : > { %5811 = dma.hbm_to_vmem [thread:$0]  (!%p10942_p2), %s10943_s5, 32, %s310_s6, [#allocation10]  }
  0x76   : > { %p6374_p10 = pnand %p6372_p8, %p10941_p3  ;;  %p6381_p6 = por %p6380_p4, %p6379_p1 }
  0x78   : > { %p6375_p12 = pneg %p6374_p10 }
  0x7a   : > { %p6382_p7 = pnand %p6381_p6, %p6375_p12 }
  0x7c   : > { %6385 = shalt.err (!%p6382_p7)
}
  0x7d   : > { %s10944_s7 = sld [smem:[#allocation350_spill]]  ;;  %s6397_s6 = scalar_lea.vmem %s358_s27, 16 }
  0x7e   : > { %p6398_p5 = scmp.ne.s32.totalorder %s358_s27, %s6397_s6  ;;  %s6404_s4 = scalar_lea.vmem %s358_s27, 32 }
  0x7f   : > { %p6405_p8 = scmp.lt.s32.totalorder %s358_s27, %s358_s27  ;;  %p6406_p10 = scmp.lt.s32.totalorder %s6404_s4, %s6397_s6 }
  0x80   : > { %p6400_p13 = pnand %p6398_p5, %p10941_p3 }
  0x81   : > { %p6407_p9 = por %p6406_p10, %p6405_p8 }
  0x82   : > { %p6401_p0 = pneg %p6400_p13 }
  0x83   : > { %5817 = dma.hbm_to_vmem [thread:$0]  (!%p10942_p2), %s10944_s7, 32, %s334_s28, [#allocation13]  }
  0x84   : > { %p6408_p1 = pnand %p6407_p9, %p6401_p0 }
  0x86   : > { %6411 = shalt.err (!%p6408_p1)
}
  0x87   : > { %5823 = dma.hbm_to_vmem [thread:$0]  (!%p10942_p2), %s10347_s9, 16, %s358_s27, [#allocation16]  }
  0x88   : > { %s10945_s26 = sshll.u32 %s6518_s16, 14  ;;  %s10946_s1 = sld [smem:[#allocation345_spill]] }
  0x89   : > { %s10947_s18 = sshll.u32 %s6693_s25, 10  ;;  %s5539_s4 = sshll.u32 %s6693_s25, 3 }
  0x8a   : > { %s372_s23 = scalar_lea.vmem [#allocation4], %s10947_s18  ;;  %s369_s13 = scalar_lea.sflag [#allocation5], %s6693_s25 }
  0x8b   : > { %s379_s6 = sshll.u32 %s372_s23, 4  ;;  %s6779_s6 = int_to_ptr.vmem [resolvable:$true] %s379_s6 }
  0x8e   : > { %s6774_s15 = scalar_lea.hbm %s10946_s1, %s10945_s26  ;;  %s6417_s26 = scalar_lea.hbm %s10946_s1, 98304 }
  0x8f   : > { %s6412_s11 = scalar_lea.hbm %s6774_s15, 16384  ;;  %p6418_p12 = scmp.lt.s32.totalorder %s6774_s15, %s10946_s1 }
  0x90   : > { %p6413_p9 = scmp.ne.s32.totalorder %s6774_s15, %s6412_s11  ;;  %p6419_p4 = scmp.lt.s32.totalorder %s6417_s26, %s6412_s11 }
  0x92   : > { %p6415_p3 = pnand %p6413_p9, %p6721_p11  ;;  %p6420_p6 = por %p6419_p4, %p6418_p12 }
  0x94   : > { %p6416_p2 = pneg %p6415_p3 }
  0x96   : > { %p6421_p7 = pnand %p6420_p6, %p6416_p2 }
  0x98   : > { %6424 = shalt.err (!%p6421_p7)
}
  0x99   : > { %s6425_s18 = scalar_lea.vmem %s6779_s6, 16384  ;;  %s6533_s23 = smov [#allocation4]  }
  0x9a   : > { %p6426_p5 = scmp.ne.s32.totalorder %s6779_s6, %s6425_s18  ;;  %s6430_s12 = sshll.u32 %s6533_s23, 4  ;;  %s6431_s12 = int_to_ptr.vmem [resolvable:$false] %s6430_s12 }
  0x9b   : > { %s6432_s27 = scalar_lea.vmem %s6431_s12, 32768  ;;  %p6433_p8 = scmp.lt.s32.totalorder %s6779_s6, %s6431_s12 }
  0x9c   : > { %p6428_p13 = pnand %p6426_p5, %p6721_p11  ;;  %p6434_p10 = scmp.lt.s32.totalorder %s6432_s27, %s6425_s18 }
  0x9e   : > { %p6429_p0 = pneg %p6428_p13  ;;  %p6435_p1 = por %p6434_p10, %p6433_p8 }
  0xa0   : > { %p6436_p9 = pnand %p6435_p1, %p6429_p0 }
  0xa2   : > { %6439 = shalt.err (!%p6436_p9)
}
  0xa3   : > { %p10948_p3 = scmp.ne.s32.totalorder %s10938_s24, 0  ;;  %s10949_s11 = smov 512  }
  0xa4   : > { %s5607_s26 = sshll.u32 %s6518_s16, 7  ;;  %s414_s28 = scalar_lea.vmem [#allocation8], %s5539_s4 }
  0xa5   : > { %5827 = dma.hbm_to_vmem [thread:$0]  (!%p10948_p3), %s6774_s15, 16384, %s6779_s6, %s369_s13, %s10949_s11, %s10949_s11, %s6530_s21  }
  0xa6   : > { %s422_s30 = sshll.u32 %s414_s28, 4  ;;  %s420_s12 = scalar_lea.hbm %s10341_s3, %s5607_s26  ;;  %s423_s30 = int_to_ptr.vmem [resolvable:$true] %s422_s30 }
  0xa7   : > { %s6440_s27 = scalar_lea.hbm %s420_s12, 128  ;;  %s6445_s5 = scalar_lea.hbm %s10341_s3, 768 }
  0xa8   : > { %p6441_p2 = scmp.ne.s32.totalorder %s420_s12, %s6440_s27  ;;  %p6446_p6 = scmp.lt.s32.totalorder %s420_s12, %s10341_s3 }
  0xa9   : > { %p6447_p7 = scmp.lt.s32.totalorder %s6445_s5, %s6440_s27 }
  0xaa   : > { %p6443_p12 = pnand %p6441_p2, %p6721_p11 }
  0xab   : > { %p6448_p5 = por %p6447_p7, %p6446_p6 }
  0xac   : > { %p6444_p4 = pneg %p6443_p12 }
  0xae   : > { %p6449_p13 = pnand %p6448_p5, %p6444_p4 }
  0xb0   : > { %6452 = shalt.err (!%p6449_p13)
}
  0xb1   : > { %s6453_s16 = scalar_lea.vmem %s423_s30, 128  ;;  %s6534_s25 = smov [#allocation8]  }
  0xb2   : > { %p6454_p0 = scmp.ne.s32.totalorder %s423_s30, %s6453_s16  ;;  %s6458_s15 = sshll.u32 %s6534_s25, 4  ;;  %s6459_s15 = int_to_ptr.vmem [resolvable:$false] %s6458_s15 }
  0xb3   : > { %s6460_s6 = scalar_lea.vmem %s6459_s15, 256  ;;  %p6461_p1 = scmp.lt.s32.totalorder %s423_s30, %s6459_s15 }
  0xb4   : > { %p6456_p8 = pnand %p6454_p0, %p6721_p11  ;;  %p6462_p9 = scmp.lt.s32.totalorder %s6460_s6, %s6453_s16 }
  0xb6   : > { %p6457_p10 = pneg %p6456_p8  ;;  %p6463_p2 = por %p6462_p9, %p6461_p1 }
  0xb8   : > { %p6464_p12 = pnand %p6463_p2, %p6457_p10 }
  0xba   : > { %6467 = shalt.err (!%p6464_p12)
}
  0xbb   : > { %5833 = dma.hbm_to_vmem [thread:$0]  (!%p10948_p3), %s420_s12, 128, %s423_s30, %s6715_s8  }
  0xbc   : > { %p10950_p4 = scmp.ne.s32.totalorder %s10930_s20, 0 }
  0xbe   : > { %431 = sbr.rel (%p10950_p4) target bundleno = 3573 (0xdf5), region = 60 }
  0xc3   : > { %s433_s1 = sand.u32 1, %s6510_s14   ;;  %p10951_p11 = scmp.ne.s32.totalorder %s10937_s17, 0 }
  0xc4   : > { %s5543_s2 = sshll.u32 %s433_s1, 10  ;;  %s434_s5 = scalar_lea.sflag [#allocation5], %s433_s1 }
  0xc5   : > { %s6827_s7 = scalar_lea.vmem [#allocation4], %s5543_s2 }
  0xc6   : > { %6485 = dma.done.wait (%p10951_p11), %s434_s5, 16384  }
  0xc7   : > { %6487 = vsyncadd (%p10951_p11), %s434_s5, 4294950912  ;;  %s442_s24 = sand.u32 1, %s6612_s19   ;;  %s6834_s8 = scalar_lea.vmem [#allocation6], %s5543_s2 }
  0xc8   : > { %s443_s22 = scalar_lea.sflag [#allocation7], %s442_s24 }
  0xc9   : > { %6489 = dma.done.wait (%p10951_p11), %s443_s22, 16512  }
  0xca   : > { %6491 = vsyncadd (%p10951_p11), %s443_s22, 4294950784  ;;  %s5545_s20 = sshll.u32 %s433_s1, 3  ;;  %p10952_p3 = scmp.eq.s32.totalorder %s6612_s19, 0 }
  0xcb   : > { %s6840_s4 = scalar_lea.vmem [#allocation8], %s5545_s20 }
  0xcc   : > { %6493 = dma.done.wait (%p10952_p3), [#allocation10], 4128   ;;  %p10953_p6 = pmov %p10952_p3 }
  0xcd   : > { %p10954_p7 = pmov %p10952_p3 }
  0xce   : > { %6495 = vsyncadd (%p10953_p6), [#allocation10], 4294963168 }
  0xcf   : > { %6497 = dma.done.wait (%p10954_p7), [#allocation13], 4128   ;;  %p10955_p5 = pmov %p10952_p3 }
  0xd0   : > { %p10956_p13 = pmov %p10952_p3 }
  0xd1   : > { %6499 = vsyncadd (%p10955_p5), [#allocation13], 4294963168 }
  0xd2   : > { %6501 = dma.done.wait (%p10956_p13), [#allocation16], 2064   ;;  %p10957_p0 = pmov %p10952_p3 }
  0xd3   : > { %p10958_p8 = scmp.ne.s32.totalorder %s6612_s19, 0 }
  0xd4   : > { %6503 = vsyncadd (%p10957_p0), [#allocation16], 4294965232 }
  0xd5   : > { %524 = sbr.rel (%p10958_p8) target bundleno = 227 (0xe3), region = 100 }
  0xda   : > { %v525_v0 = vld [vmem:[%s10338_s0] sm:$0xff]  ;;  %v526_v1 = vld [vmem:[%s10338_s0 + $0x8] sm:$0xff]  ;;  %v527_v2 = vld [vmem:[%s10338_s0 + $0x10] sm:$0xff] }
  0xdb   : > { %541 = vst [vmem:[#allocation2 + $0x30] sm:$0xff] %v525_v0  ;;  %542 = vst [vmem:[#allocation2] sm:$0xff] %v526_v1  ;;  %v528_v3 = vld [vmem:[%s10338_s0 + $0x18] sm:$0xff]  ;;  %v529_v4 = vld [vmem:[%s10338_s0 + $0x20] sm:$0xff] }
  0xdc   : > { %543 = vst [vmem:[#allocation2 + $0x58] sm:$0xff] %v527_v2  ;;  %v530_v5 = vld [vmem:[%s10338_s0 + $0x28] sm:$0xff]  ;;  %544 = vst [vmem:[#allocation2 + $0x18] sm:$0xff] %v528_v3  ;;  %v531_v6 = vld [vmem:[%s10338_s0 + $0x30] sm:$0xff] }
  0xdd   : > { %545 = vst [vmem:[#allocation2 + $0x50] sm:$0xff] %v529_v4  ;;  %546 = vst [vmem:[#allocation2 + $0x68] sm:$0xff] %v530_v5  ;;  %v532_v7 = vld [vmem:[%s10338_s0 + $0x38] sm:$0xff]  ;;  %v533_v8 = vld [vmem:[%s10338_s0 + $0x40] sm:$0xff] }
  0xde   : > { %547 = vst [vmem:[#allocation2 + $0x8] sm:$0xff] %v531_v6  ;;  %548 = vst [vmem:[#allocation2 + $0x48] sm:$0xff] %v532_v7  ;;  %v534_v9 = vld [vmem:[%s10338_s0 + $0x48] sm:$0xff]  ;;  %v535_v10 = vld [vmem:[%s10338_s0 + $0x50] sm:$0xff] }
  0xdf   : > { %549 = vst [vmem:[#allocation2 + $0x40] sm:$0xff] %v533_v8  ;;  %v536_v11 = vld [vmem:[%s10338_s0 + $0x58] sm:$0xff]  ;;  %550 = vst [vmem:[#allocation2 + $0x20] sm:$0xff] %v534_v9  ;;  %v537_v12 = vld [vmem:[%s10338_s0 + $0x60] sm:$0xff] }
  0xe0   : > { %551 = vst [vmem:[#allocation2 + $0x10] sm:$0xff] %v535_v10  ;;  %552 = vst [vmem:[#allocation2 + $0x38] sm:$0xff] %v536_v11  ;;  %v538_v13 = vld [vmem:[%s10338_s0 + $0x68] sm:$0xff]  ;;  %v539_v14 = vld [vmem:[%s10338_s0 + $0x70] sm:$0xff] }
  0xe1   : > { %553 = vst [vmem:[#allocation2 + $0x60] sm:$0xff] %v537_v12  ;;  %554 = vst [vmem:[#allocation2 + $0x70] sm:$0xff] %v538_v13  ;;  %v540_v15 = vld [vmem:[%s10338_s0 + $0x78] sm:$0xff] }
  0xe2   : > { %555 = vst [vmem:[#allocation2 + $0x78] sm:$0xff] %v539_v14  ;;  %556 = vst [vmem:[#allocation2 + $0x28] sm:$0xff] %v540_v15 }
  0xe3 PF: > { %v617_v16 = vld [vmem:[%s6827_s7 + $0x1e0] sm:$0xff]  ;;  %v618_v17 = vld [vmem:[%s6827_s7 + $0x1e8] sm:$0xff]  ;;  %p5601_p10 = scmp.ne.s32.totalorder %s6612_s19, 5 }
  0xe4   : > { %v613_v18 = vld [vmem:[%s6827_s7 + $0x1c0] sm:$0xff]  ;;  %v806_v19 = vunpack.c.h.bf16 %v617_v16  ;;  %v808_v20 = vunpack.c.h.bf16 %v618_v17  ;;  %v805_v21 = vunpack.c.l.bf16 %v617_v16  ;;  %v807_v22 = vunpack.c.l.bf16 %v618_v17  ;;  %v614_v23 = vld [vmem:[%s6827_s7 + $0x1c8] sm:$0xff] }
  0xe5   : > { %v609_v24 = vld [vmem:[%s6827_s7 + $0x1a0] sm:$0xff]  ;;  %v610_v25 = vld [vmem:[%s6827_s7 + $0x1a8] sm:$0xff]  ;;  %v798_v26 = vunpack.c.h.bf16 %v613_v18  ;;  %v800_v27 = vunpack.c.h.bf16 %v614_v23  ;;  %v797_v28 = vunpack.c.l.bf16 %v613_v18  ;;  %v799_v29 = vunpack.c.l.bf16 %v614_v23 }
  0xe6   : > { %v605_v30 = vld [vmem:[%s6827_s7 + $0x180] sm:$0xff]  ;;  %v606_v31 = vld [vmem:[%s6827_s7 + $0x188] sm:$0xff]  ;;  %1383 = vmatprep.subr.mxu0 %v806_v19  ;;  %1496 = vmatprep.subr.mxu1 %v808_v20  ;;  %v790_v32 = vunpack.c.h.bf16 %v609_v24  ;;  %v792_v33 = vunpack.c.h.bf16 %v610_v25  ;;  %v789_v34 = vunpack.c.l.bf16 %v609_v24  ;;  %v791_v35 = vunpack.c.l.bf16 %v610_v25 }
  0xe7   : > { %1384 = vmatpush1.msra.mxu0 %v805_v21  ;;  %1497 = vmatpush1.msra.mxu1 %v807_v22  ;;  %v601_v36 = vld [vmem:[%s6827_s7 + $0x160] sm:$0xff]  ;;  %v602_v37 = vld [vmem:[%s6827_s7 + $0x168] sm:$0xff]  ;;  %v782_v38 = vunpack.c.h.bf16 %v605_v30  ;;  %v784_v39 = vunpack.c.h.bf16 %v606_v31  ;;  %v781_v40 = vunpack.c.l.bf16 %v605_v30  ;;  %v783_v41 = vunpack.c.l.bf16 %v606_v31 }
  0xe8   : > { %1385 = vmatprep.subr.mxu0 %v798_v26  ;;  %1498 = vmatprep.subr.mxu1 %v800_v27  ;;  %v597_v42 = vld [vmem:[%s6827_s7 + $0x140] sm:$0xff]  ;;  %v598_v43 = vld [vmem:[%s6827_s7 + $0x148] sm:$0xff]  ;;  %v774_v44 = vunpack.c.h.bf16 %v601_v36  ;;  %v776_v45 = vunpack.c.h.bf16 %v602_v37  ;;  %v773_v46 = vunpack.c.l.bf16 %v601_v36  ;;  %v775_v47 = vunpack.c.l.bf16 %v602_v37 }
  0xe9   : > { %1386 = vmatpush1.msra.mxu0 %v797_v28  ;;  %1499 = vmatpush1.msra.mxu1 %v799_v29  ;;  %v593_v48 = vld [vmem:[%s6827_s7 + $0x120] sm:$0xff]  ;;  %v594_v49 = vld [vmem:[%s6827_s7 + $0x128] sm:$0xff]  ;;  %v766_v50 = vunpack.c.h.bf16 %v597_v42  ;;  %v768_v51 = vunpack.c.h.bf16 %v598_v43  ;;  %v765_v52 = vunpack.c.l.bf16 %v597_v42  ;;  %v767_v53 = vunpack.c.l.bf16 %v598_v43 }
  0xea   : > { %1387 = vmatprep.subr.mxu0 %v790_v32  ;;  %1500 = vmatprep.subr.mxu1 %v792_v33  ;;  %v589_v54 = vld [vmem:[%s6827_s7 + $0x100] sm:$0xff]  ;;  %v590_v55 = vld [vmem:[%s6827_s7 + $0x108] sm:$0xff]  ;;  %v758_v56 = vunpack.c.h.bf16 %v593_v48  ;;  %v760_v57 = vunpack.c.h.bf16 %v594_v49  ;;  %v757_v58 = vunpack.c.l.bf16 %v593_v48  ;;  %v759_v59 = vunpack.c.l.bf16 %v594_v49 }
  0xeb   : > { %1388 = vmatpush1.msra.mxu0 %v789_v34  ;;  %1501 = vmatpush1.msra.mxu1 %v791_v35  ;;  %v585_v60 = vld [vmem:[%s6827_s7 + $0xe0] sm:$0xff]  ;;  %v586_v61 = vld [vmem:[%s6827_s7 + $0xe8] sm:$0xff]  ;;  %v750_v62 = vunpack.c.h.bf16 %v589_v54  ;;  %v752_v63 = vunpack.c.h.bf16 %v590_v55  ;;  %v749_v0 = vunpack.c.l.bf16 %v589_v54  ;;  %v751_v1 = vunpack.c.l.bf16 %v590_v55 }
  0xec   : > { %1389 = vmatprep.subr.mxu0 %v782_v38  ;;  %1502 = vmatprep.subr.mxu1 %v784_v39  ;;  %v581_v2 = vld [vmem:[%s6827_s7 + $0xc0] sm:$0xff]  ;;  %v582_v3 = vld [vmem:[%s6827_s7 + $0xc8] sm:$0xff]  ;;  %v742_v4 = vunpack.c.h.bf16 %v585_v60  ;;  %v744_v5 = vunpack.c.h.bf16 %v586_v61  ;;  %v741_v6 = vunpack.c.l.bf16 %v585_v60  ;;  %v743_v7 = vunpack.c.l.bf16 %v586_v61 }
  0xed   : > { %1390 = vmatpush1.msra.mxu0 %v781_v40  ;;  %1503 = vmatpush1.msra.mxu1 %v783_v41  ;;  %v577_v8 = vld [vmem:[%s6827_s7 + $0xa0] sm:$0xff]  ;;  %v578_v9 = vld [vmem:[%s6827_s7 + $0xa8] sm:$0xff]  ;;  %v734_v10 = vunpack.c.h.bf16 %v581_v2  ;;  %v736_v11 = vunpack.c.h.bf16 %v582_v3  ;;  %v733_v12 = vunpack.c.l.bf16 %v581_v2  ;;  %v735_v13 = vunpack.c.l.bf16 %v582_v3 }
  0xee   : > { %1391 = vmatprep.subr.mxu0 %v774_v44  ;;  %1504 = vmatprep.subr.mxu1 %v776_v45  ;;  %v573_v14 = vld [vmem:[%s6827_s7 + $0x80] sm:$0xff]  ;;  %v574_v15 = vld [vmem:[%s6827_s7 + $0x88] sm:$0xff]  ;;  %v726_v16 = vunpack.c.h.bf16 %v577_v8  ;;  %v728_v17 = vunpack.c.h.bf16 %v578_v9  ;;  %v725_v18 = vunpack.c.l.bf16 %v577_v8  ;;  %v727_v19 = vunpack.c.l.bf16 %v578_v9 }
  0xef   : > { %1392 = vmatpush1.msra.mxu0 %v773_v46  ;;  %1505 = vmatpush1.msra.mxu1 %v775_v47  ;;  %v569_v20 = vld [vmem:[%s6827_s7 + $0x60] sm:$0xff]  ;;  %v570_v21 = vld [vmem:[%s6827_s7 + $0x68] sm:$0xff]  ;;  %v718_v22 = vunpack.c.h.bf16 %v573_v14  ;;  %v720_v23 = vunpack.c.h.bf16 %v574_v15  ;;  %v717_v24 = vunpack.c.l.bf16 %v573_v14  ;;  %v719_v25 = vunpack.c.l.bf16 %v574_v15 }
  0xf0   : > { %1393 = vmatprep.subr.mxu0 %v766_v50  ;;  %1506 = vmatprep.subr.mxu1 %v768_v51  ;;  %v565_v26 = vld [vmem:[%s6827_s7 + $0x40] sm:$0xff]  ;;  %v566_v27 = vld [vmem:[%s6827_s7 + $0x48] sm:$0xff]  ;;  %v710_v28 = vunpack.c.h.bf16 %v569_v20  ;;  %v712_v29 = vunpack.c.h.bf16 %v570_v21  ;;  %v709_v30 = vunpack.c.l.bf16 %v569_v20  ;;  %v711_v31 = vunpack.c.l.bf16 %v570_v21 }
  0xf1   : > { %1394 = vmatpush1.msra.mxu0 %v765_v52  ;;  %1507 = vmatpush1.msra.mxu1 %v767_v53  ;;  %v561_v32 = vld [vmem:[%s6827_s7 + $0x20] sm:$0xff]  ;;  %v562_v33 = vld [vmem:[%s6827_s7 + $0x28] sm:$0xff]  ;;  %v702_v34 = vunpack.c.h.bf16 %v565_v26  ;;  %v704_v35 = vunpack.c.h.bf16 %v566_v27  ;;  %v701_v36 = vunpack.c.l.bf16 %v565_v26  ;;  %v703_v37 = vunpack.c.l.bf16 %v566_v27 }
  0xf2   : > { %1395 = vmatprep.subr.mxu0 %v758_v56  ;;  %1508 = vmatprep.subr.mxu1 %v760_v57  ;;  %v557_v38 = vld [vmem:[%s6827_s7] sm:$0xff]  ;;  %v558_v39 = vld [vmem:[%s6827_s7 + $0x8] sm:$0xff]  ;;  %v694_v40 = vunpack.c.h.bf16 %v561_v32  ;;  %v696_v41 = vunpack.c.h.bf16 %v562_v33  ;;  %v693_v42 = vunpack.c.l.bf16 %v561_v32  ;;  %v695_v43 = vunpack.c.l.bf16 %v562_v33 }
  0xf3   : > { %1396 = vmatpush1.msra.mxu0 %v757_v58  ;;  %1509 = vmatpush1.msra.mxu1 %v759_v59  ;;  %v681_v44 = vld [vmem:[%s6827_s7 + $0x3e0] sm:$0xff]  ;;  %v682_v45 = vld [vmem:[%s6827_s7 + $0x3e8] sm:$0xff]  ;;  %v686_v46 = vunpack.c.h.bf16 %v557_v38  ;;  %v688_v47 = vunpack.c.h.bf16 %v558_v39  ;;  %v685_v48 = vunpack.c.l.bf16 %v557_v38  ;;  %v687_v49 = vunpack.c.l.bf16 %v558_v39 }
  0xf4   : > { %1397 = vmatprep.subr.mxu0 %v750_v62  ;;  %1510 = vmatprep.subr.mxu1 %v752_v63  ;;  %v677_v50 = vld [vmem:[%s6827_s7 + $0x3c0] sm:$0xff]  ;;  %v678_v51 = vld [vmem:[%s6827_s7 + $0x3c8] sm:$0xff]  ;;  %v934_v52 = vunpack.c.h.bf16 %v681_v44  ;;  %v936_v53 = vunpack.c.h.bf16 %v682_v45  ;;  %v933_v54 = vunpack.c.l.bf16 %v681_v44  ;;  %v935_v55 = vunpack.c.l.bf16 %v682_v45 }
  0xf5   : > { %1398 = vmatpush1.msra.mxu0 %v749_v0  ;;  %1511 = vmatpush1.msra.mxu1 %v751_v1  ;;  %v673_v56 = vld [vmem:[%s6827_s7 + $0x3a0] sm:$0xff]  ;;  %v674_v57 = vld [vmem:[%s6827_s7 + $0x3a8] sm:$0xff]  ;;  %v926_v58 = vunpack.c.h.bf16 %v677_v50  ;;  %v928_v59 = vunpack.c.h.bf16 %v678_v51  ;;  %v925_v60 = vunpack.c.l.bf16 %v677_v50  ;;  %v927_v61 = vunpack.c.l.bf16 %v678_v51 }
  0xf6   : > { %1399 = vmatprep.subr.mxu0 %v742_v4  ;;  %1512 = vmatprep.subr.mxu1 %v744_v5  ;;  %v669_v62 = vld [vmem:[%s6827_s7 + $0x380] sm:$0xff]  ;;  %v670_v63 = vld [vmem:[%s6827_s7 + $0x388] sm:$0xff]  ;;  %v918_v0 = vunpack.c.h.bf16 %v673_v56  ;;  %v920_v1 = vunpack.c.h.bf16 %v674_v57  ;;  %v917_v2 = vunpack.c.l.bf16 %v673_v56  ;;  %v919_v3 = vunpack.c.l.bf16 %v674_v57 }
  0xf7   : > { %1400 = vmatpush1.msra.mxu0 %v741_v6  ;;  %1513 = vmatpush1.msra.mxu1 %v743_v7  ;;  %v665_v4 = vld [vmem:[%s6827_s7 + $0x360] sm:$0xff]  ;;  %v666_v5 = vld [vmem:[%s6827_s7 + $0x368] sm:$0xff]  ;;  %v910_v6 = vunpack.c.h.bf16 %v669_v62  ;;  %v912_v7 = vunpack.c.h.bf16 %v670_v63  ;;  %v909_v8 = vunpack.c.l.bf16 %v669_v62  ;;  %v911_v9 = vunpack.c.l.bf16 %v670_v63 }
  0xf8   : > { %1401 = vmatprep.subr.mxu0 %v734_v10  ;;  %1514 = vmatprep.subr.mxu1 %v736_v11  ;;  %v661_v10 = vld [vmem:[%s6827_s7 + $0x340] sm:$0xff]  ;;  %v662_v11 = vld [vmem:[%s6827_s7 + $0x348] sm:$0xff]  ;;  %v901_v14 = vunpack.c.l.bf16 %v665_v4  ;;  %v903_v15 = vunpack.c.l.bf16 %v666_v5 }
  0xf9   : > { %1402 = vmatpush1.msra.mxu0 %v733_v12  ;;  %1515 = vmatpush1.msra.mxu1 %v735_v13  ;;  %v902_v12 = vunpack.c.h.bf16 %v665_v4  ;;  %v904_v13 = vunpack.c.h.bf16 %v666_v5  ;;  %v893_v20 = vunpack.c.l.bf16 %v661_v10  ;;  %v895_v21 = vunpack.c.l.bf16 %v662_v11 }
  0xfa   : > { %1403 = vmatprep.subr.mxu0 %v726_v16  ;;  %1516 = vmatprep.subr.mxu1 %v728_v17  ;;  %v657_v16 = vld [vmem:[%s6827_s7 + $0x320] sm:$0xff]  ;;  %v658_v17 = vld [vmem:[%s6827_s7 + $0x328] sm:$0xff] }
  0xfb   : > { %1404 = vmatpush1.msra.mxu0 %v725_v18  ;;  %1517 = vmatpush1.msra.mxu1 %v727_v19  ;;  %v894_v18 = vunpack.c.h.bf16 %v661_v10  ;;  %v896_v19 = vunpack.c.h.bf16 %v662_v11  ;;  %v885_v26 = vunpack.c.l.bf16 %v657_v16  ;;  %v887_v27 = vunpack.c.l.bf16 %v658_v17 }
  0xfc   : > { %1405 = vmatprep.subr.mxu0 %v718_v22  ;;  %1518 = vmatprep.subr.mxu1 %v720_v23  ;;  %v653_v22 = vld [vmem:[%s6827_s7 + $0x300] sm:$0xff]  ;;  %v654_v23 = vld [vmem:[%s6827_s7 + $0x308] sm:$0xff] }
  0xfd   : > { %1406 = vmatpush1.msra.mxu0 %v717_v24  ;;  %1519 = vmatpush1.msra.mxu1 %v719_v25  ;;  %v886_v24 = vunpack.c.h.bf16 %v657_v16  ;;  %v888_v25 = vunpack.c.h.bf16 %v658_v17  ;;  %v877_v32 = vunpack.c.l.bf16 %v653_v22  ;;  %v879_v33 = vunpack.c.l.bf16 %v654_v23  ;;  %v620_v16 = vld [vmem:[%s6827_s7 + $0x1f8] sm:$0xff]  ;;  %v6970_v17 = vld [vmem:[#allocation2] sm:$0xff] }
  0xfe   : > { %1407 = vmatprep.subr.mxu0 %v710_v28  ;;  %1520 = vmatprep.subr.mxu1 %v712_v29  ;;  %v649_v28 = vld [vmem:[%s6827_s7 + $0x2e0] sm:$0xff]  ;;  %v650_v29 = vld [vmem:[%s6827_s7 + $0x2e8] sm:$0xff] }
  0xff   : > { %1408 = vmatpush1.msra.mxu0 %v709_v30  ;;  %1521 = vmatpush1.msra.mxu1 %v711_v31  ;;  %v878_v30 = vunpack.c.h.bf16 %v653_v22  ;;  %v880_v31 = vunpack.c.h.bf16 %v654_v23  ;;  %v869_v38 = vunpack.c.l.bf16 %v649_v28  ;;  %v871_v39 = vunpack.c.l.bf16 %v650_v29 }
 0x100   : > { %1409 = vmatprep.subr.mxu0 %v702_v34  ;;  %1522 = vmatprep.subr.mxu1 %v704_v35  ;;  %v645_v34 = vld [vmem:[%s6827_s7 + $0x2c0] sm:$0xff]  ;;  %v646_v35 = vld [vmem:[%s6827_s7 + $0x2c8] sm:$0xff]  ;;  %v812_v23 = vunpack.c.h.bf16 %v620_v16 }
 0x101   : > { %1410 = vmatpush1.msra.mxu0 %v701_v36  ;;  %1523 = vmatpush1.msra.mxu1 %v703_v37  ;;  %v870_v36 = vunpack.c.h.bf16 %v649_v28  ;;  %v872_v37 = vunpack.c.h.bf16 %v650_v29  ;;  %v861_v44 = vunpack.c.l.bf16 %v645_v34  ;;  %v863_v45 = vunpack.c.l.bf16 %v646_v35 }
 0x102   : > { %1411 = vmatprep.subr.mxu0 %v694_v40  ;;  %1524 = vmatprep.subr.mxu1 %v696_v41  ;;  %v641_v40 = vld [vmem:[%s6827_s7 + $0x2a0] sm:$0xff]  ;;  %v642_v41 = vld [vmem:[%s6827_s7 + $0x2a8] sm:$0xff] }
 0x103   : > { %1412 = vmatpush1.msra.mxu0 %v693_v42  ;;  %1525 = vmatpush1.msra.mxu1 %v695_v43  ;;  %v862_v42 = vunpack.c.h.bf16 %v645_v34  ;;  %v864_v43 = vunpack.c.h.bf16 %v646_v35  ;;  %v853_v50 = vunpack.c.l.bf16 %v641_v40  ;;  %v855_v51 = vunpack.c.l.bf16 %v642_v41 }
 0x104   : > { %1413 = vmatprep.subr.mxu0 %v686_v46  ;;  %1526 = vmatprep.subr.mxu1 %v688_v47  ;;  %v637_v46 = vld [vmem:[%s6827_s7 + $0x280] sm:$0xff]  ;;  %v638_v47 = vld [vmem:[%s6827_s7 + $0x288] sm:$0xff] }
 0x105   : > { %1414 = vmatpush1.msra.mxu0 %v685_v48  ;;  %1527 = vmatpush1.msra.mxu1 %v687_v49  ;;  %v854_v48 = vunpack.c.h.bf16 %v641_v40  ;;  %v856_v49 = vunpack.c.h.bf16 %v642_v41  ;;  %v845_v56 = vunpack.c.l.bf16 %v637_v46  ;;  %v847_v57 = vunpack.c.l.bf16 %v638_v47 }
 0x106   : > { %1415 = vmatprep.subr.mxu0 %v934_v52  ;;  %1528 = vmatprep.subr.mxu1 %v936_v53  ;;  %v633_v52 = vld [vmem:[%s6827_s7 + $0x260] sm:$0xff]  ;;  %v634_v53 = vld [vmem:[%s6827_s7 + $0x268] sm:$0xff] }
 0x107   : > { %1416 = vmatpush2.msra.mxu0 %v933_v54  ;;  %1529 = vmatpush2.msra.mxu1 %v935_v55  ;;  %v846_v54 = vunpack.c.h.bf16 %v637_v46  ;;  %v848_v55 = vunpack.c.h.bf16 %v638_v47  ;;  %v837_v62 = vunpack.c.l.bf16 %v633_v52  ;;  %v839_v63 = vunpack.c.l.bf16 %v634_v53 }
 0x108   : > { %1417 = vmatprep.subr.mxu0 %v926_v58  ;;  %1530 = vmatprep.subr.mxu1 %v928_v59  ;;  %v629_v58 = vld [vmem:[%s6827_s7 + $0x240] sm:$0xff]  ;;  %v630_v59 = vld [vmem:[%s6827_s7 + $0x248] sm:$0xff] }
 0x109   : > { %1418 = vmatpush2.msra.mxu0 %v925_v60  ;;  %1531 = vmatpush2.msra.mxu1 %v927_v61  ;;  %v838_v60 = vunpack.c.h.bf16 %v633_v52  ;;  %v840_v61 = vunpack.c.h.bf16 %v634_v53  ;;  %v829_v4 = vunpack.c.l.bf16 %v629_v58  ;;  %v831_v5 = vunpack.c.l.bf16 %v630_v59 }
 0x10a   : > { %1419 = vmatprep.subr.mxu0 %v918_v0  ;;  %1532 = vmatprep.subr.mxu1 %v920_v1  ;;  %v625_v0 = vld [vmem:[%s6827_s7 + $0x220] sm:$0xff]  ;;  %v626_v1 = vld [vmem:[%s6827_s7 + $0x228] sm:$0xff] }
 0x10b   : > { %1420 = vmatpush2.msra.mxu0 %v917_v2  ;;  %1533 = vmatpush2.msra.mxu1 %v919_v3  ;;  %v830_v2 = vunpack.c.h.bf16 %v629_v58  ;;  %v832_v3 = vunpack.c.h.bf16 %v630_v59  ;;  %v821_v10 = vunpack.c.l.bf16 %v625_v0  ;;  %v823_v11 = vunpack.c.l.bf16 %v626_v1 }
 0x10c   : > { %1421 = vmatprep.subr.mxu0 %v910_v6  ;;  %1534 = vmatprep.subr.mxu1 %v912_v7  ;;  %v621_v6 = vld [vmem:[%s6827_s7 + $0x200] sm:$0xff]  ;;  %v622_v7 = vld [vmem:[%s6827_s7 + $0x208] sm:$0xff] }
 0x10d   : > { %1422 = vmatpush2.msra.mxu0 %v909_v8  ;;  %1535 = vmatpush2.msra.mxu1 %v911_v9  ;;  %v822_v8 = vunpack.c.h.bf16 %v625_v0  ;;  %v824_v9 = vunpack.c.h.bf16 %v626_v1 }
 0x10e   : > { %1423 = vmatprep.subr.mxu0 %v902_v12  ;;  %1536 = vmatprep.subr.mxu1 %v904_v13  ;;  %v814_v12 = vunpack.c.h.bf16 %v621_v6  ;;  %v816_v13 = vunpack.c.h.bf16 %v622_v7 }
 0x10f   : > { %1424 = vmatpush2.msra.mxu0 %v901_v14  ;;  %1537 = vmatpush2.msra.mxu1 %v903_v15  ;;  %v813_v14 = vunpack.c.l.bf16 %v621_v6  ;;  %v619_v15 = vld [vmem:[%s6827_s7 + $0x1f0] sm:$0xff] }
 0x110   : > { %1425 = vmatprep.subr.mxu0 %v894_v18  ;;  %1538 = vmatprep.subr.mxu1 %v896_v19  ;;  %v815_v18 = vunpack.c.l.bf16 %v622_v7  ;;  %v615_v19 = vld [vmem:[%s6827_s7 + $0x1d0] sm:$0xff]  ;;  %v810_v22 = vunpack.c.h.bf16 %v619_v15 }
 0x111   : > { %1426 = vmatpush2.msra.mxu0 %v893_v20  ;;  %1539 = vmatpush2.msra.mxu1 %v895_v21  ;;  %v616_v20 = vld [vmem:[%s6827_s7 + $0x1d8] sm:$0xff]  ;;  %v6974_v21 = vld [vmem:[#allocation2 + $0x30] sm:$0xff]  ;;  %v802_v28 = vunpack.c.h.bf16 %v615_v19 }
 0x112   : > { %1427 = vmatprep.subr.mxu0 %v886_v24  ;;  %1540 = vmatprep.subr.mxu1 %v888_v25  ;;  %v809_v24 = vunpack.c.l.bf16 %v619_v15  ;;  %v811_v25 = vunpack.c.l.bf16 %v620_v16  ;;  %v804_v29 = vunpack.c.h.bf16 %v616_v20  ;;  %v575_v16 = vld [vmem:[%s6827_s7 + $0x90] sm:$0xff] }
 0x113   : > { %1428 = vmatpush2.msra.mxu0 %v885_v26  ;;  %1541 = vmatpush2.msra.mxu1 %v887_v27  ;;  %v611_v26 = vld [vmem:[%s6827_s7 + $0x1b0] sm:$0xff]  ;;  %v612_v27 = vld [vmem:[%s6827_s7 + $0x1b8] sm:$0xff] }
 0x114   : > { %1429 = vmatprep.subr.mxu0 %v878_v30  ;;  %1542 = vmatprep.subr.mxu1 %v880_v31  ;;  %v801_v30 = vunpack.c.l.bf16 %v615_v19  ;;  %v803_v31 = vunpack.c.l.bf16 %v616_v20  ;;  %v794_v34 = vunpack.c.h.bf16 %v611_v26  ;;  %v796_v35 = vunpack.c.h.bf16 %v612_v27 }
 0x115   : > { %1430 = vmatpush2.msra.mxu0 %v877_v32  ;;  %1543 = vmatpush2.msra.mxu1 %v879_v33  ;;  %v607_v32 = vld [vmem:[%s6827_s7 + $0x190] sm:$0xff]  ;;  %v608_v33 = vld [vmem:[%s6827_s7 + $0x198] sm:$0xff] }
 0x116   : > { %1431 = vmatprep.subr.mxu0 %v870_v36  ;;  %1544 = vmatprep.subr.mxu1 %v872_v37  ;;  %v793_v36 = vunpack.c.l.bf16 %v611_v26  ;;  %v795_v37 = vunpack.c.l.bf16 %v612_v27  ;;  %v786_v40 = vunpack.c.h.bf16 %v607_v32  ;;  %v788_v41 = vunpack.c.h.bf16 %v608_v33 }
 0x117   : > { %1432 = vmatpush2.msra.mxu0 %v869_v38  ;;  %1545 = vmatpush2.msra.mxu1 %v871_v39  ;;  %v603_v38 = vld [vmem:[%s6827_s7 + $0x170] sm:$0xff]  ;;  %v604_v39 = vld [vmem:[%s6827_s7 + $0x178] sm:$0xff]  ;;  %v722_v26 = vunpack.c.h.bf16 %v575_v16 }
 0x118   : > { %1433 = vmatprep.subr.mxu0 %v862_v42  ;;  %1546 = vmatprep.subr.mxu1 %v864_v43  ;;  %v785_v42 = vunpack.c.l.bf16 %v607_v32  ;;  %v787_v43 = vunpack.c.l.bf16 %v608_v33  ;;  %v778_v46 = vunpack.c.h.bf16 %v603_v38  ;;  %v780_v47 = vunpack.c.h.bf16 %v604_v39 }
 0x119   : > { %1434 = vmatpush2.msra.mxu0 %v861_v44  ;;  %1547 = vmatpush2.msra.mxu1 %v863_v45  ;;  %v599_v44 = vld [vmem:[%s6827_s7 + $0x150] sm:$0xff]  ;;  %v600_v45 = vld [vmem:[%s6827_s7 + $0x158] sm:$0xff] }
 0x11a   : > { %1435 = vmatprep.subr.mxu0 %v854_v48  ;;  %1548 = vmatprep.subr.mxu1 %v856_v49  ;;  %v777_v48 = vunpack.c.l.bf16 %v603_v38  ;;  %v779_v49 = vunpack.c.l.bf16 %v604_v39  ;;  %v770_v52 = vunpack.c.h.bf16 %v599_v44  ;;  %v772_v53 = vunpack.c.h.bf16 %v600_v45 }
 0x11b   : > { %1436 = vmatpush2.msra.mxu0 %v853_v50  ;;  %1549 = vmatpush2.msra.mxu1 %v855_v51  ;;  %v595_v50 = vld [vmem:[%s6827_s7 + $0x130] sm:$0xff]  ;;  %v596_v51 = vld [vmem:[%s6827_s7 + $0x138] sm:$0xff] }
 0x11c   : > { %1437 = vmatprep.subr.mxu0 %v846_v54  ;;  %1550 = vmatprep.subr.mxu1 %v848_v55  ;;  %v769_v54 = vunpack.c.l.bf16 %v599_v44  ;;  %v771_v55 = vunpack.c.l.bf16 %v600_v45  ;;  %v762_v58 = vunpack.c.h.bf16 %v595_v50  ;;  %v764_v59 = vunpack.c.h.bf16 %v596_v51 }
 0x11d   : > { %1438 = vmatpush2.msra.mxu0 %v845_v56  ;;  %1551 = vmatpush2.msra.mxu1 %v847_v57  ;;  %v591_v56 = vld [vmem:[%s6827_s7 + $0x110] sm:$0xff]  ;;  %v592_v57 = vld [vmem:[%s6827_s7 + $0x118] sm:$0xff] }
 0x11e   : > { %1439 = vmatprep.subr.mxu0 %v838_v60  ;;  %1552 = vmatprep.subr.mxu1 %v840_v61  ;;  %v761_v60 = vunpack.c.l.bf16 %v595_v50  ;;  %v763_v61 = vunpack.c.l.bf16 %v596_v51  ;;  %v754_v0 = vunpack.c.h.bf16 %v591_v56  ;;  %v756_v1 = vunpack.c.h.bf16 %v592_v57 }
 0x11f   : > { %1440 = vmatpush2.msra.mxu0 %v837_v62  ;;  %1553 = vmatpush2.msra.mxu1 %v839_v63  ;;  %v587_v62 = vld [vmem:[%s6827_s7 + $0xf0] sm:$0xff]  ;;  %v588_v63 = vld [vmem:[%s6827_s7 + $0xf8] sm:$0xff] }
 0x120   : > { %1441 = vmatprep.subr.mxu0 %v830_v2  ;;  %1554 = vmatprep.subr.mxu1 %v832_v3  ;;  %v753_v2 = vunpack.c.l.bf16 %v591_v56  ;;  %v755_v3 = vunpack.c.l.bf16 %v592_v57  ;;  %v746_v6 = vunpack.c.h.bf16 %v587_v62  ;;  %v748_v7 = vunpack.c.h.bf16 %v588_v63  ;;  %v679_v56 = vld [vmem:[%s6827_s7 + $0x3d0] sm:$0xff]  ;;  %v680_v57 = vld [vmem:[%s6827_s7 + $0x3d8] sm:$0xff] }
 0x121   : > { %1442 = vmatpush2.msra.mxu0 %v829_v4  ;;  %1555 = vmatpush2.msra.mxu1 %v831_v5  ;;  %v583_v4 = vld [vmem:[%s6827_s7 + $0xd0] sm:$0xff]  ;;  %v584_v5 = vld [vmem:[%s6827_s7 + $0xd8] sm:$0xff] }
 0x122   : > { %1443 = vmatprep.subr.mxu0 %v822_v8  ;;  %1556 = vmatprep.subr.mxu1 %v824_v9  ;;  %v745_v8 = vunpack.c.l.bf16 %v587_v62  ;;  %v747_v9 = vunpack.c.l.bf16 %v588_v63  ;;  %v739_v15 = vunpack.c.l.bf16 %v584_v5  ;;  %v932_v62 = vunpack.c.h.bf16 %v680_v57  ;;  %v675_v63 = vld [vmem:[%s6827_s7 + $0x3b0] sm:$0xff] }
 0x123   : > { %1444 = vmatpush2.msra.mxu0 %v821_v10  ;;  %1557 = vmatpush2.msra.mxu1 %v823_v11  ;;  %v579_v10 = vld [vmem:[%s6827_s7 + $0xb0] sm:$0xff]  ;;  %v580_v11 = vld [vmem:[%s6827_s7 + $0xb8] sm:$0xff] }
 0x124   : > { %1445 = vmatprep.subr.mxu0 %v814_v12  ;;  %1558 = vmatprep.subr.mxu1 %v816_v13  ;;  %v738_v12 = vunpack.c.h.bf16 %v583_v4  ;;  %v740_v13 = vunpack.c.h.bf16 %v584_v5  ;;  %v730_v19 = vunpack.c.h.bf16 %v579_v10  ;;  %v732_v20 = vunpack.c.h.bf16 %v580_v11 }
 0x125   : > { %1446 = vmatpush2.msra.mxu0 %v813_v14  ;;  %1447 = vmatprep.mubr.f32.mxu0 %v6970_v17  ;;  %v737_v14 = vunpack.c.l.bf16 %v583_v4  ;;  %v922_v4 = vunpack.c.h.bf16 %v675_v63 }
 0x126   : > { %1559 = vmatpush2.msra.mxu1 %v815_v18  ;;  %1560 = vmatprep.mubr.f32.mxu1 %v6970_v17  ;;  %v576_v18 = vld [vmem:[%s6827_s7 + $0x98] sm:$0xff] }
 0x127   : > { %1448 = vmatmul.mubr.f32.vlgmr.msra.gmra.mxu0 %v6974_v21  ;;  %1561 = vmatmul.mubr.f32.vlgmr.msra.gmra.mxu1 %v6974_v21  ;;  %v724_v27 = vunpack.c.h.bf16 %v576_v18 }
 0x128   : > { %1609 = vmatprep.subr.mxu0 %v810_v22  ;;  %1722 = vmatprep.subr.mxu1 %v812_v23  ;;  %v729_v22 = vunpack.c.l.bf16 %v579_v10  ;;  %v731_v23 = vunpack.c.l.bf16 %v580_v11  ;;  %v7024_v10 = vld [vmem:[#allocation2 + $0x68] sm:$0xff] }
 0x129   : > { %1610 = vmatpush1.msra.mxu0 %v809_v24  ;;  %1723 = vmatpush1.msra.mxu1 %v811_v25  ;;  %v571_v24 = vld [vmem:[%s6827_s7 + $0x70] sm:$0xff]  ;;  %v572_v25 = vld [vmem:[%s6827_s7 + $0x78] sm:$0xff] }
 0x12a   : > { %1611 = vmatprep.subr.mxu0 %v802_v28  ;;  %1724 = vmatprep.subr.mxu1 %v804_v29  ;;  %v721_v28 = vunpack.c.l.bf16 %v575_v16  ;;  %v723_v29 = vunpack.c.l.bf16 %v576_v18  ;;  %v714_v32 = vunpack.c.h.bf16 %v571_v24  ;;  %v716_v33 = vunpack.c.h.bf16 %v572_v25  ;;  %v7028_v18 = vld [vmem:[#allocation2 + $0x50] sm:$0xff] }
 0x12b   : > { %1612 = vmatpush1.msra.mxu0 %v801_v30  ;;  %1725 = vmatpush1.msra.mxu1 %v803_v31  ;;  %v567_v30 = vld [vmem:[%s6827_s7 + $0x50] sm:$0xff]  ;;  %v568_v31 = vld [vmem:[%s6827_s7 + $0x58] sm:$0xff] }
 0x12c   : > { %1613 = vmatprep.subr.mxu0 %v794_v34  ;;  %1726 = vmatprep.subr.mxu1 %v796_v35  ;;  %v713_v34 = vunpack.c.l.bf16 %v571_v24  ;;  %v715_v35 = vunpack.c.l.bf16 %v572_v25  ;;  %v706_v38 = vunpack.c.h.bf16 %v567_v30  ;;  %v708_v39 = vunpack.c.h.bf16 %v568_v31 }
 0x12d   : > { %1614 = vmatpush1.msra.mxu0 %v793_v36  ;;  %1727 = vmatpush1.msra.mxu1 %v795_v37  ;;  %v563_v36 = vld [vmem:[%s6827_s7 + $0x30] sm:$0xff]  ;;  %v564_v37 = vld [vmem:[%s6827_s7 + $0x38] sm:$0xff] }
 0x12e   : > { %1615 = vmatprep.subr.mxu0 %v786_v40  ;;  %1728 = vmatprep.subr.mxu1 %v788_v41  ;;  %v705_v40 = vunpack.c.l.bf16 %v567_v30  ;;  %v707_v41 = vunpack.c.l.bf16 %v568_v31  ;;  %v698_v44 = vunpack.c.h.bf16 %v563_v36  ;;  %v700_v45 = vunpack.c.h.bf16 %v564_v37  ;;  %v660_v30 = vld [vmem:[%s6827_s7 + $0x338] sm:$0xff] }
 0x12f   : > { %1616 = vmatpush1.msra.mxu0 %v785_v42  ;;  %1729 = vmatpush1.msra.mxu1 %v787_v43  ;;  %v559_v42 = vld [vmem:[%s6827_s7 + $0x10] sm:$0xff]  ;;  %v560_v43 = vld [vmem:[%s6827_s7 + $0x18] sm:$0xff] }
 0x130   : > { %1617 = vmatprep.subr.mxu0 %v778_v46  ;;  %1730 = vmatprep.subr.mxu1 %v780_v47  ;;  %v697_v46 = vunpack.c.l.bf16 %v563_v36  ;;  %v699_v47 = vunpack.c.l.bf16 %v564_v37  ;;  %v690_v50 = vunpack.c.h.bf16 %v559_v42  ;;  %v692_v51 = vunpack.c.h.bf16 %v560_v43  ;;  %v655_v36 = vld [vmem:[%s6827_s7 + $0x310] sm:$0xff]  ;;  %v656_v37 = vld [vmem:[%s6827_s7 + $0x318] sm:$0xff] }
 0x131   : > { %1618 = vmatpush1.msra.mxu0 %v777_v48  ;;  %1731 = vmatpush1.msra.mxu1 %v779_v49  ;;  %v683_v48 = vld [vmem:[%s6827_s7 + $0x3f0] sm:$0xff]  ;;  %v684_v49 = vld [vmem:[%s6827_s7 + $0x3f8] sm:$0xff] }
 0x132   : > { %1619 = vmatprep.subr.mxu0 %v770_v52  ;;  %1732 = vmatprep.subr.mxu1 %v772_v53  ;;  %v689_v52 = vunpack.c.l.bf16 %v559_v42  ;;  %v691_v53 = vunpack.c.l.bf16 %v560_v43  ;;  %v884_v42 = vunpack.c.h.bf16 %v656_v37  ;;  %v651_v43 = vld [vmem:[%s6827_s7 + $0x2f0] sm:$0xff] }
 0x133   : > { %1620 = vmatpush1.msra.mxu0 %v769_v54  ;;  %1733 = vmatpush1.msra.mxu1 %v771_v55  ;;  %v938_v54 = vunpack.c.h.bf16 %v683_v48  ;;  %v940_v55 = vunpack.c.h.bf16 %v684_v49 }
 0x134   : > { %1621 = vmatprep.subr.mxu0 %v762_v58  ;;  %1734 = vmatprep.subr.mxu1 %v764_v59  ;;  %v937_v58 = vunpack.c.l.bf16 %v683_v48  ;;  %v939_v59 = vunpack.c.l.bf16 %v684_v49  ;;  %v874_v48 = vunpack.c.h.bf16 %v651_v43 }
 0x135   : > { %1622 = vmatpush1.msra.mxu0 %v761_v60  ;;  %1735 = vmatpush1.msra.mxu1 %v763_v61  ;;  %v7012_v60 = vld [vmem:[#allocation2 + $0x18] sm:$0xff]  ;;  %v930_v61 = vunpack.c.h.bf16 %v679_v56 }
 0x136   : > { %1623 = vmatprep.subr.mxu0 %v754_v0  ;;  %1736 = vmatprep.subr.mxu1 %v756_v1  ;;  %v676_v0 = vld [vmem:[%s6827_s7 + $0x3b8] sm:$0xff]  ;;  %v929_v1 = vunpack.c.l.bf16 %v679_v56 }
 0x137   : > { %1624 = vmatpush1.msra.mxu0 %v753_v2  ;;  %1737 = vmatpush1.msra.mxu1 %v755_v3  ;;  %v931_v2 = vunpack.c.l.bf16 %v680_v57  ;;  %v7016_v3 = vld [vmem:[#allocation2 + $0x58] sm:$0xff]  ;;  %v924_v5 = vunpack.c.h.bf16 %v676_v0  ;;  %v643_v57 = vld [vmem:[%s6827_s7 + $0x2b0] sm:$0xff] }
 0x138   : > { %1625 = vmatprep.subr.mxu0 %v746_v6  ;;  %1738 = vmatprep.subr.mxu1 %v748_v7  ;;  %v671_v6 = vld [vmem:[%s6827_s7 + $0x390] sm:$0xff]  ;;  %v672_v7 = vld [vmem:[%s6827_s7 + $0x398] sm:$0xff] }
 0x139   : > { %1626 = vmatpush1.msra.mxu0 %v745_v8  ;;  %1739 = vmatpush1.msra.mxu1 %v747_v9  ;;  %v921_v8 = vunpack.c.l.bf16 %v675_v63  ;;  %v923_v9 = vunpack.c.l.bf16 %v676_v0  ;;  %v914_v11 = vunpack.c.h.bf16 %v671_v6  ;;  %v915_v16 = vunpack.c.l.bf16 %v672_v7 }
 0x13a   : > { %1627 = vmatprep.subr.mxu0 %v738_v12  ;;  %1740 = vmatprep.subr.mxu1 %v740_v13  ;;  %v916_v12 = vunpack.c.h.bf16 %v672_v7  ;;  %v667_v13 = vld [vmem:[%s6827_s7 + $0x370] sm:$0xff]  ;;  %v858_v63 = vunpack.c.h.bf16 %v643_v57 }
 0x13b   : > { %1628 = vmatpush1.msra.mxu0 %v737_v14  ;;  %1741 = vmatpush1.msra.mxu1 %v739_v15  ;;  %v668_v14 = vld [vmem:[%s6827_s7 + $0x378] sm:$0xff]  ;;  %v913_v15 = vunpack.c.l.bf16 %v671_v6  ;;  %v905_v24 = vunpack.c.l.bf16 %v667_v13  ;;  %v7072_v6 = vld [vmem:[#allocation2 + $0x70] sm:$0xff] }
 0x13c   : > { %1629 = vmatprep.subr.mxu0 %v730_v19  ;;  %1742 = vmatprep.subr.mxu1 %v732_v20  ;;  %v906_v19 = vunpack.c.h.bf16 %v667_v13  ;;  %v908_v20 = vunpack.c.h.bf16 %v668_v14  ;;  %v907_v25 = vunpack.c.l.bf16 %v668_v14  ;;  %v7076_v14 = vld [vmem:[#allocation2 + $0x60] sm:$0xff] }
 0x13d   : > { %1630 = vmatpush1.msra.mxu0 %v729_v22  ;;  %1743 = vmatpush1.msra.mxu1 %v731_v23  ;;  %v663_v22 = vld [vmem:[%s6827_s7 + $0x350] sm:$0xff]  ;;  %v664_v23 = vld [vmem:[%s6827_s7 + $0x358] sm:$0xff] }
 0x13e   : > { %1631 = vmatprep.subr.mxu0 %v722_v26  ;;  %1744 = vmatprep.subr.mxu1 %v724_v27  ;;  %v7036_v26 = vld [vmem:[#allocation2 + $0x48] sm:$0xff]  ;;  %v898_v27 = vunpack.c.h.bf16 %v663_v22  ;;  %v897_v31 = vunpack.c.l.bf16 %v663_v22 }
 0x13f   : > { %1632 = vmatpush1.msra.mxu0 %v721_v28  ;;  %1745 = vmatpush1.msra.mxu1 %v723_v29  ;;  %v900_v28 = vunpack.c.h.bf16 %v664_v23  ;;  %v659_v29 = vld [vmem:[%s6827_s7 + $0x330] sm:$0xff] }
 0x140   : > { %1633 = vmatprep.subr.mxu0 %v714_v32  ;;  %1746 = vmatprep.subr.mxu1 %v716_v33  ;;  %v899_v32 = vunpack.c.l.bf16 %v664_v23  ;;  %v7040_v33 = vld [vmem:[#allocation2 + $0x8] sm:$0xff] }
 0x141   : > { %1634 = vmatpush1.msra.mxu0 %v713_v34  ;;  %1747 = vmatpush1.msra.mxu1 %v715_v35  ;;  %v890_v34 = vunpack.c.h.bf16 %v659_v29  ;;  %v892_v35 = vunpack.c.h.bf16 %v660_v30 }
 0x142   : > { %1635 = vmatprep.subr.mxu0 %v706_v38  ;;  %1748 = vmatprep.subr.mxu1 %v708_v39  ;;  %v889_v38 = vunpack.c.l.bf16 %v659_v29  ;;  %v891_v39 = vunpack.c.l.bf16 %v660_v30  ;;  %v628_v29 = vld [vmem:[%s6827_s7 + $0x238] sm:$0xff] }
 0x143   : > { %1636 = vmatpush1.msra.mxu0 %v705_v40  ;;  %1749 = vmatpush1.msra.mxu1 %v707_v41  ;;  %v7048_v40 = vld [vmem:[#allocation2 + $0x20] sm:$0xff]  ;;  %v882_v41 = vunpack.c.h.bf16 %v655_v36 }
 0x144   : > { %1637 = vmatprep.subr.mxu0 %v698_v44  ;;  %1750 = vmatprep.subr.mxu1 %v700_v45  ;;  %v652_v44 = vld [vmem:[%s6827_s7 + $0x2f8] sm:$0xff]  ;;  %v881_v45 = vunpack.c.l.bf16 %v655_v36 }
 0x145   : > { %1638 = vmatpush1.msra.mxu0 %v697_v46  ;;  %1751 = vmatpush1.msra.mxu1 %v699_v47  ;;  %v883_v46 = vunpack.c.l.bf16 %v656_v37  ;;  %v7052_v47 = vld [vmem:[#allocation2 + $0x40] sm:$0xff]  ;;  %v876_v49 = vunpack.c.h.bf16 %v652_v44  ;;  %v828_v37 = vunpack.c.h.bf16 %v628_v29 }
 0x146   : > { %1639 = vmatprep.subr.mxu0 %v690_v50  ;;  %1752 = vmatprep.subr.mxu1 %v692_v51  ;;  %v647_v50 = vld [vmem:[%s6827_s7 + $0x2d0] sm:$0xff]  ;;  %v648_v51 = vld [vmem:[%s6827_s7 + $0x2d8] sm:$0xff] }
 0x147   : > { %1640 = vmatpush1.msra.mxu0 %v689_v52  ;;  %1753 = vmatpush1.msra.mxu1 %v691_v53  ;;  %v873_v52 = vunpack.c.l.bf16 %v651_v43  ;;  %v875_v53 = vunpack.c.l.bf16 %v652_v44  ;;  %v868_v56 = vunpack.c.h.bf16 %v648_v51  ;;  %v1001_v44 = vld [vmem:[%s6834_s8 + $0x1e0] sm:$0xff] }
 0x148   : > { %1641 = vmatprep.subr.mxu0 %v938_v54  ;;  %1754 = vmatprep.subr.mxu1 %v940_v55  ;;  %v7060_v54 = vld [vmem:[#allocation2 + $0x38] sm:$0xff]  ;;  %v866_v55 = vunpack.c.h.bf16 %v647_v50 }
 0x149   : > { %1642 = vmatpush2.msra.mxu0 %v937_v58  ;;  %1755 = vmatpush2.msra.mxu1 %v939_v59  ;;  %v644_v58 = vld [vmem:[%s6827_s7 + $0x2b8] sm:$0xff]  ;;  %v865_v59 = vunpack.c.l.bf16 %v647_v50  ;;  %v7100_v50 = vunpack.c.h.bf16 %v1001_v44 }
 0x14a   : > { %1453 = vmatprep.mubr.f32.mxu0 %v7012_v60  ;;  %1566 = vmatprep.mubr.f32.mxu1 %v7012_v60  ;;  %v860_v0 = vunpack.c.h.bf16 %v644_v58 }
 0x14b   : > { %1643 = vmatprep.subr.mxu0 %v930_v61  ;;  %1756 = vmatprep.subr.mxu1 %v932_v62  ;;  %v867_v61 = vunpack.c.l.bf16 %v648_v51  ;;  %v7064_v62 = vld [vmem:[#allocation2 + $0x10] sm:$0xff]  ;;  %10959 = vst [vmem:[#allocation25_spill] sm:$0xff] %v7100_v50 }
 0x14c   : > { %1454 = vmatmul.mubr.f32.gmra.mxu0 %v7016_v3  ;;  %1567 = vmatmul.mubr.f32.gmra.mxu1 %v7016_v3 }
 0x14d   : > { %1644 = vmatpush2.msra.mxu0 %v929_v1  ;;  %1757 = vmatpush2.msra.mxu1 %v931_v2  ;;  %v639_v1 = vld [vmem:[%s6827_s7 + $0x290] sm:$0xff]  ;;  %v640_v2 = vld [vmem:[%s6827_s7 + $0x298] sm:$0xff] }
 0x14e   : > { %1645 = vmatprep.subr.mxu0 %v922_v4  ;;  %1758 = vmatprep.subr.mxu1 %v924_v5  ;;  %v857_v4 = vunpack.c.l.bf16 %v643_v57  ;;  %v859_v5 = vunpack.c.l.bf16 %v644_v58  ;;  %v850_v7 = vunpack.c.h.bf16 %v639_v1  ;;  %v851_v13 = vunpack.c.l.bf16 %v640_v2 }
 0x14f   : > { %1646 = vmatpush2.msra.mxu0 %v921_v8  ;;  %1759 = vmatpush2.msra.mxu1 %v923_v9  ;;  %v852_v8 = vunpack.c.h.bf16 %v640_v2  ;;  %v635_v9 = vld [vmem:[%s6827_s7 + $0x270] sm:$0xff] }
 0x150   : > { %1459 = vmatprep.mubr.f32.mxu0 %v7024_v10  ;;  %1572 = vmatprep.mubr.f32.mxu1 %v7024_v10  ;;  %v841_v22 = vunpack.c.l.bf16 %v635_v9 }
 0x151   : > { %1647 = vmatprep.subr.mxu0 %v914_v11  ;;  %1760 = vmatprep.subr.mxu1 %v916_v12  ;;  %v636_v11 = vld [vmem:[%s6827_s7 + $0x278] sm:$0xff]  ;;  %v849_v12 = vunpack.c.l.bf16 %v639_v1 }
 0x152   : > { %1460 = vmatmul.mubr.f32.gmra.mxu0 %v7028_v18  ;;  %1573 = vmatmul.mubr.f32.gmra.mxu1 %v7028_v18  ;;  %v843_v23 = vunpack.c.l.bf16 %v636_v11 }
 0x153   : > { %1648 = vmatpush2.msra.mxu0 %v913_v15  ;;  %1761 = vmatpush2.msra.mxu1 %v915_v16  ;;  %v842_v15 = vunpack.c.h.bf16 %v635_v9  ;;  %v844_v16 = vunpack.c.h.bf16 %v636_v11 }
 0x154   : > { %1649 = vmatprep.subr.mxu0 %v906_v19  ;;  %1762 = vmatprep.subr.mxu1 %v908_v20  ;;  %v631_v19 = vld [vmem:[%s6827_s7 + $0x250] sm:$0xff]  ;;  %v632_v20 = vld [vmem:[%s6827_s7 + $0x258] sm:$0xff] }
 0x155   : > { %1650 = vmatpush2.msra.mxu0 %v905_v24  ;;  %1763 = vmatpush2.msra.mxu1 %v907_v25  ;;  %v7084_v24 = vld [vmem:[#allocation2 + $0x28] sm:$0xff]  ;;  %v834_v25 = vunpack.c.h.bf16 %v631_v19  ;;  %v833_v30 = vunpack.c.l.bf16 %v631_v19 }
 0x156   : > { %1465 = vmatprep.mubr.f32.mxu0 %v7036_v26  ;;  %1578 = vmatprep.mubr.f32.mxu1 %v7036_v26 }
 0x157   : > { %1651 = vmatprep.subr.mxu0 %v898_v27  ;;  %1764 = vmatprep.subr.mxu1 %v900_v28  ;;  %v836_v27 = vunpack.c.h.bf16 %v632_v20  ;;  %v627_v28 = vld [vmem:[%s6827_s7 + $0x230] sm:$0xff] }
 0x158   : > { %1466 = vmatmul.mubr.f32.gmra.mxu0 %v7040_v33  ;;  %1579 = vmatmul.mubr.f32.gmra.mxu1 %v7040_v33  ;;  %v826_v36 = vunpack.c.h.bf16 %v627_v28 }
 0x159   : > { %1652 = vmatpush2.msra.mxu0 %v897_v31  ;;  %1765 = vmatpush2.msra.mxu1 %v899_v32  ;;  %v835_v31 = vunpack.c.l.bf16 %v632_v20  ;;  %v7088_v32 = vld [vmem:[#allocation2 + $0x78] sm:$0xff] }
 0x15a   : > { %1653 = vmatprep.subr.mxu0 %v890_v34  ;;  %1766 = vmatprep.subr.mxu1 %v892_v35  ;;  %v623_v34 = vld [vmem:[%s6827_s7 + $0x210] sm:$0xff]  ;;  %v624_v35 = vld [vmem:[%s6827_s7 + $0x218] sm:$0xff] }
 0x15b   : > { %1654 = vmatpush2.msra.mxu0 %v889_v38  ;;  %1767 = vmatpush2.msra.mxu1 %v891_v39  ;;  %v825_v38 = vunpack.c.l.bf16 %v627_v28  ;;  %v827_v39 = vunpack.c.l.bf16 %v628_v29  ;;  %v817_v43 = vunpack.c.l.bf16 %v623_v34 }
 0x15c   : > { %1471 = vmatprep.mubr.f32.mxu0 %v7048_v40  ;;  %1584 = vmatprep.mubr.f32.mxu1 %v7048_v40 }
 0x15d   : > { %1655 = vmatprep.subr.mxu0 %v882_v41  ;;  %1768 = vmatprep.subr.mxu1 %v884_v42  ;;  %v818_v41 = vunpack.c.h.bf16 %v623_v34  ;;  %v820_v42 = vunpack.c.h.bf16 %v624_v35 }
 0x15e   : > { %1472 = vmatmul.mubr.f32.gmra.mxu0 %v7052_v47  ;;  %1585 = vmatmul.mubr.f32.gmra.mxu1 %v7052_v47 }
 0x15f   : > { %1656 = vmatpush2.msra.mxu0 %v881_v45  ;;  %1769 = vmatpush2.msra.mxu1 %v883_v46  ;;  %v1002_v45 = vld [vmem:[%s6834_s8 + $0x1e8] sm:$0xff]  ;;  %v819_v46 = vunpack.c.l.bf16 %v624_v35 }
 0x160   : > { %1657 = vmatprep.subr.mxu0 %v874_v48  ;;  %1770 = vmatprep.subr.mxu1 %v876_v49  ;;  %v997_v48 = vld [vmem:[%s6834_s8 + $0x1c0] sm:$0xff]  ;;  %v998_v49 = vld [vmem:[%s6834_s8 + $0x1c8] sm:$0xff]  ;;  %v7102_v51 = vunpack.c.h.bf16 %v1002_v45 }
 0x161   : > { %1658 = vmatpush2.msra.mxu0 %v873_v52  ;;  %1771 = vmatpush2.msra.mxu1 %v875_v53  ;;  %v7105_v52 = vunpack.c.l.bf16 %v1001_v44  ;;  %v7107_v53 = vunpack.c.l.bf16 %v1002_v45  ;;  %v7112_v57 = vunpack.c.h.bf16 %v997_v48  ;;  %v7114_v58 = vunpack.c.h.bf16 %v998_v49  ;;  %v965_v45 = vld [vmem:[%s6834_s8 + $0xc0] sm:$0xff] }
 0x162   : > { %1477 = vmatprep.mubr.f32.mxu0 %v7060_v54  ;;  %1590 = vmatprep.mubr.f32.mxu1 %v7060_v54  ;;  %10960 = vst [vmem:[#allocation26_spill] sm:$0xff] %v7102_v51 }
 0x163   : > { %1659 = vmatprep.subr.mxu0 %v866_v55  ;;  %1772 = vmatprep.subr.mxu1 %v868_v56  ;;  %10961 = vst [vmem:[#allocation27_spill] sm:$0xff] %v7105_v52  ;;  %10962 = vst [vmem:[#allocation28_spill] sm:$0xff] %v7107_v53  ;;  %v993_v55 = vld [vmem:[%s6834_s8 + $0x1a0] sm:$0xff]  ;;  %v994_v56 = vld [vmem:[%s6834_s8 + $0x1a8] sm:$0xff] }
 0x164   : > { %1478 = vmatmul.mubr.f32.gmra.mxu0 %v7064_v62  ;;  %1591 = vmatmul.mubr.f32.gmra.mxu1 %v7064_v62  ;;  %10963 = vst [vmem:[#allocation29_spill] sm:$0xff] %v7112_v57  ;;  %10964 = vst [vmem:[#allocation30_spill] sm:$0xff] %v7114_v58  ;;  %v7128_v1 = vunpack.c.h.bf16 %v994_v56  ;;  %v7134_v2 = vunpack.c.l.bf16 %v994_v56 }
 0x165   : > { %1660 = vmatpush2.msra.mxu0 %v865_v59  ;;  %1773 = vmatpush2.msra.mxu1 %v867_v61  ;;  %v7118_v59 = vunpack.c.l.bf16 %v997_v48  ;;  %v7120_v61 = vunpack.c.l.bf16 %v998_v49 }
 0x166   : > { %1661 = vmatprep.subr.mxu0 %v858_v63  ;;  %1774 = vmatprep.subr.mxu1 %v860_v0  ;;  %v989_v63 = vld [vmem:[%s6834_s8 + $0x180] sm:$0xff]  ;;  %v990_v0 = vld [vmem:[%s6834_s8 + $0x188] sm:$0xff]  ;;  %10968 = vst [vmem:[#allocation34_spill] sm:$0xff] %v7128_v1  ;;  %10970 = vst [vmem:[#allocation36_spill] sm:$0xff] %v7134_v2 }
 0x167   : > { %1662 = vmatpush2.msra.mxu0 %v857_v4  ;;  %1775 = vmatpush2.msra.mxu1 %v859_v5  ;;  %10965 = vst [vmem:[#allocation31_spill] sm:$0xff] %v7118_v59  ;;  %10966 = vst [vmem:[#allocation32_spill] sm:$0xff] %v7120_v61  ;;  %v985_v4 = vld [vmem:[%s6834_s8 + $0x160] sm:$0xff]  ;;  %v986_v5 = vld [vmem:[%s6834_s8 + $0x168] sm:$0xff]  ;;  %v7146_v9 = vunpack.c.l.bf16 %v989_v63  ;;  %v7148_v11 = vunpack.c.l.bf16 %v990_v0 }
 0x168   : > { %1483 = vmatprep.mubr.f32.mxu0 %v7072_v6  ;;  %1596 = vmatprep.mubr.f32.mxu1 %v7072_v6  ;;  %v7160_v19 = vunpack.c.l.bf16 %v985_v4  ;;  %v7162_v20 = vunpack.c.l.bf16 %v986_v5 }
 0x169   : > { %1663 = vmatprep.subr.mxu0 %v850_v7  ;;  %1776 = vmatprep.subr.mxu1 %v852_v8  ;;  %v7140_v7 = vunpack.c.h.bf16 %v989_v63  ;;  %v7142_v8 = vunpack.c.h.bf16 %v990_v0  ;;  %10973 = vst [vmem:[#allocation39_spill] sm:$0xff] %v7146_v9  ;;  %10974 = vst [vmem:[#allocation40_spill] sm:$0xff] %v7148_v11  ;;  %v961_v63 = vld [vmem:[%s6834_s8 + $0xa0] sm:$0xff]  ;;  %v962_v0 = vld [vmem:[%s6834_s8 + $0xa8] sm:$0xff] }
 0x16a   : > { %1484 = vmatmul.mubr.f32.gmra.mxu0 %v7076_v14  ;;  %1597 = vmatmul.mubr.f32.gmra.mxu1 %v7076_v14  ;;  %10977 = vst [vmem:[#allocation43_spill] sm:$0xff] %v7160_v19  ;;  %10978 = vst [vmem:[#allocation44_spill] sm:$0xff] %v7162_v20 }
 0x16b   : > { %1664 = vmatpush2.msra.mxu0 %v849_v12  ;;  %1777 = vmatpush2.msra.mxu1 %v851_v13  ;;  %10971 = vst [vmem:[#allocation37_spill] sm:$0xff] %v7140_v7  ;;  %10972 = vst [vmem:[#allocation38_spill] sm:$0xff] %v7142_v8  ;;  %v981_v12 = vld [vmem:[%s6834_s8 + $0x140] sm:$0xff]  ;;  %v982_v13 = vld [vmem:[%s6834_s8 + $0x148] sm:$0xff] }
 0x16c   : > { %1665 = vmatprep.subr.mxu0 %v842_v15  ;;  %1778 = vmatprep.subr.mxu1 %v844_v16  ;;  %v7154_v15 = vunpack.c.h.bf16 %v985_v4  ;;  %v7156_v16 = vunpack.c.h.bf16 %v986_v5  ;;  %v7174_v28 = vunpack.c.l.bf16 %v981_v12  ;;  %v7176_v29 = vunpack.c.l.bf16 %v982_v13 }
 0x16d   : > { %1666 = vmatpush2.msra.mxu0 %v841_v22  ;;  %1779 = vmatpush2.msra.mxu1 %v843_v23  ;;  %v977_v22 = vld [vmem:[%s6834_s8 + $0x120] sm:$0xff]  ;;  %v978_v23 = vld [vmem:[%s6834_s8 + $0x128] sm:$0xff]  ;;  %v7224_v4 = vunpack.c.h.bf16 %v965_v45 }
 0x16e   : > { %1489 = vmatprep.mubr.f32.mxu0 %v7084_v24  ;;  %1602 = vmatprep.mubr.f32.mxu1 %v7084_v24  ;;  %10975 = vst [vmem:[#allocation41_spill] sm:$0xff] %v7154_v15  ;;  %10976 = vst [vmem:[#allocation42_spill] sm:$0xff] %v7156_v16  ;;  %v7182_v34 = vunpack.c.h.bf16 %v977_v22  ;;  %v7184_v35 = vunpack.c.h.bf16 %v978_v23 }
 0x16f   : > { %1667 = vmatprep.subr.mxu0 %v834_v25  ;;  %1780 = vmatprep.subr.mxu1 %v836_v27  ;;  %v7168_v25 = vunpack.c.h.bf16 %v981_v12  ;;  %v7170_v27 = vunpack.c.h.bf16 %v982_v13  ;;  %10981 = vst [vmem:[#allocation47_spill] sm:$0xff] %v7174_v28  ;;  %10982 = vst [vmem:[#allocation48_spill] sm:$0xff] %v7176_v29  ;;  %v7230_v12 = vunpack.c.l.bf16 %v965_v45  ;;  %v953_v45 = vld [vmem:[%s6834_s8 + $0x60] sm:$0xff] }
 0x170   : > { %1490 = vmatmul.mubr.f32.gmra.mxu0 %v7088_v32  ;;  %1603 = vmatmul.mubr.f32.gmra.mxu1 %v7088_v32  ;;  %10983 = vst [vmem:[#allocation49_spill] sm:$0xff] %v7182_v34  ;;  %10984 = vst [vmem:[#allocation50_spill] sm:$0xff] %v7184_v35 }
 0x171   : > { %1668 = vmatpush2.msra.mxu0 %v833_v30  ;;  %1781 = vmatpush2.msra.mxu1 %v835_v31  ;;  %10979 = vst [vmem:[#allocation45_spill] sm:$0xff] %v7168_v25  ;;  %10980 = vst [vmem:[#allocation46_spill] sm:$0xff] %v7170_v27  ;;  %v973_v30 = vld [vmem:[%s6834_s8 + $0x100] sm:$0xff]  ;;  %v974_v31 = vld [vmem:[%s6834_s8 + $0x108] sm:$0xff] }
 0x172   : > { %1669 = vmatprep.subr.mxu0 %v826_v36  ;;  %1782 = vmatprep.subr.mxu1 %v828_v37  ;;  %v7188_v36 = vunpack.c.l.bf16 %v977_v22  ;;  %v7190_v37 = vunpack.c.l.bf16 %v978_v23  ;;  %v7204_v44 = vunpack.c.l.bf16 %v974_v31  ;;  %10995 = vst [vmem:[#allocation61_spill] sm:$0xff] %v7224_v4  ;;  %10997 = vst [vmem:[#allocation63_spill] sm:$0xff] %v7230_v12  ;;  %v957_v22 = vld [vmem:[%s6834_s8 + $0x80] sm:$0xff]  ;;  %v958_v23 = vld [vmem:[%s6834_s8 + $0x88] sm:$0xff] }
 0x173   : > { %1670 = vmatpush2.msra.mxu0 %v825_v38  ;;  %1783 = vmatpush2.msra.mxu1 %v827_v39  ;;  %v969_v38 = vld [vmem:[%s6834_s8 + $0xe0] sm:$0xff]  ;;  %v970_v39 = vld [vmem:[%s6834_s8 + $0xe8] sm:$0xff] }
 0x174   : > { %1671 = vmatprep.subr.mxu0 %v818_v41  ;;  %1784 = vmatprep.subr.mxu1 %v820_v42  ;;  %10985 = vst [vmem:[#allocation51_spill] sm:$0xff] %v7188_v36  ;;  %10986 = vst [vmem:[#allocation52_spill] sm:$0xff] %v7190_v37  ;;  %v7196_v41 = vunpack.c.h.bf16 %v973_v30  ;;  %v7198_v42 = vunpack.c.h.bf16 %v974_v31  ;;  %v7210_v48 = vunpack.c.h.bf16 %v969_v38  ;;  %v7212_v49 = vunpack.c.h.bf16 %v970_v39 }
 0x175   : > { %1672 = vmatpush2.msra.mxu0 %v817_v43  ;;  %1673 = vmatprep.mubr.f32.mxu0 %v6970_v17  ;;  %v7202_v43 = vunpack.c.l.bf16 %v973_v30  ;;  %10990 = vst [vmem:[#allocation56_spill] sm:$0xff] %v7204_v44  ;;  %v7218_v56 = vunpack.c.l.bf16 %v970_v39  ;;  %v7238_v30 = vunpack.c.h.bf16 %v961_v63  ;;  %v7240_v31 = vunpack.c.h.bf16 %v962_v0 }
 0x176   : > { %1785 = vmatpush2.msra.mxu1 %v819_v46  ;;  %1786 = vmatprep.mubr.f32.mxu1 %v6970_v17  ;;  %v7126_v17 = vunpack.c.h.bf16 %v993_v55  ;;  %10987 = vst [vmem:[#allocation53_spill] sm:$0xff] %v7196_v41  ;;  %10988 = vst [vmem:[#allocation54_spill] sm:$0xff] %v7198_v42  ;;  %v966_v46 = vld [vmem:[%s6834_s8 + $0xc8] sm:$0xff]  ;;  %v7246_v39 = vunpack.c.l.bf16 %v962_v0  ;;  %v7260_v0 = vunpack.c.l.bf16 %v958_v23 }
 0x177   : > { %1674 = vmatmul.mubr.f32.vlgmr.msra.gmra.mxu0 %v6974_v21  ;;  %1787 = vmatmul.mubr.f32.vlgmr.msra.gmra.mxu1 %v6974_v21  ;;  %v7132_v21 = vunpack.c.l.bf16 %v993_v55  ;;  %10989 = vst [vmem:[#allocation55_spill] sm:$0xff] %v7202_v43  ;;  %10991 = vst [vmem:[#allocation57_spill] sm:$0xff] %v7210_v48  ;;  %v7216_v55 = vunpack.c.l.bf16 %v969_v38  ;;  %v7226_v5 = vunpack.c.h.bf16 %v966_v46  ;;  %v7232_v13 = vunpack.c.l.bf16 %v966_v46  ;;  %v954_v46 = vld [vmem:[%s6834_s8 + $0x68] sm:$0xff] }
 0x178   : > { %1907 = vmatprep.subr.mxu0 %v7100_v50  ;;  %1978 = vmatprep.subr.mxu1 %v7102_v51  ;;  %10967 = vst [vmem:[#allocation33_spill] sm:$0xff] %v7126_v17  ;;  %10992 = vst [vmem:[#allocation58_spill] sm:$0xff] %v7212_v49  ;;  %v7244_v38 = vunpack.c.l.bf16 %v961_v63  ;;  %v7258_v63 = vunpack.c.l.bf16 %v957_v22 }
 0x179   : > { %1908 = vmatpush1.msra.mxu0 %v7105_v52  ;;  %1979 = vmatpush1.msra.mxu1 %v7107_v53  ;;  %10969 = vst [vmem:[#allocation35_spill] sm:$0xff] %v7132_v21  ;;  %10993 = vst [vmem:[#allocation59_spill] sm:$0xff] %v7216_v55 }
 0x17a   : > { %1909 = vmatprep.subr.mxu0 %v7112_v57  ;;  %1980 = vmatprep.subr.mxu1 %v7114_v58  ;;  %10994 = vst [vmem:[#allocation60_spill] sm:$0xff] %v7218_v56  ;;  %10996 = vst [vmem:[#allocation62_spill] sm:$0xff] %v7226_v5 }
 0x17b   : > { %1910 = vmatpush1.msra.mxu0 %v7118_v59  ;;  %1981 = vmatpush1.msra.mxu1 %v7120_v61  ;;  %10998 = vst [vmem:[#allocation64_spill] sm:$0xff] %v7232_v13  ;;  %10999 = vst [vmem:[#allocation65_spill] sm:$0xff] %v7238_v30 }
 0x17c   : > { %1911 = vmatprep.subr.mxu0 %v7126_v17  ;;  %1982 = vmatprep.subr.mxu1 %v7128_v1  ;;  %11000 = vst [vmem:[#allocation66_spill] sm:$0xff] %v7240_v31  ;;  %11001 = vst [vmem:[#allocation67_spill] sm:$0xff] %v7244_v38 }
 0x17d   : > { %1912 = vmatpush1.msra.mxu0 %v7132_v21  ;;  %1983 = vmatpush1.msra.mxu1 %v7134_v2  ;;  %11002 = vst [vmem:[#allocation68_spill] sm:$0xff] %v7246_v39  ;;  %11005 = vst [vmem:[#allocation71_spill] sm:$0xff] %v7258_v63 }
 0x17e   : > { %1913 = vmatprep.subr.mxu0 %v7140_v7  ;;  %1984 = vmatprep.subr.mxu1 %v7142_v8  ;;  %11006 = vst [vmem:[#allocation72_spill] sm:$0xff] %v7260_v0 }
 0x17f   : > { %1914 = vmatpush1.msra.mxu0 %v7146_v9  ;;  %1985 = vmatpush1.msra.mxu1 %v7148_v11 }
 0x180   : > { %1915 = vmatprep.subr.mxu0 %v7154_v15  ;;  %1986 = vmatprep.subr.mxu1 %v7156_v16 }
 0x181   : > { %1916 = vmatpush1.msra.mxu0 %v7160_v19  ;;  %1987 = vmatpush1.msra.mxu1 %v7162_v20 }
 0x182   : > { %1917 = vmatprep.subr.mxu0 %v7168_v25  ;;  %1988 = vmatprep.subr.mxu1 %v7170_v27 }
 0x183   : > { %1918 = vmatpush1.msra.mxu0 %v7174_v28  ;;  %1989 = vmatpush1.msra.mxu1 %v7176_v29 }
 0x184   : > { %1919 = vmatprep.subr.mxu0 %v7182_v34  ;;  %1990 = vmatprep.subr.mxu1 %v7184_v35 }
 0x185   : > { %1920 = vmatpush1.msra.mxu0 %v7188_v36  ;;  %1991 = vmatpush1.msra.mxu1 %v7190_v37 }
 0x186   : > { %1921 = vmatprep.subr.mxu0 %v7196_v41  ;;  %1992 = vmatprep.subr.mxu1 %v7198_v42 }
 0x187   : > { %1922 = vmatpush1.msra.mxu0 %v7202_v43  ;;  %1993 = vmatpush1.msra.mxu1 %v7204_v44 }
 0x188   : > { %1923 = vmatprep.subr.mxu0 %v7210_v48  ;;  %1994 = vmatprep.subr.mxu1 %v7212_v49  ;;  %v7252_v49 = vunpack.c.h.bf16 %v957_v22  ;;  %v7254_v48 = vunpack.c.h.bf16 %v958_v23  ;;  %v7272_v22 = vunpack.c.l.bf16 %v953_v45  ;;  %v7274_v23 = vunpack.c.l.bf16 %v954_v46 }
 0x189   : > { %1924 = vmatpush1.msra.mxu0 %v7216_v55  ;;  %1995 = vmatpush1.msra.mxu1 %v7218_v56  ;;  %v949_v56 = vld [vmem:[%s6834_s8 + $0x40] sm:$0xff]  ;;  %v950_v55 = vld [vmem:[%s6834_s8 + $0x48] sm:$0xff] }
 0x18a   : > { %1925 = vmatprep.subr.mxu0 %v7224_v4  ;;  %1996 = vmatprep.subr.mxu1 %v7226_v5  ;;  %11003 = vst [vmem:[#allocation69_spill] sm:$0xff] %v7252_v49  ;;  %11004 = vst [vmem:[#allocation70_spill] sm:$0xff] %v7254_v48  ;;  %v7266_v5 = vunpack.c.h.bf16 %v953_v45  ;;  %v7268_v4 = vunpack.c.h.bf16 %v954_v46  ;;  %v7286_v45 = vunpack.c.l.bf16 %v949_v56  ;;  %v7288_v46 = vunpack.c.l.bf16 %v950_v55 }
 0x18b   : > { %1926 = vmatpush1.msra.mxu0 %v7230_v12  ;;  %1997 = vmatpush1.msra.mxu1 %v7232_v13  ;;  %11009 = vst [vmem:[#allocation75_spill] sm:$0xff] %v7272_v22  ;;  %11010 = vst [vmem:[#allocation76_spill] sm:$0xff] %v7274_v23  ;;  %v945_v13 = vld [vmem:[%s6834_s8 + $0x20] sm:$0xff]  ;;  %v946_v12 = vld [vmem:[%s6834_s8 + $0x28] sm:$0xff] }
 0x18c   : > { %1927 = vmatprep.subr.mxu0 %v7238_v30  ;;  %1998 = vmatprep.subr.mxu1 %v7240_v31  ;;  %11007 = vst [vmem:[#allocation73_spill] sm:$0xff] %v7266_v5  ;;  %11008 = vst [vmem:[#allocation74_spill] sm:$0xff] %v7268_v4  ;;  %v7280_v31 = vunpack.c.h.bf16 %v949_v56  ;;  %v7282_v30 = vunpack.c.h.bf16 %v950_v55  ;;  %v7302_v56 = vunpack.c.l.bf16 %v946_v12  ;;  %v1065_v55 = vld [vmem:[%s6834_s8 + $0x3e0] sm:$0xff] }
 0x18d   : > { %1928 = vmatpush1.msra.mxu0 %v7244_v38  ;;  %1999 = vmatpush1.msra.mxu1 %v7246_v39  ;;  %11013 = vst [vmem:[#allocation79_spill] sm:$0xff] %v7286_v45  ;;  %11014 = vst [vmem:[#allocation80_spill] sm:$0xff] %v7288_v46  ;;  %v941_v39 = vld [vmem:[%s6834_s8] sm:$0xff]  ;;  %v942_v38 = vld [vmem:[%s6834_s8 + $0x8] sm:$0xff] }
 0x18e   : > { %1929 = vmatprep.subr.mxu0 %v7252_v49  ;;  %2000 = vmatprep.subr.mxu1 %v7254_v48  ;;  %11011 = vst [vmem:[#allocation77_spill] sm:$0xff] %v7280_v31  ;;  %11012 = vst [vmem:[#allocation78_spill] sm:$0xff] %v7282_v30  ;;  %v7294_v48 = vunpack.c.h.bf16 %v945_v13  ;;  %v7296_v49 = vunpack.c.h.bf16 %v946_v12  ;;  %v7320_v12 = vunpack.c.h.bf16 %v1065_v55 }
 0x18f   : > { %1930 = vmatpush1.msra.mxu0 %v7258_v63  ;;  %2001 = vmatpush1.msra.mxu1 %v7260_v0  ;;  %v7300_v63 = vunpack.c.l.bf16 %v945_v13  ;;  %11018 = vst [vmem:[#allocation84_spill] sm:$0xff] %v7302_v56  ;;  %v1066_v0 = vld [vmem:[%s6834_s8 + $0x3e8] sm:$0xff]  ;;  %v7314_v13 = vunpack.c.l.bf16 %v941_v39 }
 0x190   : > { %1931 = vmatprep.subr.mxu0 %v7266_v5  ;;  %2002 = vmatprep.subr.mxu1 %v7268_v4  ;;  %11015 = vst [vmem:[#allocation81_spill] sm:$0xff] %v7294_v48  ;;  %11016 = vst [vmem:[#allocation82_spill] sm:$0xff] %v7296_v49  ;;  %v7308_v4 = vunpack.c.h.bf16 %v941_v39  ;;  %v7310_v5 = vunpack.c.h.bf16 %v942_v38  ;;  %v7328_v39 = vunpack.c.l.bf16 %v1065_v55 }
 0x191   : > { %1932 = vmatpush1.msra.mxu0 %v7272_v22  ;;  %2003 = vmatpush1.msra.mxu1 %v7274_v23  ;;  %11017 = vst [vmem:[#allocation83_spill] sm:$0xff] %v7300_v63  ;;  %11021 = vst [vmem:[#allocation87_spill] sm:$0xff] %v7314_v13  ;;  %v7316_v23 = vunpack.c.l.bf16 %v942_v38  ;;  %v1062_v22 = vld [vmem:[%s6834_s8 + $0x3c8] sm:$0xff]  ;;  %v7330_v38 = vunpack.c.l.bf16 %v1066_v0 }
 0x192   : > { %1933 = vmatprep.subr.mxu0 %v7280_v31  ;;  %2004 = vmatprep.subr.mxu1 %v7282_v30  ;;  %11019 = vst [vmem:[#allocation85_spill] sm:$0xff] %v7308_v4  ;;  %11020 = vst [vmem:[#allocation86_spill] sm:$0xff] %v7310_v5  ;;  %v7322_v30 = vunpack.c.h.bf16 %v1066_v0  ;;  %v1061_v31 = vld [vmem:[%s6834_s8 + $0x3c0] sm:$0xff]  ;;  %v7348_v55 = vunpack.c.l.bf16 %v1062_v22 }
 0x193   : > { %1934 = vmatpush1.msra.mxu0 %v7286_v45  ;;  %2005 = vmatpush1.msra.mxu1 %v7288_v46  ;;  %11022 = vst [vmem:[#allocation88_spill] sm:$0xff] %v7316_v23  ;;  %11023 = vst [vmem:[#allocation89_spill] sm:$0xff] %v7320_v12  ;;  %v7346_v0 = vunpack.c.l.bf16 %v1061_v31 }
 0x194   : > { %1935 = vmatprep.subr.mxu0 %v7294_v48  ;;  %2006 = vmatprep.subr.mxu1 %v7296_v49  ;;  %11024 = vst [vmem:[#allocation90_spill] sm:$0xff] %v7322_v30  ;;  %11025 = vst [vmem:[#allocation91_spill] sm:$0xff] %v7328_v39  ;;  %v7336_v49 = vunpack.c.h.bf16 %v1061_v31  ;;  %v7338_v48 = vunpack.c.h.bf16 %v1062_v22 }
 0x195   : > { %1936 = vmatpush1.msra.mxu0 %v7300_v63  ;;  %2007 = vmatpush1.msra.mxu1 %v7302_v56  ;;  %11026 = vst [vmem:[#allocation92_spill] sm:$0xff] %v7330_v38  ;;  %v1057_v63 = vld [vmem:[%s6834_s8 + $0x3a0] sm:$0xff]  ;;  %v1058_v56 = vld [vmem:[%s6834_s8 + $0x3a8] sm:$0xff]  ;;  %11029 = vst [vmem:[#allocation95_spill] sm:$0xff] %v7346_v0 }
 0x196   : > { %1937 = vmatprep.subr.mxu0 %v7308_v4  ;;  %2008 = vmatprep.subr.mxu1 %v7310_v5  ;;  %11027 = vst [vmem:[#allocation93_spill] sm:$0xff] %v7336_v49  ;;  %11028 = vst [vmem:[#allocation94_spill] sm:$0xff] %v7338_v48  ;;  %v7360_v31 = vunpack.c.l.bf16 %v1057_v63  ;;  %v7362_v22 = vunpack.c.l.bf16 %v1058_v56 }
 0x197   : > { %1938 = vmatpush1.msra.mxu0 %v7314_v13  ;;  %2009 = vmatpush1.msra.mxu1 %v7316_v23  ;;  %11030 = vst [vmem:[#allocation96_spill] sm:$0xff] %v7348_v55  ;;  %v7352_v23 = vunpack.c.h.bf16 %v1057_v63  ;;  %v7354_v13 = vunpack.c.h.bf16 %v1058_v56 }
 0x198   : > { %1939 = vmatprep.subr.mxu0 %v7320_v12  ;;  %2010 = vmatprep.subr.mxu1 %v7322_v30  ;;  %v1053_v12 = vld [vmem:[%s6834_s8 + $0x380] sm:$0xff]  ;;  %v1054_v30 = vld [vmem:[%s6834_s8 + $0x388] sm:$0xff]  ;;  %11033 = vst [vmem:[#allocation99_spill] sm:$0xff] %v7360_v31  ;;  %11034 = vst [vmem:[#allocation100_spill] sm:$0xff] %v7362_v22 }
 0x199   : > { %1940 = vmatpush2.msra.mxu0 %v7328_v39  ;;  %2011 = vmatpush2.msra.mxu1 %v7330_v38  ;;  %11031 = vst [vmem:[#allocation97_spill] sm:$0xff] %v7352_v23  ;;  %11032 = vst [vmem:[#allocation98_spill] sm:$0xff] %v7354_v13  ;;  %v7370_v38 = vunpack.c.h.bf16 %v1054_v30  ;;  %v7380_v63 = vunpack.c.l.bf16 %v1054_v30 }
 0x19a   : > { %1679 = vmatprep.mubr.f32.mxu0 %v7012_v60  ;;  %1792 = vmatprep.mubr.f32.mxu1 %v7012_v60  ;;  %v7368_v60 = vunpack.c.h.bf16 %v1053_v12 }
 0x19b   : > { %1941 = vmatprep.subr.mxu0 %v7336_v49  ;;  %2012 = vmatprep.subr.mxu1 %v7338_v48  ;;  %11036 = vst [vmem:[#allocation102_spill] sm:$0xff] %v7370_v38  ;;  %v1049_v49 = vld [vmem:[%s6834_s8 + $0x360] sm:$0xff]  ;;  %v1050_v48 = vld [vmem:[%s6834_s8 + $0x368] sm:$0xff]  ;;  %11038 = vst [vmem:[#allocation104_spill] sm:$0xff] %v7380_v63 }
 0x19c   : > { %1680 = vmatmul.mubr.f32.gmra.mxu0 %v7016_v3  ;;  %1793 = vmatmul.mubr.f32.gmra.mxu1 %v7016_v3  ;;  %11035 = vst [vmem:[#allocation101_spill] sm:$0xff] %v7368_v60  ;;  %v7378_v3 = vunpack.c.l.bf16 %v1053_v12  ;;  %v7384_v56 = vunpack.c.h.bf16 %v1049_v49  ;;  %v7392_v12 = vunpack.c.l.bf16 %v1049_v49  ;;  %v7394_v30 = vunpack.c.l.bf16 %v1050_v48 }
 0x19d   : > { %1942 = vmatpush2.msra.mxu0 %v7346_v0  ;;  %2013 = vmatpush2.msra.mxu1 %v7348_v55  ;;  %v7386_v55 = vunpack.c.h.bf16 %v1050_v48 }
 0x19e   : > { %1943 = vmatprep.subr.mxu0 %v7352_v23  ;;  %2014 = vmatprep.subr.mxu1 %v7354_v13  ;;  %11037 = vst [vmem:[#allocation103_spill] sm:$0xff] %v7378_v3  ;;  %11039 = vst [vmem:[#allocation105_spill] sm:$0xff] %v7384_v56  ;;  %v1045_v23 = vld [vmem:[%s6834_s8 + $0x340] sm:$0xff]  ;;  %v1046_v13 = vld [vmem:[%s6834_s8 + $0x348] sm:$0xff] }
 0x19f   : > { %1944 = vmatpush2.msra.mxu0 %v7360_v31  ;;  %2015 = vmatpush2.msra.mxu1 %v7362_v22  ;;  %11040 = vst [vmem:[#allocation106_spill] sm:$0xff] %v7386_v55  ;;  %11041 = vst [vmem:[#allocation107_spill] sm:$0xff] %v7392_v12  ;;  %v7402_v22 = vunpack.c.h.bf16 %v1046_v13  ;;  %v7412_v48 = vunpack.c.l.bf16 %v1046_v13 }
 0x1a0   : > { %1685 = vmatprep.mubr.f32.mxu0 %v7024_v10  ;;  %1798 = vmatprep.mubr.f32.mxu1 %v7024_v10  ;;  %11042 = vst [vmem:[#allocation108_spill] sm:$0xff] %v7394_v30  ;;  %v7400_v10 = vunpack.c.h.bf16 %v1045_v23 }
 0x1a1   : > { %1945 = vmatprep.subr.mxu0 %v7368_v60  ;;  %2016 = vmatprep.subr.mxu1 %v7370_v38  ;;  %11044 = vst [vmem:[#allocation110_spill] sm:$0xff] %v7402_v22  ;;  %v1041_v60 = vld [vmem:[%s6834_s8 + $0x320] sm:$0xff]  ;;  %v1042_v38 = vld [vmem:[%s6834_s8 + $0x328] sm:$0xff]  ;;  %11046 = vst [vmem:[#allocation112_spill] sm:$0xff] %v7412_v48 }
 0x1a2   : > { %1686 = vmatmul.mubr.f32.gmra.mxu0 %v7028_v18  ;;  %1799 = vmatmul.mubr.f32.gmra.mxu1 %v7028_v18  ;;  %11043 = vst [vmem:[#allocation109_spill] sm:$0xff] %v7400_v10  ;;  %v7410_v18 = vunpack.c.l.bf16 %v1045_v23  ;;  %v7416_v49 = vunpack.c.h.bf16 %v1041_v60  ;;  %v7424_v23 = vunpack.c.l.bf16 %v1041_v60  ;;  %v7426_v13 = vunpack.c.l.bf16 %v1042_v38 }
 0x1a3   : > { %1946 = vmatpush2.msra.mxu0 %v7378_v3  ;;  %2017 = vmatpush2.msra.mxu1 %v7380_v63  ;;  %v7418_v63 = vunpack.c.h.bf16 %v1042_v38 }
 0x1a4   : > { %1947 = vmatprep.subr.mxu0 %v7384_v56  ;;  %2018 = vmatprep.subr.mxu1 %v7386_v55  ;;  %11045 = vst [vmem:[#allocation111_spill] sm:$0xff] %v7410_v18  ;;  %11047 = vst [vmem:[#allocation113_spill] sm:$0xff] %v7416_v49  ;;  %v1037_v56 = vld [vmem:[%s6834_s8 + $0x300] sm:$0xff]  ;;  %v1038_v55 = vld [vmem:[%s6834_s8 + $0x308] sm:$0xff] }
 0x1a5   : > { %1948 = vmatpush2.msra.mxu0 %v7392_v12  ;;  %2019 = vmatpush2.msra.mxu1 %v7394_v30  ;;  %11048 = vst [vmem:[#allocation114_spill] sm:$0xff] %v7418_v63  ;;  %11049 = vst [vmem:[#allocation115_spill] sm:$0xff] %v7424_v23  ;;  %v7434_v30 = vunpack.c.h.bf16 %v1038_v55  ;;  %v7444_v38 = vunpack.c.l.bf16 %v1038_v55 }
 0x1a6   : > { %1691 = vmatprep.mubr.f32.mxu0 %v7036_v26  ;;  %1804 = vmatprep.mubr.f32.mxu1 %v7036_v26  ;;  %11050 = vst [vmem:[#allocation116_spill] sm:$0xff] %v7426_v13  ;;  %v7432_v26 = vunpack.c.h.bf16 %v1037_v56 }
 0x1a7   : > { %1949 = vmatprep.subr.mxu0 %v7400_v10  ;;  %2020 = vmatprep.subr.mxu1 %v7402_v22  ;;  %11052 = vst [vmem:[#allocation118_spill] sm:$0xff] %v7434_v30  ;;  %v1033_v10 = vld [vmem:[%s6834_s8 + $0x2e0] sm:$0xff]  ;;  %v1034_v22 = vld [vmem:[%s6834_s8 + $0x2e8] sm:$0xff]  ;;  %11054 = vst [vmem:[#allocation120_spill] sm:$0xff] %v7444_v38 }
 0x1a8   : > { %1692 = vmatmul.mubr.f32.gmra.mxu0 %v7040_v33  ;;  %1805 = vmatmul.mubr.f32.gmra.mxu1 %v7040_v33  ;;  %11051 = vst [vmem:[#allocation117_spill] sm:$0xff] %v7432_v26  ;;  %v7442_v33 = vunpack.c.l.bf16 %v1037_v56  ;;  %v7448_v60 = vunpack.c.h.bf16 %v1033_v10  ;;  %v7456_v56 = vunpack.c.l.bf16 %v1033_v10  ;;  %v7458_v55 = vunpack.c.l.bf16 %v1034_v22 }
 0x1a9   : > { %1950 = vmatpush2.msra.mxu0 %v7410_v18  ;;  %2021 = vmatpush2.msra.mxu1 %v7412_v48  ;;  %v7450_v48 = vunpack.c.h.bf16 %v1034_v22 }
 0x1aa   : > { %1951 = vmatprep.subr.mxu0 %v7416_v49  ;;  %2022 = vmatprep.subr.mxu1 %v7418_v63  ;;  %11053 = vst [vmem:[#allocation119_spill] sm:$0xff] %v7442_v33  ;;  %11055 = vst [vmem:[#allocation121_spill] sm:$0xff] %v7448_v60  ;;  %v1029_v49 = vld [vmem:[%s6834_s8 + $0x2c0] sm:$0xff]  ;;  %v1030_v63 = vld [vmem:[%s6834_s8 + $0x2c8] sm:$0xff] }
 0x1ab   : > { %1952 = vmatpush2.msra.mxu0 %v7424_v23  ;;  %2023 = vmatpush2.msra.mxu1 %v7426_v13  ;;  %11056 = vst [vmem:[#allocation122_spill] sm:$0xff] %v7450_v48  ;;  %11057 = vst [vmem:[#allocation123_spill] sm:$0xff] %v7456_v56  ;;  %v7466_v13 = vunpack.c.h.bf16 %v1030_v63  ;;  %v7476_v22 = vunpack.c.l.bf16 %v1030_v63 }
 0x1ac   : > { %1697 = vmatprep.mubr.f32.mxu0 %v7048_v40  ;;  %1810 = vmatprep.mubr.f32.mxu1 %v7048_v40  ;;  %11058 = vst [vmem:[#allocation124_spill] sm:$0xff] %v7458_v55  ;;  %v7464_v40 = vunpack.c.h.bf16 %v1029_v49 }
 0x1ad   : > { %1953 = vmatprep.subr.mxu0 %v7432_v26  ;;  %2024 = vmatprep.subr.mxu1 %v7434_v30  ;;  %11060 = vst [vmem:[#allocation126_spill] sm:$0xff] %v7466_v13  ;;  %v1025_v26 = vld [vmem:[%s6834_s8 + $0x2a0] sm:$0xff]  ;;  %v1026_v30 = vld [vmem:[%s6834_s8 + $0x2a8] sm:$0xff]  ;;  %11062 = vst [vmem:[#allocation128_spill] sm:$0xff] %v7476_v22 }
 0x1ae   : > { %1698 = vmatmul.mubr.f32.gmra.mxu0 %v7052_v47  ;;  %1811 = vmatmul.mubr.f32.gmra.mxu1 %v7052_v47  ;;  %11059 = vst [vmem:[#allocation125_spill] sm:$0xff] %v7464_v40  ;;  %v7474_v47 = vunpack.c.l.bf16 %v1029_v49  ;;  %v7480_v10 = vunpack.c.h.bf16 %v1025_v26  ;;  %v7488_v49 = vunpack.c.l.bf16 %v1025_v26  ;;  %v7490_v63 = vunpack.c.l.bf16 %v1026_v30 }
 0x1af   : > { %1954 = vmatpush2.msra.mxu0 %v7442_v33  ;;  %2025 = vmatpush2.msra.mxu1 %v7444_v38  ;;  %v7482_v38 = vunpack.c.h.bf16 %v1026_v30 }
 0x1b0   : > { %1955 = vmatprep.subr.mxu0 %v7448_v60  ;;  %2026 = vmatprep.subr.mxu1 %v7450_v48  ;;  %11061 = vst [vmem:[#allocation127_spill] sm:$0xff] %v7474_v47  ;;  %11063 = vst [vmem:[#allocation129_spill] sm:$0xff] %v7480_v10  ;;  %v1021_v60 = vld [vmem:[%s6834_s8 + $0x280] sm:$0xff]  ;;  %v1022_v48 = vld [vmem:[%s6834_s8 + $0x288] sm:$0xff] }
 0x1b1   : > { %1956 = vmatpush2.msra.mxu0 %v7456_v56  ;;  %2027 = vmatpush2.msra.mxu1 %v7458_v55  ;;  %11064 = vst [vmem:[#allocation130_spill] sm:$0xff] %v7482_v38  ;;  %11065 = vst [vmem:[#allocation131_spill] sm:$0xff] %v7488_v49  ;;  %v7498_v55 = vunpack.c.h.bf16 %v1022_v48  ;;  %v7508_v30 = vunpack.c.l.bf16 %v1022_v48 }
 0x1b2   : > { %1703 = vmatprep.mubr.f32.mxu0 %v7060_v54  ;;  %1816 = vmatprep.mubr.f32.mxu1 %v7060_v54  ;;  %11066 = vst [vmem:[#allocation132_spill] sm:$0xff] %v7490_v63  ;;  %v7496_v54 = vunpack.c.h.bf16 %v1021_v60 }
 0x1b3   : > { %1957 = vmatprep.subr.mxu0 %v7464_v40  ;;  %2028 = vmatprep.subr.mxu1 %v7466_v13  ;;  %11068 = vst [vmem:[#allocation134_spill] sm:$0xff] %v7498_v55  ;;  %v1017_v40 = vld [vmem:[%s6834_s8 + $0x260] sm:$0xff]  ;;  %v1018_v13 = vld [vmem:[%s6834_s8 + $0x268] sm:$0xff]  ;;  %11070 = vst [vmem:[#allocation136_spill] sm:$0xff] %v7508_v30 }
 0x1b4   : > { %1704 = vmatmul.mubr.f32.gmra.mxu0 %v7064_v62  ;;  %1817 = vmatmul.mubr.f32.gmra.mxu1 %v7064_v62  ;;  %11067 = vst [vmem:[#allocation133_spill] sm:$0xff] %v7496_v54  ;;  %v7506_v62 = vunpack.c.l.bf16 %v1021_v60  ;;  %v7512_v26 = vunpack.c.h.bf16 %v1017_v40  ;;  %v7520_v60 = vunpack.c.l.bf16 %v1017_v40  ;;  %v7522_v48 = vunpack.c.l.bf16 %v1018_v13  ;;  %v1005_v40 = vld [vmem:[%s6834_s8 + $0x200] sm:$0xff] }
 0x1b5   : > { %1958 = vmatpush2.msra.mxu0 %v7474_v47  ;;  %2029 = vmatpush2.msra.mxu1 %v7476_v22  ;;  %v7514_v22 = vunpack.c.h.bf16 %v1018_v13 }
 0x1b6   : > { %1959 = vmatprep.subr.mxu0 %v7480_v10  ;;  %2030 = vmatprep.subr.mxu1 %v7482_v38  ;;  %11069 = vst [vmem:[#allocation135_spill] sm:$0xff] %v7506_v62  ;;  %11071 = vst [vmem:[#allocation137_spill] sm:$0xff] %v7512_v26  ;;  %v1013_v10 = vld [vmem:[%s6834_s8 + $0x240] sm:$0xff]  ;;  %v1014_v38 = vld [vmem:[%s6834_s8 + $0x248] sm:$0xff] }
 0x1b7   : > { %1960 = vmatpush2.msra.mxu0 %v7488_v49  ;;  %2031 = vmatpush2.msra.mxu1 %v7490_v63  ;;  %11072 = vst [vmem:[#allocation138_spill] sm:$0xff] %v7514_v22  ;;  %11073 = vst [vmem:[#allocation139_spill] sm:$0xff] %v7520_v60  ;;  %v7530_v63 = vunpack.c.h.bf16 %v1014_v38  ;;  %v7538_v13 = vunpack.c.l.bf16 %v1013_v10  ;;  %v988_v49 = vld [vmem:[%s6834_s8 + $0x178] sm:$0xff] }
 0x1b8   : > { %1709 = vmatprep.mubr.f32.mxu0 %v7072_v6  ;;  %1822 = vmatprep.mubr.f32.mxu1 %v7072_v6  ;;  %11074 = vst [vmem:[#allocation140_spill] sm:$0xff] %v7522_v48  ;;  %v7528_v6 = vunpack.c.h.bf16 %v1013_v10 }
 0x1b9   : > { %1961 = vmatprep.subr.mxu0 %v7496_v54  ;;  %2032 = vmatprep.subr.mxu1 %v7498_v55  ;;  %11076 = vst [vmem:[#allocation142_spill] sm:$0xff] %v7530_v63  ;;  %v1009_v54 = vld [vmem:[%s6834_s8 + $0x220] sm:$0xff]  ;;  %v1010_v55 = vld [vmem:[%s6834_s8 + $0x228] sm:$0xff]  ;;  %11077 = vst [vmem:[#allocation143_spill] sm:$0xff] %v7538_v13 }
 0x1ba   : > { %1710 = vmatmul.mubr.f32.gmra.mxu0 %v7076_v14  ;;  %1823 = vmatmul.mubr.f32.gmra.mxu1 %v7076_v14  ;;  %11075 = vst [vmem:[#allocation141_spill] sm:$0xff] %v7528_v6  ;;  %v7540_v14 = vunpack.c.l.bf16 %v1014_v38  ;;  %v7552_v10 = vunpack.c.l.bf16 %v1009_v54  ;;  %v7554_v38 = vunpack.c.l.bf16 %v1010_v55 }
 0x1bb   : > { %1962 = vmatpush2.msra.mxu0 %v7506_v62  ;;  %2033 = vmatpush2.msra.mxu1 %v7508_v30  ;;  %v1006_v30 = vld [vmem:[%s6834_s8 + $0x208] sm:$0xff]  ;;  %v7546_v62 = vunpack.c.h.bf16 %v1009_v54  ;;  %v1003_v54 = vld [vmem:[%s6834_s8 + $0x1f0] sm:$0xff] }
 0x1bc   : > { %1963 = vmatprep.subr.mxu0 %v7512_v26  ;;  %2034 = vmatprep.subr.mxu1 %v7514_v22  ;;  %11078 = vst [vmem:[#allocation144_spill] sm:$0xff] %v7540_v14  ;;  %v7548_v26 = vunpack.c.h.bf16 %v1010_v55  ;;  %11081 = vst [vmem:[#allocation147_spill] sm:$0xff] %v7552_v10  ;;  %v7570_v55 = vunpack.c.l.bf16 %v1006_v30 }
 0x1bd   : > { %1964 = vmatpush2.msra.mxu0 %v7520_v60  ;;  %2035 = vmatpush2.msra.mxu1 %v7522_v48  ;;  %11079 = vst [vmem:[#allocation145_spill] sm:$0xff] %v7546_v62  ;;  %11082 = vst [vmem:[#allocation148_spill] sm:$0xff] %v7554_v38  ;;  %v7558_v48 = vunpack.c.h.bf16 %v1005_v40  ;;  %v992_v60 = vld [vmem:[%s6834_s8 + $0x198] sm:$0xff] }
 0x1be   : > { %1715 = vmatprep.mubr.f32.mxu0 %v7084_v24  ;;  %1828 = vmatprep.mubr.f32.mxu1 %v7084_v24  ;;  %11080 = vst [vmem:[#allocation146_spill] sm:$0xff] %v7548_v26  ;;  %v7560_v24 = vunpack.c.h.bf16 %v1006_v30  ;;  %11086 = vst [vmem:[#allocation152_spill] sm:$0xff] %v7570_v55  ;;  %v10524_v30 = vmov 0.0  }
 0x1bf   : > { %1965 = vmatprep.subr.mxu0 %v7528_v6  ;;  %2036 = vmatprep.subr.mxu1 %v7530_v63  ;;  %11083 = vst [vmem:[#allocation149_spill] sm:$0xff] %v7558_v48  ;;  %v7564_v6 = vunpack.c.l.bf16 %v1005_v40  ;;  %v1004_v63 = vld [vmem:[%s6834_s8 + $0x1f8] sm:$0xff]  ;;  %v7578_v40 = vunpack.c.h.bf16 %v1003_v54 }
 0x1c0   : > { %1716 = vmatmul.mubr.f32.gmra.mxu0 %v7088_v32  ;;  %1829 = vmatmul.mubr.f32.gmra.mxu1 %v7088_v32  ;;  %11084 = vst [vmem:[#allocation150_spill] sm:$0xff] %v7560_v24  ;;  %v999_v32 = vld [vmem:[%s6834_s8 + $0x1d0] sm:$0xff] }
 0x1c1   : > { %1966 = vmatpush2.msra.mxu0 %v7538_v13  ;;  %2037 = vmatpush2.msra.mxu1 %v7540_v14  ;;  %11085 = vst [vmem:[#allocation151_spill] sm:$0xff] %v7564_v6  ;;  %v1000_v13 = vld [vmem:[%s6834_s8 + $0x1d8] sm:$0xff]  ;;  %11087 = vst [vmem:[#allocation153_spill] sm:$0xff] %v7578_v40  ;;  %v7580_v14 = vunpack.c.h.bf16 %v1004_v63 }
 0x1c2   : > { %1967 = vmatprep.subr.mxu0 %v7546_v62  ;;  %2038 = vmatprep.subr.mxu1 %v7548_v26  ;;  %v995_v26 = vld [vmem:[%s6834_s8 + $0x1b0] sm:$0xff]  ;;  %v996_v62 = vld [vmem:[%s6834_s8 + $0x1b8] sm:$0xff] }
 0x1c3   : > { %1968 = vmatpush2.msra.mxu0 %v7552_v10  ;;  %2039 = vmatpush2.msra.mxu1 %v7554_v38  ;;  %11088 = vst [vmem:[#allocation154_spill] sm:$0xff] %v7580_v14  ;;  %v7584_v10 = vunpack.c.l.bf16 %v1003_v54  ;;  %v7586_v38 = vunpack.c.l.bf16 %v1004_v63  ;;  %v7598_v54 = vunpack.c.l.bf16 %v999_v32  ;;  %v7600_v63 = vunpack.c.l.bf16 %v1000_v13 }
 0x1c4   : > { %1969 = vmatprep.subr.mxu0 %v7558_v48  ;;  %2040 = vmatprep.subr.mxu1 %v7560_v24  ;;  %v7592_v24 = vunpack.c.h.bf16 %v999_v32  ;;  %v7594_v48 = vunpack.c.h.bf16 %v1000_v13  ;;  %v7608_v22 = vunpack.c.h.bf16 %v996_v62  ;;  %v7612_v32 = vunpack.c.l.bf16 %v995_v26 }
 0x1c5   : > { %1970 = vmatpush2.msra.mxu0 %v7564_v6  ;;  %1971 = vmatprep.mubr.f32.mxu0 %v10524_v30  ;;  %11089 = vst [vmem:[#allocation155_spill] sm:$0xff] %v7584_v10  ;;  %11090 = vst [vmem:[#allocation156_spill] sm:$0xff] %v7586_v38  ;;  %v991_v6 = vld [vmem:[%s6834_s8 + $0x190] sm:$0xff]  ;;  %v7614_v13 = vunpack.c.l.bf16 %v996_v62  ;;  %v7628_v62 = vunpack.c.l.bf16 %v992_v60 }
 0x1c6   : > { %2041 = vmatpush2.msra.mxu1 %v7570_v55  ;;  %2042 = vmatprep.mubr.f32.mxu1 %v10524_v30  ;;  %11091 = vst [vmem:[#allocation157_spill] sm:$0xff] %v7592_v24  ;;  %11092 = vst [vmem:[#allocation158_spill] sm:$0xff] %v7594_v48  ;;  %v7606_v55 = vunpack.c.h.bf16 %v995_v26  ;;  %v7626_v26 = vunpack.c.l.bf16 %v991_v6 }
 0x1c7   : > { %1972 = vmatmul.mubr.f32.vlgmr.msra.gmra.mxu0 %v10524_v30  ;;  %2043 = vmatmul.mubr.f32.vlgmr.msra.gmra.mxu1 %v10524_v30  ;;  %11093 = vst [vmem:[#allocation159_spill] sm:$0xff] %v7598_v54  ;;  %11094 = vst [vmem:[#allocation160_spill] sm:$0xff] %v7600_v63  ;;  %v987_v30 = vld [vmem:[%s6834_s8 + $0x170] sm:$0xff] }
 0x1c8   : > { %2049 = vmatprep.subr.mxu0 %v7578_v40  ;;  %2120 = vmatprep.subr.mxu1 %v7580_v14  ;;  %11095 = vst [vmem:[#allocation161_spill] sm:$0xff] %v7606_v55  ;;  %11096 = vst [vmem:[#allocation162_spill] sm:$0xff] %v7608_v22  ;;  %v7620_v14 = vunpack.c.h.bf16 %v991_v6  ;;  %v7622_v40 = vunpack.c.h.bf16 %v992_v60  ;;  %v7640_v6 = vunpack.c.l.bf16 %v987_v30  ;;  %v7642_v60 = vunpack.c.l.bf16 %v988_v49 }
 0x1c9   : > { %2050 = vmatpush1.msra.mxu0 %v7584_v10  ;;  %2121 = vmatpush1.msra.mxu1 %v7586_v38  ;;  %11097 = vst [vmem:[#allocation163_spill] sm:$0xff] %v7612_v32  ;;  %11098 = vst [vmem:[#allocation164_spill] sm:$0xff] %v7614_v13  ;;  %v983_v38 = vld [vmem:[%s6834_s8 + $0x150] sm:$0xff]  ;;  %v984_v10 = vld [vmem:[%s6834_s8 + $0x158] sm:$0xff] }
 0x1ca   : > { %2051 = vmatprep.subr.mxu0 %v7592_v24  ;;  %2122 = vmatprep.subr.mxu1 %v7594_v48  ;;  %11099 = vst [vmem:[#allocation165_spill] sm:$0xff] %v7620_v14  ;;  %11100 = vst [vmem:[#allocation166_spill] sm:$0xff] %v7622_v40  ;;  %v7634_v48 = vunpack.c.h.bf16 %v987_v30  ;;  %v7636_v24 = vunpack.c.h.bf16 %v988_v49  ;;  %v7654_v30 = vunpack.c.l.bf16 %v983_v38  ;;  %v7656_v49 = vunpack.c.l.bf16 %v984_v10 }
 0x1cb   : > { %2052 = vmatpush1.msra.mxu0 %v7598_v54  ;;  %2123 = vmatpush1.msra.mxu1 %v7600_v63  ;;  %11101 = vst [vmem:[#allocation167_spill] sm:$0xff] %v7626_v26  ;;  %11102 = vst [vmem:[#allocation168_spill] sm:$0xff] %v7628_v62  ;;  %v979_v63 = vld [vmem:[%s6834_s8 + $0x130] sm:$0xff]  ;;  %v980_v54 = vld [vmem:[%s6834_s8 + $0x138] sm:$0xff] }
 0x1cc   : > { %2053 = vmatprep.subr.mxu0 %v7606_v55  ;;  %2124 = vmatprep.subr.mxu1 %v7608_v22  ;;  %11103 = vst [vmem:[#allocation169_spill] sm:$0xff] %v7634_v48  ;;  %11104 = vst [vmem:[#allocation170_spill] sm:$0xff] %v7636_v24  ;;  %v7648_v22 = vunpack.c.h.bf16 %v983_v38  ;;  %v7650_v55 = vunpack.c.h.bf16 %v984_v10  ;;  %v7668_v38 = vunpack.c.l.bf16 %v979_v63  ;;  %v7670_v10 = vunpack.c.l.bf16 %v980_v54 }
 0x1cd   : > { %2054 = vmatpush1.msra.mxu0 %v7612_v32  ;;  %2125 = vmatpush1.msra.mxu1 %v7614_v13  ;;  %11105 = vst [vmem:[#allocation171_spill] sm:$0xff] %v7640_v6  ;;  %11106 = vst [vmem:[#allocation172_spill] sm:$0xff] %v7642_v60  ;;  %v975_v13 = vld [vmem:[%s6834_s8 + $0x110] sm:$0xff]  ;;  %v976_v32 = vld [vmem:[%s6834_s8 + $0x118] sm:$0xff] }
 0x1ce   : > { %2055 = vmatprep.subr.mxu0 %v7620_v14  ;;  %2126 = vmatprep.subr.mxu1 %v7622_v40  ;;  %11107 = vst [vmem:[#allocation173_spill] sm:$0xff] %v7648_v22  ;;  %11108 = vst [vmem:[#allocation174_spill] sm:$0xff] %v7650_v55  ;;  %v7662_v40 = vunpack.c.h.bf16 %v979_v63  ;;  %v7664_v14 = vunpack.c.h.bf16 %v980_v54  ;;  %v7682_v63 = vunpack.c.l.bf16 %v975_v13  ;;  %v7684_v54 = vunpack.c.l.bf16 %v976_v32 }
 0x1cf   : > { %2056 = vmatpush1.msra.mxu0 %v7626_v26  ;;  %2127 = vmatpush1.msra.mxu1 %v7628_v62  ;;  %11109 = vst [vmem:[#allocation175_spill] sm:$0xff] %v7654_v30  ;;  %11110 = vst [vmem:[#allocation176_spill] sm:$0xff] %v7656_v49  ;;  %v971_v62 = vld [vmem:[%s6834_s8 + $0xf0] sm:$0xff]  ;;  %v972_v26 = vld [vmem:[%s6834_s8 + $0xf8] sm:$0xff] }
 0x1d0   : > { %2057 = vmatprep.subr.mxu0 %v7634_v48  ;;  %2128 = vmatprep.subr.mxu1 %v7636_v24  ;;  %11111 = vst [vmem:[#allocation177_spill] sm:$0xff] %v7662_v40  ;;  %11112 = vst [vmem:[#allocation178_spill] sm:$0xff] %v7664_v14  ;;  %v7676_v24 = vunpack.c.h.bf16 %v975_v13  ;;  %v7678_v48 = vunpack.c.h.bf16 %v976_v32  ;;  %v7696_v13 = vunpack.c.l.bf16 %v971_v62  ;;  %v7698_v32 = vunpack.c.l.bf16 %v972_v26 }
 0x1d1   : > { %2058 = vmatpush1.msra.mxu0 %v7640_v6  ;;  %2129 = vmatpush1.msra.mxu1 %v7642_v60  ;;  %11113 = vst [vmem:[#allocation179_spill] sm:$0xff] %v7668_v38  ;;  %11114 = vst [vmem:[#allocation180_spill] sm:$0xff] %v7670_v10  ;;  %v967_v60 = vld [vmem:[%s6834_s8 + $0xd0] sm:$0xff]  ;;  %v968_v6 = vld [vmem:[%s6834_s8 + $0xd8] sm:$0xff] }
 0x1d2   : > { %2059 = vmatprep.subr.mxu0 %v7648_v22  ;;  %2130 = vmatprep.subr.mxu1 %v7650_v55  ;;  %11115 = vst [vmem:[#allocation181_spill] sm:$0xff] %v7676_v24  ;;  %11116 = vst [vmem:[#allocation182_spill] sm:$0xff] %v7678_v48  ;;  %v7690_v55 = vunpack.c.h.bf16 %v971_v62  ;;  %v7692_v22 = vunpack.c.h.bf16 %v972_v26  ;;  %v7710_v62 = vunpack.c.l.bf16 %v967_v60  ;;  %v7712_v26 = vunpack.c.l.bf16 %v968_v6 }
 0x1d3   : > { %2060 = vmatpush1.msra.mxu0 %v7654_v30  ;;  %2131 = vmatpush1.msra.mxu1 %v7656_v49  ;;  %11117 = vst [vmem:[#allocation183_spill] sm:$0xff] %v7682_v63  ;;  %11118 = vst [vmem:[#allocation184_spill] sm:$0xff] %v7684_v54  ;;  %v963_v49 = vld [vmem:[%s6834_s8 + $0xb0] sm:$0xff]  ;;  %v964_v30 = vld [vmem:[%s6834_s8 + $0xb8] sm:$0xff] }
 0x1d4   : > { %2061 = vmatprep.subr.mxu0 %v7662_v40  ;;  %2132 = vmatprep.subr.mxu1 %v7664_v14  ;;  %11119 = vst [vmem:[#allocation185_spill] sm:$0xff] %v7690_v55  ;;  %11120 = vst [vmem:[#allocation186_spill] sm:$0xff] %v7692_v22  ;;  %v7704_v14 = vunpack.c.h.bf16 %v967_v60  ;;  %v7706_v40 = vunpack.c.h.bf16 %v968_v6  ;;  %v7724_v60 = vunpack.c.l.bf16 %v963_v49  ;;  %v7726_v6 = vunpack.c.l.bf16 %v964_v30 }
 0x1d5   : > { %2062 = vmatpush1.msra.mxu0 %v7668_v38  ;;  %2133 = vmatpush1.msra.mxu1 %v7670_v10  ;;  %11121 = vst [vmem:[#allocation187_spill] sm:$0xff] %v7696_v13  ;;  %11122 = vst [vmem:[#allocation188_spill] sm:$0xff] %v7698_v32  ;;  %v959_v10 = vld [vmem:[%s6834_s8 + $0x90] sm:$0xff]  ;;  %v960_v38 = vld [vmem:[%s6834_s8 + $0x98] sm:$0xff] }
 0x1d6   : > { %2063 = vmatprep.subr.mxu0 %v7676_v24  ;;  %2134 = vmatprep.subr.mxu1 %v7678_v48  ;;  %11123 = vst [vmem:[#allocation189_spill] sm:$0xff] %v7704_v14  ;;  %11124 = vst [vmem:[#allocation190_spill] sm:$0xff] %v7706_v40  ;;  %v7718_v48 = vunpack.c.h.bf16 %v963_v49  ;;  %v7720_v24 = vunpack.c.h.bf16 %v964_v30  ;;  %v7738_v49 = vunpack.c.l.bf16 %v959_v10  ;;  %v7740_v30 = vunpack.c.l.bf16 %v960_v38 }
 0x1d7   : > { %2064 = vmatpush1.msra.mxu0 %v7682_v63  ;;  %2135 = vmatpush1.msra.mxu1 %v7684_v54  ;;  %11125 = vst [vmem:[#allocation191_spill] sm:$0xff] %v7710_v62  ;;  %11126 = vst [vmem:[#allocation192_spill] sm:$0xff] %v7712_v26  ;;  %v955_v54 = vld [vmem:[%s6834_s8 + $0x70] sm:$0xff]  ;;  %v956_v63 = vld [vmem:[%s6834_s8 + $0x78] sm:$0xff] }
 0x1d8   : > { %2065 = vmatprep.subr.mxu0 %v7690_v55  ;;  %2136 = vmatprep.subr.mxu1 %v7692_v22  ;;  %11127 = vst [vmem:[#allocation193_spill] sm:$0xff] %v7718_v48  ;;  %11128 = vst [vmem:[#allocation194_spill] sm:$0xff] %v7720_v24  ;;  %v7732_v22 = vunpack.c.h.bf16 %v959_v10  ;;  %v7734_v55 = vunpack.c.h.bf16 %v960_v38  ;;  %v7752_v10 = vunpack.c.l.bf16 %v955_v54  ;;  %v7754_v38 = vunpack.c.l.bf16 %v956_v63 }
 0x1d9   : > { %2066 = vmatpush1.msra.mxu0 %v7696_v13  ;;  %2137 = vmatpush1.msra.mxu1 %v7698_v32  ;;  %11129 = vst [vmem:[#allocation195_spill] sm:$0xff] %v7724_v60  ;;  %11130 = vst [vmem:[#allocation196_spill] sm:$0xff] %v7726_v6  ;;  %v951_v32 = vld [vmem:[%s6834_s8 + $0x50] sm:$0xff]  ;;  %v952_v13 = vld [vmem:[%s6834_s8 + $0x58] sm:$0xff] }
 0x1da   : > { %2067 = vmatprep.subr.mxu0 %v7704_v14  ;;  %2138 = vmatprep.subr.mxu1 %v7706_v40  ;;  %11131 = vst [vmem:[#allocation197_spill] sm:$0xff] %v7732_v22  ;;  %11132 = vst [vmem:[#allocation198_spill] sm:$0xff] %v7734_v55  ;;  %v7746_v40 = vunpack.c.h.bf16 %v955_v54  ;;  %v7748_v14 = vunpack.c.h.bf16 %v956_v63  ;;  %v7766_v54 = vunpack.c.l.bf16 %v951_v32  ;;  %v7768_v63 = vunpack.c.l.bf16 %v952_v13 }
 0x1db   : > { %2068 = vmatpush1.msra.mxu0 %v7710_v62  ;;  %2139 = vmatpush1.msra.mxu1 %v7712_v26  ;;  %11133 = vst [vmem:[#allocation199_spill] sm:$0xff] %v7738_v49  ;;  %11134 = vst [vmem:[#allocation200_spill] sm:$0xff] %v7740_v30  ;;  %v947_v26 = vld [vmem:[%s6834_s8 + $0x30] sm:$0xff]  ;;  %v948_v62 = vld [vmem:[%s6834_s8 + $0x38] sm:$0xff] }
 0x1dc   : > { %2069 = vmatprep.subr.mxu0 %v7718_v48  ;;  %2140 = vmatprep.subr.mxu1 %v7720_v24  ;;  %11135 = vst [vmem:[#allocation201_spill] sm:$0xff] %v7746_v40  ;;  %11136 = vst [vmem:[#allocation202_spill] sm:$0xff] %v7748_v14  ;;  %v7760_v24 = vunpack.c.h.bf16 %v951_v32  ;;  %v7762_v48 = vunpack.c.h.bf16 %v952_v13  ;;  %v7780_v32 = vunpack.c.l.bf16 %v947_v26  ;;  %v7782_v13 = vunpack.c.l.bf16 %v948_v62 }
 0x1dd   : > { %2070 = vmatpush1.msra.mxu0 %v7724_v60  ;;  %2141 = vmatpush1.msra.mxu1 %v7726_v6  ;;  %11137 = vst [vmem:[#allocation203_spill] sm:$0xff] %v7752_v10  ;;  %11138 = vst [vmem:[#allocation204_spill] sm:$0xff] %v7754_v38  ;;  %v943_v6 = vld [vmem:[%s6834_s8 + $0x10] sm:$0xff]  ;;  %v944_v60 = vld [vmem:[%s6834_s8 + $0x18] sm:$0xff] }
 0x1de   : > { %2071 = vmatprep.subr.mxu0 %v7732_v22  ;;  %2142 = vmatprep.subr.mxu1 %v7734_v55  ;;  %11139 = vst [vmem:[#allocation205_spill] sm:$0xff] %v7760_v24  ;;  %11140 = vst [vmem:[#allocation206_spill] sm:$0xff] %v7762_v48  ;;  %v7774_v55 = vunpack.c.h.bf16 %v947_v26  ;;  %v7776_v22 = vunpack.c.h.bf16 %v948_v62  ;;  %v7794_v26 = vunpack.c.l.bf16 %v943_v6  ;;  %v7796_v62 = vunpack.c.l.bf16 %v944_v60 }
 0x1df   : > { %2072 = vmatpush1.msra.mxu0 %v7738_v49  ;;  %2143 = vmatpush1.msra.mxu1 %v7740_v30  ;;  %11141 = vst [vmem:[#allocation207_spill] sm:$0xff] %v7766_v54  ;;  %11142 = vst [vmem:[#allocation208_spill] sm:$0xff] %v7768_v63  ;;  %v1067_v30 = vld [vmem:[%s6834_s8 + $0x3f0] sm:$0xff]  ;;  %v1068_v49 = vld [vmem:[%s6834_s8 + $0x3f8] sm:$0xff] }
 0x1e0   : > { %2073 = vmatprep.subr.mxu0 %v7746_v40  ;;  %2144 = vmatprep.subr.mxu1 %v7748_v14  ;;  %11143 = vst [vmem:[#allocation209_spill] sm:$0xff] %v7774_v55  ;;  %11144 = vst [vmem:[#allocation210_spill] sm:$0xff] %v7776_v22  ;;  %v7788_v14 = vunpack.c.h.bf16 %v943_v6  ;;  %v7790_v40 = vunpack.c.h.bf16 %v944_v60  ;;  %v7808_v6 = vunpack.c.l.bf16 %v1067_v30  ;;  %v7810_v60 = vunpack.c.l.bf16 %v1068_v49 }
 0x1e1   : > { %2074 = vmatpush1.msra.mxu0 %v7752_v10  ;;  %2145 = vmatpush1.msra.mxu1 %v7754_v38  ;;  %11145 = vst [vmem:[#allocation211_spill] sm:$0xff] %v7780_v32  ;;  %11146 = vst [vmem:[#allocation212_spill] sm:$0xff] %v7782_v13  ;;  %v1063_v38 = vld [vmem:[%s6834_s8 + $0x3d0] sm:$0xff]  ;;  %v1064_v10 = vld [vmem:[%s6834_s8 + $0x3d8] sm:$0xff] }
 0x1e2   : > { %2075 = vmatprep.subr.mxu0 %v7760_v24  ;;  %2146 = vmatprep.subr.mxu1 %v7762_v48  ;;  %11147 = vst [vmem:[#allocation213_spill] sm:$0xff] %v7788_v14  ;;  %11148 = vst [vmem:[#allocation214_spill] sm:$0xff] %v7790_v40  ;;  %v7802_v48 = vunpack.c.h.bf16 %v1067_v30  ;;  %v7804_v24 = vunpack.c.h.bf16 %v1068_v49  ;;  %v7822_v30 = vunpack.c.l.bf16 %v1063_v38  ;;  %v7824_v49 = vunpack.c.l.bf16 %v1064_v10 }
 0x1e3   : > { %2076 = vmatpush1.msra.mxu0 %v7766_v54  ;;  %2147 = vmatpush1.msra.mxu1 %v7768_v63  ;;  %11149 = vst [vmem:[#allocation215_spill] sm:$0xff] %v7794_v26  ;;  %11150 = vst [vmem:[#allocation216_spill] sm:$0xff] %v7796_v62  ;;  %v1059_v63 = vld [vmem:[%s6834_s8 + $0x3b0] sm:$0xff]  ;;  %v1060_v54 = vld [vmem:[%s6834_s8 + $0x3b8] sm:$0xff] }
 0x1e4   : > { %2077 = vmatprep.subr.mxu0 %v7774_v55  ;;  %2148 = vmatprep.subr.mxu1 %v7776_v22  ;;  %11151 = vst [vmem:[#allocation217_spill] sm:$0xff] %v7802_v48  ;;  %11152 = vst [vmem:[#allocation218_spill] sm:$0xff] %v7804_v24  ;;  %v7816_v22 = vunpack.c.h.bf16 %v1063_v38  ;;  %v7818_v55 = vunpack.c.h.bf16 %v1064_v10  ;;  %v7836_v38 = vunpack.c.l.bf16 %v1059_v63  ;;  %v7838_v10 = vunpack.c.l.bf16 %v1060_v54 }
 0x1e5   : > { %2078 = vmatpush1.msra.mxu0 %v7780_v32  ;;  %2149 = vmatpush1.msra.mxu1 %v7782_v13  ;;  %11153 = vst [vmem:[#allocation219_spill] sm:$0xff] %v7808_v6  ;;  %11154 = vst [vmem:[#allocation220_spill] sm:$0xff] %v7810_v60  ;;  %v1055_v13 = vld [vmem:[%s6834_s8 + $0x390] sm:$0xff]  ;;  %v1056_v32 = vld [vmem:[%s6834_s8 + $0x398] sm:$0xff] }
 0x1e6   : > { %2079 = vmatprep.subr.mxu0 %v7788_v14  ;;  %2150 = vmatprep.subr.mxu1 %v7790_v40  ;;  %11155 = vst [vmem:[#allocation221_spill] sm:$0xff] %v7816_v22  ;;  %11156 = vst [vmem:[#allocation222_spill] sm:$0xff] %v7818_v55  ;;  %v7830_v40 = vunpack.c.h.bf16 %v1059_v63  ;;  %v7832_v14 = vunpack.c.h.bf16 %v1060_v54  ;;  %v7850_v63 = vunpack.c.l.bf16 %v1055_v13  ;;  %v7852_v54 = vunpack.c.l.bf16 %v1056_v32 }
 0x1e7   : > { %2080 = vmatpush1.msra.mxu0 %v7794_v26  ;;  %2151 = vmatpush1.msra.mxu1 %v7796_v62  ;;  %11157 = vst [vmem:[#allocation223_spill] sm:$0xff] %v7822_v30  ;;  %11158 = vst [vmem:[#allocation224_spill] sm:$0xff] %v7824_v49  ;;  %v1051_v62 = vld [vmem:[%s6834_s8 + $0x370] sm:$0xff]  ;;  %v1052_v26 = vld [vmem:[%s6834_s8 + $0x378] sm:$0xff] }
 0x1e8   : > { %2081 = vmatprep.subr.mxu0 %v7802_v48  ;;  %2152 = vmatprep.subr.mxu1 %v7804_v24  ;;  %11159 = vst [vmem:[#allocation225_spill] sm:$0xff] %v7830_v40  ;;  %11160 = vst [vmem:[#allocation226_spill] sm:$0xff] %v7832_v14  ;;  %v7844_v24 = vunpack.c.h.bf16 %v1055_v13  ;;  %v7846_v48 = vunpack.c.h.bf16 %v1056_v32  ;;  %v7864_v13 = vunpack.c.l.bf16 %v1051_v62  ;;  %v7866_v32 = vunpack.c.l.bf16 %v1052_v26 }
 0x1e9   : > { %2082 = vmatpush2.msra.mxu0 %v7808_v6  ;;  %2153 = vmatpush2.msra.mxu1 %v7810_v60  ;;  %11161 = vst [vmem:[#allocation227_spill] sm:$0xff] %v7836_v38  ;;  %11162 = vst [vmem:[#allocation228_spill] sm:$0xff] %v7838_v10  ;;  %v1047_v60 = vld [vmem:[%s6834_s8 + $0x350] sm:$0xff]  ;;  %v1048_v6 = vld [vmem:[%s6834_s8 + $0x358] sm:$0xff] }
 0x1ea   : > { %2083 = vmatprep.subr.mxu0 %v7816_v22  ;;  %2154 = vmatprep.subr.mxu1 %v7818_v55  ;;  %11163 = vst [vmem:[#allocation229_spill] sm:$0xff] %v7844_v24  ;;  %11164 = vst [vmem:[#allocation230_spill] sm:$0xff] %v7846_v48  ;;  %v7858_v55 = vunpack.c.h.bf16 %v1051_v62  ;;  %v7860_v22 = vunpack.c.h.bf16 %v1052_v26  ;;  %v7878_v62 = vunpack.c.l.bf16 %v1047_v60  ;;  %v7880_v26 = vunpack.c.l.bf16 %v1048_v6 }
 0x1eb   : > { %2084 = vmatpush2.msra.mxu0 %v7822_v30  ;;  %2155 = vmatpush2.msra.mxu1 %v7824_v49  ;;  %11165 = vst [vmem:[#allocation231_spill] sm:$0xff] %v7850_v63  ;;  %11166 = vst [vmem:[#allocation232_spill] sm:$0xff] %v7852_v54  ;;  %v1043_v49 = vld [vmem:[%s6834_s8 + $0x330] sm:$0xff]  ;;  %v1044_v30 = vld [vmem:[%s6834_s8 + $0x338] sm:$0xff] }
 0x1ec   : > { %2085 = vmatprep.subr.mxu0 %v7830_v40  ;;  %2156 = vmatprep.subr.mxu1 %v7832_v14  ;;  %11167 = vst [vmem:[#allocation233_spill] sm:$0xff] %v7858_v55  ;;  %11168 = vst [vmem:[#allocation234_spill] sm:$0xff] %v7860_v22  ;;  %v7872_v14 = vunpack.c.h.bf16 %v1047_v60  ;;  %v7874_v40 = vunpack.c.h.bf16 %v1048_v6  ;;  %v7892_v60 = vunpack.c.l.bf16 %v1043_v49  ;;  %v7894_v6 = vunpack.c.l.bf16 %v1044_v30 }
 0x1ed   : > { %2086 = vmatpush2.msra.mxu0 %v7836_v38  ;;  %2157 = vmatpush2.msra.mxu1 %v7838_v10  ;;  %11169 = vst [vmem:[#allocation235_spill] sm:$0xff] %v7864_v13  ;;  %11170 = vst [vmem:[#allocation236_spill] sm:$0xff] %v7866_v32  ;;  %v1039_v10 = vld [vmem:[%s6834_s8 + $0x310] sm:$0xff]  ;;  %v1040_v38 = vld [vmem:[%s6834_s8 + $0x318] sm:$0xff] }
 0x1ee   : > { %2087 = vmatprep.subr.mxu0 %v7844_v24  ;;  %2158 = vmatprep.subr.mxu1 %v7846_v48  ;;  %11171 = vst [vmem:[#allocation237_spill] sm:$0xff] %v7872_v14  ;;  %11172 = vst [vmem:[#allocation238_spill] sm:$0xff] %v7874_v40  ;;  %v7886_v48 = vunpack.c.h.bf16 %v1043_v49  ;;  %v7888_v24 = vunpack.c.h.bf16 %v1044_v30  ;;  %v7906_v49 = vunpack.c.l.bf16 %v1039_v10  ;;  %v7908_v30 = vunpack.c.l.bf16 %v1040_v38 }
 0x1ef   : > { %2088 = vmatpush2.msra.mxu0 %v7850_v63  ;;  %2159 = vmatpush2.msra.mxu1 %v7852_v54  ;;  %11173 = vst [vmem:[#allocation239_spill] sm:$0xff] %v7878_v62  ;;  %11174 = vst [vmem:[#allocation240_spill] sm:$0xff] %v7880_v26  ;;  %v1035_v54 = vld [vmem:[%s6834_s8 + $0x2f0] sm:$0xff]  ;;  %v1036_v63 = vld [vmem:[%s6834_s8 + $0x2f8] sm:$0xff] }
 0x1f0   : > { %2089 = vmatprep.subr.mxu0 %v7858_v55  ;;  %2160 = vmatprep.subr.mxu1 %v7860_v22  ;;  %11175 = vst [vmem:[#allocation241_spill] sm:$0xff] %v7886_v48  ;;  %11176 = vst [vmem:[#allocation242_spill] sm:$0xff] %v7888_v24  ;;  %v7900_v22 = vunpack.c.h.bf16 %v1039_v10  ;;  %v7902_v55 = vunpack.c.h.bf16 %v1040_v38  ;;  %v7920_v10 = vunpack.c.l.bf16 %v1035_v54  ;;  %v7922_v38 = vunpack.c.l.bf16 %v1036_v63 }
 0x1f1   : > { %2090 = vmatpush2.msra.mxu0 %v7864_v13  ;;  %2161 = vmatpush2.msra.mxu1 %v7866_v32  ;;  %11177 = vst [vmem:[#allocation243_spill] sm:$0xff] %v7892_v60  ;;  %11178 = vst [vmem:[#allocation244_spill] sm:$0xff] %v7894_v6  ;;  %v1031_v32 = vld [vmem:[%s6834_s8 + $0x2d0] sm:$0xff]  ;;  %v1032_v13 = vld [vmem:[%s6834_s8 + $0x2d8] sm:$0xff] }
 0x1f2   : > { %2091 = vmatprep.subr.mxu0 %v7872_v14  ;;  %2162 = vmatprep.subr.mxu1 %v7874_v40  ;;  %11179 = vst [vmem:[#allocation245_spill] sm:$0xff] %v7900_v22  ;;  %11180 = vst [vmem:[#allocation246_spill] sm:$0xff] %v7902_v55  ;;  %v7914_v40 = vunpack.c.h.bf16 %v1035_v54  ;;  %v7916_v14 = vunpack.c.h.bf16 %v1036_v63  ;;  %v7934_v54 = vunpack.c.l.bf16 %v1031_v32  ;;  %v7936_v63 = vunpack.c.l.bf16 %v1032_v13 }
 0x1f3   : > { %2092 = vmatpush2.msra.mxu0 %v7878_v62  ;;  %2163 = vmatpush2.msra.mxu1 %v7880_v26  ;;  %11181 = vst [vmem:[#allocation247_spill] sm:$0xff] %v7906_v49  ;;  %11182 = vst [vmem:[#allocation248_spill] sm:$0xff] %v7908_v30  ;;  %v1027_v26 = vld [vmem:[%s6834_s8 + $0x2b0] sm:$0xff]  ;;  %v1028_v62 = vld [vmem:[%s6834_s8 + $0x2b8] sm:$0xff] }
 0x1f4   : > { %2093 = vmatprep.subr.mxu0 %v7886_v48  ;;  %2164 = vmatprep.subr.mxu1 %v7888_v24  ;;  %11183 = vst [vmem:[#allocation249_spill] sm:$0xff] %v7914_v40  ;;  %11184 = vst [vmem:[#allocation250_spill] sm:$0xff] %v7916_v14  ;;  %v7928_v24 = vunpack.c.h.bf16 %v1031_v32  ;;  %v7930_v48 = vunpack.c.h.bf16 %v1032_v13  ;;  %v7948_v32 = vunpack.c.l.bf16 %v1027_v26  ;;  %v7950_v13 = vunpack.c.l.bf16 %v1028_v62 }
 0x1f5   : > { %2094 = vmatpush2.msra.mxu0 %v7892_v60  ;;  %2165 = vmatpush2.msra.mxu1 %v7894_v6  ;;  %11185 = vst [vmem:[#allocation251_spill] sm:$0xff] %v7920_v10  ;;  %11186 = vst [vmem:[#allocation252_spill] sm:$0xff] %v7922_v38  ;;  %v1023_v6 = vld [vmem:[%s6834_s8 + $0x290] sm:$0xff]  ;;  %v1024_v60 = vld [vmem:[%s6834_s8 + $0x298] sm:$0xff] }
 0x1f6   : > { %2095 = vmatprep.subr.mxu0 %v7900_v22  ;;  %2166 = vmatprep.subr.mxu1 %v7902_v55  ;;  %11187 = vst [vmem:[#allocation253_spill] sm:$0xff] %v7928_v24  ;;  %11188 = vst [vmem:[#allocation254_spill] sm:$0xff] %v7930_v48  ;;  %v7942_v55 = vunpack.c.h.bf16 %v1027_v26  ;;  %v7944_v22 = vunpack.c.h.bf16 %v1028_v62  ;;  %v7962_v26 = vunpack.c.l.bf16 %v1023_v6  ;;  %v7964_v62 = vunpack.c.l.bf16 %v1024_v60 }
 0x1f7   : > { %2096 = vmatpush2.msra.mxu0 %v7906_v49  ;;  %2167 = vmatpush2.msra.mxu1 %v7908_v30  ;;  %11189 = vst [vmem:[#allocation255_spill] sm:$0xff] %v7934_v54  ;;  %11190 = vst [vmem:[#allocation256_spill] sm:$0xff] %v7936_v63  ;;  %v1019_v30 = vld [vmem:[%s6834_s8 + $0x270] sm:$0xff]  ;;  %v1020_v49 = vld [vmem:[%s6834_s8 + $0x278] sm:$0xff] }
 0x1f8   : > { %2097 = vmatprep.subr.mxu0 %v7914_v40  ;;  %2168 = vmatprep.subr.mxu1 %v7916_v14  ;;  %11191 = vst [vmem:[#allocation257_spill] sm:$0xff] %v7942_v55  ;;  %11192 = vst [vmem:[#allocation258_spill] sm:$0xff] %v7944_v22  ;;  %v7956_v14 = vunpack.c.h.bf16 %v1023_v6  ;;  %v7958_v40 = vunpack.c.h.bf16 %v1024_v60  ;;  %v7976_v6 = vunpack.c.l.bf16 %v1019_v30  ;;  %v7978_v60 = vunpack.c.l.bf16 %v1020_v49 }
 0x1f9   : > { %2098 = vmatpush2.msra.mxu0 %v7920_v10  ;;  %2169 = vmatpush2.msra.mxu1 %v7922_v38  ;;  %11193 = vst [vmem:[#allocation259_spill] sm:$0xff] %v7948_v32  ;;  %11194 = vst [vmem:[#allocation260_spill] sm:$0xff] %v7950_v13  ;;  %v1015_v38 = vld [vmem:[%s6834_s8 + $0x250] sm:$0xff]  ;;  %v1016_v10 = vld [vmem:[%s6834_s8 + $0x258] sm:$0xff] }
 0x1fa   : > { %2099 = vmatprep.subr.mxu0 %v7928_v24  ;;  %2170 = vmatprep.subr.mxu1 %v7930_v48  ;;  %11195 = vst [vmem:[#allocation261_spill] sm:$0xff] %v7956_v14  ;;  %11196 = vst [vmem:[#allocation262_spill] sm:$0xff] %v7958_v40  ;;  %v7970_v48 = vunpack.c.h.bf16 %v1019_v30  ;;  %v7972_v24 = vunpack.c.h.bf16 %v1020_v49  ;;  %v7992_v30 = vunpack.c.l.bf16 %v1016_v10  ;;  %v1007_v49 = vld [vmem:[%s6834_s8 + $0x210] sm:$0xff] }
 0x1fb   : > { %2100 = vmatpush2.msra.mxu0 %v7934_v54  ;;  %2171 = vmatpush2.msra.mxu1 %v7936_v63  ;;  %11197 = vst [vmem:[#allocation263_spill] sm:$0xff] %v7962_v26  ;;  %11198 = vst [vmem:[#allocation264_spill] sm:$0xff] %v7964_v62  ;;  %v1011_v63 = vld [vmem:[%s6834_s8 + $0x230] sm:$0xff]  ;;  %v1012_v54 = vld [vmem:[%s6834_s8 + $0x238] sm:$0xff] }
 0x1fc   : > { %2101 = vmatprep.subr.mxu0 %v7942_v55  ;;  %2172 = vmatprep.subr.mxu1 %v7944_v22  ;;  %11199 = vst [vmem:[#allocation265_spill] sm:$0xff] %v7970_v48  ;;  %11200 = vst [vmem:[#allocation266_spill] sm:$0xff] %v7972_v24  ;;  %v7984_v22 = vunpack.c.h.bf16 %v1015_v38  ;;  %v7986_v55 = vunpack.c.h.bf16 %v1016_v10  ;;  %v8010_v10 = vunpack.c.h.bf16 %v1007_v49 }
 0x1fd   : > { %2102 = vmatpush2.msra.mxu0 %v7948_v32  ;;  %2173 = vmatpush2.msra.mxu1 %v7950_v13  ;;  %11201 = vst [vmem:[#allocation267_spill] sm:$0xff] %v7976_v6  ;;  %11202 = vst [vmem:[#allocation268_spill] sm:$0xff] %v7978_v60  ;;  %v7990_v32 = vunpack.c.l.bf16 %v1015_v38  ;;  %v1008_v13 = vld [vmem:[%s6834_s8 + $0x218] sm:$0xff]  ;;  %v8006_v38 = vunpack.c.l.bf16 %v1012_v54 }
 0x1fe   : > { %2103 = vmatprep.subr.mxu0 %v7956_v14  ;;  %2174 = vmatprep.subr.mxu1 %v7958_v40  ;;  %11203 = vst [vmem:[#allocation269_spill] sm:$0xff] %v7984_v22  ;;  %11204 = vst [vmem:[#allocation270_spill] sm:$0xff] %v7986_v55  ;;  %v7998_v14 = vunpack.c.h.bf16 %v1011_v63  ;;  %v8000_v40 = vunpack.c.h.bf16 %v1012_v54  ;;  %v8020_v54 = vunpack.c.l.bf16 %v1008_v13 }
 0x1ff   : > { %2104 = vmatpush2.msra.mxu0 %v7962_v26  ;;  %2175 = vmatpush2.msra.mxu1 %v7964_v62  ;;  %11205 = vst [vmem:[#allocation271_spill] sm:$0xff] %v7990_v32  ;;  %11206 = vst [vmem:[#allocation272_spill] sm:$0xff] %v7992_v30  ;;  %v8004_v26 = vunpack.c.l.bf16 %v1011_v63  ;;  %v11215_v63 = vmov 0.0  }
 0x200   : > { %2105 = vmatprep.subr.mxu0 %v7970_v48  ;;  %2176 = vmatprep.subr.mxu1 %v7972_v24  ;;  %11207 = vst [vmem:[#allocation273_spill] sm:$0xff] %v7998_v14  ;;  %11208 = vst [vmem:[#allocation274_spill] sm:$0xff] %v8000_v40  ;;  %v8012_v48 = vunpack.c.h.bf16 %v1008_v13  ;;  %v8016_v24 = vunpack.c.l.bf16 %v1007_v49  ;;  %v11216_v13 = vld [vmem:[#allocation57_spill] sm:$0xff]  ;;  %v11217_v49 = vld [vmem:[#allocation58_spill] sm:$0xff] }
 0x201   : > { %2106 = vmatpush2.msra.mxu0 %v7976_v6  ;;  %2177 = vmatpush2.msra.mxu1 %v7978_v60  ;;  %11209 = vst [vmem:[#allocation275_spill] sm:$0xff] %v8004_v26  ;;  %11210 = vst [vmem:[#allocation276_spill] sm:$0xff] %v8006_v38 }
 0x202   : > { %2107 = vmatprep.subr.mxu0 %v7984_v22  ;;  %2178 = vmatprep.subr.mxu1 %v7986_v55  ;;  %11211 = vst [vmem:[#allocation277_spill] sm:$0xff] %v8010_v10  ;;  %11212 = vst [vmem:[#allocation278_spill] sm:$0xff] %v8012_v48 }
 0x203   : > { %2108 = vmatpush2.msra.mxu0 %v7990_v32  ;;  %2179 = vmatpush2.msra.mxu1 %v7992_v30  ;;  %11213 = vst [vmem:[#allocation279_spill] sm:$0xff] %v8016_v24  ;;  %11214 = vst [vmem:[#allocation280_spill] sm:$0xff] %v8020_v54 }
 0x204   : > { %2109 = vmatprep.subr.mxu0 %v7998_v14  ;;  %2180 = vmatprep.subr.mxu1 %v8000_v40 }
 0x205   : > { %2110 = vmatpush2.msra.mxu0 %v8004_v26  ;;  %2181 = vmatpush2.msra.mxu1 %v8006_v38 }
 0x206   : > { %2111 = vmatprep.subr.mxu0 %v8010_v10  ;;  %2182 = vmatprep.subr.mxu1 %v8012_v48 }
 0x207   : > { %2112 = vmatpush2.msra.mxu0 %v8016_v24  ;;  %2113 = vmatprep.mubr.f32.mxu0 %v11215_v63 }
 0x208   : > { %2183 = vmatpush2.msra.mxu1 %v8020_v54  ;;  %2184 = vmatprep.mubr.f32.mxu1 %v11215_v63 }
 0x209   : > { %2114 = vmatmul.mubr.f32.vlgmr.msra.gmra.mxu0 %v11215_v63  ;;  %2185 = vmatmul.mubr.f32.vlgmr.msra.gmra.mxu1 %v11215_v63  ;;  %v11218_v63 = vld [vmem:[#allocation59_spill] sm:$0xff] }
 0x20a   : > { %2257 = vmatprep.subr.mxu0 %v7100_v50  ;;  %2328 = vmatprep.subr.mxu1 %v7102_v51 }
 0x20b   : > { %2258 = vmatpush1.msra.mxu0 %v7105_v52  ;;  %2329 = vmatpush1.msra.mxu1 %v7107_v53 }
 0x20c   : > { %2259 = vmatprep.subr.mxu0 %v7112_v57  ;;  %2330 = vmatprep.subr.mxu1 %v7114_v58 }
 0x20d   : > { %2260 = vmatpush1.msra.mxu0 %v7118_v59  ;;  %2331 = vmatpush1.msra.mxu1 %v7120_v61 }
 0x20e   : > { %2261 = vmatprep.subr.mxu0 %v7126_v17  ;;  %2332 = vmatprep.subr.mxu1 %v7128_v1 }
 0x20f   : > { %2262 = vmatpush1.msra.mxu0 %v7132_v21  ;;  %2333 = vmatpush1.msra.mxu1 %v7134_v2 }
 0x210   : > { %2263 = vmatprep.subr.mxu0 %v7140_v7  ;;  %2334 = vmatprep.subr.mxu1 %v7142_v8 }
 0x211   : > { %2264 = vmatpush1.msra.mxu0 %v7146_v9  ;;  %2335 = vmatpush1.msra.mxu1 %v7148_v11 }
 0x212   : > { %2265 = vmatprep.subr.mxu0 %v7154_v15  ;;  %2336 = vmatprep.subr.mxu1 %v7156_v16 }
 0x213   : > { %2266 = vmatpush1.msra.mxu0 %v7160_v19  ;;  %2337 = vmatpush1.msra.mxu1 %v7162_v20 }
 0x214   : > { %2267 = vmatprep.subr.mxu0 %v7168_v25  ;;  %2338 = vmatprep.subr.mxu1 %v7170_v27 }
 0x215   : > { %2268 = vmatpush1.msra.mxu0 %v7174_v28  ;;  %2339 = vmatpush1.msra.mxu1 %v7176_v29 }
 0x216   : > { %2269 = vmatprep.subr.mxu0 %v7182_v34  ;;  %2340 = vmatprep.subr.mxu1 %v7184_v35  ;;  %v11219_v34 = vld [vmem:[#allocation60_spill] sm:$0xff]  ;;  %v11220_v35 = vld [vmem:[#allocation61_spill] sm:$0xff] }
 0x217   : > { %2270 = vmatpush1.msra.mxu0 %v7188_v36  ;;  %2341 = vmatpush1.msra.mxu1 %v7190_v37  ;;  %v11221_v36 = vld [vmem:[#allocation62_spill] sm:$0xff]  ;;  %v11222_v37 = vld [vmem:[#allocation63_spill] sm:$0xff] }
 0x218   : > { %2271 = vmatprep.subr.mxu0 %v7196_v41  ;;  %2342 = vmatprep.subr.mxu1 %v7198_v42  ;;  %v11223_v41 = vld [vmem:[#allocation64_spill] sm:$0xff]  ;;  %v11224_v42 = vld [vmem:[#allocation65_spill] sm:$0xff] }
 0x219   : > { %2272 = vmatpush1.msra.mxu0 %v7202_v43  ;;  %2343 = vmatpush1.msra.mxu1 %v7204_v44  ;;  %v11225_v43 = vld [vmem:[#allocation66_spill] sm:$0xff]  ;;  %v11226_v44 = vld [vmem:[#allocation67_spill] sm:$0xff] }
 0x21a   : > { %2273 = vmatprep.subr.mxu0 %v11216_v13  ;;  %2344 = vmatprep.subr.mxu1 %v11217_v49  ;;  %v11227_v13 = vld [vmem:[#allocation68_spill] sm:$0xff]  ;;  %v11228_v49 = vld [vmem:[#allocation69_spill] sm:$0xff] }
 0x21b   : > { %2274 = vmatpush1.msra.mxu0 %v11218_v63  ;;  %2345 = vmatpush1.msra.mxu1 %v11219_v34  ;;  %v11229_v63 = vld [vmem:[#allocation70_spill] sm:$0xff]  ;;  %v11230_v34 = vld [vmem:[#allocation71_spill] sm:$0xff] }
 0x21c   : > { %2275 = vmatprep.subr.mxu0 %v11220_v35  ;;  %2346 = vmatprep.subr.mxu1 %v11221_v36  ;;  %v11231_v35 = vld [vmem:[#allocation72_spill] sm:$0xff]  ;;  %v11232_v36 = vld [vmem:[#allocation73_spill] sm:$0xff] }
 0x21d   : > { %2276 = vmatpush1.msra.mxu0 %v11222_v37  ;;  %2347 = vmatpush1.msra.mxu1 %v11223_v41  ;;  %v11233_v37 = vld [vmem:[#allocation74_spill] sm:$0xff]  ;;  %v11234_v41 = vld [vmem:[#allocation75_spill] sm:$0xff] }
 0x21e   : > { %2277 = vmatprep.subr.mxu0 %v11224_v42  ;;  %2348 = vmatprep.subr.mxu1 %v11225_v43  ;;  %v11235_v42 = vld [vmem:[#allocation76_spill] sm:$0xff]  ;;  %v11236_v43 = vld [vmem:[#allocation77_spill] sm:$0xff] }
 0x21f   : > { %2278 = vmatpush1.msra.mxu0 %v11226_v44  ;;  %2349 = vmatpush1.msra.mxu1 %v11227_v13  ;;  %v11237_v44 = vld [vmem:[#allocation78_spill] sm:$0xff] }
 0x220   : > { %2279 = vmatprep.subr.mxu0 %v11228_v49  ;;  %2350 = vmatprep.subr.mxu1 %v11229_v63  ;;  %v11238_v63 = vld [vmem:[#allocation81_spill] sm:$0xff] }
 0x221   : > { %2280 = vmatpush1.msra.mxu0 %v11230_v34  ;;  %2351 = vmatpush1.msra.mxu1 %v11231_v35  ;;  %v11239_v34 = vld [vmem:[#allocation82_spill] sm:$0xff]  ;;  %v11240_v35 = vld [vmem:[#allocation83_spill] sm:$0xff] }
 0x222   : > { %2281 = vmatprep.subr.mxu0 %v11232_v36  ;;  %2352 = vmatprep.subr.mxu1 %v11233_v37  ;;  %v11241_v36 = vld [vmem:[#allocation84_spill] sm:$0xff] }
 0x223   : > { %2282 = vmatpush1.msra.mxu0 %v11234_v41  ;;  %2353 = vmatpush1.msra.mxu1 %v11235_v42  ;;  %v11242_v42 = vld [vmem:[#allocation87_spill] sm:$0xff] }
 0x224   : > { %2283 = vmatprep.subr.mxu0 %v11236_v43  ;;  %2354 = vmatprep.subr.mxu1 %v11237_v44  ;;  %v11243_v43 = vld [vmem:[#allocation88_spill] sm:$0xff]  ;;  %v11244_v44 = vld [vmem:[#allocation89_spill] sm:$0xff] }
 0x225   : > { %2284 = vmatpush1.msra.mxu0 %v7286_v45  ;;  %2355 = vmatpush1.msra.mxu1 %v7288_v46  ;;  %v11245_v45 = vld [vmem:[#allocation90_spill] sm:$0xff] }
 0x226   : > { %2285 = vmatprep.subr.mxu0 %v11238_v63  ;;  %2356 = vmatprep.subr.mxu1 %v11239_v34  ;;  %v11246_v63 = vld [vmem:[#allocation92_spill] sm:$0xff]  ;;  %v8100_v34 = vpop.f32.mrf.mxu0 }
 0x227   : > { %2286 = vmatpush1.msra.mxu0 %v11240_v35  ;;  %2357 = vmatpush1.msra.mxu1 %v11241_v36  ;;  %v11247_v35 = vld [vmem:[#allocation93_spill] sm:$0xff]  ;;  %v11248_v36 = vld [vmem:[#allocation94_spill] sm:$0xff] }
 0x228   : > { %2287 = vmatprep.subr.mxu0 %v7308_v4  ;;  %2358 = vmatprep.subr.mxu1 %v7310_v5  ;;  %v11249_v5 = vld [vmem:[#allocation96_spill] sm:$0xff] }
 0x229   : > { %2288 = vmatpush1.msra.mxu0 %v11242_v42  ;;  %2359 = vmatpush1.msra.mxu1 %v11243_v43  ;;  %v8106_v42 = vpop.f32.mrf.mxu1  ;;  %v11250_v43 = vld [vmem:[#allocation97_spill] sm:$0xff] }
 0x22a   : > { %2289 = vmatprep.subr.mxu0 %v11244_v44  ;;  %2360 = vmatprep.subr.mxu1 %v11245_v45  ;;  %v11251_v44 = vld [vmem:[#allocation98_spill] sm:$0xff]  ;;  %v11253_v45 = vld [vmem:[#allocation101_spill] sm:$0xff] }
 0x22b   : > { %2290 = vmatpush2.msra.mxu0 %v7328_v39  ;;  %2361 = vmatpush2.msra.mxu1 %v11246_v63  ;;  %v11252_v39 = vld [vmem:[#allocation100_spill] sm:$0xff]  ;;  %v8112_v63 = vpop.f32.mrf.mxu0 }
 0x22c   : > { %2291 = vmatprep.subr.mxu0 %v11247_v35  ;;  %2362 = vmatprep.subr.mxu1 %v11248_v36  ;;  %v11254_v35 = vld [vmem:[#allocation102_spill] sm:$0xff] }
 0x22d   : > { %2292 = vmatpush2.msra.mxu0 %v7346_v0  ;;  %2363 = vmatpush2.msra.mxu1 %v11249_v5  ;;  %v11255_v0 = vld [vmem:[#allocation104_spill] sm:$0xff]  ;;  %v8118_v5 = vpop.f32.mrf.mxu1  ;;  %v8120_v36 = vpop.f32.mrf.mxu0 }
 0x22e   : > { %2293 = vmatprep.subr.mxu0 %v11250_v43  ;;  %2364 = vmatprep.subr.mxu1 %v11251_v44  ;;  %11256 = vst [vmem:[#allocation281_spill] sm:$0xff] %v8120_v36  ;;  %v11257_v43 = vld [vmem:[#allocation105_spill] sm:$0xff]  ;;  %v11258_v44 = vld [vmem:[#allocation106_spill] sm:$0xff] }
 0x22f   : > { %2294 = vmatpush2.msra.mxu0 %v7360_v31  ;;  %2365 = vmatpush2.msra.mxu1 %v11252_v39  ;;  %v11259_v39 = vld [vmem:[#allocation108_spill] sm:$0xff]  ;;  %v8126_v31 = vpop.f32.mrf.mxu1  ;;  %v11265_v36 = vld [vmem:[#allocation113_spill] sm:$0xff] }
 0x230   : > { %2295 = vmatprep.subr.mxu0 %v11253_v45  ;;  %2366 = vmatprep.subr.mxu1 %v11254_v35  ;;  %11260 = vst [vmem:[#allocation282_spill] sm:$0xff] %v8126_v31  ;;  %v11261_v45 = vld [vmem:[#allocation109_spill] sm:$0xff]  ;;  %v11262_v35 = vld [vmem:[#allocation110_spill] sm:$0xff] }
 0x231   : > { %2296 = vmatpush2.msra.mxu0 %v7378_v3  ;;  %2367 = vmatpush2.msra.mxu1 %v11255_v0  ;;  %v11263_v0 = vld [vmem:[#allocation112_spill] sm:$0xff]  ;;  %v8132_v3 = vpop.f32.mrf.mxu0  ;;  %v11269_v31 = vld [vmem:[#allocation117_spill] sm:$0xff] }
 0x232   : > { %2297 = vmatprep.subr.mxu0 %v11257_v43  ;;  %2368 = vmatprep.subr.mxu1 %v11258_v44  ;;  %11264 = vst [vmem:[#allocation283_spill] sm:$0xff] %v8132_v3  ;;  %v11266_v43 = vld [vmem:[#allocation114_spill] sm:$0xff]  ;;  %v11273_v3 = vld [vmem:[#allocation121_spill] sm:$0xff] }
 0x233   : > { %2298 = vmatpush2.msra.mxu0 %v7392_v12  ;;  %2369 = vmatpush2.msra.mxu1 %v11259_v39  ;;  %v11267_v12 = vld [vmem:[#allocation116_spill] sm:$0xff]  ;;  %v8138_v39 = vpop.f32.mrf.mxu1 }
 0x234   : > { %2299 = vmatprep.subr.mxu0 %v11261_v45  ;;  %2370 = vmatprep.subr.mxu1 %v11262_v35  ;;  %11268 = vst [vmem:[#allocation284_spill] sm:$0xff] %v8138_v39  ;;  %v11270_v45 = vld [vmem:[#allocation118_spill] sm:$0xff]  ;;  %v11277_v39 = vld [vmem:[#allocation125_spill] sm:$0xff] }
 0x235   : > { %2300 = vmatpush2.msra.mxu0 %v7410_v18  ;;  %2371 = vmatpush2.msra.mxu1 %v11263_v0  ;;  %v11271_v18 = vld [vmem:[#allocation120_spill] sm:$0xff]  ;;  %v8144_v0 = vpop.f32.mrf.mxu0 }
 0x236   : > { %2301 = vmatprep.subr.mxu0 %v11265_v36  ;;  %2372 = vmatprep.subr.mxu1 %v11266_v43  ;;  %11272 = vst [vmem:[#allocation285_spill] sm:$0xff] %v8144_v0  ;;  %v11274_v36 = vld [vmem:[#allocation122_spill] sm:$0xff]  ;;  %v11281_v0 = vld [vmem:[#allocation129_spill] sm:$0xff] }
 0x237   : > { %2302 = vmatpush2.msra.mxu0 %v7424_v23  ;;  %2373 = vmatpush2.msra.mxu1 %v11267_v12  ;;  %v11275_v23 = vld [vmem:[#allocation124_spill] sm:$0xff]  ;;  %v8150_v12 = vpop.f32.mrf.mxu1 }
 0x238   : > { %2303 = vmatprep.subr.mxu0 %v11269_v31  ;;  %2374 = vmatprep.subr.mxu1 %v11270_v45  ;;  %11276 = vst [vmem:[#allocation286_spill] sm:$0xff] %v8150_v12  ;;  %v11278_v31 = vld [vmem:[#allocation126_spill] sm:$0xff]  ;;  %v11286_v12 = vld [vmem:[#allocation133_spill] sm:$0xff] }
 0x239   : > { %2304 = vmatpush2.msra.mxu0 %v7442_v33  ;;  %2375 = vmatpush2.msra.mxu1 %v11271_v18  ;;  %v11279_v33 = vld [vmem:[#allocation128_spill] sm:$0xff]  ;;  %v8156_v18 = vpop.f32.mrf.mxu0 }
 0x23a   : > { %2305 = vmatprep.subr.mxu0 %v11273_v3  ;;  %2376 = vmatprep.subr.mxu1 %v11274_v36  ;;  %11280 = vst [vmem:[#allocation287_spill] sm:$0xff] %v8156_v18  ;;  %v11282_v3 = vld [vmem:[#allocation130_spill] sm:$0xff]  ;;  %v11283_v36 = vld [vmem:[#allocation131_spill] sm:$0xff]  ;;  %v11291_v18 = vld [vmem:[#allocation137_spill] sm:$0xff] }
 0x23b   : > { %2306 = vmatpush2.msra.mxu0 %v7456_v56  ;;  %2377 = vmatpush2.msra.mxu1 %v11275_v23  ;;  %v11284_v56 = vld [vmem:[#allocation132_spill] sm:$0xff]  ;;  %v8162_v23 = vpop.f32.mrf.mxu1 }
 0x23c   : > { %2307 = vmatprep.subr.mxu0 %v11277_v39  ;;  %2378 = vmatprep.subr.mxu1 %v11278_v31  ;;  %11285 = vst [vmem:[#allocation288_spill] sm:$0xff] %v8162_v23  ;;  %v11287_v39 = vld [vmem:[#allocation134_spill] sm:$0xff]  ;;  %v11288_v31 = vld [vmem:[#allocation135_spill] sm:$0xff]  ;;  %v11296_v23 = vld [vmem:[#allocation141_spill] sm:$0xff] }
 0x23d   : > { %2308 = vmatpush2.msra.mxu0 %v7474_v47  ;;  %2379 = vmatpush2.msra.mxu1 %v11279_v33  ;;  %v11289_v47 = vld [vmem:[#allocation136_spill] sm:$0xff]  ;;  %v8168_v33 = vpop.f32.mrf.mxu0 }
 0x23e   : > { %2309 = vmatprep.subr.mxu0 %v11281_v0  ;;  %2380 = vmatprep.subr.mxu1 %v11282_v3  ;;  %11290 = vst [vmem:[#allocation289_spill] sm:$0xff] %v8168_v33  ;;  %v11292_v0 = vld [vmem:[#allocation138_spill] sm:$0xff]  ;;  %v11293_v3 = vld [vmem:[#allocation139_spill] sm:$0xff]  ;;  %v11301_v33 = vld [vmem:[#allocation145_spill] sm:$0xff] }
 0x23f   : > { %2310 = vmatpush2.msra.mxu0 %v11283_v36  ;;  %2381 = vmatpush2.msra.mxu1 %v11284_v56  ;;  %v11294_v36 = vld [vmem:[#allocation140_spill] sm:$0xff]  ;;  %v8174_v56 = vpop.f32.mrf.mxu1 }
 0x240   : > { %2311 = vmatprep.subr.mxu0 %v11286_v12  ;;  %2382 = vmatprep.subr.mxu1 %v11287_v39  ;;  %11295 = vst [vmem:[#allocation290_spill] sm:$0xff] %v8174_v56  ;;  %v11297_v12 = vld [vmem:[#allocation142_spill] sm:$0xff]  ;;  %v11298_v39 = vld [vmem:[#allocation143_spill] sm:$0xff]  ;;  %v11306_v56 = vld [vmem:[#allocation149_spill] sm:$0xff] }
 0x241   : > { %2312 = vmatpush2.msra.mxu0 %v11288_v31  ;;  %2383 = vmatpush2.msra.mxu1 %v11289_v47  ;;  %v11299_v31 = vld [vmem:[#allocation144_spill] sm:$0xff]  ;;  %v8180_v47 = vpop.f32.mrf.mxu0 }
 0x242   : > { %2313 = vmatprep.subr.mxu0 %v11291_v18  ;;  %2384 = vmatprep.subr.mxu1 %v11292_v0  ;;  %11300 = vst [vmem:[#allocation291_spill] sm:$0xff] %v8180_v47  ;;  %v11302_v18 = vld [vmem:[#allocation146_spill] sm:$0xff]  ;;  %v11303_v0 = vld [vmem:[#allocation147_spill] sm:$0xff]  ;;  %v11311_v47 = vld [vmem:[#allocation153_spill] sm:$0xff] }
 0x243   : > { %2314 = vmatpush2.msra.mxu0 %v11293_v3  ;;  %2385 = vmatpush2.msra.mxu1 %v11294_v36  ;;  %v11304_v3 = vld [vmem:[#allocation148_spill] sm:$0xff]  ;;  %v8186_v36 = vpop.f32.mrf.mxu1 }
 0x244   : > { %2315 = vmatprep.subr.mxu0 %v11296_v23  ;;  %2386 = vmatprep.subr.mxu1 %v11297_v12  ;;  %11305 = vst [vmem:[#allocation292_spill] sm:$0xff] %v8186_v36  ;;  %v11307_v23 = vld [vmem:[#allocation150_spill] sm:$0xff]  ;;  %v11308_v12 = vld [vmem:[#allocation151_spill] sm:$0xff] }
 0x245   : > { %2316 = vmatpush2.msra.mxu0 %v11298_v39  ;;  %2387 = vmatpush2.msra.mxu1 %v11299_v31  ;;  %v11309_v39 = vld [vmem:[#allocation152_spill] sm:$0xff]  ;;  %v8192_v31 = vpop.f32.mrf.mxu0 }
 0x246   : > { %2317 = vmatprep.subr.mxu0 %v11301_v33  ;;  %2388 = vmatprep.subr.mxu1 %v11302_v18  ;;  %11310 = vst [vmem:[#allocation293_spill] sm:$0xff] %v8192_v31  ;;  %v11312_v33 = vld [vmem:[#allocation154_spill] sm:$0xff]  ;;  %v8196_v18 = vpop.f32.mrf.mxu1 }
 0x247   : > { %2318 = vmatpush2.msra.mxu0 %v11303_v0  ;;  %2389 = vmatpush2.msra.mxu1 %v11304_v3  ;;  %11313 = vst [vmem:[#allocation294_spill] sm:$0xff] %v8196_v18  ;;  %v8198_v0 = vpop.f32.mrf.mxu0 }
 0x248   : > { %2319 = vmatprep.subr.mxu0 %v11306_v56  ;;  %2390 = vmatprep.subr.mxu1 %v11307_v23  ;;  %11314 = vst [vmem:[#allocation295_spill] sm:$0xff] %v8198_v0  ;;  %v8200_v3 = vpop.f32.mrf.mxu1 }
 0x249   : > { %2320 = vmatpush2.msra.mxu0 %v11308_v12  ;;  %2391 = vmatpush2.msra.mxu1 %v11309_v39  ;;  %11315 = vst [vmem:[#allocation296_spill] sm:$0xff] %v8200_v3  ;;  %v8202_v36 = vpop.f32.mrf.mxu0 }
 0x24a   : > { %2399 = vmatprep.subr.mxu0 %v11311_v47  ;;  %2470 = vmatprep.subr.mxu1 %v11312_v33  ;;  %11316 = vst [vmem:[#allocation297_spill] sm:$0xff] %v8202_v36  ;;  %v8204_v56 = vpop.f32.mrf.mxu1 }
 0x24b   : > { %11317 = vst [vmem:[#allocation298_spill] sm:$0xff] %v8204_v56  ;;  %v8206_v23 = vpop.f32.mrf.mxu0 }
 0x24c   : > { %11318 = vst [vmem:[#allocation299_spill] sm:$0xff] %v8206_v23  ;;  %v8208_v12 = vpop.f32.mrf.mxu1 }
 0x24d   : > { %11319 = vst [vmem:[#allocation300_spill] sm:$0xff] %v8208_v12  ;;  %v8210_v39 = vpop.f32.mrf.mxu0 }
 0x24e   : > { %11320 = vst [vmem:[#allocation301_spill] sm:$0xff] %v8210_v39  ;;  %v8212_v31 = vpop.f32.mrf.mxu1 }
 0x24f   : > { %11321 = vst [vmem:[#allocation302_spill] sm:$0xff] %v8212_v31  ;;  %v8214_v47 = vpop.f32.mrf.mxu0 }
 0x250   : > { %11322 = vst [vmem:[#allocation303_spill] sm:$0xff] %v8214_v47  ;;  %v8216_v33 = vpop.f32.mrf.mxu1 }
 0x251   : > { %11323 = vst [vmem:[#allocation304_spill] sm:$0xff] %v8216_v33  ;;  %v8218_v18 = vpop.f32.mrf.mxu0 }
 0x252   : > { %11324 = vst [vmem:[#allocation305_spill] sm:$0xff] %v8218_v18  ;;  %v8220_v0 = vpop.f32.mrf.mxu1 }
 0x253   : > { %11325 = vst [vmem:[#allocation306_spill] sm:$0xff] %v8220_v0  ;;  %v8222_v3 = vpop.f32.mrf.mxu0 }
 0x254   : > { %11326 = vst [vmem:[#allocation307_spill] sm:$0xff] %v8222_v3  ;;  %v8224_v36 = vpop.f32.mrf.mxu1 }
 0x255   : > { %11327 = vst [vmem:[#allocation308_spill] sm:$0xff] %v8224_v36  ;;  %v8226_v56 = vpop.f32.mrf.mxu0 }
 0x256   : > { %v8228_v23 = vpop.f32.mrf.mxu1 }
 0x257   : > { %v8230_v12 = vpop.f32.mrf.mxu0 }
 0x258   : > { %v8232_v39 = vpop.f32.mrf.mxu1 }
 0x25c   : > { %v8234_v31 = vpop.f32.mrf.mxu0  ;;  %v8236_v47 = vpop.f32.mrf.mxu1 }
 0x25d   : > { %11328 = vst [vmem:[#allocation309_spill] sm:$0xff] %v8234_v31  ;;  %11329 = vst [vmem:[#allocation310_spill] sm:$0xff] %v8236_v47 }
 0x25e   : > { %v8238_v33 = vpop.f32.mrf.mxu0  ;;  %v8240_v18 = vpop.f32.mrf.mxu1 }
 0x25f   : > { %11330 = vst [vmem:[#allocation311_spill] sm:$0xff] %v8238_v33  ;;  %11331 = vst [vmem:[#allocation312_spill] sm:$0xff] %v8240_v18 }
 0x262   : > { %v8242_v0 = vpop.f32.mrf.mxu0  ;;  %v8244_v3 = vpop.f32.mrf.mxu1 }
 0x263   : > { %11332 = vst [vmem:[#allocation313_spill] sm:$0xff] %v8242_v0  ;;  %11333 = vst [vmem:[#allocation314_spill] sm:$0xff] %v8244_v3 }
 0x264   : > { %v8246_v36 = vpop.f32.mrf.mxu0  ;;  %v8248_v45 = vpop.f32.mrf.mxu1 }
 0x265   : > { %11334 = vst [vmem:[#allocation315_spill] sm:$0xff] %v8246_v36  ;;  %11335 = vst [vmem:[#allocation316_spill] sm:$0xff] %v8248_v45 }
 0x268   : > { %v8250_v43 = vpop.f32.mrf.mxu0  ;;  %v8252_v35 = vpop.f32.mrf.mxu1 }
 0x269   : > { %11336 = vst [vmem:[#allocation317_spill] sm:$0xff] %v8250_v43  ;;  %11337 = vst [vmem:[#allocation318_spill] sm:$0xff] %v8252_v35 }
 0x26a   : > { %v8254_v44 = vpop.f32.mrf.mxu0  ;;  %v8256_v31 = vpop.f32.mrf.mxu1 }
 0x26b   : > { %11338 = vst [vmem:[#allocation319_spill] sm:$0xff] %v8254_v44  ;;  %11339 = vst [vmem:[#allocation320_spill] sm:$0xff] %v8256_v31 }
 0x26e   : > { %v8258_v47 = vpop.f32.mrf.mxu0  ;;  %v8260_v33 = vpop.f32.mrf.mxu1 }
 0x26f   : > { %11340 = vst [vmem:[#allocation321_spill] sm:$0xff] %v8258_v47  ;;  %11341 = vst [vmem:[#allocation322_spill] sm:$0xff] %v8260_v33  ;;  %v1343_v47 = vlaneseq }
 0x270   : > { %v8262_v0 = vpop.f32.mrf.mxu0  ;;  %v8264_v3 = vpop.f32.mrf.mxu1 }
 0x271   : > { %11342 = vst [vmem:[#allocation323_spill] sm:$0xff] %v8262_v0  ;;  %11343 = vst [vmem:[#allocation324_spill] sm:$0xff] %v8264_v3  ;;  %v1344_v0 = vshrl.u32 %v1343_v47, 7 }
 0x274   : > { %v8266_v36 = vpop.f32.mrf.mxu0  ;;  %v8268_v45 = vpop.f32.mrf.mxu1 }
 0x275   : > { %11344 = vst [vmem:[#allocation325_spill] sm:$0xff] %v8266_v36  ;;  %11345 = vst [vmem:[#allocation326_spill] sm:$0xff] %v8268_v45  ;;  %v8286_v36 = vsub.s32 0, %v1344_v0  ;;  %v1325_v45 = vld [vmem:[%s6840_s4] sm:$0xff] }
 0x276   : > { %v8270_v43 = vpop.f32.mrf.mxu0  ;;  %v8272_v35 = vpop.f32.mrf.mxu1 }
 0x277   : > { %11346 = vst [vmem:[#allocation327_spill] sm:$0xff] %v8270_v43  ;;  %11347 = vst [vmem:[#allocation328_spill] sm:$0xff] %v8272_v35  ;;  %v1353_v43 = vsub.s32 2, %v1344_v0  ;;  %v8291_v35 = vsub.s32 1, %v1344_v0 }
 0x278   : > { %11354 = vst [vmem:[#allocation335_spill] sm:$0xff] %v8286_v36 }
 0x279   : > { %11356 = vst [vmem:[#allocation337_spill] sm:$0xff] %v8291_v35 }
 0x27a   : > { %v8274_v44 = vpop.f32.mrf.mxu0  ;;  %v8276_v31 = vpop.f32.mrf.mxu1 }
 0x27b   : > { %11348 = vst [vmem:[#allocation329_spill] sm:$0xff] %v8274_v44  ;;  %11349 = vst [vmem:[#allocation330_spill] sm:$0xff] %v8276_v31  ;;  %v8296_v31 = vrot.slane %v1325_v45, %v8286_v36 }
 0x27c   : > { %v8278_v18 = vpop.f32.mrf.mxu0  ;;  %v8280_v33 = vpop.f32.mrf.mxu1 }
 0x27d   : > { %11350 = vst [vmem:[#allocation331_spill] sm:$0xff] %v8278_v18  ;;  %11351 = vst [vmem:[#allocation332_spill] sm:$0xff] %v8280_v33  ;;  %v1357_v18 = vsub.s32 3, %v1344_v0  ;;  %v8298_v33 = vrot.slane %v1325_v45, %v1353_v43  ;;  %v1450_v41 = vadd.f32 %v8100_v34, %v8296_v31 }
 0x27e   : > { %11358 = vst [vmem:[#allocation339_spill] sm:$0xff] %v8296_v31  ;;  %v1365_v31 = vsub.s32 5, %v1344_v0 }
 0x27f   : > { %11359 = vst [vmem:[#allocation340_spill] sm:$0xff] %v8298_v33  ;;  %v8305_v37 = vrot.slane %v1325_v45, %v1357_v18 }
 0x280   : > { %v8282_v4 = vpop.f32.mrf.mxu0  ;;  %v8284_v3 = vpop.f32.mrf.mxu1 }
 0x281   : > { %11352 = vst [vmem:[#allocation333_spill] sm:$0xff] %v8282_v4  ;;  %11353 = vst [vmem:[#allocation334_spill] sm:$0xff] %v8284_v3  ;;  %v8301_v4 = vrot.slane %v1325_v45, %v8291_v35  ;;  %v1565_v35 = vadd.f32 %v8118_v5, %v8305_v37 }
 0x282   : > { %v8289_v46 = vpop.f32.mrf.mxu0  ;;  %v8293_v44 = vpop.f32.mrf.mxu1 }
 0x283   : > { %11355 = vst [vmem:[#allocation336_spill] sm:$0xff] %v8289_v46  ;;  %11357 = vst [vmem:[#allocation338_spill] sm:$0xff] %v8293_v44  ;;  %v1563_v46 = vadd.f32 %v8106_v42, %v8298_v33  ;;  %v1452_v36 = vadd.f32 %v8112_v63, %v8301_v4  ;;  %v1361_v42 = vsub.s32 4, %v1344_v0  ;;  %v1369_v33 = vsub.s32 6, %v1344_v0 }
 0x284   : > { %11360 = vst [vmem:[#allocation341_spill] sm:$0xff] %v8301_v4 }
 0x285   : > { %v8315_v5 = vrot.slane %v1325_v45, %v1369_v33 }
 0x287   : > { %v1973_v47 = vpop.f32.mrf.mxu0  ;;  %v2044_v3 = vpop.f32.mrf.mxu1  ;;  %11362 = vst [vmem:[#allocation343_spill] sm:$0xff] %v8315_v5 }
 0x288   : > { %v2191_v49 = vadd.f32 %v1973_v47, %v1450_v41  ;;  %v2193_v43 = vadd.f32 %v2044_v3, %v1563_v46  ;;  %v1373_v41 = vsub.s32 7, %v1344_v0  ;;  %v8313_v47 = vrot.slane %v1325_v45, %v1361_v42 }
 0x289   : > { %v1975_v44 = vpop.f32.mrf.mxu0  ;;  %v2046_v13 = vpop.f32.mrf.mxu1  ;;  %v1789_v0 = vadd.f32 %v8228_v23, %v8315_v5 }
 0x28a   : > { %v2192_v29 = vadd.f32 %v1975_v44, %v1452_v36  ;;  %v5553_v28 = vmul.f32 -1.442695, %v2191_v49  ;;  %v2194_v27 = vadd.f32 %v2046_v13, %v1565_v35  ;;  %v5555_v25 = vmul.f32 -1.442695, %v2193_v43  ;;  %11361 = vst [vmem:[#allocation342_spill] sm:$0xff] %v8313_v47 }
 0x28b   : > { %v8317_v36 = vrot.slane %v1325_v45, %v1365_v31  ;;  %v1676_v44 = vadd.f32 %v8226_v56, %v8313_v47 }
 0x28c   : > { %v5554_v34 = vmul.f32 -1.442695, %v2192_v29  ;;  %5892 = vpow2.f32 %v5553_v28  ;;  %v5556_v18 = vmul.f32 -1.442695, %v2194_v27  ;;  %v8319_v28 = vrot.slane %v1325_v45, %v1373_v41 }
 0x28d   : > { %5894 = vpow2.f32 %v5555_v25  ;;  %11363 = vst [vmem:[#allocation344_spill] sm:$0xff] %v8317_v36  ;;  %v1678_v13 = vadd.f32 %v8230_v12, %v8317_v36 }
 0x28e   : > { %5896 = vpow2.f32 %v5554_v34  ;;  %v1791_v43 = vadd.f32 %v8232_v39, %v8319_v28 }
 0x28f   : > { %5898 = vpow2.f32 %v5556_v18 }
 0x299   : > { %v5893_v63 = vpop.eup %5892 }
 0x29a   : > { %v5895_v46 = vpop.eup %5894  ;;  %v2205_v35 = vadd.f32 1.0, %v5893_v63 }
 0x29b   : > { %v5897_v3 = vpop.eup %5896  ;;  %v2217_v25 = vadd.f32 1.0, %v5895_v46 }
 0x29c   : > { %v5899_v29 = vpop.eup %5898  ;;  %v2206_v27 = vadd.f32 1.0, %v5897_v3  ;;  %5900 = vrcp.f32 %v2205_v35 }
 0x29d   : > { %v2218_v33 = vadd.f32 1.0, %v5899_v29  ;;  %5902 = vrcp.f32 %v2217_v25 }
 0x29e   : > { %5904 = vrcp.f32 %v2206_v27 }
 0x2a9   : > { %v5901_v41 = vpop.eup %5900 }
 0x2aa   : > { %v5903_v46 = vpop.eup %5902 }
 0x2ab   : > { %v5905_v3 = vpop.eup %5904  ;;  %v2237_v29 = vmul.f32 0.0, %v5903_v46  ;;  %v11366_v46 = vld [vmem:[#allocation157_spill] sm:$0xff] }
 0x2c9   : > { %v2115_v49 = vpop.f32.mrf.mxu0  ;;  %v2186_v31 = vpop.f32.mrf.mxu1 }
 0x2ca   : > { %v2195_v45 = vadd.f32 %v2115_v49, %v1676_v44  ;;  %v2197_v34 = vadd.f32 %v2186_v31, %v1789_v0 }
 0x2cb   : > { %v2117_v18 = vpop.f32.mrf.mxu0  ;;  %v2188_v42 = vpop.f32.mrf.mxu1 }
 0x2cc   : > { %5906 = vtanh.f32 %v2195_v45  ;;  %v5557_v56 = vmul.f32 -1.442695, %v2197_v34  ;;  %v2196_v63 = vadd.f32 %v2117_v18, %v1678_v13  ;;  %v2198_v23 = vadd.f32 %v2188_v42, %v1791_v43 }
 0x2cd   : > { %5908 = vrcp.f32 %v2218_v33 }
 0x2ce   : > { %5910 = vpow2.f32 %v5557_v56  ;;  %v5558_v12 = vmul.f32 -1.442695, %v2198_v23 }
 0x2cf   : > { %5912 = vtanh.f32 %v2196_v63 }
 0x2d0   : > { %5914 = vpow2.f32 %v5558_v12  ;;  %v11364_v12 = vld [vmem:[#allocation155_spill] sm:$0xff] }
 0x2d9   : > { %v5907_v35 = vpop.eup %5906 }
 0x2da   : > { %v5909_v39 = vpop.eup %5908  ;;  %v2239_v25 = vmul.f32 %v5907_v35, %v5901_v41  ;;  %v11365_v41 = vld [vmem:[#allocation156_spill] sm:$0xff]  ;;  %v11368_v35 = vld [vmem:[#allocation159_spill] sm:$0xff] }
 0x2db   : > { %v5911_v44 = vpop.eup %5910  ;;  %v2238_v13 = vmul.f32 0.0, %v5909_v39  ;;  %v11369_v39 = vld [vmem:[#allocation160_spill] sm:$0xff] }
 0x2dc   : > { %v5913_v27 = vpop.eup %5912  ;;  %v8329_v0 = vadd.f32 %v2239_v25, %v2237_v29  ;;  %v2231_v49 = vadd.f32 1.0, %v5911_v44  ;;  %v11370_v29 = vld [vmem:[#allocation161_spill] sm:$0xff]  ;;  %v11371_v25 = vld [vmem:[#allocation162_spill] sm:$0xff]  ;;  %v11372_v44 = vld [vmem:[#allocation163_spill] sm:$0xff] }
 0x2dd   : > { %v5915_v31 = vpop.eup %5914  ;;  %v2240_v43 = vmul.f32 %v5913_v27, %v5905_v3  ;;  %v11367_v3 = vld [vmem:[#allocation158_spill] sm:$0xff]  ;;  %v11373_v27 = vld [vmem:[#allocation164_spill] sm:$0xff] }
 0x2de   : > { %5916 = vtanh.f32 %v8329_v0  ;;  %v2232_v33 = vadd.f32 1.0, %v5915_v31  ;;  %v11375_v31 = vld [vmem:[#allocation166_spill] sm:$0xff] }
 0x2df   : > { %5918 = vrcp.f32 %v2231_v49  ;;  %v8332_v45 = vadd.f32 %v2240_v43, %v2238_v13  ;;  %v11374_v49 = vld [vmem:[#allocation165_spill] sm:$0xff]  ;;  %v11376_v13 = vld [vmem:[#allocation167_spill] sm:$0xff]  ;;  %v11377_v43 = vld [vmem:[#allocation168_spill] sm:$0xff] }
 0x2e0   : > { %5920 = vrcp.f32 %v2232_v33  ;;  %v11378_v33 = vld [vmem:[#allocation169_spill] sm:$0xff] }
 0x2e1   : > { %5922 = vtanh.f32 %v8332_v45 }
 0x2eb   : > { %v5917_v34 = vpop.eup %5916 }
 0x2ec   : > { %v5919_v18 = vpop.eup %5918 }
 0x2ed   : > { %v5921_v42 = vpop.eup %5920  ;;  %v8335_v56 = vmul.f32 %v5919_v18, %v5917_v34  ;;  %v11379_v34 = vld [vmem:[#allocation170_spill] sm:$0xff]  ;;  %v11380_v18 = vld [vmem:[#allocation171_spill] sm:$0xff] }
 0x2ee   : > { %v5923_v63 = vpop.eup %5922 }
 0x2ef   : > { %v2246_v23 = vmul.f32 %v5923_v63, %v5921_v42  ;;  %2247 = vst [vmem:[#allocation2 + $0x30] sm:$0xff] %v8335_v56  ;;  %v11381_v42 = vld [vmem:[#allocation172_spill] sm:$0xff]  ;;  %v11382_v63 = vld [vmem:[#allocation173_spill] sm:$0xff] }
 0x2f1   : > { %2248 = vst [vmem:[#allocation2] sm:$0xff] %v2246_v23  ;;  %2321 = vmatprep.mubr.f32.mxu0 %v2246_v23  ;;  %2392 = vmatprep.mubr.f32.mxu1 %v2246_v23 }
 0x2f2   : > { %2322 = vmatmul.mubr.f32.vlgmr.msra.gmra.mxu0 %v8335_v56  ;;  %2393 = vmatmul.mubr.f32.vlgmr.msra.gmra.mxu1 %v8335_v56 }
 0x2f3   : > { %2400 = vmatpush1.msra.mxu0 %v11364_v12  ;;  %2471 = vmatpush1.msra.mxu1 %v11365_v41 }
 0x2f4   : > { %2401 = vmatprep.subr.mxu0 %v11366_v46  ;;  %2463 = vmatprep.mubr.f32.mxu0 %v2246_v23 }
 0x2f5   : > { %2472 = vmatprep.subr.mxu1 %v11367_v3  ;;  %2534 = vmatprep.mubr.f32.mxu1 %v2246_v23  ;;  %v11383_v23 = vld [vmem:[#allocation174_spill] sm:$0xff] }
 0x2f6   : > { %2402 = vmatpush1.msra.mxu0 %v11368_v35  ;;  %2473 = vmatpush1.msra.mxu1 %v11369_v39 }
 0x2f7   : > { %2403 = vmatprep.subr.mxu0 %v11370_v29  ;;  %2474 = vmatprep.subr.mxu1 %v11371_v25 }
 0x2f8   : > { %2404 = vmatpush1.msra.mxu0 %v11372_v44  ;;  %2475 = vmatpush1.msra.mxu1 %v11373_v27  ;;  %v11384_v27 = vld [vmem:[#allocation175_spill] sm:$0xff] }
 0x2f9   : > { %2405 = vmatprep.subr.mxu0 %v11374_v49  ;;  %2476 = vmatprep.subr.mxu1 %v11375_v31  ;;  %v11385_v49 = vld [vmem:[#allocation176_spill] sm:$0xff]  ;;  %v11386_v31 = vld [vmem:[#allocation177_spill] sm:$0xff] }
 0x2fa   : > { %2406 = vmatpush1.msra.mxu0 %v11376_v13  ;;  %2477 = vmatpush1.msra.mxu1 %v11377_v43  ;;  %v11387_v13 = vld [vmem:[#allocation178_spill] sm:$0xff]  ;;  %v11388_v43 = vld [vmem:[#allocation179_spill] sm:$0xff] }
 0x2fb   : > { %2407 = vmatprep.subr.mxu0 %v11378_v33  ;;  %2478 = vmatprep.subr.mxu1 %v11379_v34  ;;  %v11389_v33 = vld [vmem:[#allocation180_spill] sm:$0xff]  ;;  %v11390_v34 = vld [vmem:[#allocation181_spill] sm:$0xff] }
 0x2fc   : > { %2408 = vmatpush1.msra.mxu0 %v11380_v18  ;;  %2479 = vmatpush1.msra.mxu1 %v11381_v42  ;;  %v11391_v18 = vld [vmem:[#allocation182_spill] sm:$0xff]  ;;  %v11392_v42 = vld [vmem:[#allocation183_spill] sm:$0xff] }
 0x2fd   : > { %2409 = vmatprep.subr.mxu0 %v11382_v63  ;;  %2480 = vmatprep.subr.mxu1 %v11383_v23  ;;  %v11393_v63 = vld [vmem:[#allocation184_spill] sm:$0xff]  ;;  %v11394_v23 = vld [vmem:[#allocation185_spill] sm:$0xff] }
 0x2fe   : > { %2410 = vmatpush1.msra.mxu0 %v11384_v27  ;;  %2481 = vmatpush1.msra.mxu1 %v11385_v49  ;;  %v11395_v27 = vld [vmem:[#allocation186_spill] sm:$0xff]  ;;  %v11396_v49 = vld [vmem:[#allocation187_spill] sm:$0xff] }
 0x2ff   : > { %2411 = vmatprep.subr.mxu0 %v11386_v31  ;;  %2482 = vmatprep.subr.mxu1 %v11387_v13  ;;  %v11397_v31 = vld [vmem:[#allocation188_spill] sm:$0xff]  ;;  %v11398_v13 = vld [vmem:[#allocation189_spill] sm:$0xff] }
 0x300   : > { %2412 = vmatpush1.msra.mxu0 %v11388_v43  ;;  %2483 = vmatpush1.msra.mxu1 %v11389_v33  ;;  %v11399_v43 = vld [vmem:[#allocation190_spill] sm:$0xff]  ;;  %v11400_v33 = vld [vmem:[#allocation191_spill] sm:$0xff] }
 0x301   : > { %2413 = vmatprep.subr.mxu0 %v11390_v34  ;;  %2484 = vmatprep.subr.mxu1 %v11391_v18  ;;  %v11401_v34 = vld [vmem:[#allocation192_spill] sm:$0xff]  ;;  %v11402_v18 = vld [vmem:[#allocation193_spill] sm:$0xff] }
 0x302   : > { %2414 = vmatpush1.msra.mxu0 %v11392_v42  ;;  %2485 = vmatpush1.msra.mxu1 %v11393_v63  ;;  %v11403_v42 = vld [vmem:[#allocation194_spill] sm:$0xff]  ;;  %v11404_v63 = vld [vmem:[#allocation195_spill] sm:$0xff] }
 0x303   : > { %2415 = vmatprep.subr.mxu0 %v11394_v23  ;;  %2486 = vmatprep.subr.mxu1 %v11395_v27  ;;  %v11405_v23 = vld [vmem:[#allocation196_spill] sm:$0xff]  ;;  %v11406_v27 = vld [vmem:[#allocation197_spill] sm:$0xff] }
 0x304   : > { %2416 = vmatpush1.msra.mxu0 %v11396_v49  ;;  %2487 = vmatpush1.msra.mxu1 %v11397_v31  ;;  %v11407_v49 = vld [vmem:[#allocation198_spill] sm:$0xff]  ;;  %v11408_v31 = vld [vmem:[#allocation199_spill] sm:$0xff] }
 0x305   : > { %2417 = vmatprep.subr.mxu0 %v11398_v13  ;;  %2488 = vmatprep.subr.mxu1 %v11399_v43  ;;  %v11409_v13 = vld [vmem:[#allocation200_spill] sm:$0xff]  ;;  %v11410_v43 = vld [vmem:[#allocation201_spill] sm:$0xff] }
 0x306   : > { %2418 = vmatpush1.msra.mxu0 %v11400_v33  ;;  %2489 = vmatpush1.msra.mxu1 %v11401_v34  ;;  %v11411_v33 = vld [vmem:[#allocation202_spill] sm:$0xff]  ;;  %v11412_v34 = vld [vmem:[#allocation203_spill] sm:$0xff] }
 0x307   : > { %2419 = vmatprep.subr.mxu0 %v11402_v18  ;;  %2490 = vmatprep.subr.mxu1 %v11403_v42  ;;  %v11413_v18 = vld [vmem:[#allocation204_spill] sm:$0xff]  ;;  %v11414_v42 = vld [vmem:[#allocation205_spill] sm:$0xff] }
 0x308   : > { %2420 = vmatpush1.msra.mxu0 %v11404_v63  ;;  %2491 = vmatpush1.msra.mxu1 %v11405_v23  ;;  %v11415_v63 = vld [vmem:[#allocation206_spill] sm:$0xff]  ;;  %v11416_v23 = vld [vmem:[#allocation207_spill] sm:$0xff] }
 0x309   : > { %2421 = vmatprep.subr.mxu0 %v11406_v27  ;;  %2492 = vmatprep.subr.mxu1 %v11407_v49  ;;  %v11417_v27 = vld [vmem:[#allocation208_spill] sm:$0xff]  ;;  %v11418_v49 = vld [vmem:[#allocation209_spill] sm:$0xff] }
 0x30a   : > { %2422 = vmatpush1.msra.mxu0 %v11408_v31  ;;  %2493 = vmatpush1.msra.mxu1 %v11409_v13  ;;  %v11419_v31 = vld [vmem:[#allocation210_spill] sm:$0xff]  ;;  %v11420_v13 = vld [vmem:[#allocation211_spill] sm:$0xff] }
 0x30b   : > { %2423 = vmatprep.subr.mxu0 %v11410_v43  ;;  %2494 = vmatprep.subr.mxu1 %v11411_v33  ;;  %v11421_v43 = vld [vmem:[#allocation212_spill] sm:$0xff]  ;;  %v11422_v33 = vld [vmem:[#allocation213_spill] sm:$0xff] }
 0x30c   : > { %2424 = vmatpush1.msra.mxu0 %v11412_v34  ;;  %2495 = vmatpush1.msra.mxu1 %v11413_v18  ;;  %v11423_v34 = vld [vmem:[#allocation214_spill] sm:$0xff]  ;;  %v11424_v18 = vld [vmem:[#allocation215_spill] sm:$0xff] }
 0x30d   : > { %2425 = vmatprep.subr.mxu0 %v11414_v42  ;;  %2496 = vmatprep.subr.mxu1 %v11415_v63  ;;  %v11425_v42 = vld [vmem:[#allocation216_spill] sm:$0xff]  ;;  %v11426_v63 = vld [vmem:[#allocation217_spill] sm:$0xff] }
 0x30e   : > { %2426 = vmatpush1.msra.mxu0 %v11416_v23  ;;  %2497 = vmatpush1.msra.mxu1 %v11417_v27  ;;  %v11427_v23 = vld [vmem:[#allocation218_spill] sm:$0xff]  ;;  %v11428_v27 = vld [vmem:[#allocation219_spill] sm:$0xff] }
 0x30f   : > { %2427 = vmatprep.subr.mxu0 %v11418_v49  ;;  %2498 = vmatprep.subr.mxu1 %v11419_v31  ;;  %v11429_v49 = vld [vmem:[#allocation220_spill] sm:$0xff]  ;;  %v11430_v31 = vld [vmem:[#allocation221_spill] sm:$0xff] }
 0x310   : > { %2428 = vmatpush1.msra.mxu0 %v11420_v13  ;;  %2499 = vmatpush1.msra.mxu1 %v11421_v43  ;;  %v11431_v13 = vld [vmem:[#allocation222_spill] sm:$0xff]  ;;  %v11432_v43 = vld [vmem:[#allocation223_spill] sm:$0xff] }
 0x311   : > { %2429 = vmatprep.subr.mxu0 %v11422_v33  ;;  %2500 = vmatprep.subr.mxu1 %v11423_v34  ;;  %v11433_v33 = vld [vmem:[#allocation224_spill] sm:$0xff]  ;;  %v11434_v34 = vld [vmem:[#allocation225_spill] sm:$0xff] }
 0x312   : > { %2430 = vmatpush1.msra.mxu0 %v11424_v18  ;;  %2501 = vmatpush1.msra.mxu1 %v11425_v42  ;;  %v11435_v18 = vld [vmem:[#allocation226_spill] sm:$0xff]  ;;  %v11436_v42 = vld [vmem:[#allocation227_spill] sm:$0xff] }
 0x313   : > { %2431 = vmatprep.subr.mxu0 %v11426_v63  ;;  %2502 = vmatprep.subr.mxu1 %v11427_v23  ;;  %v11437_v63 = vld [vmem:[#allocation228_spill] sm:$0xff]  ;;  %v11438_v23 = vld [vmem:[#allocation229_spill] sm:$0xff] }
 0x314   : > { %2432 = vmatpush2.msra.mxu0 %v11428_v27  ;;  %2503 = vmatpush2.msra.mxu1 %v11429_v49  ;;  %v11439_v27 = vld [vmem:[#allocation230_spill] sm:$0xff]  ;;  %v11440_v49 = vld [vmem:[#allocation231_spill] sm:$0xff] }
 0x315   : > { %2433 = vmatprep.subr.mxu0 %v11430_v31  ;;  %2504 = vmatprep.subr.mxu1 %v11431_v13  ;;  %v11441_v31 = vld [vmem:[#allocation232_spill] sm:$0xff]  ;;  %v11442_v13 = vld [vmem:[#allocation233_spill] sm:$0xff] }
 0x316   : > { %2434 = vmatpush2.msra.mxu0 %v11432_v43  ;;  %2505 = vmatpush2.msra.mxu1 %v11433_v33  ;;  %v11443_v43 = vld [vmem:[#allocation234_spill] sm:$0xff]  ;;  %v11444_v33 = vld [vmem:[#allocation235_spill] sm:$0xff] }
 0x317   : > { %2435 = vmatprep.subr.mxu0 %v11434_v34  ;;  %2506 = vmatprep.subr.mxu1 %v11435_v18  ;;  %v11445_v34 = vld [vmem:[#allocation236_spill] sm:$0xff]  ;;  %v11446_v18 = vld [vmem:[#allocation237_spill] sm:$0xff] }
 0x318   : > { %2436 = vmatpush2.msra.mxu0 %v11436_v42  ;;  %2507 = vmatpush2.msra.mxu1 %v11437_v63  ;;  %v11447_v42 = vld [vmem:[#allocation238_spill] sm:$0xff]  ;;  %v11448_v63 = vld [vmem:[#allocation239_spill] sm:$0xff] }
 0x319   : > { %2437 = vmatprep.subr.mxu0 %v11438_v23  ;;  %2508 = vmatprep.subr.mxu1 %v11439_v27  ;;  %v11449_v23 = vld [vmem:[#allocation240_spill] sm:$0xff]  ;;  %v11450_v27 = vld [vmem:[#allocation241_spill] sm:$0xff] }
 0x31a   : > { %2438 = vmatpush2.msra.mxu0 %v11440_v49  ;;  %2509 = vmatpush2.msra.mxu1 %v11441_v31  ;;  %v11451_v49 = vld [vmem:[#allocation242_spill] sm:$0xff]  ;;  %v11452_v31 = vld [vmem:[#allocation243_spill] sm:$0xff] }
 0x31b   : > { %2439 = vmatprep.subr.mxu0 %v11442_v13  ;;  %2510 = vmatprep.subr.mxu1 %v11443_v43  ;;  %v11453_v13 = vld [vmem:[#allocation244_spill] sm:$0xff]  ;;  %v11454_v43 = vld [vmem:[#allocation245_spill] sm:$0xff] }
 0x31c   : > { %2440 = vmatpush2.msra.mxu0 %v11444_v33  ;;  %2511 = vmatpush2.msra.mxu1 %v11445_v34  ;;  %v11455_v33 = vld [vmem:[#allocation246_spill] sm:$0xff]  ;;  %v11456_v34 = vld [vmem:[#allocation247_spill] sm:$0xff] }
 0x31d   : > { %2441 = vmatprep.subr.mxu0 %v11446_v18  ;;  %2512 = vmatprep.subr.mxu1 %v11447_v42  ;;  %v11457_v18 = vld [vmem:[#allocation248_spill] sm:$0xff]  ;;  %v11458_v42 = vld [vmem:[#allocation249_spill] sm:$0xff] }
 0x31e   : > { %2442 = vmatpush2.msra.mxu0 %v11448_v63  ;;  %2513 = vmatpush2.msra.mxu1 %v11449_v23  ;;  %v11459_v63 = vld [vmem:[#allocation250_spill] sm:$0xff]  ;;  %v11460_v23 = vld [vmem:[#allocation251_spill] sm:$0xff] }
 0x31f   : > { %2443 = vmatprep.subr.mxu0 %v11450_v27  ;;  %2514 = vmatprep.subr.mxu1 %v11451_v49  ;;  %v11461_v27 = vld [vmem:[#allocation252_spill] sm:$0xff]  ;;  %v11462_v49 = vld [vmem:[#allocation253_spill] sm:$0xff] }
 0x320   : > { %2444 = vmatpush2.msra.mxu0 %v11452_v31  ;;  %2515 = vmatpush2.msra.mxu1 %v11453_v13  ;;  %v11463_v31 = vld [vmem:[#allocation254_spill] sm:$0xff]  ;;  %v11464_v13 = vld [vmem:[#allocation255_spill] sm:$0xff] }
 0x321   : > { %2445 = vmatprep.subr.mxu0 %v11454_v43  ;;  %2516 = vmatprep.subr.mxu1 %v11455_v33  ;;  %v11465_v43 = vld [vmem:[#allocation256_spill] sm:$0xff]  ;;  %v11466_v33 = vld [vmem:[#allocation257_spill] sm:$0xff] }
 0x322   : > { %2446 = vmatpush2.msra.mxu0 %v11456_v34  ;;  %2517 = vmatpush2.msra.mxu1 %v11457_v18  ;;  %v11467_v34 = vld [vmem:[#allocation258_spill] sm:$0xff]  ;;  %v11468_v18 = vld [vmem:[#allocation259_spill] sm:$0xff] }
 0x323   : > { %2447 = vmatprep.subr.mxu0 %v11458_v42  ;;  %2518 = vmatprep.subr.mxu1 %v11459_v63  ;;  %v11469_v42 = vld [vmem:[#allocation260_spill] sm:$0xff]  ;;  %v11470_v63 = vld [vmem:[#allocation261_spill] sm:$0xff] }
 0x324   : > { %2448 = vmatpush2.msra.mxu0 %v11460_v23  ;;  %2519 = vmatpush2.msra.mxu1 %v11461_v27  ;;  %v11471_v23 = vld [vmem:[#allocation262_spill] sm:$0xff]  ;;  %v11472_v27 = vld [vmem:[#allocation263_spill] sm:$0xff] }
 0x325   : > { %2449 = vmatprep.subr.mxu0 %v11462_v49  ;;  %2520 = vmatprep.subr.mxu1 %v11463_v31  ;;  %v11473_v31 = vld [vmem:[#allocation265_spill] sm:$0xff] }
 0x326   : > { %2450 = vmatpush2.msra.mxu0 %v11464_v13  ;;  %2521 = vmatpush2.msra.mxu1 %v11465_v43  ;;  %v11474_v13 = vld [vmem:[#allocation266_spill] sm:$0xff] }
 0x327   : > { %2451 = vmatprep.subr.mxu0 %v11466_v33  ;;  %2522 = vmatprep.subr.mxu1 %v11467_v34 }
 0x328   : > { %2452 = vmatpush2.msra.mxu0 %v11468_v18  ;;  %2523 = vmatpush2.msra.mxu1 %v11469_v42 }
 0x329   : > { %2453 = vmatprep.subr.mxu0 %v11470_v63  ;;  %2524 = vmatprep.subr.mxu1 %v11471_v23 }
 0x32a   : > { %2454 = vmatpush2.msra.mxu0 %v11472_v27  ;;  %2525 = vmatpush2.msra.mxu1 %v7964_v62 }
 0x32b   : > { %2455 = vmatprep.subr.mxu0 %v11473_v31  ;;  %2526 = vmatprep.subr.mxu1 %v11474_v13 }
 0x32c   : > { %2456 = vmatpush2.msra.mxu0 %v7976_v6  ;;  %2527 = vmatpush2.msra.mxu1 %v7978_v60 }
 0x32d   : > { %2457 = vmatprep.subr.mxu0 %v7984_v22  ;;  %2528 = vmatprep.subr.mxu1 %v7986_v55 }
 0x32e   : > { %2458 = vmatpush2.msra.mxu0 %v7990_v32  ;;  %2529 = vmatpush2.msra.mxu1 %v7992_v30 }
 0x32f   : > { %2459 = vmatprep.subr.mxu0 %v7998_v14  ;;  %2530 = vmatprep.subr.mxu1 %v8000_v40 }
 0x330   : > { %2460 = vmatpush2.msra.mxu0 %v8004_v26  ;;  %2531 = vmatpush2.msra.mxu1 %v8006_v38 }
 0x331   : > { %2461 = vmatprep.subr.mxu0 %v8010_v10  ;;  %2532 = vmatprep.subr.mxu1 %v8012_v48 }
 0x332   : > { %2462 = vmatpush2.msra.mxu0 %v8016_v24  ;;  %2533 = vmatpush2.msra.mxu1 %v8020_v54 }
 0x333   : > { %2464 = vmatmul.mubr.f32.vlgmr.msra.gmra.mxu0 %v8335_v56  ;;  %2535 = vmatmul.mubr.f32.vlgmr.msra.gmra.mxu1 %v8335_v56  ;;  %v11475_v56 = vld [vmem:[#allocation45_spill] sm:$0xff] }
 0x334   : > { %2607 = vmatprep.subr.mxu0 %v7100_v50  ;;  %2678 = vmatprep.subr.mxu1 %v7102_v51 }
 0x335   : > { %2608 = vmatpush1.msra.mxu0 %v7105_v52  ;;  %2679 = vmatpush1.msra.mxu1 %v7107_v53 }
 0x336   : > { %2609 = vmatprep.subr.mxu0 %v7112_v57  ;;  %2680 = vmatprep.subr.mxu1 %v7114_v58 }
 0x337   : > { %2610 = vmatpush1.msra.mxu0 %v7118_v59  ;;  %2681 = vmatpush1.msra.mxu1 %v7120_v61  ;;  %v11588_v61 = vld [vmem:[#allocation282_spill] sm:$0xff] }
 0x338   : > { %2611 = vmatprep.subr.mxu0 %v7126_v17  ;;  %2682 = vmatprep.subr.mxu1 %v7128_v1  ;;  %v11585_v1 = vld [vmem:[#allocation339_spill] sm:$0xff] }
 0x339   : > { %2612 = vmatpush1.msra.mxu0 %v7132_v21  ;;  %2683 = vmatpush1.msra.mxu1 %v7134_v2  ;;  %v11476_v21 = vld [vmem:[#allocation46_spill] sm:$0xff]  ;;  %v11477_v2 = vld [vmem:[#allocation47_spill] sm:$0xff] }
 0x33a   : > { %2613 = vmatprep.subr.mxu0 %v7140_v7  ;;  %2684 = vmatprep.subr.mxu1 %v7142_v8  ;;  %v11478_v7 = vld [vmem:[#allocation48_spill] sm:$0xff]  ;;  %v11479_v8 = vld [vmem:[#allocation49_spill] sm:$0xff] }
 0x33b   : > { %2614 = vmatpush1.msra.mxu0 %v7146_v9  ;;  %2685 = vmatpush1.msra.mxu1 %v7148_v11  ;;  %v11480_v9 = vld [vmem:[#allocation50_spill] sm:$0xff]  ;;  %v11481_v11 = vld [vmem:[#allocation51_spill] sm:$0xff] }
 0x33c   : > { %2615 = vmatprep.subr.mxu0 %v7154_v15  ;;  %2686 = vmatprep.subr.mxu1 %v7156_v16  ;;  %v11482_v15 = vld [vmem:[#allocation52_spill] sm:$0xff]  ;;  %v11483_v16 = vld [vmem:[#allocation53_spill] sm:$0xff] }
 0x33d   : > { %2616 = vmatpush1.msra.mxu0 %v7160_v19  ;;  %2687 = vmatpush1.msra.mxu1 %v7162_v20  ;;  %v11484_v19 = vld [vmem:[#allocation54_spill] sm:$0xff]  ;;  %v11485_v20 = vld [vmem:[#allocation55_spill] sm:$0xff] }
 0x33e   : > { %2617 = vmatprep.subr.mxu0 %v11475_v56  ;;  %2688 = vmatprep.subr.mxu1 %v11476_v21  ;;  %v11486_v56 = vld [vmem:[#allocation56_spill] sm:$0xff]  ;;  %v11487_v21 = vld [vmem:[#allocation57_spill] sm:$0xff] }
 0x33f   : > { %2618 = vmatpush1.msra.mxu0 %v11477_v2  ;;  %2689 = vmatpush1.msra.mxu1 %v11478_v7  ;;  %v11488_v2 = vld [vmem:[#allocation58_spill] sm:$0xff]  ;;  %v11489_v7 = vld [vmem:[#allocation59_spill] sm:$0xff] }
 0x340   : > { %2619 = vmatprep.subr.mxu0 %v11479_v8  ;;  %2690 = vmatprep.subr.mxu1 %v11480_v9  ;;  %v11490_v8 = vld [vmem:[#allocation60_spill] sm:$0xff]  ;;  %v11491_v9 = vld [vmem:[#allocation61_spill] sm:$0xff] }
 0x341   : > { %2620 = vmatpush1.msra.mxu0 %v11481_v11  ;;  %2691 = vmatpush1.msra.mxu1 %v11482_v15  ;;  %v11492_v11 = vld [vmem:[#allocation62_spill] sm:$0xff]  ;;  %v11493_v15 = vld [vmem:[#allocation63_spill] sm:$0xff] }
 0x342   : > { %2621 = vmatprep.subr.mxu0 %v11483_v16  ;;  %2692 = vmatprep.subr.mxu1 %v11484_v19  ;;  %v11494_v16 = vld [vmem:[#allocation64_spill] sm:$0xff]  ;;  %v11495_v19 = vld [vmem:[#allocation65_spill] sm:$0xff] }
 0x343   : > { %2622 = vmatpush1.msra.mxu0 %v11485_v20  ;;  %2693 = vmatpush1.msra.mxu1 %v11486_v56  ;;  %v11496_v20 = vld [vmem:[#allocation66_spill] sm:$0xff]  ;;  %v11497_v56 = vld [vmem:[#allocation67_spill] sm:$0xff] }
 0x344   : > { %2623 = vmatprep.subr.mxu0 %v11487_v21  ;;  %2694 = vmatprep.subr.mxu1 %v11488_v2  ;;  %v11498_v21 = vld [vmem:[#allocation68_spill] sm:$0xff]  ;;  %v11499_v2 = vld [vmem:[#allocation69_spill] sm:$0xff] }
 0x345   : > { %2624 = vmatpush1.msra.mxu0 %v11489_v7  ;;  %2695 = vmatpush1.msra.mxu1 %v11490_v8  ;;  %v11500_v7 = vld [vmem:[#allocation70_spill] sm:$0xff]  ;;  %v11501_v8 = vld [vmem:[#allocation71_spill] sm:$0xff] }
 0x346   : > { %2625 = vmatprep.subr.mxu0 %v11491_v9  ;;  %2696 = vmatprep.subr.mxu1 %v11492_v11  ;;  %v11502_v9 = vld [vmem:[#allocation72_spill] sm:$0xff]  ;;  %v11503_v11 = vld [vmem:[#allocation73_spill] sm:$0xff] }
 0x347   : > { %2626 = vmatpush1.msra.mxu0 %v11493_v15  ;;  %2697 = vmatpush1.msra.mxu1 %v11494_v16  ;;  %v11504_v15 = vld [vmem:[#allocation74_spill] sm:$0xff]  ;;  %v11505_v16 = vld [vmem:[#allocation75_spill] sm:$0xff] }
 0x348   : > { %2627 = vmatprep.subr.mxu0 %v11495_v19  ;;  %2698 = vmatprep.subr.mxu1 %v11496_v20  ;;  %v11506_v19 = vld [vmem:[#allocation76_spill] sm:$0xff]  ;;  %v11507_v20 = vld [vmem:[#allocation77_spill] sm:$0xff] }
 0x349   : > { %2628 = vmatpush1.msra.mxu0 %v11497_v56  ;;  %2699 = vmatpush1.msra.mxu1 %v11498_v21  ;;  %v11508_v56 = vld [vmem:[#allocation78_spill] sm:$0xff]  ;;  %v11509_v21 = vld [vmem:[#allocation79_spill] sm:$0xff] }
 0x34a   : > { %2629 = vmatprep.subr.mxu0 %v11499_v2  ;;  %2700 = vmatprep.subr.mxu1 %v11500_v7  ;;  %v11510_v2 = vld [vmem:[#allocation80_spill] sm:$0xff]  ;;  %v11511_v7 = vld [vmem:[#allocation81_spill] sm:$0xff] }
 0x34b   : > { %2630 = vmatpush1.msra.mxu0 %v11501_v8  ;;  %2701 = vmatpush1.msra.mxu1 %v11502_v9  ;;  %v11512_v8 = vld [vmem:[#allocation82_spill] sm:$0xff]  ;;  %v11513_v9 = vld [vmem:[#allocation83_spill] sm:$0xff] }
 0x34c   : > { %2631 = vmatprep.subr.mxu0 %v11503_v11  ;;  %2702 = vmatprep.subr.mxu1 %v11504_v15  ;;  %v11514_v11 = vld [vmem:[#allocation84_spill] sm:$0xff]  ;;  %v11515_v15 = vld [vmem:[#allocation85_spill] sm:$0xff] }
 0x34d   : > { %2632 = vmatpush1.msra.mxu0 %v11505_v16  ;;  %2703 = vmatpush1.msra.mxu1 %v11506_v19  ;;  %v11516_v16 = vld [vmem:[#allocation86_spill] sm:$0xff]  ;;  %v11517_v19 = vld [vmem:[#allocation87_spill] sm:$0xff] }
 0x34e   : > { %2633 = vmatprep.subr.mxu0 %v11507_v20  ;;  %2704 = vmatprep.subr.mxu1 %v11508_v56  ;;  %v11518_v20 = vld [vmem:[#allocation88_spill] sm:$0xff]  ;;  %v11519_v56 = vld [vmem:[#allocation89_spill] sm:$0xff] }
 0x34f   : > { %2634 = vmatpush1.msra.mxu0 %v11509_v21  ;;  %2705 = vmatpush1.msra.mxu1 %v11510_v2  ;;  %v11520_v21 = vld [vmem:[#allocation90_spill] sm:$0xff]  ;;  %v11521_v2 = vld [vmem:[#allocation91_spill] sm:$0xff] }
 0x350   : > { %2635 = vmatprep.subr.mxu0 %v11511_v7  ;;  %2706 = vmatprep.subr.mxu1 %v11512_v8  ;;  %v11522_v7 = vld [vmem:[#allocation92_spill] sm:$0xff]  ;;  %v11523_v8 = vld [vmem:[#allocation93_spill] sm:$0xff] }
 0x351   : > { %2636 = vmatpush1.msra.mxu0 %v11513_v9  ;;  %2707 = vmatpush1.msra.mxu1 %v11514_v11  ;;  %v11524_v9 = vld [vmem:[#allocation94_spill] sm:$0xff]  ;;  %v11525_v11 = vld [vmem:[#allocation95_spill] sm:$0xff] }
 0x352   : > { %2637 = vmatprep.subr.mxu0 %v11515_v15  ;;  %2708 = vmatprep.subr.mxu1 %v11516_v16  ;;  %v11526_v15 = vld [vmem:[#allocation96_spill] sm:$0xff]  ;;  %v11527_v16 = vld [vmem:[#allocation97_spill] sm:$0xff] }
 0x353   : > { %2638 = vmatpush1.msra.mxu0 %v11517_v19  ;;  %2709 = vmatpush1.msra.mxu1 %v11518_v20  ;;  %v11528_v19 = vld [vmem:[#allocation98_spill] sm:$0xff]  ;;  %v11529_v20 = vld [vmem:[#allocation99_spill] sm:$0xff] }
 0x354   : > { %2639 = vmatprep.subr.mxu0 %v11519_v56  ;;  %2710 = vmatprep.subr.mxu1 %v11520_v21  ;;  %v11530_v56 = vld [vmem:[#allocation100_spill] sm:$0xff]  ;;  %v11531_v21 = vld [vmem:[#allocation101_spill] sm:$0xff] }
 0x355   : > { %2640 = vmatpush2.msra.mxu0 %v11521_v2  ;;  %2711 = vmatpush2.msra.mxu1 %v11522_v7  ;;  %v11532_v2 = vld [vmem:[#allocation102_spill] sm:$0xff]  ;;  %v11533_v7 = vld [vmem:[#allocation103_spill] sm:$0xff] }
 0x356   : > { %2641 = vmatprep.subr.mxu0 %v11523_v8  ;;  %2712 = vmatprep.subr.mxu1 %v11524_v9  ;;  %v11534_v8 = vld [vmem:[#allocation104_spill] sm:$0xff]  ;;  %v11535_v9 = vld [vmem:[#allocation105_spill] sm:$0xff] }
 0x357   : > { %2642 = vmatpush2.msra.mxu0 %v11525_v11  ;;  %2713 = vmatpush2.msra.mxu1 %v11526_v15  ;;  %v11536_v11 = vld [vmem:[#allocation106_spill] sm:$0xff]  ;;  %v11537_v15 = vld [vmem:[#allocation107_spill] sm:$0xff] }
 0x358   : > { %2643 = vmatprep.subr.mxu0 %v11527_v16  ;;  %2714 = vmatprep.subr.mxu1 %v11528_v19  ;;  %v11538_v16 = vld [vmem:[#allocation108_spill] sm:$0xff]  ;;  %v11539_v19 = vld [vmem:[#allocation109_spill] sm:$0xff] }
 0x359   : > { %2644 = vmatpush2.msra.mxu0 %v11529_v20  ;;  %2715 = vmatpush2.msra.mxu1 %v11530_v56  ;;  %v11540_v20 = vld [vmem:[#allocation110_spill] sm:$0xff]  ;;  %v11541_v56 = vld [vmem:[#allocation111_spill] sm:$0xff] }
 0x35a   : > { %2645 = vmatprep.subr.mxu0 %v11531_v21  ;;  %2716 = vmatprep.subr.mxu1 %v11532_v2  ;;  %v11542_v21 = vld [vmem:[#allocation112_spill] sm:$0xff]  ;;  %v11543_v2 = vld [vmem:[#allocation113_spill] sm:$0xff] }
 0x35b   : > { %2646 = vmatpush2.msra.mxu0 %v11533_v7  ;;  %2717 = vmatpush2.msra.mxu1 %v11534_v8  ;;  %v11544_v7 = vld [vmem:[#allocation114_spill] sm:$0xff]  ;;  %v11545_v8 = vld [vmem:[#allocation115_spill] sm:$0xff] }
 0x35c   : > { %2647 = vmatprep.subr.mxu0 %v11535_v9  ;;  %2718 = vmatprep.subr.mxu1 %v11536_v11  ;;  %v11546_v9 = vld [vmem:[#allocation116_spill] sm:$0xff]  ;;  %v11547_v11 = vld [vmem:[#allocation117_spill] sm:$0xff] }
 0x35d   : > { %2648 = vmatpush2.msra.mxu0 %v11537_v15  ;;  %2719 = vmatpush2.msra.mxu1 %v11538_v16  ;;  %v11548_v15 = vld [vmem:[#allocation118_spill] sm:$0xff]  ;;  %v11549_v16 = vld [vmem:[#allocation119_spill] sm:$0xff] }
 0x35e   : > { %2649 = vmatprep.subr.mxu0 %v11539_v19  ;;  %2720 = vmatprep.subr.mxu1 %v11540_v20  ;;  %v11550_v19 = vld [vmem:[#allocation120_spill] sm:$0xff]  ;;  %v11551_v20 = vld [vmem:[#allocation121_spill] sm:$0xff] }
 0x35f   : > { %2650 = vmatpush2.msra.mxu0 %v11541_v56  ;;  %2721 = vmatpush2.msra.mxu1 %v11542_v21  ;;  %v11552_v56 = vld [vmem:[#allocation122_spill] sm:$0xff]  ;;  %v11553_v21 = vld [vmem:[#allocation123_spill] sm:$0xff] }
 0x360   : > { %2651 = vmatprep.subr.mxu0 %v11543_v2  ;;  %2722 = vmatprep.subr.mxu1 %v11544_v7  ;;  %v11554_v2 = vld [vmem:[#allocation124_spill] sm:$0xff]  ;;  %v11555_v7 = vld [vmem:[#allocation125_spill] sm:$0xff] }
 0x361   : > { %2652 = vmatpush2.msra.mxu0 %v11545_v8  ;;  %2723 = vmatpush2.msra.mxu1 %v11546_v9  ;;  %v11556_v8 = vld [vmem:[#allocation126_spill] sm:$0xff]  ;;  %v11557_v9 = vld [vmem:[#allocation127_spill] sm:$0xff] }
 0x362   : > { %2653 = vmatprep.subr.mxu0 %v11547_v11  ;;  %2724 = vmatprep.subr.mxu1 %v11548_v15  ;;  %v11558_v11 = vld [vmem:[#allocation128_spill] sm:$0xff]  ;;  %v11559_v15 = vld [vmem:[#allocation129_spill] sm:$0xff] }
 0x363   : > { %2654 = vmatpush2.msra.mxu0 %v11549_v16  ;;  %2725 = vmatpush2.msra.mxu1 %v11550_v19  ;;  %v11560_v16 = vld [vmem:[#allocation130_spill] sm:$0xff]  ;;  %v11561_v19 = vld [vmem:[#allocation131_spill] sm:$0xff] }
 0x364   : > { %2655 = vmatprep.subr.mxu0 %v11551_v20  ;;  %2726 = vmatprep.subr.mxu1 %v11552_v56  ;;  %v11562_v20 = vld [vmem:[#allocation132_spill] sm:$0xff]  ;;  %v11563_v56 = vld [vmem:[#allocation133_spill] sm:$0xff] }
 0x365   : > { %2656 = vmatpush2.msra.mxu0 %v11553_v21  ;;  %2727 = vmatpush2.msra.mxu1 %v11554_v2  ;;  %v11564_v21 = vld [vmem:[#allocation134_spill] sm:$0xff]  ;;  %v11565_v2 = vld [vmem:[#allocation135_spill] sm:$0xff] }
 0x366   : > { %2657 = vmatprep.subr.mxu0 %v11555_v7  ;;  %2728 = vmatprep.subr.mxu1 %v11556_v8  ;;  %v11566_v7 = vld [vmem:[#allocation136_spill] sm:$0xff]  ;;  %v11567_v8 = vld [vmem:[#allocation137_spill] sm:$0xff] }
 0x367   : > { %2658 = vmatpush2.msra.mxu0 %v11557_v9  ;;  %2729 = vmatpush2.msra.mxu1 %v11558_v11  ;;  %v11568_v9 = vld [vmem:[#allocation138_spill] sm:$0xff]  ;;  %v11569_v11 = vld [vmem:[#allocation139_spill] sm:$0xff] }
 0x368   : > { %2659 = vmatprep.subr.mxu0 %v11559_v15  ;;  %2730 = vmatprep.subr.mxu1 %v11560_v16  ;;  %v11570_v15 = vld [vmem:[#allocation140_spill] sm:$0xff]  ;;  %v11571_v16 = vld [vmem:[#allocation141_spill] sm:$0xff] }
 0x369   : > { %2660 = vmatpush2.msra.mxu0 %v11561_v19  ;;  %2731 = vmatpush2.msra.mxu1 %v11562_v20  ;;  %v11572_v19 = vld [vmem:[#allocation142_spill] sm:$0xff]  ;;  %v11573_v20 = vld [vmem:[#allocation143_spill] sm:$0xff] }
 0x36a   : > { %2661 = vmatprep.subr.mxu0 %v11563_v56  ;;  %2732 = vmatprep.subr.mxu1 %v11564_v21  ;;  %v11574_v56 = vld [vmem:[#allocation144_spill] sm:$0xff]  ;;  %v11575_v21 = vld [vmem:[#allocation145_spill] sm:$0xff] }
 0x36b   : > { %2662 = vmatpush2.msra.mxu0 %v11565_v2  ;;  %2733 = vmatpush2.msra.mxu1 %v11566_v7  ;;  %v11576_v2 = vld [vmem:[#allocation146_spill] sm:$0xff]  ;;  %v11577_v7 = vld [vmem:[#allocation147_spill] sm:$0xff] }
 0x36c   : > { %2663 = vmatprep.subr.mxu0 %v11567_v8  ;;  %2734 = vmatprep.subr.mxu1 %v11568_v9  ;;  %v11578_v8 = vld [vmem:[#allocation148_spill] sm:$0xff]  ;;  %v11579_v9 = vld [vmem:[#allocation149_spill] sm:$0xff] }
 0x36d   : > { %2664 = vmatpush2.msra.mxu0 %v11569_v11  ;;  %2735 = vmatpush2.msra.mxu1 %v11570_v15  ;;  %v11580_v11 = vld [vmem:[#allocation150_spill] sm:$0xff]  ;;  %v11581_v15 = vld [vmem:[#allocation151_spill] sm:$0xff] }
 0x36e   : > { %2665 = vmatprep.subr.mxu0 %v11571_v16  ;;  %2736 = vmatprep.subr.mxu1 %v11572_v19  ;;  %v11582_v16 = vld [vmem:[#allocation152_spill] sm:$0xff]  ;;  %v11583_v19 = vld [vmem:[#allocation153_spill] sm:$0xff] }
 0x36f   : > { %2666 = vmatpush2.msra.mxu0 %v11573_v20  ;;  %2737 = vmatpush2.msra.mxu1 %v11574_v56  ;;  %v11584_v20 = vld [vmem:[#allocation154_spill] sm:$0xff] }
 0x370   : > { %2667 = vmatprep.subr.mxu0 %v11575_v21  ;;  %2738 = vmatprep.subr.mxu1 %v11576_v2  ;;  %v11586_v2 = vld [vmem:[#allocation281_spill] sm:$0xff] }
 0x371   : > { %2668 = vmatpush2.msra.mxu0 %v11577_v7  ;;  %2739 = vmatpush2.msra.mxu1 %v11578_v8  ;;  %v1456_v17 = vadd.f32 %v11586_v2, %v11585_v1  ;;  %v11587_v7 = vld [vmem:[#allocation340_spill] sm:$0xff] }
 0x372   : > { %2669 = vmatprep.subr.mxu0 %v11579_v9  ;;  %2740 = vmatprep.subr.mxu1 %v11580_v11  ;;  %v1569_v8 = vadd.f32 %v11588_v61, %v11587_v7  ;;  %v11589_v9 = vld [vmem:[#allocation283_spill] sm:$0xff] }
 0x373   : > { %2670 = vmatpush2.msra.mxu0 %v11581_v15  ;;  %2741 = vmatpush2.msra.mxu1 %v11582_v16  ;;  %v1458_v11 = vadd.f32 %v11589_v9, %v8301_v4  ;;  %v11590_v16 = vld [vmem:[#allocation284_spill] sm:$0xff] }
 0x374   : > { %2749 = vmatprep.subr.mxu0 %v11583_v19  ;;  %2820 = vmatprep.subr.mxu1 %v11584_v20  ;;  %v1571_v19 = vadd.f32 %v11590_v16, %v8305_v37 }
 0x3b2   : > { %v2323_v56 = vpop.f32.mrf.mxu0  ;;  %v2394_v21 = vpop.f32.mrf.mxu1 }
 0x3b3   : > { %v2541_v58 = vadd.f32 %v2323_v56, %v1456_v17  ;;  %v2543_v15 = vadd.f32 %v2394_v21, %v1569_v8  ;;  %v11591_v56 = vld [vmem:[#allocation309_spill] sm:$0xff] }
 0x3b4   : > { %v2325_v59 = vpop.f32.mrf.mxu0  ;;  %v2396_v57 = vpop.f32.mrf.mxu1  ;;  %v1682_v16 = vadd.f32 %v11591_v56, %v8313_v47 }
 0x3b5   : > { %v2542_v53 = vadd.f32 %v2325_v59, %v1458_v11  ;;  %v5559_v20 = vmul.f32 -1.442695, %v2541_v58  ;;  %v2544_v52 = vadd.f32 %v2396_v57, %v1571_v19  ;;  %v5561_v51 = vmul.f32 -1.442695, %v2543_v15  ;;  %v11592_v58 = vld [vmem:[#allocation310_spill] sm:$0xff]  ;;  %v11594_v11 = vld [vmem:[#allocation312_spill] sm:$0xff] }
 0x3b6   : > { %v1795_v57 = vadd.f32 %v11592_v58, %v8315_v5  ;;  %v1797_v15 = vadd.f32 %v11594_v11, %v8319_v28 }
 0x3b7   : > { %v5560_v50 = vmul.f32 -1.442695, %v2542_v53  ;;  %5924 = vpow2.f32 %v5559_v20  ;;  %v5562_v2 = vmul.f32 -1.442695, %v2544_v52  ;;  %v11593_v53 = vld [vmem:[#allocation311_spill] sm:$0xff] }
 0x3b8   : > { %5926 = vpow2.f32 %v5561_v51  ;;  %v1684_v59 = vadd.f32 %v11593_v53, %v8317_v36 }
 0x3b9   : > { %5928 = vpow2.f32 %v5560_v50 }
 0x3ba   : > { %5930 = vpow2.f32 %v5562_v2 }
 0x3c4   : > { %v5925_v61 = vpop.eup %5924 }
 0x3c5   : > { %v5927_v7 = vpop.eup %5926  ;;  %v2555_v9 = vadd.f32 1.0, %v5925_v61 }
 0x3c6   : > { %v5929_v1 = vpop.eup %5928  ;;  %v2567_v21 = vadd.f32 1.0, %v5927_v7 }
 0x3c7   : > { %v5931_v17 = vpop.eup %5930  ;;  %v2556_v8 = vadd.f32 1.0, %v5929_v1  ;;  %5932 = vrcp.f32 %v2555_v9 }
 0x3c8   : > { %v2568_v51 = vadd.f32 1.0, %v5931_v17  ;;  %5934 = vrcp.f32 %v2567_v21 }
 0x3c9   : > { %5936 = vrcp.f32 %v2556_v8 }
 0x3d4   : > { %v5933_v9 = vpop.eup %5932 }
 0x3d5   : > { %v5935_v17 = vpop.eup %5934 }
 0x3d6   : > { %v5937_v53 = vpop.eup %5936  ;;  %v2587_v21 = vmul.f32 %v5935_v17, %v8329_v0  ;;  %v11599_v17 = vld [vmem:[#allocation168_spill] sm:$0xff] }
 0x3f3   : > { %v2465_v50 = vpop.f32.mrf.mxu0  ;;  %v2536_v52 = vpop.f32.mrf.mxu1 }
 0x3f4   : > { %v2545_v19 = vadd.f32 %v2465_v50, %v1682_v16  ;;  %v2547_v7 = vadd.f32 %v2536_v52, %v1795_v57 }
 0x3f5   : > { %v2467_v1 = vpop.f32.mrf.mxu0  ;;  %v2538_v20 = vpop.f32.mrf.mxu1 }
 0x3f6   : > { %5938 = vtanh.f32 %v2545_v19  ;;  %v5563_v2 = vmul.f32 -1.442695, %v2547_v7  ;;  %v2546_v61 = vadd.f32 %v2467_v1, %v1684_v59  ;;  %v2548_v56 = vadd.f32 %v2538_v20, %v1797_v15 }
 0x3f7   : > { %5940 = vrcp.f32 %v2568_v51 }
 0x3f8   : > { %5942 = vpow2.f32 %v5563_v2  ;;  %v5564_v58 = vmul.f32 -1.442695, %v2548_v56  ;;  %v11596_v56 = vld [vmem:[#allocation165_spill] sm:$0xff] }
 0x3f9   : > { %5944 = vtanh.f32 %v2546_v61 }
 0x3fa   : > { %5946 = vpow2.f32 %v5564_v58  ;;  %v11597_v58 = vld [vmem:[#allocation166_spill] sm:$0xff] }
 0x403   : > { %v5939_v36 = vpop.eup %5938 }
 0x404   : > { %v5941_v11 = vpop.eup %5940  ;;  %v2589_v16 = vmul.f32 %v5939_v36, %v5933_v9  ;;  %v11598_v9 = vld [vmem:[#allocation167_spill] sm:$0xff] }
 0x405   : > { %v5943_v8 = vpop.eup %5942  ;;  %v2588_v51 = vmul.f32 %v5941_v11, %v8332_v45  ;;  %v11595_v45 = vld [vmem:[#allocation164_spill] sm:$0xff]  ;;  %v11601_v11 = vld [vmem:[#allocation170_spill] sm:$0xff] }
 0x406   : > { %v5945_v57 = vpop.eup %5944  ;;  %v8615_v50 = vadd.f32 %v2589_v16, %v2587_v21  ;;  %v2581_v52 = vadd.f32 1.0, %v5943_v8  ;;  %v11602_v21 = vld [vmem:[#allocation171_spill] sm:$0xff]  ;;  %v11603_v16 = vld [vmem:[#allocation172_spill] sm:$0xff]  ;;  %v11604_v8 = vld [vmem:[#allocation173_spill] sm:$0xff] }
 0x407   : > { %v5947_v59 = vpop.eup %5946  ;;  %v2590_v15 = vmul.f32 %v5945_v57, %v5937_v53  ;;  %v11600_v53 = vld [vmem:[#allocation169_spill] sm:$0xff]  ;;  %v11605_v57 = vld [vmem:[#allocation174_spill] sm:$0xff] }
 0x408   : > { %5948 = vtanh.f32 %v8615_v50  ;;  %v2582_v19 = vadd.f32 1.0, %v5947_v59  ;;  %v11607_v59 = vld [vmem:[#allocation176_spill] sm:$0xff] }
 0x409   : > { %5950 = vrcp.f32 %v2581_v52  ;;  %v8619_v7 = vadd.f32 %v2590_v15, %v2588_v51  ;;  %v11606_v52 = vld [vmem:[#allocation175_spill] sm:$0xff]  ;;  %v11608_v51 = vld [vmem:[#allocation177_spill] sm:$0xff]  ;;  %v11609_v15 = vld [vmem:[#allocation178_spill] sm:$0xff] }
 0x40a   : > { %5952 = vrcp.f32 %v2582_v19  ;;  %v11610_v19 = vld [vmem:[#allocation179_spill] sm:$0xff] }
 0x40b   : > { %5954 = vtanh.f32 %v8619_v7 }
 0x415   : > { %v5949_v0 = vpop.eup %5948 }
 0x416   : > { %v5951_v36 = vpop.eup %5950 }
 0x417   : > { %v5953_v1 = vpop.eup %5952  ;;  %v8622_v20 = vmul.f32 %v5951_v36, %v5949_v0  ;;  %v11611_v0 = vld [vmem:[#allocation180_spill] sm:$0xff]  ;;  %v11612_v36 = vld [vmem:[#allocation181_spill] sm:$0xff] }
 0x418   : > { %v5955_v2 = vpop.eup %5954 }
 0x419   : > { %v2596_v61 = vmul.f32 %v5955_v2, %v5953_v1  ;;  %2597 = vst [vmem:[#allocation2 + $0x58] sm:$0xff] %v8622_v20  ;;  %v11613_v1 = vld [vmem:[#allocation182_spill] sm:$0xff]  ;;  %v11614_v2 = vld [vmem:[#allocation183_spill] sm:$0xff] }
 0x41b   : > { %2598 = vst [vmem:[#allocation2 + $0x18] sm:$0xff] %v2596_v61  ;;  %2671 = vmatprep.mubr.f32.mxu0 %v2596_v61  ;;  %2742 = vmatprep.mubr.f32.mxu1 %v2596_v61 }
 0x41c   : > { %2672 = vmatmul.mubr.f32.vlgmr.msra.gmra.mxu0 %v8622_v20  ;;  %2743 = vmatmul.mubr.f32.vlgmr.msra.gmra.mxu1 %v8622_v20 }
 0x41d   : > { %2750 = vmatpush1.msra.mxu0 %v11364_v12  ;;  %2821 = vmatpush1.msra.mxu1 %v11365_v41 }
 0x41e   : > { %2751 = vmatprep.subr.mxu0 %v11366_v46  ;;  %2813 = vmatprep.mubr.f32.mxu0 %v2596_v61 }
 0x41f   : > { %2822 = vmatprep.subr.mxu1 %v11367_v3  ;;  %2884 = vmatprep.mubr.f32.mxu1 %v2596_v61  ;;  %v11615_v61 = vld [vmem:[#allocation184_spill] sm:$0xff] }
 0x420   : > { %2752 = vmatpush1.msra.mxu0 %v11368_v35  ;;  %2823 = vmatpush1.msra.mxu1 %v11369_v39 }
 0x421   : > { %2753 = vmatprep.subr.mxu0 %v11370_v29  ;;  %2824 = vmatprep.subr.mxu1 %v11371_v25 }
 0x422   : > { %2754 = vmatpush1.msra.mxu0 %v11372_v44  ;;  %2825 = vmatpush1.msra.mxu1 %v11595_v45 }
 0x423   : > { %2755 = vmatprep.subr.mxu0 %v11596_v56  ;;  %2826 = vmatprep.subr.mxu1 %v11597_v58 }
 0x424   : > { %2756 = vmatpush1.msra.mxu0 %v11598_v9  ;;  %2827 = vmatpush1.msra.mxu1 %v11599_v17 }
 0x425   : > { %2757 = vmatprep.subr.mxu0 %v11600_v53  ;;  %2828 = vmatprep.subr.mxu1 %v11601_v11 }
 0x426   : > { %2758 = vmatpush1.msra.mxu0 %v11602_v21  ;;  %2829 = vmatpush1.msra.mxu1 %v11603_v16 }
 0x427   : > { %2759 = vmatprep.subr.mxu0 %v11604_v8  ;;  %2830 = vmatprep.subr.mxu1 %v11605_v57  ;;  %v11616_v57 = vld [vmem:[#allocation185_spill] sm:$0xff] }
 0x428   : > { %2760 = vmatpush1.msra.mxu0 %v11606_v52  ;;  %2831 = vmatpush1.msra.mxu1 %v11607_v59  ;;  %v11617_v52 = vld [vmem:[#allocation186_spill] sm:$0xff]  ;;  %v11618_v59 = vld [vmem:[#allocation187_spill] sm:$0xff] }
 0x429   : > { %2761 = vmatprep.subr.mxu0 %v11608_v51  ;;  %2832 = vmatprep.subr.mxu1 %v11609_v15  ;;  %v11619_v51 = vld [vmem:[#allocation188_spill] sm:$0xff]  ;;  %v11620_v15 = vld [vmem:[#allocation189_spill] sm:$0xff] }
 0x42a   : > { %2762 = vmatpush1.msra.mxu0 %v11610_v19  ;;  %2833 = vmatpush1.msra.mxu1 %v11611_v0  ;;  %v11621_v19 = vld [vmem:[#allocation190_spill] sm:$0xff]  ;;  %v11622_v0 = vld [vmem:[#allocation191_spill] sm:$0xff] }
 0x42b   : > { %2763 = vmatprep.subr.mxu0 %v11612_v36  ;;  %2834 = vmatprep.subr.mxu1 %v11613_v1  ;;  %v11623_v36 = vld [vmem:[#allocation192_spill] sm:$0xff]  ;;  %v11624_v1 = vld [vmem:[#allocation193_spill] sm:$0xff] }
 0x42c   : > { %2764 = vmatpush1.msra.mxu0 %v11614_v2  ;;  %2835 = vmatpush1.msra.mxu1 %v11615_v61  ;;  %v11625_v2 = vld [vmem:[#allocation194_spill] sm:$0xff]  ;;  %v11626_v61 = vld [vmem:[#allocation195_spill] sm:$0xff] }
 0x42d   : > { %2765 = vmatprep.subr.mxu0 %v11616_v57  ;;  %2836 = vmatprep.subr.mxu1 %v11617_v52  ;;  %v11627_v57 = vld [vmem:[#allocation196_spill] sm:$0xff]  ;;  %v11628_v52 = vld [vmem:[#allocation197_spill] sm:$0xff] }
 0x42e   : > { %2766 = vmatpush1.msra.mxu0 %v11618_v59  ;;  %2837 = vmatpush1.msra.mxu1 %v11619_v51  ;;  %v11629_v59 = vld [vmem:[#allocation198_spill] sm:$0xff]  ;;  %v11630_v51 = vld [vmem:[#allocation199_spill] sm:$0xff] }
 0x42f   : > { %2767 = vmatprep.subr.mxu0 %v11620_v15  ;;  %2838 = vmatprep.subr.mxu1 %v11621_v19  ;;  %v11631_v15 = vld [vmem:[#allocation200_spill] sm:$0xff]  ;;  %v11632_v19 = vld [vmem:[#allocation201_spill] sm:$0xff] }
 0x430   : > { %2768 = vmatpush1.msra.mxu0 %v11622_v0  ;;  %2839 = vmatpush1.msra.mxu1 %v11623_v36  ;;  %v11633_v0 = vld [vmem:[#allocation202_spill] sm:$0xff]  ;;  %v11634_v36 = vld [vmem:[#allocation203_spill] sm:$0xff] }
 0x431   : > { %2769 = vmatprep.subr.mxu0 %v11624_v1  ;;  %2840 = vmatprep.subr.mxu1 %v11625_v2  ;;  %v11635_v1 = vld [vmem:[#allocation204_spill] sm:$0xff]  ;;  %v11636_v2 = vld [vmem:[#allocation205_spill] sm:$0xff] }
 0x432   : > { %2770 = vmatpush1.msra.mxu0 %v11626_v61  ;;  %2841 = vmatpush1.msra.mxu1 %v11627_v57  ;;  %v11637_v61 = vld [vmem:[#allocation206_spill] sm:$0xff]  ;;  %v11638_v57 = vld [vmem:[#allocation207_spill] sm:$0xff] }
 0x433   : > { %2771 = vmatprep.subr.mxu0 %v11628_v52  ;;  %2842 = vmatprep.subr.mxu1 %v11629_v59  ;;  %v11639_v52 = vld [vmem:[#allocation208_spill] sm:$0xff]  ;;  %v11640_v59 = vld [vmem:[#allocation209_spill] sm:$0xff] }
 0x434   : > { %2772 = vmatpush1.msra.mxu0 %v11630_v51  ;;  %2843 = vmatpush1.msra.mxu1 %v11631_v15  ;;  %v11641_v51 = vld [vmem:[#allocation210_spill] sm:$0xff]  ;;  %v11642_v15 = vld [vmem:[#allocation211_spill] sm:$0xff] }
 0x435   : > { %2773 = vmatprep.subr.mxu0 %v11632_v19  ;;  %2844 = vmatprep.subr.mxu1 %v11633_v0  ;;  %v11643_v19 = vld [vmem:[#allocation212_spill] sm:$0xff]  ;;  %v11644_v0 = vld [vmem:[#allocation213_spill] sm:$0xff] }
 0x436   : > { %2774 = vmatpush1.msra.mxu0 %v11634_v36  ;;  %2845 = vmatpush1.msra.mxu1 %v11635_v1  ;;  %v11645_v36 = vld [vmem:[#allocation214_spill] sm:$0xff]  ;;  %v11646_v1 = vld [vmem:[#allocation215_spill] sm:$0xff] }
 0x437   : > { %2775 = vmatprep.subr.mxu0 %v11636_v2  ;;  %2846 = vmatprep.subr.mxu1 %v11637_v61  ;;  %v11647_v2 = vld [vmem:[#allocation216_spill] sm:$0xff]  ;;  %v11648_v61 = vld [vmem:[#allocation217_spill] sm:$0xff] }
 0x438   : > { %2776 = vmatpush1.msra.mxu0 %v11638_v57  ;;  %2847 = vmatpush1.msra.mxu1 %v11639_v52  ;;  %v11649_v57 = vld [vmem:[#allocation218_spill] sm:$0xff]  ;;  %v11650_v52 = vld [vmem:[#allocation219_spill] sm:$0xff] }
 0x439   : > { %2777 = vmatprep.subr.mxu0 %v11640_v59  ;;  %2848 = vmatprep.subr.mxu1 %v11641_v51  ;;  %v11651_v59 = vld [vmem:[#allocation220_spill] sm:$0xff]  ;;  %v11652_v51 = vld [vmem:[#allocation221_spill] sm:$0xff] }
 0x43a   : > { %2778 = vmatpush1.msra.mxu0 %v11642_v15  ;;  %2849 = vmatpush1.msra.mxu1 %v11643_v19  ;;  %v11653_v15 = vld [vmem:[#allocation222_spill] sm:$0xff]  ;;  %v11654_v19 = vld [vmem:[#allocation223_spill] sm:$0xff] }
 0x43b   : > { %2779 = vmatprep.subr.mxu0 %v11644_v0  ;;  %2850 = vmatprep.subr.mxu1 %v11645_v36  ;;  %v11655_v0 = vld [vmem:[#allocation224_spill] sm:$0xff]  ;;  %v11656_v36 = vld [vmem:[#allocation225_spill] sm:$0xff] }
 0x43c   : > { %2780 = vmatpush1.msra.mxu0 %v11646_v1  ;;  %2851 = vmatpush1.msra.mxu1 %v11647_v2  ;;  %v11657_v1 = vld [vmem:[#allocation226_spill] sm:$0xff]  ;;  %v11658_v2 = vld [vmem:[#allocation227_spill] sm:$0xff] }
 0x43d   : > { %2781 = vmatprep.subr.mxu0 %v11648_v61  ;;  %2852 = vmatprep.subr.mxu1 %v11649_v57  ;;  %v11659_v61 = vld [vmem:[#allocation228_spill] sm:$0xff]  ;;  %v11660_v57 = vld [vmem:[#allocation229_spill] sm:$0xff] }
 0x43e   : > { %2782 = vmatpush2.msra.mxu0 %v11650_v52  ;;  %2853 = vmatpush2.msra.mxu1 %v11651_v59  ;;  %v11661_v52 = vld [vmem:[#allocation230_spill] sm:$0xff]  ;;  %v11662_v59 = vld [vmem:[#allocation231_spill] sm:$0xff] }
 0x43f   : > { %2783 = vmatprep.subr.mxu0 %v11652_v51  ;;  %2854 = vmatprep.subr.mxu1 %v11653_v15  ;;  %v11663_v51 = vld [vmem:[#allocation232_spill] sm:$0xff]  ;;  %v11664_v15 = vld [vmem:[#allocation233_spill] sm:$0xff] }
 0x440   : > { %2784 = vmatpush2.msra.mxu0 %v11654_v19  ;;  %2855 = vmatpush2.msra.mxu1 %v11655_v0  ;;  %v11665_v19 = vld [vmem:[#allocation234_spill] sm:$0xff]  ;;  %v11666_v0 = vld [vmem:[#allocation235_spill] sm:$0xff] }
 0x441   : > { %2785 = vmatprep.subr.mxu0 %v11656_v36  ;;  %2856 = vmatprep.subr.mxu1 %v11657_v1  ;;  %v11667_v36 = vld [vmem:[#allocation236_spill] sm:$0xff]  ;;  %v11668_v1 = vld [vmem:[#allocation237_spill] sm:$0xff] }
 0x442   : > { %2786 = vmatpush2.msra.mxu0 %v11658_v2  ;;  %2857 = vmatpush2.msra.mxu1 %v11659_v61  ;;  %v11669_v2 = vld [vmem:[#allocation238_spill] sm:$0xff]  ;;  %v11670_v61 = vld [vmem:[#allocation239_spill] sm:$0xff] }
 0x443   : > { %2787 = vmatprep.subr.mxu0 %v11660_v57  ;;  %2858 = vmatprep.subr.mxu1 %v11661_v52  ;;  %v11671_v57 = vld [vmem:[#allocation240_spill] sm:$0xff]  ;;  %v11672_v52 = vld [vmem:[#allocation241_spill] sm:$0xff] }
 0x444   : > { %2788 = vmatpush2.msra.mxu0 %v11662_v59  ;;  %2859 = vmatpush2.msra.mxu1 %v11663_v51  ;;  %v11673_v59 = vld [vmem:[#allocation242_spill] sm:$0xff]  ;;  %v11674_v51 = vld [vmem:[#allocation243_spill] sm:$0xff] }
 0x445   : > { %2789 = vmatprep.subr.mxu0 %v11664_v15  ;;  %2860 = vmatprep.subr.mxu1 %v11665_v19  ;;  %v11675_v15 = vld [vmem:[#allocation244_spill] sm:$0xff]  ;;  %v11676_v19 = vld [vmem:[#allocation245_spill] sm:$0xff] }
 0x446   : > { %2790 = vmatpush2.msra.mxu0 %v11666_v0  ;;  %2861 = vmatpush2.msra.mxu1 %v11667_v36  ;;  %v11677_v0 = vld [vmem:[#allocation246_spill] sm:$0xff]  ;;  %v11678_v36 = vld [vmem:[#allocation247_spill] sm:$0xff] }
 0x447   : > { %2791 = vmatprep.subr.mxu0 %v11668_v1  ;;  %2862 = vmatprep.subr.mxu1 %v11669_v2  ;;  %v11679_v1 = vld [vmem:[#allocation248_spill] sm:$0xff]  ;;  %v11680_v2 = vld [vmem:[#allocation249_spill] sm:$0xff] }
 0x448   : > { %2792 = vmatpush2.msra.mxu0 %v11670_v61  ;;  %2863 = vmatpush2.msra.mxu1 %v11671_v57  ;;  %v11681_v61 = vld [vmem:[#allocation250_spill] sm:$0xff]  ;;  %v11682_v57 = vld [vmem:[#allocation251_spill] sm:$0xff] }
 0x449   : > { %2793 = vmatprep.subr.mxu0 %v11672_v52  ;;  %2864 = vmatprep.subr.mxu1 %v11673_v59  ;;  %v11683_v52 = vld [vmem:[#allocation252_spill] sm:$0xff] }
 0x44a   : > { %2794 = vmatpush2.msra.mxu0 %v11674_v51  ;;  %2865 = vmatpush2.msra.mxu1 %v11675_v15  ;;  %v11684_v51 = vld [vmem:[#allocation254_spill] sm:$0xff]  ;;  %v11685_v15 = vld [vmem:[#allocation255_spill] sm:$0xff] }
 0x44b   : > { %2795 = vmatprep.subr.mxu0 %v11676_v19  ;;  %2866 = vmatprep.subr.mxu1 %v11677_v0 }
 0x44c   : > { %2796 = vmatpush2.msra.mxu0 %v11678_v36  ;;  %2867 = vmatpush2.msra.mxu1 %v11679_v1 }
 0x44d   : > { %2797 = vmatprep.subr.mxu0 %v11680_v2  ;;  %2868 = vmatprep.subr.mxu1 %v11681_v61 }
 0x44e   : > { %2798 = vmatpush2.msra.mxu0 %v11682_v57  ;;  %2869 = vmatpush2.msra.mxu1 %v11683_v52 }
 0x44f   : > { %2799 = vmatprep.subr.mxu0 %v11462_v49  ;;  %2870 = vmatprep.subr.mxu1 %v11684_v51 }
 0x450   : > { %2800 = vmatpush2.msra.mxu0 %v11685_v15  ;;  %2871 = vmatpush2.msra.mxu1 %v11465_v43 }
 0x451   : > { %2801 = vmatprep.subr.mxu0 %v11466_v33  ;;  %2872 = vmatprep.subr.mxu1 %v11467_v34 }
 0x452   : > { %2802 = vmatpush2.msra.mxu0 %v11468_v18  ;;  %2873 = vmatpush2.msra.mxu1 %v11469_v42 }
 0x453   : > { %2803 = vmatprep.subr.mxu0 %v11470_v63  ;;  %2874 = vmatprep.subr.mxu1 %v11471_v23 }
 0x454   : > { %2804 = vmatpush2.msra.mxu0 %v11472_v27  ;;  %2875 = vmatpush2.msra.mxu1 %v7964_v62 }
 0x455   : > { %2805 = vmatprep.subr.mxu0 %v11473_v31  ;;  %2876 = vmatprep.subr.mxu1 %v11474_v13 }
 0x456   : > { %2806 = vmatpush2.msra.mxu0 %v7976_v6  ;;  %2877 = vmatpush2.msra.mxu1 %v7978_v60  ;;  %v11819_v60 = vld [vmem:[#allocation286_spill] sm:$0xff] }
 0x457   : > { %2807 = vmatprep.subr.mxu0 %v7984_v22  ;;  %2878 = vmatprep.subr.mxu1 %v7986_v55  ;;  %v11816_v55 = vld [vmem:[#allocation339_spill] sm:$0xff] }
 0x458   : > { %2808 = vmatpush2.msra.mxu0 %v7990_v32  ;;  %2879 = vmatpush2.msra.mxu1 %v7992_v30  ;;  %v11686_v30 = vld [vmem:[#allocation25_spill] sm:$0xff]  ;;  %v11695_v32 = vld [vmem:[#allocation34_spill] sm:$0xff] }
 0x459   : > { %2809 = vmatprep.subr.mxu0 %v7998_v14  ;;  %2880 = vmatprep.subr.mxu1 %v8000_v40  ;;  %v11687_v14 = vld [vmem:[#allocation26_spill] sm:$0xff]  ;;  %v11688_v40 = vld [vmem:[#allocation27_spill] sm:$0xff] }
 0x45a   : > { %2810 = vmatpush2.msra.mxu0 %v8004_v26  ;;  %2881 = vmatpush2.msra.mxu1 %v8006_v38  ;;  %v11689_v26 = vld [vmem:[#allocation28_spill] sm:$0xff]  ;;  %v11690_v38 = vld [vmem:[#allocation29_spill] sm:$0xff] }
 0x45b   : > { %2811 = vmatprep.subr.mxu0 %v8010_v10  ;;  %2882 = vmatprep.subr.mxu1 %v8012_v48  ;;  %v11691_v10 = vld [vmem:[#allocation30_spill] sm:$0xff]  ;;  %v11692_v48 = vld [vmem:[#allocation31_spill] sm:$0xff] }
 0x45c   : > { %2812 = vmatpush2.msra.mxu0 %v8016_v24  ;;  %2883 = vmatpush2.msra.mxu1 %v8020_v54  ;;  %v11693_v24 = vld [vmem:[#allocation32_spill] sm:$0xff]  ;;  %v11694_v54 = vld [vmem:[#allocation33_spill] sm:$0xff] }
 0x45d   : > { %2814 = vmatmul.mubr.f32.vlgmr.msra.gmra.mxu0 %v8622_v20  ;;  %2885 = vmatmul.mubr.f32.vlgmr.msra.gmra.mxu1 %v8622_v20  ;;  %v11696_v20 = vld [vmem:[#allocation35_spill] sm:$0xff] }
 0x45e   : > { %2957 = vmatprep.subr.mxu0 %v11686_v30  ;;  %3028 = vmatprep.subr.mxu1 %v11687_v14  ;;  %v11697_v30 = vld [vmem:[#allocation36_spill] sm:$0xff]  ;;  %v11698_v14 = vld [vmem:[#allocation37_spill] sm:$0xff] }
 0x45f   : > { %2958 = vmatpush1.msra.mxu0 %v11688_v40  ;;  %3029 = vmatpush1.msra.mxu1 %v11689_v26  ;;  %v11699_v40 = vld [vmem:[#allocation38_spill] sm:$0xff]  ;;  %v11700_v26 = vld [vmem:[#allocation39_spill] sm:$0xff] }
 0x460   : > { %2959 = vmatprep.subr.mxu0 %v11690_v38  ;;  %3030 = vmatprep.subr.mxu1 %v11691_v10  ;;  %v11701_v38 = vld [vmem:[#allocation40_spill] sm:$0xff]  ;;  %v11702_v10 = vld [vmem:[#allocation41_spill] sm:$0xff] }
 0x461   : > { %2960 = vmatpush1.msra.mxu0 %v11692_v48  ;;  %3031 = vmatpush1.msra.mxu1 %v11693_v24  ;;  %v11703_v48 = vld [vmem:[#allocation42_spill] sm:$0xff]  ;;  %v11704_v24 = vld [vmem:[#allocation43_spill] sm:$0xff] }
 0x462   : > { %2961 = vmatprep.subr.mxu0 %v11694_v54  ;;  %3032 = vmatprep.subr.mxu1 %v11695_v32  ;;  %v11705_v54 = vld [vmem:[#allocation44_spill] sm:$0xff]  ;;  %v11706_v32 = vld [vmem:[#allocation45_spill] sm:$0xff] }
 0x463   : > { %2962 = vmatpush1.msra.mxu0 %v11696_v20  ;;  %3033 = vmatpush1.msra.mxu1 %v11697_v30  ;;  %v11707_v20 = vld [vmem:[#allocation46_spill] sm:$0xff]  ;;  %v11708_v30 = vld [vmem:[#allocation47_spill] sm:$0xff] }
 0x464   : > { %2963 = vmatprep.subr.mxu0 %v11698_v14  ;;  %3034 = vmatprep.subr.mxu1 %v11699_v40  ;;  %v11709_v14 = vld [vmem:[#allocation48_spill] sm:$0xff]  ;;  %v11710_v40 = vld [vmem:[#allocation49_spill] sm:$0xff] }
 0x465   : > { %2964 = vmatpush1.msra.mxu0 %v11700_v26  ;;  %3035 = vmatpush1.msra.mxu1 %v11701_v38  ;;  %v11711_v26 = vld [vmem:[#allocation50_spill] sm:$0xff]  ;;  %v11712_v38 = vld [vmem:[#allocation51_spill] sm:$0xff] }
 0x466   : > { %2965 = vmatprep.subr.mxu0 %v11702_v10  ;;  %3036 = vmatprep.subr.mxu1 %v11703_v48  ;;  %v11713_v10 = vld [vmem:[#allocation52_spill] sm:$0xff]  ;;  %v11714_v48 = vld [vmem:[#allocation53_spill] sm:$0xff] }
 0x467   : > { %2966 = vmatpush1.msra.mxu0 %v11704_v24  ;;  %3037 = vmatpush1.msra.mxu1 %v11705_v54  ;;  %v11715_v24 = vld [vmem:[#allocation54_spill] sm:$0xff]  ;;  %v11716_v54 = vld [vmem:[#allocation55_spill] sm:$0xff] }
 0x468   : > { %2967 = vmatprep.subr.mxu0 %v11706_v32  ;;  %3038 = vmatprep.subr.mxu1 %v11707_v20  ;;  %v11717_v32 = vld [vmem:[#allocation56_spill] sm:$0xff]  ;;  %v11718_v20 = vld [vmem:[#allocation57_spill] sm:$0xff] }
 0x469   : > { %2968 = vmatpush1.msra.mxu0 %v11708_v30  ;;  %3039 = vmatpush1.msra.mxu1 %v11709_v14  ;;  %v11719_v30 = vld [vmem:[#allocation58_spill] sm:$0xff]  ;;  %v11720_v14 = vld [vmem:[#allocation59_spill] sm:$0xff] }
 0x46a   : > { %2969 = vmatprep.subr.mxu0 %v11710_v40  ;;  %3040 = vmatprep.subr.mxu1 %v11711_v26  ;;  %v11721_v40 = vld [vmem:[#allocation60_spill] sm:$0xff]  ;;  %v11722_v26 = vld [vmem:[#allocation61_spill] sm:$0xff] }
 0x46b   : > { %2970 = vmatpush1.msra.mxu0 %v11712_v38  ;;  %3041 = vmatpush1.msra.mxu1 %v11713_v10  ;;  %v11723_v38 = vld [vmem:[#allocation62_spill] sm:$0xff]  ;;  %v11724_v10 = vld [vmem:[#allocation63_spill] sm:$0xff] }
 0x46c   : > { %2971 = vmatprep.subr.mxu0 %v11714_v48  ;;  %3042 = vmatprep.subr.mxu1 %v11715_v24  ;;  %v11725_v48 = vld [vmem:[#allocation64_spill] sm:$0xff]  ;;  %v11726_v24 = vld [vmem:[#allocation65_spill] sm:$0xff] }
 0x46d   : > { %2972 = vmatpush1.msra.mxu0 %v11716_v54  ;;  %3043 = vmatpush1.msra.mxu1 %v11717_v32  ;;  %v11727_v54 = vld [vmem:[#allocation66_spill] sm:$0xff]  ;;  %v11728_v32 = vld [vmem:[#allocation67_spill] sm:$0xff] }
 0x46e   : > { %2973 = vmatprep.subr.mxu0 %v11718_v20  ;;  %3044 = vmatprep.subr.mxu1 %v11719_v30  ;;  %v11729_v20 = vld [vmem:[#allocation68_spill] sm:$0xff]  ;;  %v11730_v30 = vld [vmem:[#allocation69_spill] sm:$0xff] }
 0x46f   : > { %2974 = vmatpush1.msra.mxu0 %v11720_v14  ;;  %3045 = vmatpush1.msra.mxu1 %v11721_v40  ;;  %v11731_v14 = vld [vmem:[#allocation70_spill] sm:$0xff]  ;;  %v11732_v40 = vld [vmem:[#allocation71_spill] sm:$0xff] }
 0x470   : > { %2975 = vmatprep.subr.mxu0 %v11722_v26  ;;  %3046 = vmatprep.subr.mxu1 %v11723_v38  ;;  %v11733_v26 = vld [vmem:[#allocation72_spill] sm:$0xff]  ;;  %v11734_v38 = vld [vmem:[#allocation73_spill] sm:$0xff] }
 0x471   : > { %2976 = vmatpush1.msra.mxu0 %v11724_v10  ;;  %3047 = vmatpush1.msra.mxu1 %v11725_v48  ;;  %v11735_v10 = vld [vmem:[#allocation74_spill] sm:$0xff]  ;;  %v11736_v48 = vld [vmem:[#allocation75_spill] sm:$0xff] }
 0x472   : > { %2977 = vmatprep.subr.mxu0 %v11726_v24  ;;  %3048 = vmatprep.subr.mxu1 %v11727_v54  ;;  %v11737_v24 = vld [vmem:[#allocation76_spill] sm:$0xff]  ;;  %v11738_v54 = vld [vmem:[#allocation77_spill] sm:$0xff] }
 0x473   : > { %2978 = vmatpush1.msra.mxu0 %v11728_v32  ;;  %3049 = vmatpush1.msra.mxu1 %v11729_v20  ;;  %v11739_v32 = vld [vmem:[#allocation78_spill] sm:$0xff]  ;;  %v11740_v20 = vld [vmem:[#allocation79_spill] sm:$0xff] }
 0x474   : > { %2979 = vmatprep.subr.mxu0 %v11730_v30  ;;  %3050 = vmatprep.subr.mxu1 %v11731_v14  ;;  %v11741_v30 = vld [vmem:[#allocation80_spill] sm:$0xff]  ;;  %v11742_v14 = vld [vmem:[#allocation81_spill] sm:$0xff] }
 0x475   : > { %2980 = vmatpush1.msra.mxu0 %v11732_v40  ;;  %3051 = vmatpush1.msra.mxu1 %v11733_v26  ;;  %v11743_v40 = vld [vmem:[#allocation82_spill] sm:$0xff]  ;;  %v11744_v26 = vld [vmem:[#allocation83_spill] sm:$0xff] }
 0x476   : > { %2981 = vmatprep.subr.mxu0 %v11734_v38  ;;  %3052 = vmatprep.subr.mxu1 %v11735_v10  ;;  %v11745_v38 = vld [vmem:[#allocation84_spill] sm:$0xff]  ;;  %v11746_v10 = vld [vmem:[#allocation85_spill] sm:$0xff] }
 0x477   : > { %2982 = vmatpush1.msra.mxu0 %v11736_v48  ;;  %3053 = vmatpush1.msra.mxu1 %v11737_v24  ;;  %v11747_v48 = vld [vmem:[#allocation86_spill] sm:$0xff]  ;;  %v11748_v24 = vld [vmem:[#allocation87_spill] sm:$0xff] }
 0x478   : > { %2983 = vmatprep.subr.mxu0 %v11738_v54  ;;  %3054 = vmatprep.subr.mxu1 %v11739_v32  ;;  %v11749_v54 = vld [vmem:[#allocation88_spill] sm:$0xff]  ;;  %v11750_v32 = vld [vmem:[#allocation89_spill] sm:$0xff] }
 0x479   : > { %2984 = vmatpush1.msra.mxu0 %v11740_v20  ;;  %3055 = vmatpush1.msra.mxu1 %v11741_v30  ;;  %v11751_v20 = vld [vmem:[#allocation90_spill] sm:$0xff]  ;;  %v11752_v30 = vld [vmem:[#allocation91_spill] sm:$0xff] }
 0x47a   : > { %2985 = vmatprep.subr.mxu0 %v11742_v14  ;;  %3056 = vmatprep.subr.mxu1 %v11743_v40  ;;  %v11753_v14 = vld [vmem:[#allocation92_spill] sm:$0xff]  ;;  %v11754_v40 = vld [vmem:[#allocation93_spill] sm:$0xff] }
 0x47b   : > { %2986 = vmatpush1.msra.mxu0 %v11744_v26  ;;  %3057 = vmatpush1.msra.mxu1 %v11745_v38  ;;  %v11755_v26 = vld [vmem:[#allocation94_spill] sm:$0xff]  ;;  %v11756_v38 = vld [vmem:[#allocation95_spill] sm:$0xff] }
 0x47c   : > { %2987 = vmatprep.subr.mxu0 %v11746_v10  ;;  %3058 = vmatprep.subr.mxu1 %v11747_v48  ;;  %v11757_v10 = vld [vmem:[#allocation96_spill] sm:$0xff]  ;;  %v11758_v48 = vld [vmem:[#allocation97_spill] sm:$0xff] }
 0x47d   : > { %2988 = vmatpush1.msra.mxu0 %v11748_v24  ;;  %3059 = vmatpush1.msra.mxu1 %v11749_v54  ;;  %v11759_v24 = vld [vmem:[#allocation98_spill] sm:$0xff]  ;;  %v11760_v54 = vld [vmem:[#allocation99_spill] sm:$0xff] }
 0x47e   : > { %2989 = vmatprep.subr.mxu0 %v11750_v32  ;;  %3060 = vmatprep.subr.mxu1 %v11751_v20  ;;  %v11761_v32 = vld [vmem:[#allocation100_spill] sm:$0xff]  ;;  %v11762_v20 = vld [vmem:[#allocation101_spill] sm:$0xff] }
 0x47f   : > { %2990 = vmatpush2.msra.mxu0 %v11752_v30  ;;  %3061 = vmatpush2.msra.mxu1 %v11753_v14  ;;  %v11763_v30 = vld [vmem:[#allocation102_spill] sm:$0xff]  ;;  %v11764_v14 = vld [vmem:[#allocation103_spill] sm:$0xff] }
 0x480   : > { %2991 = vmatprep.subr.mxu0 %v11754_v40  ;;  %3062 = vmatprep.subr.mxu1 %v11755_v26  ;;  %v11765_v40 = vld [vmem:[#allocation104_spill] sm:$0xff]  ;;  %v11766_v26 = vld [vmem:[#allocation105_spill] sm:$0xff] }
 0x481   : > { %2992 = vmatpush2.msra.mxu0 %v11756_v38  ;;  %3063 = vmatpush2.msra.mxu1 %v11757_v10  ;;  %v11767_v38 = vld [vmem:[#allocation106_spill] sm:$0xff]  ;;  %v11768_v10 = vld [vmem:[#allocation107_spill] sm:$0xff] }
 0x482   : > { %2993 = vmatprep.subr.mxu0 %v11758_v48  ;;  %3064 = vmatprep.subr.mxu1 %v11759_v24  ;;  %v11769_v48 = vld [vmem:[#allocation108_spill] sm:$0xff]  ;;  %v11770_v24 = vld [vmem:[#allocation109_spill] sm:$0xff] }
 0x483   : > { %2994 = vmatpush2.msra.mxu0 %v11760_v54  ;;  %3065 = vmatpush2.msra.mxu1 %v11761_v32  ;;  %v11771_v54 = vld [vmem:[#allocation110_spill] sm:$0xff]  ;;  %v11772_v32 = vld [vmem:[#allocation111_spill] sm:$0xff] }
 0x484   : > { %2995 = vmatprep.subr.mxu0 %v11762_v20  ;;  %3066 = vmatprep.subr.mxu1 %v11763_v30  ;;  %v11773_v20 = vld [vmem:[#allocation112_spill] sm:$0xff]  ;;  %v11774_v30 = vld [vmem:[#allocation113_spill] sm:$0xff] }
 0x485   : > { %2996 = vmatpush2.msra.mxu0 %v11764_v14  ;;  %3067 = vmatpush2.msra.mxu1 %v11765_v40  ;;  %v11775_v14 = vld [vmem:[#allocation114_spill] sm:$0xff]  ;;  %v11776_v40 = vld [vmem:[#allocation115_spill] sm:$0xff] }
 0x486   : > { %2997 = vmatprep.subr.mxu0 %v11766_v26  ;;  %3068 = vmatprep.subr.mxu1 %v11767_v38  ;;  %v11777_v26 = vld [vmem:[#allocation116_spill] sm:$0xff]  ;;  %v11778_v38 = vld [vmem:[#allocation117_spill] sm:$0xff] }
 0x487   : > { %2998 = vmatpush2.msra.mxu0 %v11768_v10  ;;  %3069 = vmatpush2.msra.mxu1 %v11769_v48  ;;  %v11779_v10 = vld [vmem:[#allocation118_spill] sm:$0xff]  ;;  %v11780_v48 = vld [vmem:[#allocation119_spill] sm:$0xff] }
 0x488   : > { %2999 = vmatprep.subr.mxu0 %v11770_v24  ;;  %3070 = vmatprep.subr.mxu1 %v11771_v54  ;;  %v11781_v24 = vld [vmem:[#allocation120_spill] sm:$0xff]  ;;  %v11782_v54 = vld [vmem:[#allocation121_spill] sm:$0xff] }
 0x489   : > { %3000 = vmatpush2.msra.mxu0 %v11772_v32  ;;  %3071 = vmatpush2.msra.mxu1 %v11773_v20  ;;  %v11783_v32 = vld [vmem:[#allocation122_spill] sm:$0xff]  ;;  %v11784_v20 = vld [vmem:[#allocation123_spill] sm:$0xff] }
 0x48a   : > { %3001 = vmatprep.subr.mxu0 %v11774_v30  ;;  %3072 = vmatprep.subr.mxu1 %v11775_v14  ;;  %v11785_v30 = vld [vmem:[#allocation124_spill] sm:$0xff]  ;;  %v11786_v14 = vld [vmem:[#allocation125_spill] sm:$0xff] }
 0x48b   : > { %3002 = vmatpush2.msra.mxu0 %v11776_v40  ;;  %3073 = vmatpush2.msra.mxu1 %v11777_v26  ;;  %v11787_v40 = vld [vmem:[#allocation126_spill] sm:$0xff]  ;;  %v11788_v26 = vld [vmem:[#allocation127_spill] sm:$0xff] }
 0x48c   : > { %3003 = vmatprep.subr.mxu0 %v11778_v38  ;;  %3074 = vmatprep.subr.mxu1 %v11779_v10  ;;  %v11789_v38 = vld [vmem:[#allocation128_spill] sm:$0xff]  ;;  %v11790_v10 = vld [vmem:[#allocation129_spill] sm:$0xff] }
 0x48d   : > { %3004 = vmatpush2.msra.mxu0 %v11780_v48  ;;  %3075 = vmatpush2.msra.mxu1 %v11781_v24  ;;  %v11791_v48 = vld [vmem:[#allocation130_spill] sm:$0xff]  ;;  %v11792_v24 = vld [vmem:[#allocation131_spill] sm:$0xff] }
 0x48e   : > { %3005 = vmatprep.subr.mxu0 %v11782_v54  ;;  %3076 = vmatprep.subr.mxu1 %v11783_v32  ;;  %v11793_v54 = vld [vmem:[#allocation132_spill] sm:$0xff]  ;;  %v11794_v32 = vld [vmem:[#allocation133_spill] sm:$0xff] }
 0x48f   : > { %3006 = vmatpush2.msra.mxu0 %v11784_v20  ;;  %3077 = vmatpush2.msra.mxu1 %v11785_v30  ;;  %v11795_v20 = vld [vmem:[#allocation134_spill] sm:$0xff]  ;;  %v11796_v30 = vld [vmem:[#allocation135_spill] sm:$0xff] }
 0x490   : > { %3007 = vmatprep.subr.mxu0 %v11786_v14  ;;  %3078 = vmatprep.subr.mxu1 %v11787_v40  ;;  %v11797_v14 = vld [vmem:[#allocation136_spill] sm:$0xff]  ;;  %v11798_v40 = vld [vmem:[#allocation137_spill] sm:$0xff] }
 0x491   : > { %3008 = vmatpush2.msra.mxu0 %v11788_v26  ;;  %3079 = vmatpush2.msra.mxu1 %v11789_v38  ;;  %v11799_v26 = vld [vmem:[#allocation138_spill] sm:$0xff]  ;;  %v11800_v38 = vld [vmem:[#allocation139_spill] sm:$0xff] }
 0x492   : > { %3009 = vmatprep.subr.mxu0 %v11790_v10  ;;  %3080 = vmatprep.subr.mxu1 %v11791_v48  ;;  %v11801_v10 = vld [vmem:[#allocation140_spill] sm:$0xff]  ;;  %v11802_v48 = vld [vmem:[#allocation141_spill] sm:$0xff] }
 0x493   : > { %3010 = vmatpush2.msra.mxu0 %v11792_v24  ;;  %3081 = vmatpush2.msra.mxu1 %v11793_v54  ;;  %v11803_v24 = vld [vmem:[#allocation142_spill] sm:$0xff]  ;;  %v11804_v54 = vld [vmem:[#allocation143_spill] sm:$0xff] }
 0x494   : > { %3011 = vmatprep.subr.mxu0 %v11794_v32  ;;  %3082 = vmatprep.subr.mxu1 %v11795_v20  ;;  %v11805_v32 = vld [vmem:[#allocation144_spill] sm:$0xff]  ;;  %v11806_v20 = vld [vmem:[#allocation145_spill] sm:$0xff] }
 0x495   : > { %3012 = vmatpush2.msra.mxu0 %v11796_v30  ;;  %3083 = vmatpush2.msra.mxu1 %v11797_v14  ;;  %v11807_v30 = vld [vmem:[#allocation146_spill] sm:$0xff]  ;;  %v11808_v14 = vld [vmem:[#allocation147_spill] sm:$0xff] }
 0x496   : > { %3013 = vmatprep.subr.mxu0 %v11798_v40  ;;  %3084 = vmatprep.subr.mxu1 %v11799_v26  ;;  %v11809_v40 = vld [vmem:[#allocation148_spill] sm:$0xff]  ;;  %v11810_v26 = vld [vmem:[#allocation149_spill] sm:$0xff] }
 0x497   : > { %3014 = vmatpush2.msra.mxu0 %v11800_v38  ;;  %3085 = vmatpush2.msra.mxu1 %v11801_v10  ;;  %v11811_v38 = vld [vmem:[#allocation150_spill] sm:$0xff]  ;;  %v11812_v10 = vld [vmem:[#allocation151_spill] sm:$0xff] }
 0x498   : > { %3015 = vmatprep.subr.mxu0 %v11802_v48  ;;  %3086 = vmatprep.subr.mxu1 %v11803_v24  ;;  %v11813_v48 = vld [vmem:[#allocation152_spill] sm:$0xff]  ;;  %v11814_v24 = vld [vmem:[#allocation153_spill] sm:$0xff] }
 0x499   : > { %3016 = vmatpush2.msra.mxu0 %v11804_v54  ;;  %3087 = vmatpush2.msra.mxu1 %v11805_v32  ;;  %v11815_v54 = vld [vmem:[#allocation154_spill] sm:$0xff] }
 0x49a   : > { %3017 = vmatprep.subr.mxu0 %v11806_v20  ;;  %3088 = vmatprep.subr.mxu1 %v11807_v30  ;;  %v11817_v30 = vld [vmem:[#allocation285_spill] sm:$0xff] }
 0x49b   : > { %3018 = vmatpush2.msra.mxu0 %v11808_v14  ;;  %3089 = vmatpush2.msra.mxu1 %v11809_v40  ;;  %v1462_v22 = vadd.f32 %v11817_v30, %v11816_v55  ;;  %v11818_v14 = vld [vmem:[#allocation340_spill] sm:$0xff] }
 0x49c   : > { %3019 = vmatprep.subr.mxu0 %v11810_v26  ;;  %3090 = vmatprep.subr.mxu1 %v11811_v38  ;;  %v1575_v40 = vadd.f32 %v11819_v60, %v11818_v14  ;;  %v11820_v26 = vld [vmem:[#allocation287_spill] sm:$0xff] }
 0x49d   : > { %3020 = vmatpush2.msra.mxu0 %v11812_v10  ;;  %3091 = vmatpush2.msra.mxu1 %v11813_v48  ;;  %v1464_v38 = vadd.f32 %v11820_v26, %v8301_v4  ;;  %v11821_v48 = vld [vmem:[#allocation288_spill] sm:$0xff] }
 0x49e   : > { %3099 = vmatprep.subr.mxu0 %v11814_v24  ;;  %3170 = vmatprep.subr.mxu1 %v11815_v54  ;;  %v1577_v24 = vadd.f32 %v11821_v48, %v8305_v37 }
 0x4dc   : > { %v2673_v32 = vpop.f32.mrf.mxu0  ;;  %v2744_v20 = vpop.f32.mrf.mxu1 }
 0x4dd   : > { %v2891_v13 = vadd.f32 %v2673_v32, %v1462_v22  ;;  %v2893_v10 = vadd.f32 %v2744_v20, %v1575_v40  ;;  %v11822_v20 = vld [vmem:[#allocation313_spill] sm:$0xff] }
 0x4de   : > { %v2675_v6 = vpop.f32.mrf.mxu0  ;;  %v2746_v31 = vpop.f32.mrf.mxu1  ;;  %v1688_v48 = vadd.f32 %v11822_v20, %v8313_v47 }
 0x4df   : > { %v2892_v62 = vadd.f32 %v2675_v6, %v1464_v38  ;;  %v5565_v54 = vmul.f32 -1.442695, %v2891_v13  ;;  %v2894_v27 = vadd.f32 %v2746_v31, %v1577_v24  ;;  %v5567_v23 = vmul.f32 -1.442695, %v2893_v10  ;;  %v11823_v6 = vld [vmem:[#allocation314_spill] sm:$0xff]  ;;  %v11824_v38 = vld [vmem:[#allocation344_spill] sm:$0xff] }
 0x4e0   : > { %v1801_v24 = vadd.f32 %v11823_v6, %v8315_v5  ;;  %v11826_v13 = vld [vmem:[#allocation316_spill] sm:$0xff] }
 0x4e1   : > { %v5566_v63 = vmul.f32 -1.442695, %v2892_v62  ;;  %5956 = vpow2.f32 %v5565_v54  ;;  %v5568_v30 = vmul.f32 -1.442695, %v2894_v27  ;;  %v11825_v62 = vld [vmem:[#allocation315_spill] sm:$0xff] }
 0x4e2   : > { %5958 = vpow2.f32 %v5567_v23  ;;  %v1690_v10 = vadd.f32 %v11825_v62, %v11824_v38 }
 0x4e3   : > { %5960 = vpow2.f32 %v5566_v63  ;;  %v1803_v63 = vadd.f32 %v11826_v13, %v8319_v28 }
 0x4e4   : > { %5962 = vpow2.f32 %v5568_v30 }
 0x4ee   : > { %v5957_v60 = vpop.eup %5956 }
 0x4ef   : > { %v5959_v14 = vpop.eup %5958  ;;  %v2905_v26 = vadd.f32 1.0, %v5957_v60 }
 0x4f0   : > { %v5961_v55 = vpop.eup %5960  ;;  %v2917_v40 = vadd.f32 1.0, %v5959_v14 }
 0x4f1   : > { %v5963_v22 = vpop.eup %5962  ;;  %v2906_v32 = vadd.f32 1.0, %v5961_v55  ;;  %5964 = vrcp.f32 %v2905_v26 }
 0x4f2   : > { %v2918_v54 = vadd.f32 1.0, %v5963_v22  ;;  %5966 = vrcp.f32 %v2917_v40 }
 0x4f3   : > { %5968 = vrcp.f32 %v2906_v32 }
 0x4fe   : > { %v5965_v26 = vpop.eup %5964 }
 0x4ff   : > { %v5967_v22 = vpop.eup %5966 }
 0x500   : > { %v5969_v38 = vpop.eup %5968  ;;  %v2937_v40 = vmul.f32 %v5967_v22, %v8615_v50  ;;  %v11832_v22 = vld [vmem:[#allocation179_spill] sm:$0xff] }
 0x51d   : > { %v2815_v27 = vpop.f32.mrf.mxu0  ;;  %v2886_v31 = vpop.f32.mrf.mxu1 }
 0x51e   : > { %v2895_v23 = vadd.f32 %v2815_v27, %v1688_v48  ;;  %v2897_v14 = vadd.f32 %v2886_v31, %v1801_v24 }
 0x51f   : > { %v2817_v55 = vpop.f32.mrf.mxu0  ;;  %v2888_v30 = vpop.f32.mrf.mxu1 }
 0x520   : > { %5970 = vtanh.f32 %v2895_v23  ;;  %v5569_v60 = vmul.f32 -1.442695, %v2897_v14  ;;  %v2896_v20 = vadd.f32 %v2817_v55, %v1690_v10  ;;  %v2898_v6 = vadd.f32 %v2888_v30, %v1803_v63 }
 0x521   : > { %5972 = vrcp.f32 %v2918_v54 }
 0x522   : > { %5974 = vpow2.f32 %v5569_v60  ;;  %v5570_v62 = vmul.f32 -1.442695, %v2898_v6  ;;  %v11829_v6 = vld [vmem:[#allocation176_spill] sm:$0xff] }
 0x523   : > { %5976 = vtanh.f32 %v2896_v20 }
 0x524   : > { %5978 = vpow2.f32 %v5570_v62  ;;  %v11830_v62 = vld [vmem:[#allocation177_spill] sm:$0xff] }
 0x52d   : > { %v5971_v5 = vpop.eup %5970 }
 0x52e   : > { %v5973_v13 = vpop.eup %5972  ;;  %v2939_v48 = vmul.f32 %v5971_v5, %v5965_v26  ;;  %v11831_v26 = vld [vmem:[#allocation178_spill] sm:$0xff] }
 0x52f   : > { %v5975_v32 = vpop.eup %5974  ;;  %v2938_v54 = vmul.f32 %v5973_v13, %v8619_v7  ;;  %v11827_v7 = vld [vmem:[#allocation174_spill] sm:$0xff]  ;;  %v11833_v13 = vld [vmem:[#allocation180_spill] sm:$0xff] }
 0x530   : > { %v5977_v24 = vpop.eup %5976  ;;  %v8902_v27 = vadd.f32 %v2939_v48, %v2937_v40  ;;  %v2931_v31 = vadd.f32 1.0, %v5975_v32  ;;  %v11834_v40 = vld [vmem:[#allocation181_spill] sm:$0xff]  ;;  %v11835_v48 = vld [vmem:[#allocation182_spill] sm:$0xff]  ;;  %v11836_v32 = vld [vmem:[#allocation183_spill] sm:$0xff] }
 0x531   : > { %v5979_v10 = vpop.eup %5978  ;;  %v2940_v63 = vmul.f32 %v5977_v24, %v5969_v38  ;;  %v11828_v38 = vld [vmem:[#allocation175_spill] sm:$0xff]  ;;  %v11837_v24 = vld [vmem:[#allocation184_spill] sm:$0xff] }
 0x532   : > { %5980 = vtanh.f32 %v8902_v27  ;;  %v2932_v23 = vadd.f32 1.0, %v5979_v10  ;;  %v11839_v10 = vld [vmem:[#allocation186_spill] sm:$0xff] }
 0x533   : > { %5982 = vrcp.f32 %v2931_v31  ;;  %v8906_v14 = vadd.f32 %v2940_v63, %v2938_v54  ;;  %v11838_v31 = vld [vmem:[#allocation185_spill] sm:$0xff]  ;;  %v11840_v54 = vld [vmem:[#allocation187_spill] sm:$0xff]  ;;  %v11841_v63 = vld [vmem:[#allocation188_spill] sm:$0xff] }
 0x534   : > { %5984 = vrcp.f32 %v2932_v23  ;;  %v11842_v23 = vld [vmem:[#allocation189_spill] sm:$0xff] }
 0x535   : > { %5986 = vtanh.f32 %v8906_v14 }
 0x53f   : > { %v5981_v50 = vpop.eup %5980 }
 0x540   : > { %v5983_v5 = vpop.eup %5982 }
 0x541   : > { %v5985_v55 = vpop.eup %5984  ;;  %v8909_v30 = vmul.f32 %v5983_v5, %v5981_v50  ;;  %v11843_v50 = vld [vmem:[#allocation190_spill] sm:$0xff]  ;;  %v11844_v5 = vld [vmem:[#allocation191_spill] sm:$0xff] }
 0x542   : > { %v5987_v60 = vpop.eup %5986 }
 0x543   : > { %v2946_v20 = vmul.f32 %v5987_v60, %v5985_v55  ;;  %2947 = vst [vmem:[#allocation2 + $0x50] sm:$0xff] %v8909_v30  ;;  %v11845_v55 = vld [vmem:[#allocation192_spill] sm:$0xff]  ;;  %v11846_v60 = vld [vmem:[#allocation193_spill] sm:$0xff] }
 0x545   : > { %2948 = vst [vmem:[#allocation2 + $0x68] sm:$0xff] %v2946_v20  ;;  %3021 = vmatprep.mubr.f32.mxu0 %v2946_v20  ;;  %3092 = vmatprep.mubr.f32.mxu1 %v2946_v20 }
 0x546   : > { %3022 = vmatmul.mubr.f32.vlgmr.msra.gmra.mxu0 %v8909_v30  ;;  %3093 = vmatmul.mubr.f32.vlgmr.msra.gmra.mxu1 %v8909_v30 }
 0x547   : > { %3100 = vmatpush1.msra.mxu0 %v11364_v12  ;;  %3171 = vmatpush1.msra.mxu1 %v11365_v41 }
 0x548   : > { %3101 = vmatprep.subr.mxu0 %v11366_v46  ;;  %3163 = vmatprep.mubr.f32.mxu0 %v2946_v20 }
 0x549   : > { %3172 = vmatprep.subr.mxu1 %v11367_v3  ;;  %3234 = vmatprep.mubr.f32.mxu1 %v2946_v20  ;;  %v11847_v20 = vld [vmem:[#allocation194_spill] sm:$0xff] }
 0x54a   : > { %3102 = vmatpush1.msra.mxu0 %v11368_v35  ;;  %3173 = vmatpush1.msra.mxu1 %v11369_v39 }
 0x54b   : > { %3103 = vmatprep.subr.mxu0 %v11370_v29  ;;  %3174 = vmatprep.subr.mxu1 %v11371_v25 }
 0x54c   : > { %3104 = vmatpush1.msra.mxu0 %v11372_v44  ;;  %3175 = vmatpush1.msra.mxu1 %v11595_v45 }
 0x54d   : > { %3105 = vmatprep.subr.mxu0 %v11596_v56  ;;  %3176 = vmatprep.subr.mxu1 %v11597_v58 }
 0x54e   : > { %3106 = vmatpush1.msra.mxu0 %v11598_v9  ;;  %3177 = vmatpush1.msra.mxu1 %v11599_v17 }
 0x54f   : > { %3107 = vmatprep.subr.mxu0 %v11600_v53  ;;  %3178 = vmatprep.subr.mxu1 %v11601_v11 }
 0x550   : > { %3108 = vmatpush1.msra.mxu0 %v11602_v21  ;;  %3179 = vmatpush1.msra.mxu1 %v11603_v16 }
 0x551   : > { %3109 = vmatprep.subr.mxu0 %v11604_v8  ;;  %3180 = vmatprep.subr.mxu1 %v11827_v7 }
 0x552   : > { %3110 = vmatpush1.msra.mxu0 %v11828_v38  ;;  %3181 = vmatpush1.msra.mxu1 %v11829_v6 }
 0x553   : > { %3111 = vmatprep.subr.mxu0 %v11830_v62  ;;  %3182 = vmatprep.subr.mxu1 %v11831_v26 }
 0x554   : > { %3112 = vmatpush1.msra.mxu0 %v11832_v22  ;;  %3183 = vmatpush1.msra.mxu1 %v11833_v13 }
 0x555   : > { %3113 = vmatprep.subr.mxu0 %v11834_v40  ;;  %3184 = vmatprep.subr.mxu1 %v11835_v48 }
 0x556   : > { %3114 = vmatpush1.msra.mxu0 %v11836_v32  ;;  %3185 = vmatpush1.msra.mxu1 %v11837_v24  ;;  %v11848_v24 = vld [vmem:[#allocation195_spill] sm:$0xff] }
 0x557   : > { %3115 = vmatprep.subr.mxu0 %v11838_v31  ;;  %3186 = vmatprep.subr.mxu1 %v11839_v10  ;;  %v11849_v31 = vld [vmem:[#allocation196_spill] sm:$0xff]  ;;  %v11850_v10 = vld [vmem:[#allocation197_spill] sm:$0xff] }
 0x558   : > { %3116 = vmatpush1.msra.mxu0 %v11840_v54  ;;  %3187 = vmatpush1.msra.mxu1 %v11841_v63  ;;  %v11851_v54 = vld [vmem:[#allocation198_spill] sm:$0xff]  ;;  %v11852_v63 = vld [vmem:[#allocation199_spill] sm:$0xff] }
 0x559   : > { %3117 = vmatprep.subr.mxu0 %v11842_v23  ;;  %3188 = vmatprep.subr.mxu1 %v11843_v50  ;;  %v11853_v23 = vld [vmem:[#allocation200_spill] sm:$0xff]  ;;  %v11854_v50 = vld [vmem:[#allocation201_spill] sm:$0xff] }
 0x55a   : > { %3118 = vmatpush1.msra.mxu0 %v11844_v5  ;;  %3189 = vmatpush1.msra.mxu1 %v11845_v55  ;;  %v11855_v5 = vld [vmem:[#allocation202_spill] sm:$0xff]  ;;  %v11856_v55 = vld [vmem:[#allocation203_spill] sm:$0xff] }
 0x55b   : > { %3119 = vmatprep.subr.mxu0 %v11846_v60  ;;  %3190 = vmatprep.subr.mxu1 %v11847_v20  ;;  %v11857_v60 = vld [vmem:[#allocation204_spill] sm:$0xff]  ;;  %v11858_v20 = vld [vmem:[#allocation205_spill] sm:$0xff] }
 0x55c   : > { %3120 = vmatpush1.msra.mxu0 %v11848_v24  ;;  %3191 = vmatpush1.msra.mxu1 %v11849_v31  ;;  %v11859_v24 = vld [vmem:[#allocation206_spill] sm:$0xff]  ;;  %v11860_v31 = vld [vmem:[#allocation207_spill] sm:$0xff] }
 0x55d   : > { %3121 = vmatprep.subr.mxu0 %v11850_v10  ;;  %3192 = vmatprep.subr.mxu1 %v11851_v54  ;;  %v11861_v10 = vld [vmem:[#allocation208_spill] sm:$0xff]  ;;  %v11862_v54 = vld [vmem:[#allocation209_spill] sm:$0xff] }
 0x55e   : > { %3122 = vmatpush1.msra.mxu0 %v11852_v63  ;;  %3193 = vmatpush1.msra.mxu1 %v11853_v23  ;;  %v11863_v63 = vld [vmem:[#allocation210_spill] sm:$0xff]  ;;  %v11864_v23 = vld [vmem:[#allocation211_spill] sm:$0xff] }
 0x55f   : > { %3123 = vmatprep.subr.mxu0 %v11854_v50  ;;  %3194 = vmatprep.subr.mxu1 %v11855_v5  ;;  %v11865_v50 = vld [vmem:[#allocation212_spill] sm:$0xff]  ;;  %v11866_v5 = vld [vmem:[#allocation213_spill] sm:$0xff] }
 0x560   : > { %3124 = vmatpush1.msra.mxu0 %v11856_v55  ;;  %3195 = vmatpush1.msra.mxu1 %v11857_v60  ;;  %v11867_v55 = vld [vmem:[#allocation214_spill] sm:$0xff]  ;;  %v11868_v60 = vld [vmem:[#allocation215_spill] sm:$0xff] }
 0x561   : > { %3125 = vmatprep.subr.mxu0 %v11858_v20  ;;  %3196 = vmatprep.subr.mxu1 %v11859_v24  ;;  %v11869_v20 = vld [vmem:[#allocation216_spill] sm:$0xff]  ;;  %v11870_v24 = vld [vmem:[#allocation217_spill] sm:$0xff] }
 0x562   : > { %3126 = vmatpush1.msra.mxu0 %v11860_v31  ;;  %3197 = vmatpush1.msra.mxu1 %v11861_v10  ;;  %v11871_v31 = vld [vmem:[#allocation218_spill] sm:$0xff]  ;;  %v11872_v10 = vld [vmem:[#allocation219_spill] sm:$0xff] }
 0x563   : > { %3127 = vmatprep.subr.mxu0 %v11862_v54  ;;  %3198 = vmatprep.subr.mxu1 %v11863_v63  ;;  %v11873_v54 = vld [vmem:[#allocation220_spill] sm:$0xff]  ;;  %v11874_v63 = vld [vmem:[#allocation221_spill] sm:$0xff] }
 0x564   : > { %3128 = vmatpush1.msra.mxu0 %v11864_v23  ;;  %3199 = vmatpush1.msra.mxu1 %v11865_v50  ;;  %v11875_v23 = vld [vmem:[#allocation222_spill] sm:$0xff]  ;;  %v11876_v50 = vld [vmem:[#allocation223_spill] sm:$0xff] }
 0x565   : > { %3129 = vmatprep.subr.mxu0 %v11866_v5  ;;  %3200 = vmatprep.subr.mxu1 %v11867_v55  ;;  %v11877_v5 = vld [vmem:[#allocation224_spill] sm:$0xff]  ;;  %v11878_v55 = vld [vmem:[#allocation225_spill] sm:$0xff] }
 0x566   : > { %3130 = vmatpush1.msra.mxu0 %v11868_v60  ;;  %3201 = vmatpush1.msra.mxu1 %v11869_v20  ;;  %v11879_v60 = vld [vmem:[#allocation226_spill] sm:$0xff]  ;;  %v11880_v20 = vld [vmem:[#allocation227_spill] sm:$0xff] }
 0x567   : > { %3131 = vmatprep.subr.mxu0 %v11870_v24  ;;  %3202 = vmatprep.subr.mxu1 %v11871_v31  ;;  %v11881_v24 = vld [vmem:[#allocation228_spill] sm:$0xff]  ;;  %v11882_v31 = vld [vmem:[#allocation229_spill] sm:$0xff] }
 0x568   : > { %3132 = vmatpush2.msra.mxu0 %v11872_v10  ;;  %3203 = vmatpush2.msra.mxu1 %v11873_v54  ;;  %v11883_v10 = vld [vmem:[#allocation230_spill] sm:$0xff]  ;;  %v11884_v54 = vld [vmem:[#allocation231_spill] sm:$0xff] }
 0x569   : > { %3133 = vmatprep.subr.mxu0 %v11874_v63  ;;  %3204 = vmatprep.subr.mxu1 %v11875_v23  ;;  %v11885_v63 = vld [vmem:[#allocation232_spill] sm:$0xff]  ;;  %v11886_v23 = vld [vmem:[#allocation233_spill] sm:$0xff] }
 0x56a   : > { %3134 = vmatpush2.msra.mxu0 %v11876_v50  ;;  %3205 = vmatpush2.msra.mxu1 %v11877_v5  ;;  %v11887_v50 = vld [vmem:[#allocation234_spill] sm:$0xff]  ;;  %v11888_v5 = vld [vmem:[#allocation235_spill] sm:$0xff] }
 0x56b   : > { %3135 = vmatprep.subr.mxu0 %v11878_v55  ;;  %3206 = vmatprep.subr.mxu1 %v11879_v60  ;;  %v11889_v55 = vld [vmem:[#allocation236_spill] sm:$0xff]  ;;  %v11890_v60 = vld [vmem:[#allocation237_spill] sm:$0xff] }
 0x56c   : > { %3136 = vmatpush2.msra.mxu0 %v11880_v20  ;;  %3207 = vmatpush2.msra.mxu1 %v11881_v24  ;;  %v11891_v20 = vld [vmem:[#allocation238_spill] sm:$0xff]  ;;  %v11892_v24 = vld [vmem:[#allocation239_spill] sm:$0xff] }
 0x56d   : > { %3137 = vmatprep.subr.mxu0 %v11882_v31  ;;  %3208 = vmatprep.subr.mxu1 %v11883_v10  ;;  %v11893_v31 = vld [vmem:[#allocation240_spill] sm:$0xff]  ;;  %v11894_v10 = vld [vmem:[#allocation241_spill] sm:$0xff] }
 0x56e   : > { %3138 = vmatpush2.msra.mxu0 %v11884_v54  ;;  %3209 = vmatpush2.msra.mxu1 %v11885_v63  ;;  %v11895_v63 = vld [vmem:[#allocation243_spill] sm:$0xff] }
 0x56f   : > { %3139 = vmatprep.subr.mxu0 %v11886_v23  ;;  %3210 = vmatprep.subr.mxu1 %v11887_v50  ;;  %v11896_v23 = vld [vmem:[#allocation244_spill] sm:$0xff] }
 0x570   : > { %3140 = vmatpush2.msra.mxu0 %v11888_v5  ;;  %3211 = vmatpush2.msra.mxu1 %v11889_v55 }
 0x571   : > { %3141 = vmatprep.subr.mxu0 %v11890_v60  ;;  %3212 = vmatprep.subr.mxu1 %v11891_v20 }
 0x572   : > { %3142 = vmatpush2.msra.mxu0 %v11892_v24  ;;  %3213 = vmatpush2.msra.mxu1 %v11893_v31 }
 0x573   : > { %3143 = vmatprep.subr.mxu0 %v11894_v10  ;;  %3214 = vmatprep.subr.mxu1 %v11673_v59 }
 0x574   : > { %3144 = vmatpush2.msra.mxu0 %v11895_v63  ;;  %3215 = vmatpush2.msra.mxu1 %v11896_v23 }
 0x575   : > { %3145 = vmatprep.subr.mxu0 %v11676_v19  ;;  %3216 = vmatprep.subr.mxu1 %v11677_v0 }
 0x576   : > { %3146 = vmatpush2.msra.mxu0 %v11678_v36  ;;  %3217 = vmatpush2.msra.mxu1 %v11679_v1  ;;  %v12050_v1 = vld [vmem:[#allocation290_spill] sm:$0xff] }
 0x577   : > { %3147 = vmatprep.subr.mxu0 %v11680_v2  ;;  %3218 = vmatprep.subr.mxu1 %v11681_v61  ;;  %v11897_v61 = vld [vmem:[#allocation261_spill] sm:$0xff] }
 0x578   : > { %3148 = vmatpush2.msra.mxu0 %v11682_v57  ;;  %3219 = vmatpush2.msra.mxu1 %v11683_v52  ;;  %v11898_v57 = vld [vmem:[#allocation262_spill] sm:$0xff]  ;;  %v11899_v52 = vld [vmem:[#allocation263_spill] sm:$0xff] }
 0x579   : > { %3149 = vmatprep.subr.mxu0 %v11462_v49  ;;  %3220 = vmatprep.subr.mxu1 %v11684_v51  ;;  %v11900_v49 = vld [vmem:[#allocation264_spill] sm:$0xff]  ;;  %v11901_v51 = vld [vmem:[#allocation265_spill] sm:$0xff] }
 0x57a   : > { %3150 = vmatpush2.msra.mxu0 %v11685_v15  ;;  %3221 = vmatpush2.msra.mxu1 %v11465_v43  ;;  %v11902_v15 = vld [vmem:[#allocation266_spill] sm:$0xff]  ;;  %v11903_v43 = vld [vmem:[#allocation267_spill] sm:$0xff] }
 0x57b   : > { %3151 = vmatprep.subr.mxu0 %v11466_v33  ;;  %3222 = vmatprep.subr.mxu1 %v11467_v34  ;;  %v11904_v33 = vld [vmem:[#allocation268_spill] sm:$0xff]  ;;  %v11905_v34 = vld [vmem:[#allocation269_spill] sm:$0xff] }
 0x57c   : > { %3152 = vmatpush2.msra.mxu0 %v11468_v18  ;;  %3223 = vmatpush2.msra.mxu1 %v11469_v42  ;;  %v11906_v18 = vld [vmem:[#allocation270_spill] sm:$0xff]  ;;  %v11907_v42 = vld [vmem:[#allocation271_spill] sm:$0xff] }
 0x57d   : > { %3153 = vmatprep.subr.mxu0 %v11897_v61  ;;  %3224 = vmatprep.subr.mxu1 %v11898_v57  ;;  %v11908_v61 = vld [vmem:[#allocation272_spill] sm:$0xff]  ;;  %v11909_v57 = vld [vmem:[#allocation273_spill] sm:$0xff] }
 0x57e   : > { %3154 = vmatpush2.msra.mxu0 %v11899_v52  ;;  %3225 = vmatpush2.msra.mxu1 %v11900_v49  ;;  %v11910_v52 = vld [vmem:[#allocation274_spill] sm:$0xff]  ;;  %v11911_v49 = vld [vmem:[#allocation275_spill] sm:$0xff] }
 0x57f   : > { %3155 = vmatprep.subr.mxu0 %v11901_v51  ;;  %3226 = vmatprep.subr.mxu1 %v11902_v15  ;;  %v11912_v51 = vld [vmem:[#allocation276_spill] sm:$0xff]  ;;  %v11913_v15 = vld [vmem:[#allocation277_spill] sm:$0xff] }
 0x580   : > { %3156 = vmatpush2.msra.mxu0 %v11903_v43  ;;  %3227 = vmatpush2.msra.mxu1 %v11904_v33  ;;  %v11914_v43 = vld [vmem:[#allocation278_spill] sm:$0xff]  ;;  %v11915_v33 = vld [vmem:[#allocation279_spill] sm:$0xff] }
 0x581   : > { %3157 = vmatprep.subr.mxu0 %v11905_v34  ;;  %3228 = vmatprep.subr.mxu1 %v11906_v18  ;;  %v11916_v34 = vld [vmem:[#allocation280_spill] sm:$0xff]  ;;  %v12047_v18 = vld [vmem:[#allocation339_spill] sm:$0xff] }
 0x582   : > { %3158 = vmatpush2.msra.mxu0 %v11907_v42  ;;  %3229 = vmatpush2.msra.mxu1 %v11908_v61  ;;  %v11917_v61 = vld [vmem:[#allocation25_spill] sm:$0xff]  ;;  %v11926_v42 = vld [vmem:[#allocation34_spill] sm:$0xff] }
 0x583   : > { %3159 = vmatprep.subr.mxu0 %v11909_v57  ;;  %3230 = vmatprep.subr.mxu1 %v11910_v52  ;;  %v11918_v57 = vld [vmem:[#allocation26_spill] sm:$0xff]  ;;  %v11919_v52 = vld [vmem:[#allocation27_spill] sm:$0xff] }
 0x584   : > { %3160 = vmatpush2.msra.mxu0 %v11911_v49  ;;  %3231 = vmatpush2.msra.mxu1 %v11912_v51  ;;  %v11920_v49 = vld [vmem:[#allocation28_spill] sm:$0xff]  ;;  %v11921_v51 = vld [vmem:[#allocation29_spill] sm:$0xff] }
 0x585   : > { %3161 = vmatprep.subr.mxu0 %v11913_v15  ;;  %3232 = vmatprep.subr.mxu1 %v11914_v43  ;;  %v11922_v15 = vld [vmem:[#allocation30_spill] sm:$0xff]  ;;  %v11923_v43 = vld [vmem:[#allocation31_spill] sm:$0xff] }
 0x586   : > { %3162 = vmatpush2.msra.mxu0 %v11915_v33  ;;  %3233 = vmatpush2.msra.mxu1 %v11916_v34  ;;  %v11924_v33 = vld [vmem:[#allocation32_spill] sm:$0xff]  ;;  %v11925_v34 = vld [vmem:[#allocation33_spill] sm:$0xff] }
 0x587   : > { %3164 = vmatmul.mubr.f32.vlgmr.msra.gmra.mxu0 %v8909_v30  ;;  %3235 = vmatmul.mubr.f32.vlgmr.msra.gmra.mxu1 %v8909_v30  ;;  %v11927_v30 = vld [vmem:[#allocation35_spill] sm:$0xff] }
 0x588   : > { %3307 = vmatprep.subr.mxu0 %v11917_v61  ;;  %3378 = vmatprep.subr.mxu1 %v11918_v57  ;;  %v11928_v61 = vld [vmem:[#allocation36_spill] sm:$0xff]  ;;  %v11929_v57 = vld [vmem:[#allocation37_spill] sm:$0xff] }
 0x589   : > { %3308 = vmatpush1.msra.mxu0 %v11919_v52  ;;  %3379 = vmatpush1.msra.mxu1 %v11920_v49  ;;  %v11930_v52 = vld [vmem:[#allocation38_spill] sm:$0xff]  ;;  %v11931_v49 = vld [vmem:[#allocation39_spill] sm:$0xff] }
 0x58a   : > { %3309 = vmatprep.subr.mxu0 %v11921_v51  ;;  %3380 = vmatprep.subr.mxu1 %v11922_v15  ;;  %v11932_v51 = vld [vmem:[#allocation40_spill] sm:$0xff]  ;;  %v11933_v15 = vld [vmem:[#allocation41_spill] sm:$0xff] }
 0x58b   : > { %3310 = vmatpush1.msra.mxu0 %v11923_v43  ;;  %3381 = vmatpush1.msra.mxu1 %v11924_v33  ;;  %v11934_v43 = vld [vmem:[#allocation42_spill] sm:$0xff]  ;;  %v11935_v33 = vld [vmem:[#allocation43_spill] sm:$0xff] }
 0x58c   : > { %3311 = vmatprep.subr.mxu0 %v11925_v34  ;;  %3382 = vmatprep.subr.mxu1 %v11926_v42  ;;  %v11936_v34 = vld [vmem:[#allocation44_spill] sm:$0xff]  ;;  %v11937_v42 = vld [vmem:[#allocation45_spill] sm:$0xff] }
 0x58d   : > { %3312 = vmatpush1.msra.mxu0 %v11927_v30  ;;  %3383 = vmatpush1.msra.mxu1 %v11928_v61  ;;  %v11938_v30 = vld [vmem:[#allocation46_spill] sm:$0xff]  ;;  %v11939_v61 = vld [vmem:[#allocation47_spill] sm:$0xff] }
 0x58e   : > { %3313 = vmatprep.subr.mxu0 %v11929_v57  ;;  %3384 = vmatprep.subr.mxu1 %v11930_v52  ;;  %v11940_v57 = vld [vmem:[#allocation48_spill] sm:$0xff]  ;;  %v11941_v52 = vld [vmem:[#allocation49_spill] sm:$0xff] }
 0x58f   : > { %3314 = vmatpush1.msra.mxu0 %v11931_v49  ;;  %3385 = vmatpush1.msra.mxu1 %v11932_v51  ;;  %v11942_v49 = vld [vmem:[#allocation50_spill] sm:$0xff]  ;;  %v11943_v51 = vld [vmem:[#allocation51_spill] sm:$0xff] }
 0x590   : > { %3315 = vmatprep.subr.mxu0 %v11933_v15  ;;  %3386 = vmatprep.subr.mxu1 %v11934_v43  ;;  %v11944_v15 = vld [vmem:[#allocation52_spill] sm:$0xff]  ;;  %v11945_v43 = vld [vmem:[#allocation53_spill] sm:$0xff] }
 0x591   : > { %3316 = vmatpush1.msra.mxu0 %v11935_v33  ;;  %3387 = vmatpush1.msra.mxu1 %v11936_v34  ;;  %v11946_v33 = vld [vmem:[#allocation54_spill] sm:$0xff]  ;;  %v11947_v34 = vld [vmem:[#allocation55_spill] sm:$0xff] }
 0x592   : > { %3317 = vmatprep.subr.mxu0 %v11937_v42  ;;  %3388 = vmatprep.subr.mxu1 %v11938_v30  ;;  %v11948_v42 = vld [vmem:[#allocation56_spill] sm:$0xff]  ;;  %v11949_v30 = vld [vmem:[#allocation57_spill] sm:$0xff] }
 0x593   : > { %3318 = vmatpush1.msra.mxu0 %v11939_v61  ;;  %3389 = vmatpush1.msra.mxu1 %v11940_v57  ;;  %v11950_v61 = vld [vmem:[#allocation58_spill] sm:$0xff]  ;;  %v11951_v57 = vld [vmem:[#allocation59_spill] sm:$0xff] }
 0x594   : > { %3319 = vmatprep.subr.mxu0 %v11941_v52  ;;  %3390 = vmatprep.subr.mxu1 %v11942_v49  ;;  %v11952_v52 = vld [vmem:[#allocation60_spill] sm:$0xff]  ;;  %v11953_v49 = vld [vmem:[#allocation61_spill] sm:$0xff] }
 0x595   : > { %3320 = vmatpush1.msra.mxu0 %v11943_v51  ;;  %3391 = vmatpush1.msra.mxu1 %v11944_v15  ;;  %v11954_v51 = vld [vmem:[#allocation62_spill] sm:$0xff]  ;;  %v11955_v15 = vld [vmem:[#allocation63_spill] sm:$0xff] }
 0x596   : > { %3321 = vmatprep.subr.mxu0 %v11945_v43  ;;  %3392 = vmatprep.subr.mxu1 %v11946_v33  ;;  %v11956_v43 = vld [vmem:[#allocation64_spill] sm:$0xff]  ;;  %v11957_v33 = vld [vmem:[#allocation65_spill] sm:$0xff] }
 0x597   : > { %3322 = vmatpush1.msra.mxu0 %v11947_v34  ;;  %3393 = vmatpush1.msra.mxu1 %v11948_v42  ;;  %v11958_v34 = vld [vmem:[#allocation66_spill] sm:$0xff]  ;;  %v11959_v42 = vld [vmem:[#allocation67_spill] sm:$0xff] }
 0x598   : > { %3323 = vmatprep.subr.mxu0 %v11949_v30  ;;  %3394 = vmatprep.subr.mxu1 %v11950_v61  ;;  %v11960_v30 = vld [vmem:[#allocation68_spill] sm:$0xff]  ;;  %v11961_v61 = vld [vmem:[#allocation69_spill] sm:$0xff] }
 0x599   : > { %3324 = vmatpush1.msra.mxu0 %v11951_v57  ;;  %3395 = vmatpush1.msra.mxu1 %v11952_v52  ;;  %v11962_v57 = vld [vmem:[#allocation70_spill] sm:$0xff]  ;;  %v11963_v52 = vld [vmem:[#allocation71_spill] sm:$0xff] }
 0x59a   : > { %3325 = vmatprep.subr.mxu0 %v11953_v49  ;;  %3396 = vmatprep.subr.mxu1 %v11954_v51  ;;  %v11964_v49 = vld [vmem:[#allocation72_spill] sm:$0xff]  ;;  %v11965_v51 = vld [vmem:[#allocation73_spill] sm:$0xff] }
 0x59b   : > { %3326 = vmatpush1.msra.mxu0 %v11955_v15  ;;  %3397 = vmatpush1.msra.mxu1 %v11956_v43  ;;  %v11966_v15 = vld [vmem:[#allocation74_spill] sm:$0xff]  ;;  %v11967_v43 = vld [vmem:[#allocation75_spill] sm:$0xff] }
 0x59c   : > { %3327 = vmatprep.subr.mxu0 %v11957_v33  ;;  %3398 = vmatprep.subr.mxu1 %v11958_v34  ;;  %v11968_v33 = vld [vmem:[#allocation76_spill] sm:$0xff]  ;;  %v11969_v34 = vld [vmem:[#allocation77_spill] sm:$0xff] }
 0x59d   : > { %3328 = vmatpush1.msra.mxu0 %v11959_v42  ;;  %3399 = vmatpush1.msra.mxu1 %v11960_v30  ;;  %v11970_v42 = vld [vmem:[#allocation78_spill] sm:$0xff]  ;;  %v11971_v30 = vld [vmem:[#allocation79_spill] sm:$0xff] }
 0x59e   : > { %3329 = vmatprep.subr.mxu0 %v11961_v61  ;;  %3400 = vmatprep.subr.mxu1 %v11962_v57  ;;  %v11972_v61 = vld [vmem:[#allocation80_spill] sm:$0xff]  ;;  %v11973_v57 = vld [vmem:[#allocation81_spill] sm:$0xff] }
 0x59f   : > { %3330 = vmatpush1.msra.mxu0 %v11963_v52  ;;  %3401 = vmatpush1.msra.mxu1 %v11964_v49  ;;  %v11974_v52 = vld [vmem:[#allocation82_spill] sm:$0xff]  ;;  %v11975_v49 = vld [vmem:[#allocation83_spill] sm:$0xff] }
 0x5a0   : > { %3331 = vmatprep.subr.mxu0 %v11965_v51  ;;  %3402 = vmatprep.subr.mxu1 %v11966_v15  ;;  %v11976_v51 = vld [vmem:[#allocation84_spill] sm:$0xff]  ;;  %v11977_v15 = vld [vmem:[#allocation85_spill] sm:$0xff] }
 0x5a1   : > { %3332 = vmatpush1.msra.mxu0 %v11967_v43  ;;  %3403 = vmatpush1.msra.mxu1 %v11968_v33  ;;  %v11978_v43 = vld [vmem:[#allocation86_spill] sm:$0xff]  ;;  %v11979_v33 = vld [vmem:[#allocation87_spill] sm:$0xff] }
 0x5a2   : > { %3333 = vmatprep.subr.mxu0 %v11969_v34  ;;  %3404 = vmatprep.subr.mxu1 %v11970_v42  ;;  %v11980_v34 = vld [vmem:[#allocation88_spill] sm:$0xff]  ;;  %v11981_v42 = vld [vmem:[#allocation89_spill] sm:$0xff] }
 0x5a3   : > { %3334 = vmatpush1.msra.mxu0 %v11971_v30  ;;  %3405 = vmatpush1.msra.mxu1 %v11972_v61  ;;  %v11982_v30 = vld [vmem:[#allocation90_spill] sm:$0xff]  ;;  %v11983_v61 = vld [vmem:[#allocation91_spill] sm:$0xff] }
 0x5a4   : > { %3335 = vmatprep.subr.mxu0 %v11973_v57  ;;  %3406 = vmatprep.subr.mxu1 %v11974_v52  ;;  %v11984_v57 = vld [vmem:[#allocation92_spill] sm:$0xff]  ;;  %v11985_v52 = vld [vmem:[#allocation93_spill] sm:$0xff] }
 0x5a5   : > { %3336 = vmatpush1.msra.mxu0 %v11975_v49  ;;  %3407 = vmatpush1.msra.mxu1 %v11976_v51  ;;  %v11986_v49 = vld [vmem:[#allocation94_spill] sm:$0xff]  ;;  %v11987_v51 = vld [vmem:[#allocation95_spill] sm:$0xff] }
 0x5a6   : > { %3337 = vmatprep.subr.mxu0 %v11977_v15  ;;  %3408 = vmatprep.subr.mxu1 %v11978_v43  ;;  %v11988_v15 = vld [vmem:[#allocation96_spill] sm:$0xff]  ;;  %v11989_v43 = vld [vmem:[#allocation97_spill] sm:$0xff] }
 0x5a7   : > { %3338 = vmatpush1.msra.mxu0 %v11979_v33  ;;  %3409 = vmatpush1.msra.mxu1 %v11980_v34  ;;  %v11990_v33 = vld [vmem:[#allocation98_spill] sm:$0xff]  ;;  %v11991_v34 = vld [vmem:[#allocation99_spill] sm:$0xff] }
 0x5a8   : > { %3339 = vmatprep.subr.mxu0 %v11981_v42  ;;  %3410 = vmatprep.subr.mxu1 %v11982_v30  ;;  %v11992_v42 = vld [vmem:[#allocation100_spill] sm:$0xff]  ;;  %v11993_v30 = vld [vmem:[#allocation101_spill] sm:$0xff] }
 0x5a9   : > { %3340 = vmatpush2.msra.mxu0 %v11983_v61  ;;  %3411 = vmatpush2.msra.mxu1 %v11984_v57  ;;  %v11994_v61 = vld [vmem:[#allocation102_spill] sm:$0xff]  ;;  %v11995_v57 = vld [vmem:[#allocation103_spill] sm:$0xff] }
 0x5aa   : > { %3341 = vmatprep.subr.mxu0 %v11985_v52  ;;  %3412 = vmatprep.subr.mxu1 %v11986_v49  ;;  %v11996_v52 = vld [vmem:[#allocation104_spill] sm:$0xff]  ;;  %v11997_v49 = vld [vmem:[#allocation105_spill] sm:$0xff] }
 0x5ab   : > { %3342 = vmatpush2.msra.mxu0 %v11987_v51  ;;  %3413 = vmatpush2.msra.mxu1 %v11988_v15  ;;  %v11998_v51 = vld [vmem:[#allocation106_spill] sm:$0xff]  ;;  %v11999_v15 = vld [vmem:[#allocation107_spill] sm:$0xff] }
 0x5ac   : > { %3343 = vmatprep.subr.mxu0 %v11989_v43  ;;  %3414 = vmatprep.subr.mxu1 %v11990_v33  ;;  %v12000_v43 = vld [vmem:[#allocation108_spill] sm:$0xff]  ;;  %v12001_v33 = vld [vmem:[#allocation109_spill] sm:$0xff] }
 0x5ad   : > { %3344 = vmatpush2.msra.mxu0 %v11991_v34  ;;  %3415 = vmatpush2.msra.mxu1 %v11992_v42  ;;  %v12002_v34 = vld [vmem:[#allocation110_spill] sm:$0xff]  ;;  %v12003_v42 = vld [vmem:[#allocation111_spill] sm:$0xff] }
 0x5ae   : > { %3345 = vmatprep.subr.mxu0 %v11993_v30  ;;  %3416 = vmatprep.subr.mxu1 %v11994_v61  ;;  %v12004_v30 = vld [vmem:[#allocation112_spill] sm:$0xff]  ;;  %v12005_v61 = vld [vmem:[#allocation113_spill] sm:$0xff] }
 0x5af   : > { %3346 = vmatpush2.msra.mxu0 %v11995_v57  ;;  %3417 = vmatpush2.msra.mxu1 %v11996_v52  ;;  %v12006_v57 = vld [vmem:[#allocation114_spill] sm:$0xff]  ;;  %v12007_v52 = vld [vmem:[#allocation115_spill] sm:$0xff] }
 0x5b0   : > { %3347 = vmatprep.subr.mxu0 %v11997_v49  ;;  %3418 = vmatprep.subr.mxu1 %v11998_v51  ;;  %v12008_v49 = vld [vmem:[#allocation116_spill] sm:$0xff]  ;;  %v12009_v51 = vld [vmem:[#allocation117_spill] sm:$0xff] }
 0x5b1   : > { %3348 = vmatpush2.msra.mxu0 %v11999_v15  ;;  %3419 = vmatpush2.msra.mxu1 %v12000_v43  ;;  %v12010_v15 = vld [vmem:[#allocation118_spill] sm:$0xff]  ;;  %v12011_v43 = vld [vmem:[#allocation119_spill] sm:$0xff] }
 0x5b2   : > { %3349 = vmatprep.subr.mxu0 %v12001_v33  ;;  %3420 = vmatprep.subr.mxu1 %v12002_v34  ;;  %v12012_v33 = vld [vmem:[#allocation120_spill] sm:$0xff]  ;;  %v12013_v34 = vld [vmem:[#allocation121_spill] sm:$0xff] }
 0x5b3   : > { %3350 = vmatpush2.msra.mxu0 %v12003_v42  ;;  %3421 = vmatpush2.msra.mxu1 %v12004_v30  ;;  %v12014_v42 = vld [vmem:[#allocation122_spill] sm:$0xff]  ;;  %v12015_v30 = vld [vmem:[#allocation123_spill] sm:$0xff] }
 0x5b4   : > { %3351 = vmatprep.subr.mxu0 %v12005_v61  ;;  %3422 = vmatprep.subr.mxu1 %v12006_v57  ;;  %v12016_v61 = vld [vmem:[#allocation124_spill] sm:$0xff]  ;;  %v12017_v57 = vld [vmem:[#allocation125_spill] sm:$0xff] }
 0x5b5   : > { %3352 = vmatpush2.msra.mxu0 %v12007_v52  ;;  %3423 = vmatpush2.msra.mxu1 %v12008_v49  ;;  %v12018_v52 = vld [vmem:[#allocation126_spill] sm:$0xff]  ;;  %v12019_v49 = vld [vmem:[#allocation127_spill] sm:$0xff] }
 0x5b6   : > { %3353 = vmatprep.subr.mxu0 %v12009_v51  ;;  %3424 = vmatprep.subr.mxu1 %v12010_v15  ;;  %v12020_v51 = vld [vmem:[#allocation128_spill] sm:$0xff]  ;;  %v12021_v15 = vld [vmem:[#allocation129_spill] sm:$0xff] }
 0x5b7   : > { %3354 = vmatpush2.msra.mxu0 %v12011_v43  ;;  %3425 = vmatpush2.msra.mxu1 %v12012_v33  ;;  %v12022_v43 = vld [vmem:[#allocation130_spill] sm:$0xff]  ;;  %v12023_v33 = vld [vmem:[#allocation131_spill] sm:$0xff] }
 0x5b8   : > { %3355 = vmatprep.subr.mxu0 %v12013_v34  ;;  %3426 = vmatprep.subr.mxu1 %v12014_v42  ;;  %v12024_v34 = vld [vmem:[#allocation132_spill] sm:$0xff]  ;;  %v12025_v42 = vld [vmem:[#allocation133_spill] sm:$0xff] }
 0x5b9   : > { %3356 = vmatpush2.msra.mxu0 %v12015_v30  ;;  %3427 = vmatpush2.msra.mxu1 %v12016_v61  ;;  %v12026_v30 = vld [vmem:[#allocation134_spill] sm:$0xff]  ;;  %v12027_v61 = vld [vmem:[#allocation135_spill] sm:$0xff] }
 0x5ba   : > { %3357 = vmatprep.subr.mxu0 %v12017_v57  ;;  %3428 = vmatprep.subr.mxu1 %v12018_v52  ;;  %v12028_v57 = vld [vmem:[#allocation136_spill] sm:$0xff]  ;;  %v12029_v52 = vld [vmem:[#allocation137_spill] sm:$0xff] }
 0x5bb   : > { %3358 = vmatpush2.msra.mxu0 %v12019_v49  ;;  %3429 = vmatpush2.msra.mxu1 %v12020_v51  ;;  %v12030_v49 = vld [vmem:[#allocation138_spill] sm:$0xff]  ;;  %v12031_v51 = vld [vmem:[#allocation139_spill] sm:$0xff] }
 0x5bc   : > { %3359 = vmatprep.subr.mxu0 %v12021_v15  ;;  %3430 = vmatprep.subr.mxu1 %v12022_v43  ;;  %v12032_v15 = vld [vmem:[#allocation140_spill] sm:$0xff]  ;;  %v12033_v43 = vld [vmem:[#allocation141_spill] sm:$0xff] }
 0x5bd   : > { %3360 = vmatpush2.msra.mxu0 %v12023_v33  ;;  %3431 = vmatpush2.msra.mxu1 %v12024_v34  ;;  %v12034_v33 = vld [vmem:[#allocation142_spill] sm:$0xff]  ;;  %v12035_v34 = vld [vmem:[#allocation143_spill] sm:$0xff] }
 0x5be   : > { %3361 = vmatprep.subr.mxu0 %v12025_v42  ;;  %3432 = vmatprep.subr.mxu1 %v12026_v30  ;;  %v12036_v42 = vld [vmem:[#allocation144_spill] sm:$0xff]  ;;  %v12037_v30 = vld [vmem:[#allocation145_spill] sm:$0xff] }
 0x5bf   : > { %3362 = vmatpush2.msra.mxu0 %v12027_v61  ;;  %3433 = vmatpush2.msra.mxu1 %v12028_v57  ;;  %v12038_v61 = vld [vmem:[#allocation146_spill] sm:$0xff]  ;;  %v12039_v57 = vld [vmem:[#allocation147_spill] sm:$0xff] }
 0x5c0   : > { %3363 = vmatprep.subr.mxu0 %v12029_v52  ;;  %3434 = vmatprep.subr.mxu1 %v12030_v49  ;;  %v12040_v52 = vld [vmem:[#allocation148_spill] sm:$0xff]  ;;  %v12041_v49 = vld [vmem:[#allocation149_spill] sm:$0xff] }
 0x5c1   : > { %3364 = vmatpush2.msra.mxu0 %v12031_v51  ;;  %3435 = vmatpush2.msra.mxu1 %v12032_v15  ;;  %v12042_v51 = vld [vmem:[#allocation150_spill] sm:$0xff]  ;;  %v12043_v15 = vld [vmem:[#allocation151_spill] sm:$0xff] }
 0x5c2   : > { %3365 = vmatprep.subr.mxu0 %v12033_v43  ;;  %3436 = vmatprep.subr.mxu1 %v12034_v33  ;;  %v12044_v43 = vld [vmem:[#allocation152_spill] sm:$0xff]  ;;  %v12045_v33 = vld [vmem:[#allocation153_spill] sm:$0xff] }
 0x5c3   : > { %3366 = vmatpush2.msra.mxu0 %v12035_v34  ;;  %3437 = vmatpush2.msra.mxu1 %v12036_v42  ;;  %v12046_v34 = vld [vmem:[#allocation154_spill] sm:$0xff] }
 0x5c4   : > { %3367 = vmatprep.subr.mxu0 %v12037_v30  ;;  %3438 = vmatprep.subr.mxu1 %v12038_v61  ;;  %v12048_v61 = vld [vmem:[#allocation289_spill] sm:$0xff] }
 0x5c5   : > { %3368 = vmatpush2.msra.mxu0 %v12039_v57  ;;  %3439 = vmatpush2.msra.mxu1 %v12040_v52  ;;  %v1468_v2 = vadd.f32 %v12048_v61, %v12047_v18  ;;  %v12049_v57 = vld [vmem:[#allocation340_spill] sm:$0xff] }
 0x5c6   : > { %3369 = vmatprep.subr.mxu0 %v12041_v49  ;;  %3440 = vmatprep.subr.mxu1 %v12042_v51  ;;  %v1581_v52 = vadd.f32 %v12050_v1, %v12049_v57  ;;  %v12051_v49 = vld [vmem:[#allocation291_spill] sm:$0xff] }
 0x5c7   : > { %3370 = vmatpush2.msra.mxu0 %v12043_v15  ;;  %3441 = vmatpush2.msra.mxu1 %v12044_v43  ;;  %v1470_v51 = vadd.f32 %v12051_v49, %v8301_v4  ;;  %v12052_v43 = vld [vmem:[#allocation292_spill] sm:$0xff] }
 0x5c8   : > { %3449 = vmatprep.subr.mxu0 %v12045_v33  ;;  %3520 = vmatprep.subr.mxu1 %v12046_v34  ;;  %v1583_v33 = vadd.f32 %v12052_v43, %v8305_v37 }
 0x606   : > { %v3023_v42 = vpop.f32.mrf.mxu0  ;;  %v3094_v30 = vpop.f32.mrf.mxu1 }
 0x607   : > { %v3241_v0 = vadd.f32 %v3023_v42, %v1468_v2  ;;  %v3243_v15 = vadd.f32 %v3094_v30, %v1581_v52  ;;  %v12053_v30 = vld [vmem:[#allocation317_spill] sm:$0xff] }
 0x608   : > { %v3025_v36 = vpop.f32.mrf.mxu0  ;;  %v3096_v19 = vpop.f32.mrf.mxu1  ;;  %v1694_v43 = vadd.f32 %v12053_v30, %v8313_v47 }
 0x609   : > { %v3242_v23 = vadd.f32 %v3025_v36, %v1470_v51  ;;  %v5571_v34 = vmul.f32 -1.442695, %v3241_v0  ;;  %v3244_v63 = vadd.f32 %v3096_v19, %v1583_v33  ;;  %v5573_v59 = vmul.f32 -1.442695, %v3243_v15  ;;  %v12054_v51 = vld [vmem:[#allocation343_spill] sm:$0xff]  ;;  %v12055_v0 = vld [vmem:[#allocation318_spill] sm:$0xff] }
 0x60a   : > { %v1807_v33 = vadd.f32 %v12055_v0, %v12054_v51  ;;  %v12056_v15 = vld [vmem:[#allocation344_spill] sm:$0xff]  ;;  %v12057_v19 = vld [vmem:[#allocation319_spill] sm:$0xff] }
 0x60b   : > { %v5572_v10 = vmul.f32 -1.442695, %v3242_v23  ;;  %5988 = vpow2.f32 %v5571_v34  ;;  %v5574_v61 = vmul.f32 -1.442695, %v3244_v63  ;;  %v1696_v34 = vadd.f32 %v12057_v19, %v12056_v15  ;;  %v12058_v63 = vld [vmem:[#allocation320_spill] sm:$0xff] }
 0x60c   : > { %5990 = vpow2.f32 %v5573_v59  ;;  %v1809_v23 = vadd.f32 %v12058_v63, %v8319_v28 }
 0x60d   : > { %5992 = vpow2.f32 %v5572_v10 }
 0x60e   : > { %5994 = vpow2.f32 %v5574_v61 }
 0x618   : > { %v5989_v1 = vpop.eup %5988 }
 0x619   : > { %v5991_v57 = vpop.eup %5990  ;;  %v3255_v49 = vadd.f32 1.0, %v5989_v1 }
 0x61a   : > { %v5993_v18 = vpop.eup %5992  ;;  %v3267_v52 = vadd.f32 1.0, %v5991_v57 }
 0x61b   : > { %v5995_v42 = vpop.eup %5994  ;;  %v3256_v2 = vadd.f32 1.0, %v5993_v18  ;;  %5996 = vrcp.f32 %v3255_v49 }
 0x61c   : > { %v3268_v59 = vadd.f32 1.0, %v5995_v42  ;;  %5998 = vrcp.f32 %v3267_v52 }
 0x61d   : > { %6000 = vrcp.f32 %v3256_v2 }
 0x628   : > { %v5997_v49 = vpop.eup %5996 }
 0x629   : > { %v5999_v42 = vpop.eup %5998 }
 0x62a   : > { %v6001_v15 = vpop.eup %6000  ;;  %v3287_v52 = vmul.f32 %v5999_v42, %v8902_v27  ;;  %v12064_v42 = vld [vmem:[#allocation189_spill] sm:$0xff] }
 0x647   : > { %v3165_v36 = vpop.f32.mrf.mxu0  ;;  %v3236_v10 = vpop.f32.mrf.mxu1 }
 0x648   : > { %v3245_v61 = vadd.f32 %v3165_v36, %v1694_v43  ;;  %v3247_v57 = vadd.f32 %v3236_v10, %v1807_v33 }
 0x649   : > { %v3167_v18 = vpop.f32.mrf.mxu0  ;;  %v3238_v1 = vpop.f32.mrf.mxu1 }
 0x64a   : > { %6002 = vtanh.f32 %v3245_v61  ;;  %v5575_v30 = vmul.f32 -1.442695, %v3247_v57  ;;  %v3246_v47 = vadd.f32 %v3167_v18, %v1696_v34  ;;  %v3248_v0 = vadd.f32 %v3238_v1, %v1809_v23 }
 0x64b   : > { %6004 = vrcp.f32 %v3268_v59 }
 0x64c   : > { %6006 = vpow2.f32 %v5575_v30  ;;  %v5576_v19 = vmul.f32 -1.442695, %v3248_v0  ;;  %v12061_v0 = vld [vmem:[#allocation186_spill] sm:$0xff] }
 0x64d   : > { %6008 = vtanh.f32 %v3246_v47 }
 0x64e   : > { %6010 = vpow2.f32 %v5576_v19  ;;  %v12062_v19 = vld [vmem:[#allocation187_spill] sm:$0xff] }
 0x657   : > { %v6003_v51 = vpop.eup %6002 }
 0x658   : > { %v6005_v63 = vpop.eup %6004  ;;  %v3289_v43 = vmul.f32 %v6003_v51, %v5997_v49  ;;  %v12063_v49 = vld [vmem:[#allocation188_spill] sm:$0xff] }
 0x659   : > { %v6007_v2 = vpop.eup %6006  ;;  %v3288_v59 = vmul.f32 %v6005_v63, %v8906_v14  ;;  %v12059_v14 = vld [vmem:[#allocation184_spill] sm:$0xff]  ;;  %v12065_v63 = vld [vmem:[#allocation190_spill] sm:$0xff] }
 0x65a   : > { %v6009_v33 = vpop.eup %6008  ;;  %v9189_v36 = vadd.f32 %v3289_v43, %v3287_v52  ;;  %v3281_v10 = vadd.f32 1.0, %v6007_v2  ;;  %v12066_v52 = vld [vmem:[#allocation191_spill] sm:$0xff]  ;;  %v12067_v43 = vld [vmem:[#allocation192_spill] sm:$0xff]  ;;  %v12068_v2 = vld [vmem:[#allocation193_spill] sm:$0xff] }
 0x65b   : > { %v6011_v34 = vpop.eup %6010  ;;  %v3290_v23 = vmul.f32 %v6009_v33, %v6001_v15  ;;  %v12060_v15 = vld [vmem:[#allocation185_spill] sm:$0xff]  ;;  %v12069_v33 = vld [vmem:[#allocation194_spill] sm:$0xff] }
 0x65c   : > { %6012 = vtanh.f32 %v9189_v36  ;;  %v3282_v47 = vadd.f32 1.0, %v6011_v34  ;;  %v12071_v34 = vld [vmem:[#allocation196_spill] sm:$0xff] }
 0x65d   : > { %6014 = vrcp.f32 %v3281_v10  ;;  %v9193_v61 = vadd.f32 %v3290_v23, %v3288_v59  ;;  %v12070_v10 = vld [vmem:[#allocation195_spill] sm:$0xff]  ;;  %v12072_v59 = vld [vmem:[#allocation197_spill] sm:$0xff]  ;;  %v12073_v23 = vld [vmem:[#allocation198_spill] sm:$0xff] }
 0x65e   : > { %6016 = vrcp.f32 %v3282_v47  ;;  %v12074_v47 = vld [vmem:[#allocation199_spill] sm:$0xff] }
 0x65f   : > { %6018 = vtanh.f32 %v9193_v61 }
 0x669   : > { %v6013_v27 = vpop.eup %6012 }
 0x66a   : > { %v6015_v51 = vpop.eup %6014 }
 0x66b   : > { %v6017_v57 = vpop.eup %6016  ;;  %v9196_v18 = vmul.f32 %v6015_v51, %v6013_v27  ;;  %v12075_v27 = vld [vmem:[#allocation200_spill] sm:$0xff]  ;;  %v12076_v51 = vld [vmem:[#allocation201_spill] sm:$0xff] }
 0x66c   : > { %v6019_v1 = vpop.eup %6018 }
 0x66d   : > { %v3296_v30 = vmul.f32 %v6019_v1, %v6017_v57  ;;  %3297 = vst [vmem:[#allocation2 + $0x8] sm:$0xff] %v9196_v18  ;;  %v12077_v57 = vld [vmem:[#allocation202_spill] sm:$0xff]  ;;  %v12078_v1 = vld [vmem:[#allocation203_spill] sm:$0xff] }
 0x66f   : > { %3298 = vst [vmem:[#allocation2 + $0x48] sm:$0xff] %v3296_v30  ;;  %3371 = vmatprep.mubr.f32.mxu0 %v3296_v30  ;;  %3442 = vmatprep.mubr.f32.mxu1 %v3296_v30 }
 0x670   : > { %3372 = vmatmul.mubr.f32.vlgmr.msra.gmra.mxu0 %v9196_v18  ;;  %3443 = vmatmul.mubr.f32.vlgmr.msra.gmra.mxu1 %v9196_v18 }
 0x671   : > { %3450 = vmatpush1.msra.mxu0 %v11364_v12  ;;  %3521 = vmatpush1.msra.mxu1 %v11365_v41 }
 0x672   : > { %3451 = vmatprep.subr.mxu0 %v11366_v46  ;;  %3513 = vmatprep.mubr.f32.mxu0 %v3296_v30 }
 0x673   : > { %3522 = vmatprep.subr.mxu1 %v11367_v3  ;;  %3584 = vmatprep.mubr.f32.mxu1 %v3296_v30  ;;  %v12079_v30 = vld [vmem:[#allocation204_spill] sm:$0xff] }
 0x674   : > { %3452 = vmatpush1.msra.mxu0 %v11368_v35  ;;  %3523 = vmatpush1.msra.mxu1 %v11369_v39 }
 0x675   : > { %3453 = vmatprep.subr.mxu0 %v11370_v29  ;;  %3524 = vmatprep.subr.mxu1 %v11371_v25 }
 0x676   : > { %3454 = vmatpush1.msra.mxu0 %v11372_v44  ;;  %3525 = vmatpush1.msra.mxu1 %v11595_v45 }
 0x677   : > { %3455 = vmatprep.subr.mxu0 %v11596_v56  ;;  %3526 = vmatprep.subr.mxu1 %v11597_v58 }
 0x678   : > { %3456 = vmatpush1.msra.mxu0 %v11598_v9  ;;  %3527 = vmatpush1.msra.mxu1 %v11599_v17 }
 0x679   : > { %3457 = vmatprep.subr.mxu0 %v11600_v53  ;;  %3528 = vmatprep.subr.mxu1 %v11601_v11 }
 0x67a   : > { %3458 = vmatpush1.msra.mxu0 %v11602_v21  ;;  %3529 = vmatpush1.msra.mxu1 %v11603_v16 }
 0x67b   : > { %3459 = vmatprep.subr.mxu0 %v11604_v8  ;;  %3530 = vmatprep.subr.mxu1 %v11827_v7 }
 0x67c   : > { %3460 = vmatpush1.msra.mxu0 %v11828_v38  ;;  %3531 = vmatpush1.msra.mxu1 %v11829_v6 }
 0x67d   : > { %3461 = vmatprep.subr.mxu0 %v11830_v62  ;;  %3532 = vmatprep.subr.mxu1 %v11831_v26 }
 0x67e   : > { %3462 = vmatpush1.msra.mxu0 %v11832_v22  ;;  %3533 = vmatpush1.msra.mxu1 %v11833_v13 }
 0x67f   : > { %3463 = vmatprep.subr.mxu0 %v11834_v40  ;;  %3534 = vmatprep.subr.mxu1 %v11835_v48 }
 0x680   : > { %3464 = vmatpush1.msra.mxu0 %v11836_v32  ;;  %3535 = vmatpush1.msra.mxu1 %v12059_v14 }
 0x681   : > { %3465 = vmatprep.subr.mxu0 %v12060_v15  ;;  %3536 = vmatprep.subr.mxu1 %v12061_v0 }
 0x682   : > { %3466 = vmatpush1.msra.mxu0 %v12062_v19  ;;  %3537 = vmatpush1.msra.mxu1 %v12063_v49 }
 0x683   : > { %3467 = vmatprep.subr.mxu0 %v12064_v42  ;;  %3538 = vmatprep.subr.mxu1 %v12065_v63 }
 0x684   : > { %3468 = vmatpush1.msra.mxu0 %v12066_v52  ;;  %3539 = vmatpush1.msra.mxu1 %v12067_v43 }
 0x685   : > { %3469 = vmatprep.subr.mxu0 %v12068_v2  ;;  %3540 = vmatprep.subr.mxu1 %v12069_v33  ;;  %v12080_v33 = vld [vmem:[#allocation205_spill] sm:$0xff] }
 0x686   : > { %3470 = vmatpush1.msra.mxu0 %v12070_v10  ;;  %3541 = vmatpush1.msra.mxu1 %v12071_v34  ;;  %v12081_v10 = vld [vmem:[#allocation206_spill] sm:$0xff]  ;;  %v12082_v34 = vld [vmem:[#allocation207_spill] sm:$0xff] }
 0x687   : > { %3471 = vmatprep.subr.mxu0 %v12072_v59  ;;  %3542 = vmatprep.subr.mxu1 %v12073_v23  ;;  %v12083_v59 = vld [vmem:[#allocation208_spill] sm:$0xff]  ;;  %v12084_v23 = vld [vmem:[#allocation209_spill] sm:$0xff] }
 0x688   : > { %3472 = vmatpush1.msra.mxu0 %v12074_v47  ;;  %3543 = vmatpush1.msra.mxu1 %v12075_v27  ;;  %v12085_v47 = vld [vmem:[#allocation210_spill] sm:$0xff]  ;;  %v12086_v27 = vld [vmem:[#allocation211_spill] sm:$0xff] }
 0x689   : > { %3473 = vmatprep.subr.mxu0 %v12076_v51  ;;  %3544 = vmatprep.subr.mxu1 %v12077_v57  ;;  %v12087_v51 = vld [vmem:[#allocation212_spill] sm:$0xff]  ;;  %v12088_v57 = vld [vmem:[#allocation213_spill] sm:$0xff] }
 0x68a   : > { %3474 = vmatpush1.msra.mxu0 %v12078_v1  ;;  %3545 = vmatpush1.msra.mxu1 %v12079_v30  ;;  %v12089_v1 = vld [vmem:[#allocation214_spill] sm:$0xff]  ;;  %v12090_v30 = vld [vmem:[#allocation215_spill] sm:$0xff] }
 0x68b   : > { %3475 = vmatprep.subr.mxu0 %v12080_v33  ;;  %3546 = vmatprep.subr.mxu1 %v12081_v10  ;;  %v12091_v33 = vld [vmem:[#allocation216_spill] sm:$0xff]  ;;  %v12092_v10 = vld [vmem:[#allocation217_spill] sm:$0xff] }
 0x68c   : > { %3476 = vmatpush1.msra.mxu0 %v12082_v34  ;;  %3547 = vmatpush1.msra.mxu1 %v12083_v59  ;;  %v12093_v34 = vld [vmem:[#allocation218_spill] sm:$0xff]  ;;  %v12094_v59 = vld [vmem:[#allocation219_spill] sm:$0xff] }
 0x68d   : > { %3477 = vmatprep.subr.mxu0 %v12084_v23  ;;  %3548 = vmatprep.subr.mxu1 %v12085_v47  ;;  %v12095_v23 = vld [vmem:[#allocation220_spill] sm:$0xff]  ;;  %v12096_v47 = vld [vmem:[#allocation221_spill] sm:$0xff] }
 0x68e   : > { %3478 = vmatpush1.msra.mxu0 %v12086_v27  ;;  %3549 = vmatpush1.msra.mxu1 %v12087_v51  ;;  %v12097_v27 = vld [vmem:[#allocation222_spill] sm:$0xff]  ;;  %v12098_v51 = vld [vmem:[#allocation223_spill] sm:$0xff] }
 0x68f   : > { %3479 = vmatprep.subr.mxu0 %v12088_v57  ;;  %3550 = vmatprep.subr.mxu1 %v12089_v1  ;;  %v12099_v57 = vld [vmem:[#allocation224_spill] sm:$0xff]  ;;  %v12100_v1 = vld [vmem:[#allocation225_spill] sm:$0xff] }
 0x690   : > { %3480 = vmatpush1.msra.mxu0 %v12090_v30  ;;  %3551 = vmatpush1.msra.mxu1 %v12091_v33  ;;  %v12101_v30 = vld [vmem:[#allocation226_spill] sm:$0xff]  ;;  %v12102_v33 = vld [vmem:[#allocation227_spill] sm:$0xff] }
 0x691   : > { %3481 = vmatprep.subr.mxu0 %v12092_v10  ;;  %3552 = vmatprep.subr.mxu1 %v12093_v34  ;;  %v12103_v10 = vld [vmem:[#allocation228_spill] sm:$0xff]  ;;  %v12104_v34 = vld [vmem:[#allocation229_spill] sm:$0xff] }
 0x692   : > { %3482 = vmatpush2.msra.mxu0 %v12094_v59  ;;  %3553 = vmatpush2.msra.mxu1 %v12095_v23  ;;  %v12105_v59 = vld [vmem:[#allocation230_spill] sm:$0xff] }
 0x693   : > { %3483 = vmatprep.subr.mxu0 %v12096_v47  ;;  %3554 = vmatprep.subr.mxu1 %v12097_v27  ;;  %v12106_v47 = vld [vmem:[#allocation232_spill] sm:$0xff]  ;;  %v12107_v27 = vld [vmem:[#allocation233_spill] sm:$0xff] }
 0x694   : > { %3484 = vmatpush2.msra.mxu0 %v12098_v51  ;;  %3555 = vmatpush2.msra.mxu1 %v12099_v57 }
 0x695   : > { %3485 = vmatprep.subr.mxu0 %v12100_v1  ;;  %3556 = vmatprep.subr.mxu1 %v12101_v30 }
 0x696   : > { %3486 = vmatpush2.msra.mxu0 %v12102_v33  ;;  %3557 = vmatpush2.msra.mxu1 %v12103_v10  ;;  %v12281_v10 = vld [vmem:[#allocation294_spill] sm:$0xff] }
 0x697   : > { %3487 = vmatprep.subr.mxu0 %v12104_v34  ;;  %3558 = vmatprep.subr.mxu1 %v12105_v59  ;;  %v12108_v59 = vld [vmem:[#allocation241_spill] sm:$0xff] }
 0x698   : > { %3488 = vmatpush2.msra.mxu0 %v11884_v54  ;;  %3559 = vmatpush2.msra.mxu1 %v12106_v47  ;;  %v12109_v54 = vld [vmem:[#allocation242_spill] sm:$0xff]  ;;  %v12110_v47 = vld [vmem:[#allocation243_spill] sm:$0xff] }
 0x699   : > { %3489 = vmatprep.subr.mxu0 %v12107_v27  ;;  %3560 = vmatprep.subr.mxu1 %v11887_v50  ;;  %v12111_v27 = vld [vmem:[#allocation244_spill] sm:$0xff]  ;;  %v12112_v50 = vld [vmem:[#allocation245_spill] sm:$0xff] }
 0x69a   : > { %3490 = vmatpush2.msra.mxu0 %v11888_v5  ;;  %3561 = vmatpush2.msra.mxu1 %v11889_v55  ;;  %v12113_v5 = vld [vmem:[#allocation246_spill] sm:$0xff]  ;;  %v12114_v55 = vld [vmem:[#allocation247_spill] sm:$0xff] }
 0x69b   : > { %3491 = vmatprep.subr.mxu0 %v11890_v60  ;;  %3562 = vmatprep.subr.mxu1 %v11891_v20  ;;  %v12115_v60 = vld [vmem:[#allocation248_spill] sm:$0xff]  ;;  %v12116_v20 = vld [vmem:[#allocation249_spill] sm:$0xff] }
 0x69c   : > { %3492 = vmatpush2.msra.mxu0 %v11892_v24  ;;  %3563 = vmatpush2.msra.mxu1 %v11893_v31  ;;  %v12117_v24 = vld [vmem:[#allocation250_spill] sm:$0xff]  ;;  %v12118_v31 = vld [vmem:[#allocation251_spill] sm:$0xff] }
 0x69d   : > { %3493 = vmatprep.subr.mxu0 %v12108_v59  ;;  %3564 = vmatprep.subr.mxu1 %v12109_v54  ;;  %v12119_v59 = vld [vmem:[#allocation252_spill] sm:$0xff]  ;;  %v12120_v54 = vld [vmem:[#allocation253_spill] sm:$0xff] }
 0x69e   : > { %3494 = vmatpush2.msra.mxu0 %v12110_v47  ;;  %3565 = vmatpush2.msra.mxu1 %v12111_v27  ;;  %v12121_v47 = vld [vmem:[#allocation254_spill] sm:$0xff]  ;;  %v12122_v27 = vld [vmem:[#allocation255_spill] sm:$0xff] }
 0x69f   : > { %3495 = vmatprep.subr.mxu0 %v12112_v50  ;;  %3566 = vmatprep.subr.mxu1 %v12113_v5  ;;  %v12123_v50 = vld [vmem:[#allocation256_spill] sm:$0xff]  ;;  %v12124_v5 = vld [vmem:[#allocation257_spill] sm:$0xff] }
 0x6a0   : > { %3496 = vmatpush2.msra.mxu0 %v12114_v55  ;;  %3567 = vmatpush2.msra.mxu1 %v12115_v60  ;;  %v12125_v55 = vld [vmem:[#allocation258_spill] sm:$0xff]  ;;  %v12126_v60 = vld [vmem:[#allocation259_spill] sm:$0xff] }
 0x6a1   : > { %3497 = vmatprep.subr.mxu0 %v12116_v20  ;;  %3568 = vmatprep.subr.mxu1 %v12117_v24  ;;  %v12127_v20 = vld [vmem:[#allocation260_spill] sm:$0xff]  ;;  %v12128_v24 = vld [vmem:[#allocation261_spill] sm:$0xff] }
 0x6a2   : > { %3498 = vmatpush2.msra.mxu0 %v12118_v31  ;;  %3569 = vmatpush2.msra.mxu1 %v12119_v59  ;;  %v12129_v31 = vld [vmem:[#allocation262_spill] sm:$0xff]  ;;  %v12130_v59 = vld [vmem:[#allocation263_spill] sm:$0xff] }
 0x6a3   : > { %3499 = vmatprep.subr.mxu0 %v12120_v54  ;;  %3570 = vmatprep.subr.mxu1 %v12121_v47  ;;  %v12131_v54 = vld [vmem:[#allocation264_spill] sm:$0xff]  ;;  %v12132_v47 = vld [vmem:[#allocation265_spill] sm:$0xff] }
 0x6a4   : > { %3500 = vmatpush2.msra.mxu0 %v12122_v27  ;;  %3571 = vmatpush2.msra.mxu1 %v12123_v50  ;;  %v12133_v27 = vld [vmem:[#allocation266_spill] sm:$0xff]  ;;  %v12134_v50 = vld [vmem:[#allocation267_spill] sm:$0xff] }
 0x6a5   : > { %3501 = vmatprep.subr.mxu0 %v12124_v5  ;;  %3572 = vmatprep.subr.mxu1 %v12125_v55  ;;  %v12135_v5 = vld [vmem:[#allocation268_spill] sm:$0xff]  ;;  %v12136_v55 = vld [vmem:[#allocation269_spill] sm:$0xff] }
 0x6a6   : > { %3502 = vmatpush2.msra.mxu0 %v12126_v60  ;;  %3573 = vmatpush2.msra.mxu1 %v12127_v20  ;;  %v12137_v60 = vld [vmem:[#allocation270_spill] sm:$0xff]  ;;  %v12138_v20 = vld [vmem:[#allocation271_spill] sm:$0xff] }
 0x6a7   : > { %3503 = vmatprep.subr.mxu0 %v12128_v24  ;;  %3574 = vmatprep.subr.mxu1 %v12129_v31  ;;  %v12139_v24 = vld [vmem:[#allocation272_spill] sm:$0xff]  ;;  %v12140_v31 = vld [vmem:[#allocation273_spill] sm:$0xff] }
 0x6a8   : > { %3504 = vmatpush2.msra.mxu0 %v12130_v59  ;;  %3575 = vmatpush2.msra.mxu1 %v12131_v54  ;;  %v12141_v59 = vld [vmem:[#allocation274_spill] sm:$0xff]  ;;  %v12142_v54 = vld [vmem:[#allocation275_spill] sm:$0xff] }
 0x6a9   : > { %3505 = vmatprep.subr.mxu0 %v12132_v47  ;;  %3576 = vmatprep.subr.mxu1 %v12133_v27  ;;  %v12143_v47 = vld [vmem:[#allocation276_spill] sm:$0xff]  ;;  %v12144_v27 = vld [vmem:[#allocation277_spill] sm:$0xff] }
 0x6aa   : > { %3506 = vmatpush2.msra.mxu0 %v12134_v50  ;;  %3577 = vmatpush2.msra.mxu1 %v12135_v5  ;;  %v12145_v50 = vld [vmem:[#allocation278_spill] sm:$0xff]  ;;  %v12146_v5 = vld [vmem:[#allocation279_spill] sm:$0xff] }
 0x6ab   : > { %3507 = vmatprep.subr.mxu0 %v12136_v55  ;;  %3578 = vmatprep.subr.mxu1 %v12137_v60  ;;  %v12147_v55 = vld [vmem:[#allocation280_spill] sm:$0xff]  ;;  %v12278_v60 = vld [vmem:[#allocation339_spill] sm:$0xff] }
 0x6ac   : > { %3508 = vmatpush2.msra.mxu0 %v12138_v20  ;;  %3579 = vmatpush2.msra.mxu1 %v12139_v24  ;;  %v12148_v24 = vld [vmem:[#allocation25_spill] sm:$0xff]  ;;  %v12157_v20 = vld [vmem:[#allocation34_spill] sm:$0xff] }
 0x6ad   : > { %3509 = vmatprep.subr.mxu0 %v12140_v31  ;;  %3580 = vmatprep.subr.mxu1 %v12141_v59  ;;  %v12149_v31 = vld [vmem:[#allocation26_spill] sm:$0xff]  ;;  %v12150_v59 = vld [vmem:[#allocation27_spill] sm:$0xff] }
 0x6ae   : > { %3510 = vmatpush2.msra.mxu0 %v12142_v54  ;;  %3581 = vmatpush2.msra.mxu1 %v12143_v47  ;;  %v12151_v54 = vld [vmem:[#allocation28_spill] sm:$0xff]  ;;  %v12152_v47 = vld [vmem:[#allocation29_spill] sm:$0xff] }
 0x6af   : > { %3511 = vmatprep.subr.mxu0 %v12144_v27  ;;  %3582 = vmatprep.subr.mxu1 %v12145_v50  ;;  %v12153_v27 = vld [vmem:[#allocation30_spill] sm:$0xff]  ;;  %v12154_v50 = vld [vmem:[#allocation31_spill] sm:$0xff] }
 0x6b0   : > { %3512 = vmatpush2.msra.mxu0 %v12146_v5  ;;  %3583 = vmatpush2.msra.mxu1 %v12147_v55  ;;  %v12155_v5 = vld [vmem:[#allocation32_spill] sm:$0xff]  ;;  %v12156_v55 = vld [vmem:[#allocation33_spill] sm:$0xff] }
 0x6b1   : > { %3514 = vmatmul.mubr.f32.vlgmr.msra.gmra.mxu0 %v9196_v18  ;;  %3585 = vmatmul.mubr.f32.vlgmr.msra.gmra.mxu1 %v9196_v18  ;;  %v12158_v18 = vld [vmem:[#allocation35_spill] sm:$0xff] }
 0x6b2   : > { %3657 = vmatprep.subr.mxu0 %v12148_v24  ;;  %3728 = vmatprep.subr.mxu1 %v12149_v31  ;;  %v12159_v24 = vld [vmem:[#allocation36_spill] sm:$0xff]  ;;  %v12160_v31 = vld [vmem:[#allocation37_spill] sm:$0xff] }
 0x6b3   : > { %3658 = vmatpush1.msra.mxu0 %v12150_v59  ;;  %3729 = vmatpush1.msra.mxu1 %v12151_v54  ;;  %v12161_v59 = vld [vmem:[#allocation38_spill] sm:$0xff]  ;;  %v12162_v54 = vld [vmem:[#allocation39_spill] sm:$0xff] }
 0x6b4   : > { %3659 = vmatprep.subr.mxu0 %v12152_v47  ;;  %3730 = vmatprep.subr.mxu1 %v12153_v27  ;;  %v12163_v47 = vld [vmem:[#allocation40_spill] sm:$0xff]  ;;  %v12164_v27 = vld [vmem:[#allocation41_spill] sm:$0xff] }
 0x6b5   : > { %3660 = vmatpush1.msra.mxu0 %v12154_v50  ;;  %3731 = vmatpush1.msra.mxu1 %v12155_v5  ;;  %v12165_v50 = vld [vmem:[#allocation42_spill] sm:$0xff]  ;;  %v12166_v5 = vld [vmem:[#allocation43_spill] sm:$0xff] }
 0x6b6   : > { %3661 = vmatprep.subr.mxu0 %v12156_v55  ;;  %3732 = vmatprep.subr.mxu1 %v12157_v20  ;;  %v12167_v55 = vld [vmem:[#allocation44_spill] sm:$0xff]  ;;  %v12168_v20 = vld [vmem:[#allocation45_spill] sm:$0xff] }
 0x6b7   : > { %3662 = vmatpush1.msra.mxu0 %v12158_v18  ;;  %3733 = vmatpush1.msra.mxu1 %v12159_v24  ;;  %v12169_v18 = vld [vmem:[#allocation46_spill] sm:$0xff]  ;;  %v12170_v24 = vld [vmem:[#allocation47_spill] sm:$0xff] }
 0x6b8   : > { %3663 = vmatprep.subr.mxu0 %v12160_v31  ;;  %3734 = vmatprep.subr.mxu1 %v12161_v59  ;;  %v12171_v31 = vld [vmem:[#allocation48_spill] sm:$0xff]  ;;  %v12172_v59 = vld [vmem:[#allocation49_spill] sm:$0xff] }
 0x6b9   : > { %3664 = vmatpush1.msra.mxu0 %v12162_v54  ;;  %3735 = vmatpush1.msra.mxu1 %v12163_v47  ;;  %v12173_v54 = vld [vmem:[#allocation50_spill] sm:$0xff]  ;;  %v12174_v47 = vld [vmem:[#allocation51_spill] sm:$0xff] }
 0x6ba   : > { %3665 = vmatprep.subr.mxu0 %v12164_v27  ;;  %3736 = vmatprep.subr.mxu1 %v12165_v50  ;;  %v12175_v27 = vld [vmem:[#allocation52_spill] sm:$0xff]  ;;  %v12176_v50 = vld [vmem:[#allocation53_spill] sm:$0xff] }
 0x6bb   : > { %3666 = vmatpush1.msra.mxu0 %v12166_v5  ;;  %3737 = vmatpush1.msra.mxu1 %v12167_v55  ;;  %v12177_v5 = vld [vmem:[#allocation54_spill] sm:$0xff]  ;;  %v12178_v55 = vld [vmem:[#allocation55_spill] sm:$0xff] }
 0x6bc   : > { %3667 = vmatprep.subr.mxu0 %v12168_v20  ;;  %3738 = vmatprep.subr.mxu1 %v12169_v18  ;;  %v12179_v20 = vld [vmem:[#allocation56_spill] sm:$0xff]  ;;  %v12180_v18 = vld [vmem:[#allocation57_spill] sm:$0xff] }
 0x6bd   : > { %3668 = vmatpush1.msra.mxu0 %v12170_v24  ;;  %3739 = vmatpush1.msra.mxu1 %v12171_v31  ;;  %v12181_v24 = vld [vmem:[#allocation58_spill] sm:$0xff]  ;;  %v12182_v31 = vld [vmem:[#allocation59_spill] sm:$0xff] }
 0x6be   : > { %3669 = vmatprep.subr.mxu0 %v12172_v59  ;;  %3740 = vmatprep.subr.mxu1 %v12173_v54  ;;  %v12183_v59 = vld [vmem:[#allocation60_spill] sm:$0xff]  ;;  %v12184_v54 = vld [vmem:[#allocation61_spill] sm:$0xff] }
 0x6bf   : > { %3670 = vmatpush1.msra.mxu0 %v12174_v47  ;;  %3741 = vmatpush1.msra.mxu1 %v12175_v27  ;;  %v12185_v47 = vld [vmem:[#allocation62_spill] sm:$0xff]  ;;  %v12186_v27 = vld [vmem:[#allocation63_spill] sm:$0xff] }
 0x6c0   : > { %3671 = vmatprep.subr.mxu0 %v12176_v50  ;;  %3742 = vmatprep.subr.mxu1 %v12177_v5  ;;  %v12187_v50 = vld [vmem:[#allocation64_spill] sm:$0xff]  ;;  %v12188_v5 = vld [vmem:[#allocation65_spill] sm:$0xff] }
 0x6c1   : > { %3672 = vmatpush1.msra.mxu0 %v12178_v55  ;;  %3743 = vmatpush1.msra.mxu1 %v12179_v20  ;;  %v12189_v55 = vld [vmem:[#allocation66_spill] sm:$0xff]  ;;  %v12190_v20 = vld [vmem:[#allocation67_spill] sm:$0xff] }
 0x6c2   : > { %3673 = vmatprep.subr.mxu0 %v12180_v18  ;;  %3744 = vmatprep.subr.mxu1 %v12181_v24  ;;  %v12191_v18 = vld [vmem:[#allocation68_spill] sm:$0xff]  ;;  %v12192_v24 = vld [vmem:[#allocation69_spill] sm:$0xff] }
 0x6c3   : > { %3674 = vmatpush1.msra.mxu0 %v12182_v31  ;;  %3745 = vmatpush1.msra.mxu1 %v12183_v59  ;;  %v12193_v31 = vld [vmem:[#allocation70_spill] sm:$0xff]  ;;  %v12194_v59 = vld [vmem:[#allocation71_spill] sm:$0xff] }
 0x6c4   : > { %3675 = vmatprep.subr.mxu0 %v12184_v54  ;;  %3746 = vmatprep.subr.mxu1 %v12185_v47  ;;  %v12195_v54 = vld [vmem:[#allocation72_spill] sm:$0xff]  ;;  %v12196_v47 = vld [vmem:[#allocation73_spill] sm:$0xff] }
 0x6c5   : > { %3676 = vmatpush1.msra.mxu0 %v12186_v27  ;;  %3747 = vmatpush1.msra.mxu1 %v12187_v50  ;;  %v12197_v27 = vld [vmem:[#allocation74_spill] sm:$0xff]  ;;  %v12198_v50 = vld [vmem:[#allocation75_spill] sm:$0xff] }
 0x6c6   : > { %3677 = vmatprep.subr.mxu0 %v12188_v5  ;;  %3748 = vmatprep.subr.mxu1 %v12189_v55  ;;  %v12199_v5 = vld [vmem:[#allocation76_spill] sm:$0xff]  ;;  %v12200_v55 = vld [vmem:[#allocation77_spill] sm:$0xff] }
 0x6c7   : > { %3678 = vmatpush1.msra.mxu0 %v12190_v20  ;;  %3749 = vmatpush1.msra.mxu1 %v12191_v18  ;;  %v12201_v20 = vld [vmem:[#allocation78_spill] sm:$0xff]  ;;  %v12202_v18 = vld [vmem:[#allocation79_spill] sm:$0xff] }
 0x6c8   : > { %3679 = vmatprep.subr.mxu0 %v12192_v24  ;;  %3750 = vmatprep.subr.mxu1 %v12193_v31  ;;  %v12203_v24 = vld [vmem:[#allocation80_spill] sm:$0xff]  ;;  %v12204_v31 = vld [vmem:[#allocation81_spill] sm:$0xff] }
 0x6c9   : > { %3680 = vmatpush1.msra.mxu0 %v12194_v59  ;;  %3751 = vmatpush1.msra.mxu1 %v12195_v54  ;;  %v12205_v59 = vld [vmem:[#allocation82_spill] sm:$0xff]  ;;  %v12206_v54 = vld [vmem:[#allocation83_spill] sm:$0xff] }
 0x6ca   : > { %3681 = vmatprep.subr.mxu0 %v12196_v47  ;;  %3752 = vmatprep.subr.mxu1 %v12197_v27  ;;  %v12207_v47 = vld [vmem:[#allocation84_spill] sm:$0xff]  ;;  %v12208_v27 = vld [vmem:[#allocation85_spill] sm:$0xff] }
 0x6cb   : > { %3682 = vmatpush1.msra.mxu0 %v12198_v50  ;;  %3753 = vmatpush1.msra.mxu1 %v12199_v5  ;;  %v12209_v50 = vld [vmem:[#allocation86_spill] sm:$0xff]  ;;  %v12210_v5 = vld [vmem:[#allocation87_spill] sm:$0xff] }
 0x6cc   : > { %3683 = vmatprep.subr.mxu0 %v12200_v55  ;;  %3754 = vmatprep.subr.mxu1 %v12201_v20  ;;  %v12211_v55 = vld [vmem:[#allocation88_spill] sm:$0xff]  ;;  %v12212_v20 = vld [vmem:[#allocation89_spill] sm:$0xff] }
 0x6cd   : > { %3684 = vmatpush1.msra.mxu0 %v12202_v18  ;;  %3755 = vmatpush1.msra.mxu1 %v12203_v24  ;;  %v12213_v18 = vld [vmem:[#allocation90_spill] sm:$0xff]  ;;  %v12214_v24 = vld [vmem:[#allocation91_spill] sm:$0xff] }
 0x6ce   : > { %3685 = vmatprep.subr.mxu0 %v12204_v31  ;;  %3756 = vmatprep.subr.mxu1 %v12205_v59  ;;  %v12215_v31 = vld [vmem:[#allocation92_spill] sm:$0xff]  ;;  %v12216_v59 = vld [vmem:[#allocation93_spill] sm:$0xff] }
 0x6cf   : > { %3686 = vmatpush1.msra.mxu0 %v12206_v54  ;;  %3757 = vmatpush1.msra.mxu1 %v12207_v47  ;;  %v12217_v54 = vld [vmem:[#allocation94_spill] sm:$0xff]  ;;  %v12218_v47 = vld [vmem:[#allocation95_spill] sm:$0xff] }
 0x6d0   : > { %3687 = vmatprep.subr.mxu0 %v12208_v27  ;;  %3758 = vmatprep.subr.mxu1 %v12209_v50  ;;  %v12219_v27 = vld [vmem:[#allocation96_spill] sm:$0xff]  ;;  %v12220_v50 = vld [vmem:[#allocation97_spill] sm:$0xff] }
 0x6d1   : > { %3688 = vmatpush1.msra.mxu0 %v12210_v5  ;;  %3759 = vmatpush1.msra.mxu1 %v12211_v55  ;;  %v12221_v5 = vld [vmem:[#allocation98_spill] sm:$0xff]  ;;  %v12222_v55 = vld [vmem:[#allocation99_spill] sm:$0xff] }
 0x6d2   : > { %3689 = vmatprep.subr.mxu0 %v12212_v20  ;;  %3760 = vmatprep.subr.mxu1 %v12213_v18  ;;  %v12223_v20 = vld [vmem:[#allocation100_spill] sm:$0xff]  ;;  %v12224_v18 = vld [vmem:[#allocation101_spill] sm:$0xff] }
 0x6d3   : > { %3690 = vmatpush2.msra.mxu0 %v12214_v24  ;;  %3761 = vmatpush2.msra.mxu1 %v12215_v31  ;;  %v12225_v24 = vld [vmem:[#allocation102_spill] sm:$0xff]  ;;  %v12226_v31 = vld [vmem:[#allocation103_spill] sm:$0xff] }
 0x6d4   : > { %3691 = vmatprep.subr.mxu0 %v12216_v59  ;;  %3762 = vmatprep.subr.mxu1 %v12217_v54  ;;  %v12227_v59 = vld [vmem:[#allocation104_spill] sm:$0xff]  ;;  %v12228_v54 = vld [vmem:[#allocation105_spill] sm:$0xff] }
 0x6d5   : > { %3692 = vmatpush2.msra.mxu0 %v12218_v47  ;;  %3763 = vmatpush2.msra.mxu1 %v12219_v27  ;;  %v12229_v47 = vld [vmem:[#allocation106_spill] sm:$0xff]  ;;  %v12230_v27 = vld [vmem:[#allocation107_spill] sm:$0xff] }
 0x6d6   : > { %3693 = vmatprep.subr.mxu0 %v12220_v50  ;;  %3764 = vmatprep.subr.mxu1 %v12221_v5  ;;  %v12231_v50 = vld [vmem:[#allocation108_spill] sm:$0xff]  ;;  %v12232_v5 = vld [vmem:[#allocation109_spill] sm:$0xff] }
 0x6d7   : > { %3694 = vmatpush2.msra.mxu0 %v12222_v55  ;;  %3765 = vmatpush2.msra.mxu1 %v12223_v20  ;;  %v12233_v55 = vld [vmem:[#allocation110_spill] sm:$0xff]  ;;  %v12234_v20 = vld [vmem:[#allocation111_spill] sm:$0xff] }
 0x6d8   : > { %3695 = vmatprep.subr.mxu0 %v12224_v18  ;;  %3766 = vmatprep.subr.mxu1 %v12225_v24  ;;  %v12235_v18 = vld [vmem:[#allocation112_spill] sm:$0xff]  ;;  %v12236_v24 = vld [vmem:[#allocation113_spill] sm:$0xff] }
 0x6d9   : > { %3696 = vmatpush2.msra.mxu0 %v12226_v31  ;;  %3767 = vmatpush2.msra.mxu1 %v12227_v59  ;;  %v12237_v31 = vld [vmem:[#allocation114_spill] sm:$0xff]  ;;  %v12238_v59 = vld [vmem:[#allocation115_spill] sm:$0xff] }
 0x6da   : > { %3697 = vmatprep.subr.mxu0 %v12228_v54  ;;  %3768 = vmatprep.subr.mxu1 %v12229_v47  ;;  %v12239_v54 = vld [vmem:[#allocation116_spill] sm:$0xff]  ;;  %v12240_v47 = vld [vmem:[#allocation117_spill] sm:$0xff] }
 0x6db   : > { %3698 = vmatpush2.msra.mxu0 %v12230_v27  ;;  %3769 = vmatpush2.msra.mxu1 %v12231_v50  ;;  %v12241_v27 = vld [vmem:[#allocation118_spill] sm:$0xff]  ;;  %v12242_v50 = vld [vmem:[#allocation119_spill] sm:$0xff] }
 0x6dc   : > { %3699 = vmatprep.subr.mxu0 %v12232_v5  ;;  %3770 = vmatprep.subr.mxu1 %v12233_v55  ;;  %v12243_v5 = vld [vmem:[#allocation120_spill] sm:$0xff]  ;;  %v12244_v55 = vld [vmem:[#allocation121_spill] sm:$0xff] }
 0x6dd   : > { %3700 = vmatpush2.msra.mxu0 %v12234_v20  ;;  %3771 = vmatpush2.msra.mxu1 %v12235_v18  ;;  %v12245_v20 = vld [vmem:[#allocation122_spill] sm:$0xff]  ;;  %v12246_v18 = vld [vmem:[#allocation123_spill] sm:$0xff] }
 0x6de   : > { %3701 = vmatprep.subr.mxu0 %v12236_v24  ;;  %3772 = vmatprep.subr.mxu1 %v12237_v31  ;;  %v12247_v24 = vld [vmem:[#allocation124_spill] sm:$0xff]  ;;  %v12248_v31 = vld [vmem:[#allocation125_spill] sm:$0xff] }
 0x6df   : > { %3702 = vmatpush2.msra.mxu0 %v12238_v59  ;;  %3773 = vmatpush2.msra.mxu1 %v12239_v54  ;;  %v12249_v59 = vld [vmem:[#allocation126_spill] sm:$0xff]  ;;  %v12250_v54 = vld [vmem:[#allocation127_spill] sm:$0xff] }
 0x6e0   : > { %3703 = vmatprep.subr.mxu0 %v12240_v47  ;;  %3774 = vmatprep.subr.mxu1 %v12241_v27  ;;  %v12251_v47 = vld [vmem:[#allocation128_spill] sm:$0xff]  ;;  %v12252_v27 = vld [vmem:[#allocation129_spill] sm:$0xff] }
 0x6e1   : > { %3704 = vmatpush2.msra.mxu0 %v12242_v50  ;;  %3775 = vmatpush2.msra.mxu1 %v12243_v5  ;;  %v12253_v50 = vld [vmem:[#allocation130_spill] sm:$0xff]  ;;  %v12254_v5 = vld [vmem:[#allocation131_spill] sm:$0xff] }
 0x6e2   : > { %3705 = vmatprep.subr.mxu0 %v12244_v55  ;;  %3776 = vmatprep.subr.mxu1 %v12245_v20  ;;  %v12255_v55 = vld [vmem:[#allocation132_spill] sm:$0xff]  ;;  %v12256_v20 = vld [vmem:[#allocation133_spill] sm:$0xff] }
 0x6e3   : > { %3706 = vmatpush2.msra.mxu0 %v12246_v18  ;;  %3777 = vmatpush2.msra.mxu1 %v12247_v24  ;;  %v12257_v18 = vld [vmem:[#allocation134_spill] sm:$0xff]  ;;  %v12258_v24 = vld [vmem:[#allocation135_spill] sm:$0xff] }
 0x6e4   : > { %3707 = vmatprep.subr.mxu0 %v12248_v31  ;;  %3778 = vmatprep.subr.mxu1 %v12249_v59  ;;  %v12259_v31 = vld [vmem:[#allocation136_spill] sm:$0xff]  ;;  %v12260_v59 = vld [vmem:[#allocation137_spill] sm:$0xff] }
 0x6e5   : > { %3708 = vmatpush2.msra.mxu0 %v12250_v54  ;;  %3779 = vmatpush2.msra.mxu1 %v12251_v47  ;;  %v12261_v54 = vld [vmem:[#allocation138_spill] sm:$0xff]  ;;  %v12262_v47 = vld [vmem:[#allocation139_spill] sm:$0xff] }
 0x6e6   : > { %3709 = vmatprep.subr.mxu0 %v12252_v27  ;;  %3780 = vmatprep.subr.mxu1 %v12253_v50  ;;  %v12263_v27 = vld [vmem:[#allocation140_spill] sm:$0xff]  ;;  %v12264_v50 = vld [vmem:[#allocation141_spill] sm:$0xff] }
 0x6e7   : > { %3710 = vmatpush2.msra.mxu0 %v12254_v5  ;;  %3781 = vmatpush2.msra.mxu1 %v12255_v55  ;;  %v12265_v5 = vld [vmem:[#allocation142_spill] sm:$0xff]  ;;  %v12266_v55 = vld [vmem:[#allocation143_spill] sm:$0xff] }
 0x6e8   : > { %3711 = vmatprep.subr.mxu0 %v12256_v20  ;;  %3782 = vmatprep.subr.mxu1 %v12257_v18  ;;  %v12267_v20 = vld [vmem:[#allocation144_spill] sm:$0xff]  ;;  %v12268_v18 = vld [vmem:[#allocation145_spill] sm:$0xff] }
 0x6e9   : > { %3712 = vmatpush2.msra.mxu0 %v12258_v24  ;;  %3783 = vmatpush2.msra.mxu1 %v12259_v31  ;;  %v12269_v24 = vld [vmem:[#allocation146_spill] sm:$0xff]  ;;  %v12270_v31 = vld [vmem:[#allocation147_spill] sm:$0xff] }
 0x6ea   : > { %3713 = vmatprep.subr.mxu0 %v12260_v59  ;;  %3784 = vmatprep.subr.mxu1 %v12261_v54  ;;  %v12271_v59 = vld [vmem:[#allocation148_spill] sm:$0xff]  ;;  %v12272_v54 = vld [vmem:[#allocation149_spill] sm:$0xff] }
 0x6eb   : > { %3714 = vmatpush2.msra.mxu0 %v12262_v47  ;;  %3785 = vmatpush2.msra.mxu1 %v12263_v27  ;;  %v12273_v47 = vld [vmem:[#allocation150_spill] sm:$0xff]  ;;  %v12274_v27 = vld [vmem:[#allocation151_spill] sm:$0xff] }
 0x6ec   : > { %3715 = vmatprep.subr.mxu0 %v12264_v50  ;;  %3786 = vmatprep.subr.mxu1 %v12265_v5  ;;  %v12275_v50 = vld [vmem:[#allocation152_spill] sm:$0xff]  ;;  %v12276_v5 = vld [vmem:[#allocation153_spill] sm:$0xff] }
 0x6ed   : > { %3716 = vmatpush2.msra.mxu0 %v12266_v55  ;;  %3787 = vmatpush2.msra.mxu1 %v12267_v20  ;;  %v12277_v55 = vld [vmem:[#allocation154_spill] sm:$0xff] }
 0x6ee   : > { %3717 = vmatprep.subr.mxu0 %v12268_v18  ;;  %3788 = vmatprep.subr.mxu1 %v12269_v24  ;;  %v12279_v24 = vld [vmem:[#allocation293_spill] sm:$0xff] }
 0x6ef   : > { %3718 = vmatpush2.msra.mxu0 %v12270_v31  ;;  %3789 = vmatpush2.msra.mxu1 %v12271_v59  ;;  %v1474_v34 = vadd.f32 %v12279_v24, %v12278_v60  ;;  %v12280_v31 = vld [vmem:[#allocation340_spill] sm:$0xff] }
 0x6f0   : > { %3719 = vmatprep.subr.mxu0 %v12272_v54  ;;  %3790 = vmatprep.subr.mxu1 %v12273_v47  ;;  %v1587_v59 = vadd.f32 %v12281_v10, %v12280_v31  ;;  %v12282_v54 = vld [vmem:[#allocation295_spill] sm:$0xff] }
 0x6f1   : > { %3720 = vmatpush2.msra.mxu0 %v12274_v27  ;;  %3791 = vmatpush2.msra.mxu1 %v12275_v50  ;;  %v1476_v47 = vadd.f32 %v12282_v54, %v8301_v4  ;;  %v12283_v50 = vld [vmem:[#allocation296_spill] sm:$0xff]  ;;  %v12285_v4 = vld [vmem:[#allocation321_spill] sm:$0xff] }
 0x6f2   : > { %3799 = vmatprep.subr.mxu0 %v12276_v5  ;;  %3870 = vmatprep.subr.mxu1 %v12277_v55  ;;  %v1589_v5 = vadd.f32 %v12283_v50, %v8305_v37 }
 0x730   : > { %v3373_v20 = vpop.f32.mrf.mxu0  ;;  %v3444_v18 = vpop.f32.mrf.mxu1 }
 0x731   : > { %v3591_v30 = vadd.f32 %v3373_v20, %v1474_v34  ;;  %v3593_v27 = vadd.f32 %v3444_v18, %v1587_v59  ;;  %v12284_v18 = vld [vmem:[#allocation342_spill] sm:$0xff] }
 0x732   : > { %v3375_v33 = vpop.f32.mrf.mxu0  ;;  %v3446_v1 = vpop.f32.mrf.mxu1  ;;  %v1700_v50 = vadd.f32 %v12285_v4, %v12284_v18 }
 0x733   : > { %v3592_v57 = vadd.f32 %v3375_v33, %v1476_v47  ;;  %v5577_v55 = vmul.f32 -1.442695, %v3591_v30  ;;  %v3594_v51 = vadd.f32 %v3446_v1, %v1589_v5  ;;  %v5579_v23 = vmul.f32 -1.442695, %v3593_v27  ;;  %v12286_v33 = vld [vmem:[#allocation343_spill] sm:$0xff]  ;;  %v12287_v47 = vld [vmem:[#allocation322_spill] sm:$0xff] }
 0x734   : > { %v1813_v5 = vadd.f32 %v12287_v47, %v12286_v33  ;;  %v12288_v27 = vld [vmem:[#allocation344_spill] sm:$0xff] }
 0x735   : > { %v5578_v2 = vmul.f32 -1.442695, %v3592_v57  ;;  %6020 = vpow2.f32 %v5577_v55  ;;  %v5580_v24 = vmul.f32 -1.442695, %v3594_v51  ;;  %v12289_v57 = vld [vmem:[#allocation323_spill] sm:$0xff]  ;;  %v12290_v1 = vld [vmem:[#allocation324_spill] sm:$0xff] }
 0x736   : > { %6022 = vpow2.f32 %v5579_v23  ;;  %v1702_v55 = vadd.f32 %v12289_v57, %v12288_v27  ;;  %v1815_v30 = vadd.f32 %v12290_v1, %v8319_v28 }
 0x737   : > { %6024 = vpow2.f32 %v5578_v2 }
 0x738   : > { %6026 = vpow2.f32 %v5580_v24 }
 0x742   : > { %v6021_v10 = vpop.eup %6020 }
 0x743   : > { %v6023_v31 = vpop.eup %6022  ;;  %v3605_v54 = vadd.f32 1.0, %v6021_v10 }
 0x744   : > { %v6025_v60 = vpop.eup %6024  ;;  %v3617_v34 = vadd.f32 1.0, %v6023_v31 }
 0x745   : > { %v6027_v20 = vpop.eup %6026  ;;  %v3606_v59 = vadd.f32 1.0, %v6025_v60  ;;  %6028 = vrcp.f32 %v3605_v54 }
 0x746   : > { %v3618_v23 = vadd.f32 1.0, %v6027_v20  ;;  %6030 = vrcp.f32 %v3617_v34 }
 0x747   : > { %6032 = vrcp.f32 %v3606_v59 }
 0x752   : > { %v6029_v54 = vpop.eup %6028 }
 0x753   : > { %v6031_v20 = vpop.eup %6030 }
 0x754   : > { %v6033_v27 = vpop.eup %6032  ;;  %v3637_v34 = vmul.f32 %v6031_v20, %v9189_v36  ;;  %v12296_v20 = vld [vmem:[#allocation198_spill] sm:$0xff] }
 0x771   : > { %v3515_v2 = vpop.f32.mrf.mxu0  ;;  %v3586_v51 = vpop.f32.mrf.mxu1 }
 0x772   : > { %v3595_v24 = vadd.f32 %v3515_v2, %v1700_v50  ;;  %v3597_v31 = vadd.f32 %v3586_v51, %v1813_v5 }
 0x773   : > { %v3517_v60 = vpop.f32.mrf.mxu0  ;;  %v3588_v10 = vpop.f32.mrf.mxu1 }
 0x774   : > { %6034 = vtanh.f32 %v3595_v24  ;;  %v5581_v4 = vmul.f32 -1.442695, %v3597_v31  ;;  %v3596_v18 = vadd.f32 %v3517_v60, %v1702_v55  ;;  %v3598_v47 = vadd.f32 %v3588_v10, %v1815_v30 }
 0x775   : > { %6036 = vrcp.f32 %v3618_v23 }
 0x776   : > { %6038 = vpow2.f32 %v5581_v4  ;;  %v5582_v57 = vmul.f32 -1.442695, %v3598_v47  ;;  %v12293_v47 = vld [vmem:[#allocation195_spill] sm:$0xff] }
 0x777   : > { %6040 = vtanh.f32 %v3596_v18 }
 0x778   : > { %6042 = vpow2.f32 %v5582_v57  ;;  %v12294_v57 = vld [vmem:[#allocation196_spill] sm:$0xff] }
 0x781   : > { %v6035_v33 = vpop.eup %6034 }
 0x782   : > { %v6037_v1 = vpop.eup %6036  ;;  %v3639_v50 = vmul.f32 %v6035_v33, %v6029_v54  ;;  %v12295_v54 = vld [vmem:[#allocation197_spill] sm:$0xff] }
 0x783   : > { %v6039_v59 = vpop.eup %6038  ;;  %v3638_v23 = vmul.f32 %v6037_v1, %v9193_v61  ;;  %v12291_v61 = vld [vmem:[#allocation193_spill] sm:$0xff]  ;;  %v12297_v1 = vld [vmem:[#allocation199_spill] sm:$0xff] }
 0x784   : > { %v6041_v5 = vpop.eup %6040  ;;  %v9476_v2 = vadd.f32 %v3639_v50, %v3637_v34  ;;  %v3631_v51 = vadd.f32 1.0, %v6039_v59  ;;  %v12298_v34 = vld [vmem:[#allocation200_spill] sm:$0xff]  ;;  %v12299_v50 = vld [vmem:[#allocation201_spill] sm:$0xff]  ;;  %v12300_v59 = vld [vmem:[#allocation202_spill] sm:$0xff] }
 0x785   : > { %v6043_v55 = vpop.eup %6042  ;;  %v3640_v30 = vmul.f32 %v6041_v5, %v6033_v27  ;;  %v12292_v27 = vld [vmem:[#allocation194_spill] sm:$0xff]  ;;  %v12301_v5 = vld [vmem:[#allocation203_spill] sm:$0xff] }
 0x786   : > { %6044 = vtanh.f32 %v9476_v2  ;;  %v3632_v18 = vadd.f32 1.0, %v6043_v55  ;;  %v12303_v55 = vld [vmem:[#allocation205_spill] sm:$0xff] }
 0x787   : > { %6046 = vrcp.f32 %v3631_v51  ;;  %v9480_v24 = vadd.f32 %v3640_v30, %v3638_v23  ;;  %v12302_v51 = vld [vmem:[#allocation204_spill] sm:$0xff]  ;;  %v12304_v23 = vld [vmem:[#allocation206_spill] sm:$0xff]  ;;  %v12305_v30 = vld [vmem:[#allocation207_spill] sm:$0xff] }
 0x788   : > { %6048 = vrcp.f32 %v3632_v18  ;;  %v12306_v18 = vld [vmem:[#allocation208_spill] sm:$0xff] }
 0x789   : > { %6050 = vtanh.f32 %v9480_v24 }
 0x793   : > { %v6045_v36 = vpop.eup %6044 }
 0x794   : > { %v6047_v33 = vpop.eup %6046 }
 0x795   : > { %v6049_v31 = vpop.eup %6048  ;;  %v9483_v60 = vmul.f32 %v6047_v33, %v6045_v36  ;;  %v12307_v36 = vld [vmem:[#allocation209_spill] sm:$0xff]  ;;  %v12308_v33 = vld [vmem:[#allocation210_spill] sm:$0xff] }
 0x796   : > { %v6051_v10 = vpop.eup %6050 }
 0x797   : > { %v3646_v4 = vmul.f32 %v6051_v10, %v6049_v31  ;;  %3647 = vst [vmem:[#allocation2 + $0x40] sm:$0xff] %v9483_v60  ;;  %v12309_v31 = vld [vmem:[#allocation211_spill] sm:$0xff]  ;;  %v12310_v10 = vld [vmem:[#allocation212_spill] sm:$0xff] }
 0x799   : > { %3648 = vst [vmem:[#allocation2 + $0x20] sm:$0xff] %v3646_v4  ;;  %3721 = vmatprep.mubr.f32.mxu0 %v3646_v4  ;;  %3792 = vmatprep.mubr.f32.mxu1 %v3646_v4 }
 0x79a   : > { %3722 = vmatmul.mubr.f32.vlgmr.msra.gmra.mxu0 %v9483_v60  ;;  %3793 = vmatmul.mubr.f32.vlgmr.msra.gmra.mxu1 %v9483_v60 }
 0x79b   : > { %3800 = vmatpush1.msra.mxu0 %v11364_v12  ;;  %3871 = vmatpush1.msra.mxu1 %v11365_v41 }
 0x79c   : > { %3801 = vmatprep.subr.mxu0 %v11366_v46  ;;  %3863 = vmatprep.mubr.f32.mxu0 %v3646_v4 }
 0x79d   : > { %3872 = vmatprep.subr.mxu1 %v11367_v3  ;;  %3934 = vmatprep.mubr.f32.mxu1 %v3646_v4  ;;  %v12311_v4 = vld [vmem:[#allocation213_spill] sm:$0xff] }
 0x79e   : > { %3802 = vmatpush1.msra.mxu0 %v11368_v35  ;;  %3873 = vmatpush1.msra.mxu1 %v11369_v39 }
 0x79f   : > { %3803 = vmatprep.subr.mxu0 %v11370_v29  ;;  %3874 = vmatprep.subr.mxu1 %v11371_v25 }
 0x7a0   : > { %3804 = vmatpush1.msra.mxu0 %v11372_v44  ;;  %3875 = vmatpush1.msra.mxu1 %v11595_v45 }
 0x7a1   : > { %3805 = vmatprep.subr.mxu0 %v11596_v56  ;;  %3876 = vmatprep.subr.mxu1 %v11597_v58 }
 0x7a2   : > { %3806 = vmatpush1.msra.mxu0 %v11598_v9  ;;  %3877 = vmatpush1.msra.mxu1 %v11599_v17 }
 0x7a3   : > { %3807 = vmatprep.subr.mxu0 %v11600_v53  ;;  %3878 = vmatprep.subr.mxu1 %v11601_v11 }
 0x7a4   : > { %3808 = vmatpush1.msra.mxu0 %v11602_v21  ;;  %3879 = vmatpush1.msra.mxu1 %v11603_v16 }
 0x7a5   : > { %3809 = vmatprep.subr.mxu0 %v11604_v8  ;;  %3880 = vmatprep.subr.mxu1 %v11827_v7 }
 0x7a6   : > { %3810 = vmatpush1.msra.mxu0 %v11828_v38  ;;  %3881 = vmatpush1.msra.mxu1 %v11829_v6 }
 0x7a7   : > { %3811 = vmatprep.subr.mxu0 %v11830_v62  ;;  %3882 = vmatprep.subr.mxu1 %v11831_v26 }
 0x7a8   : > { %3812 = vmatpush1.msra.mxu0 %v11832_v22  ;;  %3883 = vmatpush1.msra.mxu1 %v11833_v13 }
 0x7a9   : > { %3813 = vmatprep.subr.mxu0 %v11834_v40  ;;  %3884 = vmatprep.subr.mxu1 %v11835_v48 }
 0x7aa   : > { %3814 = vmatpush1.msra.mxu0 %v11836_v32  ;;  %3885 = vmatpush1.msra.mxu1 %v12059_v14 }
 0x7ab   : > { %3815 = vmatprep.subr.mxu0 %v12060_v15  ;;  %3886 = vmatprep.subr.mxu1 %v12061_v0 }
 0x7ac   : > { %3816 = vmatpush1.msra.mxu0 %v12062_v19  ;;  %3887 = vmatpush1.msra.mxu1 %v12063_v49 }
 0x7ad   : > { %3817 = vmatprep.subr.mxu0 %v12064_v42  ;;  %3888 = vmatprep.subr.mxu1 %v12065_v63 }
 0x7ae   : > { %3818 = vmatpush1.msra.mxu0 %v12066_v52  ;;  %3889 = vmatpush1.msra.mxu1 %v12067_v43 }
 0x7af   : > { %3819 = vmatprep.subr.mxu0 %v12291_v61  ;;  %3890 = vmatprep.subr.mxu1 %v12292_v27 }
 0x7b0   : > { %3820 = vmatpush1.msra.mxu0 %v12293_v47  ;;  %3891 = vmatpush1.msra.mxu1 %v12294_v57 }
 0x7b1   : > { %3821 = vmatprep.subr.mxu0 %v12295_v54  ;;  %3892 = vmatprep.subr.mxu1 %v12296_v20 }
 0x7b2   : > { %3822 = vmatpush1.msra.mxu0 %v12297_v1  ;;  %3893 = vmatpush1.msra.mxu1 %v12298_v34  ;;  %v12514_v1 = vld [vmem:[#allocation299_spill] sm:$0xff] }
 0x7b3   : > { %3823 = vmatprep.subr.mxu0 %v12299_v50  ;;  %3894 = vmatprep.subr.mxu1 %v12300_v59  ;;  %v12512_v50 = vld [vmem:[#allocation298_spill] sm:$0xff] }
 0x7b4   : > { %3824 = vmatpush1.msra.mxu0 %v12301_v5  ;;  %3895 = vmatpush1.msra.mxu1 %v12302_v51  ;;  %v12312_v5 = vld [vmem:[#allocation214_spill] sm:$0xff]  ;;  %v12313_v51 = vld [vmem:[#allocation215_spill] sm:$0xff] }
 0x7b5   : > { %3825 = vmatprep.subr.mxu0 %v12303_v55  ;;  %3896 = vmatprep.subr.mxu1 %v12304_v23  ;;  %v12314_v55 = vld [vmem:[#allocation216_spill] sm:$0xff]  ;;  %v12315_v23 = vld [vmem:[#allocation217_spill] sm:$0xff] }
 0x7b6   : > { %3826 = vmatpush1.msra.mxu0 %v12305_v30  ;;  %3897 = vmatpush1.msra.mxu1 %v12306_v18  ;;  %v12316_v30 = vld [vmem:[#allocation218_spill] sm:$0xff]  ;;  %v12317_v18 = vld [vmem:[#allocation219_spill] sm:$0xff] }
 0x7b7   : > { %3827 = vmatprep.subr.mxu0 %v12307_v36  ;;  %3898 = vmatprep.subr.mxu1 %v12308_v33  ;;  %v12318_v36 = vld [vmem:[#allocation220_spill] sm:$0xff]  ;;  %v12319_v33 = vld [vmem:[#allocation221_spill] sm:$0xff] }
 0x7b8   : > { %3828 = vmatpush1.msra.mxu0 %v12309_v31  ;;  %3899 = vmatpush1.msra.mxu1 %v12310_v10  ;;  %v12320_v31 = vld [vmem:[#allocation222_spill] sm:$0xff]  ;;  %v12321_v10 = vld [vmem:[#allocation223_spill] sm:$0xff] }
 0x7b9   : > { %3829 = vmatprep.subr.mxu0 %v12311_v4  ;;  %3900 = vmatprep.subr.mxu1 %v12312_v5  ;;  %v12322_v4 = vld [vmem:[#allocation224_spill] sm:$0xff]  ;;  %v12323_v5 = vld [vmem:[#allocation225_spill] sm:$0xff] }
 0x7ba   : > { %3830 = vmatpush1.msra.mxu0 %v12313_v51  ;;  %3901 = vmatpush1.msra.mxu1 %v12314_v55  ;;  %v12324_v51 = vld [vmem:[#allocation226_spill] sm:$0xff]  ;;  %v12325_v55 = vld [vmem:[#allocation227_spill] sm:$0xff] }
 0x7bb   : > { %3831 = vmatprep.subr.mxu0 %v12315_v23  ;;  %3902 = vmatprep.subr.mxu1 %v12316_v30  ;;  %v12326_v23 = vld [vmem:[#allocation228_spill] sm:$0xff]  ;;  %v12327_v30 = vld [vmem:[#allocation229_spill] sm:$0xff] }
 0x7bc   : > { %3832 = vmatpush2.msra.mxu0 %v12317_v18  ;;  %3903 = vmatpush2.msra.mxu1 %v12318_v36  ;;  %v12328_v18 = vld [vmem:[#allocation230_spill] sm:$0xff]  ;;  %v12329_v36 = vld [vmem:[#allocation231_spill] sm:$0xff] }
 0x7bd   : > { %3833 = vmatprep.subr.mxu0 %v12319_v33  ;;  %3904 = vmatprep.subr.mxu1 %v12320_v31  ;;  %v12330_v33 = vld [vmem:[#allocation232_spill] sm:$0xff]  ;;  %v12331_v31 = vld [vmem:[#allocation233_spill] sm:$0xff] }
 0x7be   : > { %3834 = vmatpush2.msra.mxu0 %v12321_v10  ;;  %3905 = vmatpush2.msra.mxu1 %v12322_v4  ;;  %v12332_v10 = vld [vmem:[#allocation234_spill] sm:$0xff]  ;;  %v12333_v4 = vld [vmem:[#allocation235_spill] sm:$0xff] }
 0x7bf   : > { %3835 = vmatprep.subr.mxu0 %v12323_v5  ;;  %3906 = vmatprep.subr.mxu1 %v12324_v51  ;;  %v12334_v5 = vld [vmem:[#allocation236_spill] sm:$0xff]  ;;  %v12335_v51 = vld [vmem:[#allocation237_spill] sm:$0xff] }
 0x7c0   : > { %3836 = vmatpush2.msra.mxu0 %v12325_v55  ;;  %3907 = vmatpush2.msra.mxu1 %v12326_v23  ;;  %v12336_v55 = vld [vmem:[#allocation238_spill] sm:$0xff]  ;;  %v12337_v23 = vld [vmem:[#allocation239_spill] sm:$0xff] }
 0x7c1   : > { %3837 = vmatprep.subr.mxu0 %v12327_v30  ;;  %3908 = vmatprep.subr.mxu1 %v12328_v18  ;;  %v12338_v30 = vld [vmem:[#allocation240_spill] sm:$0xff]  ;;  %v12339_v18 = vld [vmem:[#allocation241_spill] sm:$0xff] }
 0x7c2   : > { %3838 = vmatpush2.msra.mxu0 %v12329_v36  ;;  %3909 = vmatpush2.msra.mxu1 %v12330_v33  ;;  %v12340_v36 = vld [vmem:[#allocation242_spill] sm:$0xff]  ;;  %v12341_v33 = vld [vmem:[#allocation243_spill] sm:$0xff] }
 0x7c3   : > { %3839 = vmatprep.subr.mxu0 %v12331_v31  ;;  %3910 = vmatprep.subr.mxu1 %v12332_v10  ;;  %v12342_v31 = vld [vmem:[#allocation244_spill] sm:$0xff]  ;;  %v12343_v10 = vld [vmem:[#allocation245_spill] sm:$0xff] }
 0x7c4   : > { %3840 = vmatpush2.msra.mxu0 %v12333_v4  ;;  %3911 = vmatpush2.msra.mxu1 %v12334_v5  ;;  %v12344_v4 = vld [vmem:[#allocation246_spill] sm:$0xff]  ;;  %v12345_v5 = vld [vmem:[#allocation247_spill] sm:$0xff] }
 0x7c5   : > { %3841 = vmatprep.subr.mxu0 %v12335_v51  ;;  %3912 = vmatprep.subr.mxu1 %v12336_v55  ;;  %v12346_v51 = vld [vmem:[#allocation248_spill] sm:$0xff]  ;;  %v12347_v55 = vld [vmem:[#allocation249_spill] sm:$0xff] }
 0x7c6   : > { %3842 = vmatpush2.msra.mxu0 %v12337_v23  ;;  %3913 = vmatpush2.msra.mxu1 %v12338_v30  ;;  %v12348_v23 = vld [vmem:[#allocation250_spill] sm:$0xff]  ;;  %v12349_v30 = vld [vmem:[#allocation251_spill] sm:$0xff] }
 0x7c7   : > { %3843 = vmatprep.subr.mxu0 %v12339_v18  ;;  %3914 = vmatprep.subr.mxu1 %v12340_v36  ;;  %v12350_v18 = vld [vmem:[#allocation252_spill] sm:$0xff]  ;;  %v12351_v36 = vld [vmem:[#allocation253_spill] sm:$0xff] }
 0x7c8   : > { %3844 = vmatpush2.msra.mxu0 %v12341_v33  ;;  %3915 = vmatpush2.msra.mxu1 %v12342_v31  ;;  %v12352_v33 = vld [vmem:[#allocation254_spill] sm:$0xff]  ;;  %v12353_v31 = vld [vmem:[#allocation255_spill] sm:$0xff] }
 0x7c9   : > { %3845 = vmatprep.subr.mxu0 %v12343_v10  ;;  %3916 = vmatprep.subr.mxu1 %v12344_v4  ;;  %v12354_v10 = vld [vmem:[#allocation256_spill] sm:$0xff]  ;;  %v12355_v4 = vld [vmem:[#allocation257_spill] sm:$0xff] }
 0x7ca   : > { %3846 = vmatpush2.msra.mxu0 %v12345_v5  ;;  %3917 = vmatpush2.msra.mxu1 %v12346_v51  ;;  %v12356_v5 = vld [vmem:[#allocation258_spill] sm:$0xff]  ;;  %v12357_v51 = vld [vmem:[#allocation259_spill] sm:$0xff] }
 0x7cb   : > { %3847 = vmatprep.subr.mxu0 %v12347_v55  ;;  %3918 = vmatprep.subr.mxu1 %v12348_v23  ;;  %v12358_v55 = vld [vmem:[#allocation260_spill] sm:$0xff]  ;;  %v12359_v23 = vld [vmem:[#allocation261_spill] sm:$0xff] }
 0x7cc   : > { %3848 = vmatpush2.msra.mxu0 %v12349_v30  ;;  %3919 = vmatpush2.msra.mxu1 %v12350_v18  ;;  %v12360_v30 = vld [vmem:[#allocation262_spill] sm:$0xff]  ;;  %v12361_v18 = vld [vmem:[#allocation263_spill] sm:$0xff] }
 0x7cd   : > { %3849 = vmatprep.subr.mxu0 %v12351_v36  ;;  %3920 = vmatprep.subr.mxu1 %v12352_v33  ;;  %v12362_v36 = vld [vmem:[#allocation264_spill] sm:$0xff]  ;;  %v12363_v33 = vld [vmem:[#allocation265_spill] sm:$0xff] }
 0x7ce   : > { %3850 = vmatpush2.msra.mxu0 %v12353_v31  ;;  %3921 = vmatpush2.msra.mxu1 %v12354_v10  ;;  %v12364_v31 = vld [vmem:[#allocation266_spill] sm:$0xff]  ;;  %v12365_v10 = vld [vmem:[#allocation267_spill] sm:$0xff] }
 0x7cf   : > { %3851 = vmatprep.subr.mxu0 %v12355_v4  ;;  %3922 = vmatprep.subr.mxu1 %v12356_v5  ;;  %v12366_v4 = vld [vmem:[#allocation268_spill] sm:$0xff]  ;;  %v12367_v5 = vld [vmem:[#allocation269_spill] sm:$0xff] }
 0x7d0   : > { %3852 = vmatpush2.msra.mxu0 %v12357_v51  ;;  %3923 = vmatpush2.msra.mxu1 %v12358_v55  ;;  %v12368_v51 = vld [vmem:[#allocation270_spill] sm:$0xff]  ;;  %v12369_v55 = vld [vmem:[#allocation271_spill] sm:$0xff] }
 0x7d1   : > { %3853 = vmatprep.subr.mxu0 %v12359_v23  ;;  %3924 = vmatprep.subr.mxu1 %v12360_v30  ;;  %v12370_v23 = vld [vmem:[#allocation272_spill] sm:$0xff]  ;;  %v12371_v30 = vld [vmem:[#allocation273_spill] sm:$0xff] }
 0x7d2   : > { %3854 = vmatpush2.msra.mxu0 %v12361_v18  ;;  %3925 = vmatpush2.msra.mxu1 %v12362_v36  ;;  %v12372_v18 = vld [vmem:[#allocation274_spill] sm:$0xff]  ;;  %v12373_v36 = vld [vmem:[#allocation275_spill] sm:$0xff] }
 0x7d3   : > { %3855 = vmatprep.subr.mxu0 %v12363_v33  ;;  %3926 = vmatprep.subr.mxu1 %v12364_v31  ;;  %v12374_v33 = vld [vmem:[#allocation276_spill] sm:$0xff]  ;;  %v12375_v31 = vld [vmem:[#allocation277_spill] sm:$0xff] }
 0x7d4   : > { %3856 = vmatpush2.msra.mxu0 %v12365_v10  ;;  %3927 = vmatpush2.msra.mxu1 %v12366_v4  ;;  %v12376_v10 = vld [vmem:[#allocation278_spill] sm:$0xff]  ;;  %v12377_v4 = vld [vmem:[#allocation279_spill] sm:$0xff] }
 0x7d5   : > { %3857 = vmatprep.subr.mxu0 %v12367_v5  ;;  %3928 = vmatprep.subr.mxu1 %v12368_v51  ;;  %v12378_v5 = vld [vmem:[#allocation280_spill] sm:$0xff]  ;;  %v12509_v51 = vld [vmem:[#allocation339_spill] sm:$0xff] }
 0x7d6   : > { %3858 = vmatpush2.msra.mxu0 %v12369_v55  ;;  %3929 = vmatpush2.msra.mxu1 %v12370_v23  ;;  %v12379_v23 = vld [vmem:[#allocation25_spill] sm:$0xff]  ;;  %v12388_v55 = vld [vmem:[#allocation34_spill] sm:$0xff] }
 0x7d7   : > { %3859 = vmatprep.subr.mxu0 %v12371_v30  ;;  %3930 = vmatprep.subr.mxu1 %v12372_v18  ;;  %v12380_v30 = vld [vmem:[#allocation26_spill] sm:$0xff]  ;;  %v12381_v18 = vld [vmem:[#allocation27_spill] sm:$0xff] }
 0x7d8   : > { %3860 = vmatpush2.msra.mxu0 %v12373_v36  ;;  %3931 = vmatpush2.msra.mxu1 %v12374_v33  ;;  %v12382_v36 = vld [vmem:[#allocation28_spill] sm:$0xff]  ;;  %v12383_v33 = vld [vmem:[#allocation29_spill] sm:$0xff] }
 0x7d9   : > { %3861 = vmatprep.subr.mxu0 %v12375_v31  ;;  %3932 = vmatprep.subr.mxu1 %v12376_v10  ;;  %v12384_v31 = vld [vmem:[#allocation30_spill] sm:$0xff]  ;;  %v12385_v10 = vld [vmem:[#allocation31_spill] sm:$0xff] }
 0x7da   : > { %3862 = vmatpush2.msra.mxu0 %v12377_v4  ;;  %3933 = vmatpush2.msra.mxu1 %v12378_v5  ;;  %v12386_v4 = vld [vmem:[#allocation32_spill] sm:$0xff]  ;;  %v12387_v5 = vld [vmem:[#allocation33_spill] sm:$0xff] }
 0x7db   : > { %3864 = vmatmul.mubr.f32.vlgmr.msra.gmra.mxu0 %v9483_v60  ;;  %3935 = vmatmul.mubr.f32.vlgmr.msra.gmra.mxu1 %v9483_v60  ;;  %v12389_v60 = vld [vmem:[#allocation35_spill] sm:$0xff] }
 0x7dc   : > { %4007 = vmatprep.subr.mxu0 %v12379_v23  ;;  %4078 = vmatprep.subr.mxu1 %v12380_v30  ;;  %v12390_v23 = vld [vmem:[#allocation36_spill] sm:$0xff]  ;;  %v12391_v30 = vld [vmem:[#allocation37_spill] sm:$0xff] }
 0x7dd   : > { %4008 = vmatpush1.msra.mxu0 %v12381_v18  ;;  %4079 = vmatpush1.msra.mxu1 %v12382_v36  ;;  %v12392_v18 = vld [vmem:[#allocation38_spill] sm:$0xff]  ;;  %v12393_v36 = vld [vmem:[#allocation39_spill] sm:$0xff] }
 0x7de   : > { %4009 = vmatprep.subr.mxu0 %v12383_v33  ;;  %4080 = vmatprep.subr.mxu1 %v12384_v31  ;;  %v12394_v33 = vld [vmem:[#allocation40_spill] sm:$0xff]  ;;  %v12395_v31 = vld [vmem:[#allocation41_spill] sm:$0xff] }
 0x7df   : > { %4010 = vmatpush1.msra.mxu0 %v12385_v10  ;;  %4081 = vmatpush1.msra.mxu1 %v12386_v4  ;;  %v12396_v10 = vld [vmem:[#allocation42_spill] sm:$0xff]  ;;  %v12397_v4 = vld [vmem:[#allocation43_spill] sm:$0xff] }
 0x7e0   : > { %4011 = vmatprep.subr.mxu0 %v12387_v5  ;;  %4082 = vmatprep.subr.mxu1 %v12388_v55  ;;  %v12398_v5 = vld [vmem:[#allocation44_spill] sm:$0xff]  ;;  %v12399_v55 = vld [vmem:[#allocation45_spill] sm:$0xff] }
 0x7e1   : > { %4012 = vmatpush1.msra.mxu0 %v12389_v60  ;;  %4083 = vmatpush1.msra.mxu1 %v12390_v23  ;;  %v12400_v60 = vld [vmem:[#allocation46_spill] sm:$0xff]  ;;  %v12401_v23 = vld [vmem:[#allocation47_spill] sm:$0xff] }
 0x7e2   : > { %4013 = vmatprep.subr.mxu0 %v12391_v30  ;;  %4084 = vmatprep.subr.mxu1 %v12392_v18  ;;  %v12402_v30 = vld [vmem:[#allocation48_spill] sm:$0xff]  ;;  %v12403_v18 = vld [vmem:[#allocation49_spill] sm:$0xff] }
 0x7e3   : > { %4014 = vmatpush1.msra.mxu0 %v12393_v36  ;;  %4085 = vmatpush1.msra.mxu1 %v12394_v33  ;;  %v12404_v36 = vld [vmem:[#allocation50_spill] sm:$0xff]  ;;  %v12405_v33 = vld [vmem:[#allocation51_spill] sm:$0xff] }
 0x7e4   : > { %4015 = vmatprep.subr.mxu0 %v12395_v31  ;;  %4086 = vmatprep.subr.mxu1 %v12396_v10  ;;  %v12406_v31 = vld [vmem:[#allocation52_spill] sm:$0xff]  ;;  %v12407_v10 = vld [vmem:[#allocation53_spill] sm:$0xff] }
 0x7e5   : > { %4016 = vmatpush1.msra.mxu0 %v12397_v4  ;;  %4087 = vmatpush1.msra.mxu1 %v12398_v5  ;;  %v12408_v4 = vld [vmem:[#allocation54_spill] sm:$0xff]  ;;  %v12409_v5 = vld [vmem:[#allocation55_spill] sm:$0xff] }
 0x7e6   : > { %4017 = vmatprep.subr.mxu0 %v12399_v55  ;;  %4088 = vmatprep.subr.mxu1 %v12400_v60  ;;  %v12410_v55 = vld [vmem:[#allocation56_spill] sm:$0xff]  ;;  %v12411_v60 = vld [vmem:[#allocation57_spill] sm:$0xff] }
 0x7e7   : > { %4018 = vmatpush1.msra.mxu0 %v12401_v23  ;;  %4089 = vmatpush1.msra.mxu1 %v12402_v30  ;;  %v12412_v23 = vld [vmem:[#allocation58_spill] sm:$0xff]  ;;  %v12413_v30 = vld [vmem:[#allocation59_spill] sm:$0xff] }
 0x7e8   : > { %4019 = vmatprep.subr.mxu0 %v12403_v18  ;;  %4090 = vmatprep.subr.mxu1 %v12404_v36  ;;  %v12414_v18 = vld [vmem:[#allocation60_spill] sm:$0xff]  ;;  %v12415_v36 = vld [vmem:[#allocation61_spill] sm:$0xff] }
 0x7e9   : > { %4020 = vmatpush1.msra.mxu0 %v12405_v33  ;;  %4091 = vmatpush1.msra.mxu1 %v12406_v31  ;;  %v12416_v33 = vld [vmem:[#allocation62_spill] sm:$0xff]  ;;  %v12417_v31 = vld [vmem:[#allocation63_spill] sm:$0xff] }
 0x7ea   : > { %4021 = vmatprep.subr.mxu0 %v12407_v10  ;;  %4092 = vmatprep.subr.mxu1 %v12408_v4  ;;  %v12418_v10 = vld [vmem:[#allocation64_spill] sm:$0xff]  ;;  %v12419_v4 = vld [vmem:[#allocation65_spill] sm:$0xff] }
 0x7eb   : > { %4022 = vmatpush1.msra.mxu0 %v12409_v5  ;;  %4093 = vmatpush1.msra.mxu1 %v12410_v55  ;;  %v12420_v5 = vld [vmem:[#allocation66_spill] sm:$0xff]  ;;  %v12421_v55 = vld [vmem:[#allocation67_spill] sm:$0xff] }
 0x7ec   : > { %4023 = vmatprep.subr.mxu0 %v12411_v60  ;;  %4094 = vmatprep.subr.mxu1 %v12412_v23  ;;  %v12422_v60 = vld [vmem:[#allocation68_spill] sm:$0xff]  ;;  %v12423_v23 = vld [vmem:[#allocation69_spill] sm:$0xff] }
 0x7ed   : > { %4024 = vmatpush1.msra.mxu0 %v12413_v30  ;;  %4095 = vmatpush1.msra.mxu1 %v12414_v18  ;;  %v12424_v30 = vld [vmem:[#allocation70_spill] sm:$0xff]  ;;  %v12425_v18 = vld [vmem:[#allocation71_spill] sm:$0xff] }
 0x7ee   : > { %4025 = vmatprep.subr.mxu0 %v12415_v36  ;;  %4096 = vmatprep.subr.mxu1 %v12416_v33  ;;  %v12426_v36 = vld [vmem:[#allocation72_spill] sm:$0xff]  ;;  %v12427_v33 = vld [vmem:[#allocation73_spill] sm:$0xff] }
 0x7ef   : > { %4026 = vmatpush1.msra.mxu0 %v12417_v31  ;;  %4097 = vmatpush1.msra.mxu1 %v12418_v10  ;;  %v12428_v31 = vld [vmem:[#allocation74_spill] sm:$0xff]  ;;  %v12429_v10 = vld [vmem:[#allocation75_spill] sm:$0xff] }
 0x7f0   : > { %4027 = vmatprep.subr.mxu0 %v12419_v4  ;;  %4098 = vmatprep.subr.mxu1 %v12420_v5  ;;  %v12430_v4 = vld [vmem:[#allocation76_spill] sm:$0xff]  ;;  %v12431_v5 = vld [vmem:[#allocation77_spill] sm:$0xff] }
 0x7f1   : > { %4028 = vmatpush1.msra.mxu0 %v12421_v55  ;;  %4099 = vmatpush1.msra.mxu1 %v12422_v60  ;;  %v12432_v55 = vld [vmem:[#allocation78_spill] sm:$0xff]  ;;  %v12433_v60 = vld [vmem:[#allocation79_spill] sm:$0xff] }
 0x7f2   : > { %4029 = vmatprep.subr.mxu0 %v12423_v23  ;;  %4100 = vmatprep.subr.mxu1 %v12424_v30  ;;  %v12434_v23 = vld [vmem:[#allocation80_spill] sm:$0xff]  ;;  %v12435_v30 = vld [vmem:[#allocation81_spill] sm:$0xff] }
 0x7f3   : > { %4030 = vmatpush1.msra.mxu0 %v12425_v18  ;;  %4101 = vmatpush1.msra.mxu1 %v12426_v36  ;;  %v12436_v18 = vld [vmem:[#allocation82_spill] sm:$0xff]  ;;  %v12437_v36 = vld [vmem:[#allocation83_spill] sm:$0xff] }
 0x7f4   : > { %4031 = vmatprep.subr.mxu0 %v12427_v33  ;;  %4102 = vmatprep.subr.mxu1 %v12428_v31  ;;  %v12438_v33 = vld [vmem:[#allocation84_spill] sm:$0xff]  ;;  %v12439_v31 = vld [vmem:[#allocation85_spill] sm:$0xff] }
 0x7f5   : > { %4032 = vmatpush1.msra.mxu0 %v12429_v10  ;;  %4103 = vmatpush1.msra.mxu1 %v12430_v4  ;;  %v12440_v10 = vld [vmem:[#allocation86_spill] sm:$0xff]  ;;  %v12441_v4 = vld [vmem:[#allocation87_spill] sm:$0xff] }
 0x7f6   : > { %4033 = vmatprep.subr.mxu0 %v12431_v5  ;;  %4104 = vmatprep.subr.mxu1 %v12432_v55  ;;  %v12442_v5 = vld [vmem:[#allocation88_spill] sm:$0xff]  ;;  %v12443_v55 = vld [vmem:[#allocation89_spill] sm:$0xff] }
 0x7f7   : > { %4034 = vmatpush1.msra.mxu0 %v12433_v60  ;;  %4105 = vmatpush1.msra.mxu1 %v12434_v23  ;;  %v12444_v60 = vld [vmem:[#allocation90_spill] sm:$0xff]  ;;  %v12445_v23 = vld [vmem:[#allocation91_spill] sm:$0xff] }
 0x7f8   : > { %4035 = vmatprep.subr.mxu0 %v12435_v30  ;;  %4106 = vmatprep.subr.mxu1 %v12436_v18  ;;  %v12446_v30 = vld [vmem:[#allocation92_spill] sm:$0xff]  ;;  %v12447_v18 = vld [vmem:[#allocation93_spill] sm:$0xff] }
 0x7f9   : > { %4036 = vmatpush1.msra.mxu0 %v12437_v36  ;;  %4107 = vmatpush1.msra.mxu1 %v12438_v33  ;;  %v12448_v36 = vld [vmem:[#allocation94_spill] sm:$0xff]  ;;  %v12449_v33 = vld [vmem:[#allocation95_spill] sm:$0xff] }
 0x7fa   : > { %4037 = vmatprep.subr.mxu0 %v12439_v31  ;;  %4108 = vmatprep.subr.mxu1 %v12440_v10  ;;  %v12450_v31 = vld [vmem:[#allocation96_spill] sm:$0xff]  ;;  %v12451_v10 = vld [vmem:[#allocation97_spill] sm:$0xff] }
 0x7fb   : > { %4038 = vmatpush1.msra.mxu0 %v12441_v4  ;;  %4109 = vmatpush1.msra.mxu1 %v12442_v5  ;;  %v12452_v4 = vld [vmem:[#allocation98_spill] sm:$0xff]  ;;  %v12453_v5 = vld [vmem:[#allocation99_spill] sm:$0xff] }
 0x7fc   : > { %4039 = vmatprep.subr.mxu0 %v12443_v55  ;;  %4110 = vmatprep.subr.mxu1 %v12444_v60  ;;  %v12454_v55 = vld [vmem:[#allocation100_spill] sm:$0xff]  ;;  %v12455_v60 = vld [vmem:[#allocation101_spill] sm:$0xff] }
 0x7fd   : > { %4040 = vmatpush2.msra.mxu0 %v12445_v23  ;;  %4111 = vmatpush2.msra.mxu1 %v12446_v30  ;;  %v12456_v23 = vld [vmem:[#allocation102_spill] sm:$0xff]  ;;  %v12457_v30 = vld [vmem:[#allocation103_spill] sm:$0xff] }
 0x7fe   : > { %4041 = vmatprep.subr.mxu0 %v12447_v18  ;;  %4112 = vmatprep.subr.mxu1 %v12448_v36  ;;  %v12458_v18 = vld [vmem:[#allocation104_spill] sm:$0xff]  ;;  %v12459_v36 = vld [vmem:[#allocation105_spill] sm:$0xff] }
 0x7ff   : > { %4042 = vmatpush2.msra.mxu0 %v12449_v33  ;;  %4113 = vmatpush2.msra.mxu1 %v12450_v31  ;;  %v12460_v33 = vld [vmem:[#allocation106_spill] sm:$0xff]  ;;  %v12461_v31 = vld [vmem:[#allocation107_spill] sm:$0xff] }
 0x800   : > { %4043 = vmatprep.subr.mxu0 %v12451_v10  ;;  %4114 = vmatprep.subr.mxu1 %v12452_v4  ;;  %v12462_v10 = vld [vmem:[#allocation108_spill] sm:$0xff]  ;;  %v12463_v4 = vld [vmem:[#allocation109_spill] sm:$0xff] }
 0x801   : > { %4044 = vmatpush2.msra.mxu0 %v12453_v5  ;;  %4115 = vmatpush2.msra.mxu1 %v12454_v55  ;;  %v12464_v5 = vld [vmem:[#allocation110_spill] sm:$0xff]  ;;  %v12465_v55 = vld [vmem:[#allocation111_spill] sm:$0xff] }
 0x802   : > { %4045 = vmatprep.subr.mxu0 %v12455_v60  ;;  %4116 = vmatprep.subr.mxu1 %v12456_v23  ;;  %v12466_v60 = vld [vmem:[#allocation112_spill] sm:$0xff]  ;;  %v12467_v23 = vld [vmem:[#allocation113_spill] sm:$0xff] }
 0x803   : > { %4046 = vmatpush2.msra.mxu0 %v12457_v30  ;;  %4117 = vmatpush2.msra.mxu1 %v12458_v18  ;;  %v12468_v30 = vld [vmem:[#allocation114_spill] sm:$0xff]  ;;  %v12469_v18 = vld [vmem:[#allocation115_spill] sm:$0xff] }
 0x804   : > { %4047 = vmatprep.subr.mxu0 %v12459_v36  ;;  %4118 = vmatprep.subr.mxu1 %v12460_v33  ;;  %v12470_v36 = vld [vmem:[#allocation116_spill] sm:$0xff]  ;;  %v12471_v33 = vld [vmem:[#allocation117_spill] sm:$0xff] }
 0x805   : > { %4048 = vmatpush2.msra.mxu0 %v12461_v31  ;;  %4119 = vmatpush2.msra.mxu1 %v12462_v10  ;;  %v12472_v31 = vld [vmem:[#allocation118_spill] sm:$0xff]  ;;  %v12473_v10 = vld [vmem:[#allocation119_spill] sm:$0xff] }
 0x806   : > { %4049 = vmatprep.subr.mxu0 %v12463_v4  ;;  %4120 = vmatprep.subr.mxu1 %v12464_v5  ;;  %v12474_v4 = vld [vmem:[#allocation120_spill] sm:$0xff]  ;;  %v12475_v5 = vld [vmem:[#allocation121_spill] sm:$0xff] }
 0x807   : > { %4050 = vmatpush2.msra.mxu0 %v12465_v55  ;;  %4121 = vmatpush2.msra.mxu1 %v12466_v60  ;;  %v12476_v55 = vld [vmem:[#allocation122_spill] sm:$0xff]  ;;  %v12477_v60 = vld [vmem:[#allocation123_spill] sm:$0xff] }
 0x808   : > { %4051 = vmatprep.subr.mxu0 %v12467_v23  ;;  %4122 = vmatprep.subr.mxu1 %v12468_v30  ;;  %v12478_v23 = vld [vmem:[#allocation124_spill] sm:$0xff]  ;;  %v12479_v30 = vld [vmem:[#allocation125_spill] sm:$0xff] }
 0x809   : > { %4052 = vmatpush2.msra.mxu0 %v12469_v18  ;;  %4123 = vmatpush2.msra.mxu1 %v12470_v36  ;;  %v12480_v18 = vld [vmem:[#allocation126_spill] sm:$0xff]  ;;  %v12481_v36 = vld [vmem:[#allocation127_spill] sm:$0xff] }
 0x80a   : > { %4053 = vmatprep.subr.mxu0 %v12471_v33  ;;  %4124 = vmatprep.subr.mxu1 %v12472_v31  ;;  %v12482_v33 = vld [vmem:[#allocation128_spill] sm:$0xff]  ;;  %v12483_v31 = vld [vmem:[#allocation129_spill] sm:$0xff] }
 0x80b   : > { %4054 = vmatpush2.msra.mxu0 %v12473_v10  ;;  %4125 = vmatpush2.msra.mxu1 %v12474_v4  ;;  %v12484_v10 = vld [vmem:[#allocation130_spill] sm:$0xff]  ;;  %v12485_v4 = vld [vmem:[#allocation131_spill] sm:$0xff] }
 0x80c   : > { %4055 = vmatprep.subr.mxu0 %v12475_v5  ;;  %4126 = vmatprep.subr.mxu1 %v12476_v55  ;;  %v12486_v5 = vld [vmem:[#allocation132_spill] sm:$0xff]  ;;  %v12487_v55 = vld [vmem:[#allocation133_spill] sm:$0xff] }
 0x80d   : > { %4056 = vmatpush2.msra.mxu0 %v12477_v60  ;;  %4127 = vmatpush2.msra.mxu1 %v12478_v23  ;;  %v12488_v60 = vld [vmem:[#allocation134_spill] sm:$0xff]  ;;  %v12489_v23 = vld [vmem:[#allocation135_spill] sm:$0xff] }
 0x80e   : > { %4057 = vmatprep.subr.mxu0 %v12479_v30  ;;  %4128 = vmatprep.subr.mxu1 %v12480_v18  ;;  %v12490_v30 = vld [vmem:[#allocation136_spill] sm:$0xff]  ;;  %v12491_v18 = vld [vmem:[#allocation137_spill] sm:$0xff] }
 0x80f   : > { %4058 = vmatpush2.msra.mxu0 %v12481_v36  ;;  %4129 = vmatpush2.msra.mxu1 %v12482_v33  ;;  %v12492_v36 = vld [vmem:[#allocation138_spill] sm:$0xff]  ;;  %v12493_v33 = vld [vmem:[#allocation139_spill] sm:$0xff] }
 0x810   : > { %4059 = vmatprep.subr.mxu0 %v12483_v31  ;;  %4130 = vmatprep.subr.mxu1 %v12484_v10  ;;  %v12494_v31 = vld [vmem:[#allocation140_spill] sm:$0xff]  ;;  %v12495_v10 = vld [vmem:[#allocation141_spill] sm:$0xff] }
 0x811   : > { %4060 = vmatpush2.msra.mxu0 %v12485_v4  ;;  %4131 = vmatpush2.msra.mxu1 %v12486_v5  ;;  %v12496_v4 = vld [vmem:[#allocation142_spill] sm:$0xff]  ;;  %v12497_v5 = vld [vmem:[#allocation143_spill] sm:$0xff] }
 0x812   : > { %4061 = vmatprep.subr.mxu0 %v12487_v55  ;;  %4132 = vmatprep.subr.mxu1 %v12488_v60  ;;  %v12498_v55 = vld [vmem:[#allocation144_spill] sm:$0xff]  ;;  %v12499_v60 = vld [vmem:[#allocation145_spill] sm:$0xff] }
 0x813   : > { %4062 = vmatpush2.msra.mxu0 %v12489_v23  ;;  %4133 = vmatpush2.msra.mxu1 %v12490_v30  ;;  %v12500_v23 = vld [vmem:[#allocation146_spill] sm:$0xff]  ;;  %v12501_v30 = vld [vmem:[#allocation147_spill] sm:$0xff] }
 0x814   : > { %4063 = vmatprep.subr.mxu0 %v12491_v18  ;;  %4134 = vmatprep.subr.mxu1 %v12492_v36  ;;  %v12502_v18 = vld [vmem:[#allocation148_spill] sm:$0xff]  ;;  %v12503_v36 = vld [vmem:[#allocation149_spill] sm:$0xff] }
 0x815   : > { %4064 = vmatpush2.msra.mxu0 %v12493_v33  ;;  %4135 = vmatpush2.msra.mxu1 %v12494_v31  ;;  %v12504_v33 = vld [vmem:[#allocation150_spill] sm:$0xff]  ;;  %v12505_v31 = vld [vmem:[#allocation151_spill] sm:$0xff] }
 0x816   : > { %4065 = vmatprep.subr.mxu0 %v12495_v10  ;;  %4136 = vmatprep.subr.mxu1 %v12496_v4  ;;  %v12506_v10 = vld [vmem:[#allocation152_spill] sm:$0xff]  ;;  %v12507_v4 = vld [vmem:[#allocation153_spill] sm:$0xff] }
 0x817   : > { %4066 = vmatpush2.msra.mxu0 %v12497_v5  ;;  %4137 = vmatpush2.msra.mxu1 %v12498_v55  ;;  %v12508_v5 = vld [vmem:[#allocation154_spill] sm:$0xff] }
 0x818   : > { %4067 = vmatprep.subr.mxu0 %v12499_v60  ;;  %4138 = vmatprep.subr.mxu1 %v12500_v23  ;;  %v12510_v23 = vld [vmem:[#allocation297_spill] sm:$0xff] }
 0x819   : > { %4068 = vmatpush2.msra.mxu0 %v12501_v30  ;;  %4139 = vmatpush2.msra.mxu1 %v12502_v18  ;;  %v1480_v59 = vadd.f32 %v12510_v23, %v12509_v51  ;;  %v12511_v30 = vld [vmem:[#allocation340_spill] sm:$0xff] }
 0x81a   : > { %4069 = vmatprep.subr.mxu0 %v12503_v36  ;;  %4140 = vmatprep.subr.mxu1 %v12504_v33  ;;  %v1593_v18 = vadd.f32 %v12512_v50, %v12511_v30  ;;  %v12513_v36 = vld [vmem:[#allocation341_spill] sm:$0xff] }
 0x81b   : > { %4070 = vmatpush2.msra.mxu0 %v12505_v31  ;;  %4141 = vmatpush2.msra.mxu1 %v12506_v10  ;;  %v1482_v33 = vadd.f32 %v12514_v1, %v12513_v36  ;;  %v12515_v10 = vld [vmem:[#allocation300_spill] sm:$0xff]  ;;  %v12517_v36 = vld [vmem:[#allocation325_spill] sm:$0xff] }
 0x81c   : > { %4149 = vmatprep.subr.mxu0 %v12507_v4  ;;  %4220 = vmatprep.subr.mxu1 %v12508_v5  ;;  %v1595_v4 = vadd.f32 %v12515_v10, %v8305_v37 }
 0x85a   : > { %v3723_v55 = vpop.f32.mrf.mxu0  ;;  %v3794_v60 = vpop.f32.mrf.mxu1 }
 0x85b   : > { %v3941_v20 = vadd.f32 %v3723_v55, %v1480_v59  ;;  %v3943_v31 = vadd.f32 %v3794_v60, %v1593_v18  ;;  %v12516_v60 = vld [vmem:[#allocation342_spill] sm:$0xff] }
 0x85c   : > { %v3725_v34 = vpop.f32.mrf.mxu0  ;;  %v3796_v54 = vpop.f32.mrf.mxu1  ;;  %v1706_v10 = vadd.f32 %v12517_v36, %v12516_v60 }
 0x85d   : > { %v3942_v57 = vadd.f32 %v3725_v34, %v1482_v33  ;;  %v5583_v5 = vmul.f32 -1.442695, %v3941_v20  ;;  %v3944_v47 = vadd.f32 %v3796_v54, %v1595_v4  ;;  %v5585_v27 = vmul.f32 -1.442695, %v3943_v31  ;;  %v12518_v34 = vld [vmem:[#allocation343_spill] sm:$0xff]  ;;  %v12519_v20 = vld [vmem:[#allocation326_spill] sm:$0xff] }
 0x85e   : > { %v1819_v54 = vadd.f32 %v12519_v20, %v12518_v34  ;;  %v12520_v33 = vld [vmem:[#allocation344_spill] sm:$0xff] }
 0x85f   : > { %v5584_v61 = vmul.f32 -1.442695, %v3942_v57  ;;  %6052 = vpow2.f32 %v5583_v5  ;;  %v5586_v23 = vmul.f32 -1.442695, %v3944_v47  ;;  %v12521_v57 = vld [vmem:[#allocation327_spill] sm:$0xff]  ;;  %v12522_v31 = vld [vmem:[#allocation328_spill] sm:$0xff] }
 0x860   : > { %6054 = vpow2.f32 %v5585_v27  ;;  %v1708_v5 = vadd.f32 %v12521_v57, %v12520_v33  ;;  %v1821_v4 = vadd.f32 %v12522_v31, %v8319_v28 }
 0x861   : > { %6056 = vpow2.f32 %v5584_v61 }
 0x862   : > { %6058 = vpow2.f32 %v5586_v23 }
 0x86c   : > { %v6053_v50 = vpop.eup %6052 }
 0x86d   : > { %v6055_v30 = vpop.eup %6054  ;;  %v3955_v1 = vadd.f32 1.0, %v6053_v50 }
 0x86e   : > { %v6057_v51 = vpop.eup %6056  ;;  %v3967_v55 = vadd.f32 1.0, %v6055_v30 }
 0x86f   : > { %v6059_v59 = vpop.eup %6058  ;;  %v3956_v18 = vadd.f32 1.0, %v6057_v51  ;;  %6060 = vrcp.f32 %v3955_v1 }
 0x870   : > { %v3968_v27 = vadd.f32 1.0, %v6059_v59  ;;  %6062 = vrcp.f32 %v3967_v55 }
 0x871   : > { %6064 = vrcp.f32 %v3956_v18 }
 0x87c   : > { %v6061_v1 = vpop.eup %6060 }
 0x87d   : > { %v6063_v59 = vpop.eup %6062 }
 0x87e   : > { %v6065_v33 = vpop.eup %6064  ;;  %v3987_v55 = vmul.f32 %v6063_v59, %v9476_v2  ;;  %v12528_v59 = vld [vmem:[#allocation198_spill] sm:$0xff] }
 0x89b   : > { %v3865_v61 = vpop.f32.mrf.mxu0  ;;  %v3936_v47 = vpop.f32.mrf.mxu1 }
 0x89c   : > { %v3945_v23 = vadd.f32 %v3865_v61, %v1706_v10  ;;  %v3947_v30 = vadd.f32 %v3936_v47, %v1819_v54 }
 0x89d   : > { %v3867_v51 = vpop.f32.mrf.mxu0  ;;  %v3938_v50 = vpop.f32.mrf.mxu1 }
 0x89e   : > { %6066 = vtanh.f32 %v3945_v23  ;;  %v5587_v36 = vmul.f32 -1.442695, %v3947_v30  ;;  %v3946_v60 = vadd.f32 %v3867_v51, %v1708_v5  ;;  %v3948_v20 = vadd.f32 %v3938_v50, %v1821_v4 }
 0x89f   : > { %6068 = vrcp.f32 %v3968_v27 }
 0x8a0   : > { %6070 = vpow2.f32 %v5587_v36  ;;  %v5588_v57 = vmul.f32 -1.442695, %v3948_v20  ;;  %v12525_v20 = vld [vmem:[#allocation195_spill] sm:$0xff] }
 0x8a1   : > { %6072 = vtanh.f32 %v3946_v60 }
 0x8a2   : > { %6074 = vpow2.f32 %v5588_v57  ;;  %v12526_v57 = vld [vmem:[#allocation196_spill] sm:$0xff] }
 0x8ab   : > { %v6067_v34 = vpop.eup %6066 }
 0x8ac   : > { %v6069_v31 = vpop.eup %6068  ;;  %v3989_v10 = vmul.f32 %v6067_v34, %v6061_v1  ;;  %v12527_v1 = vld [vmem:[#allocation197_spill] sm:$0xff] }
 0x8ad   : > { %v6071_v18 = vpop.eup %6070  ;;  %v3988_v27 = vmul.f32 %v6069_v31, %v9480_v24  ;;  %v12523_v24 = vld [vmem:[#allocation193_spill] sm:$0xff]  ;;  %v12529_v31 = vld [vmem:[#allocation199_spill] sm:$0xff] }
 0x8ae   : > { %v6073_v54 = vpop.eup %6072  ;;  %v9763_v61 = vadd.f32 %v3989_v10, %v3987_v55  ;;  %v3981_v47 = vadd.f32 1.0, %v6071_v18  ;;  %v12530_v55 = vld [vmem:[#allocation200_spill] sm:$0xff]  ;;  %v12531_v10 = vld [vmem:[#allocation201_spill] sm:$0xff]  ;;  %v12532_v18 = vld [vmem:[#allocation202_spill] sm:$0xff] }
 0x8af   : > { %v6075_v5 = vpop.eup %6074  ;;  %v3990_v4 = vmul.f32 %v6073_v54, %v6065_v33  ;;  %v12524_v33 = vld [vmem:[#allocation194_spill] sm:$0xff]  ;;  %v12533_v54 = vld [vmem:[#allocation203_spill] sm:$0xff] }
 0x8b0   : > { %6076 = vtanh.f32 %v9763_v61  ;;  %v3982_v60 = vadd.f32 1.0, %v6075_v5  ;;  %v12535_v5 = vld [vmem:[#allocation205_spill] sm:$0xff] }
 0x8b1   : > { %6078 = vrcp.f32 %v3981_v47  ;;  %v9767_v23 = vadd.f32 %v3990_v4, %v3988_v27  ;;  %v12534_v47 = vld [vmem:[#allocation204_spill] sm:$0xff]  ;;  %v12536_v27 = vld [vmem:[#allocation206_spill] sm:$0xff]  ;;  %v12537_v4 = vld [vmem:[#allocation207_spill] sm:$0xff] }
 0x8b2   : > { %6080 = vrcp.f32 %v3982_v60  ;;  %v12538_v60 = vld [vmem:[#allocation208_spill] sm:$0xff] }
 0x8b3   : > { %6082 = vtanh.f32 %v9767_v23 }
 0x8bd   : > { %v6077_v2 = vpop.eup %6076 }
 0x8be   : > { %v6079_v34 = vpop.eup %6078 }
 0x8bf   : > { %v6081_v30 = vpop.eup %6080  ;;  %v9770_v51 = vmul.f32 %v6079_v34, %v6077_v2  ;;  %v12539_v2 = vld [vmem:[#allocation209_spill] sm:$0xff]  ;;  %v12540_v34 = vld [vmem:[#allocation210_spill] sm:$0xff] }
 0x8c0   : > { %v6083_v50 = vpop.eup %6082 }
 0x8c1   : > { %v3996_v36 = vmul.f32 %v6083_v50, %v6081_v30  ;;  %3997 = vst [vmem:[#allocation2 + $0x10] sm:$0xff] %v9770_v51  ;;  %v12541_v30 = vld [vmem:[#allocation211_spill] sm:$0xff]  ;;  %v12542_v50 = vld [vmem:[#allocation212_spill] sm:$0xff] }
 0x8c3   : > { %3998 = vst [vmem:[#allocation2 + $0x38] sm:$0xff] %v3996_v36  ;;  %4071 = vmatprep.mubr.f32.mxu0 %v3996_v36  ;;  %4142 = vmatprep.mubr.f32.mxu1 %v3996_v36 }
 0x8c4   : > { %4072 = vmatmul.mubr.f32.vlgmr.msra.gmra.mxu0 %v9770_v51  ;;  %4143 = vmatmul.mubr.f32.vlgmr.msra.gmra.mxu1 %v9770_v51 }
 0x8c5   : > { %4150 = vmatpush1.msra.mxu0 %v11364_v12  ;;  %4221 = vmatpush1.msra.mxu1 %v11365_v41 }
 0x8c6   : > { %4151 = vmatprep.subr.mxu0 %v11366_v46  ;;  %4213 = vmatprep.mubr.f32.mxu0 %v3996_v36 }
 0x8c7   : > { %4222 = vmatprep.subr.mxu1 %v11367_v3  ;;  %4284 = vmatprep.mubr.f32.mxu1 %v3996_v36  ;;  %v12543_v36 = vld [vmem:[#allocation213_spill] sm:$0xff] }
 0x8c8   : > { %4152 = vmatpush1.msra.mxu0 %v11368_v35  ;;  %4223 = vmatpush1.msra.mxu1 %v11369_v39 }
 0x8c9   : > { %4153 = vmatprep.subr.mxu0 %v11370_v29  ;;  %4224 = vmatprep.subr.mxu1 %v11371_v25 }
 0x8ca   : > { %4154 = vmatpush1.msra.mxu0 %v11372_v44  ;;  %4225 = vmatpush1.msra.mxu1 %v11595_v45 }
 0x8cb   : > { %4155 = vmatprep.subr.mxu0 %v11596_v56  ;;  %4226 = vmatprep.subr.mxu1 %v11597_v58 }
 0x8cc   : > { %4156 = vmatpush1.msra.mxu0 %v11598_v9  ;;  %4227 = vmatpush1.msra.mxu1 %v11599_v17 }
 0x8cd   : > { %4157 = vmatprep.subr.mxu0 %v11600_v53  ;;  %4228 = vmatprep.subr.mxu1 %v11601_v11 }
 0x8ce   : > { %4158 = vmatpush1.msra.mxu0 %v11602_v21  ;;  %4229 = vmatpush1.msra.mxu1 %v11603_v16 }
 0x8cf   : > { %4159 = vmatprep.subr.mxu0 %v11604_v8  ;;  %4230 = vmatprep.subr.mxu1 %v11827_v7 }
 0x8d0   : > { %4160 = vmatpush1.msra.mxu0 %v11828_v38  ;;  %4231 = vmatpush1.msra.mxu1 %v11829_v6 }
 0x8d1   : > { %4161 = vmatprep.subr.mxu0 %v11830_v62  ;;  %4232 = vmatprep.subr.mxu1 %v11831_v26 }
 0x8d2   : > { %4162 = vmatpush1.msra.mxu0 %v11832_v22  ;;  %4233 = vmatpush1.msra.mxu1 %v11833_v13 }
 0x8d3   : > { %4163 = vmatprep.subr.mxu0 %v11834_v40  ;;  %4234 = vmatprep.subr.mxu1 %v11835_v48 }
 0x8d4   : > { %4164 = vmatpush1.msra.mxu0 %v11836_v32  ;;  %4235 = vmatpush1.msra.mxu1 %v12059_v14 }
 0x8d5   : > { %4165 = vmatprep.subr.mxu0 %v12060_v15  ;;  %4236 = vmatprep.subr.mxu1 %v12061_v0 }
 0x8d6   : > { %4166 = vmatpush1.msra.mxu0 %v12062_v19  ;;  %4237 = vmatpush1.msra.mxu1 %v12063_v49 }
 0x8d7   : > { %4167 = vmatprep.subr.mxu0 %v12064_v42  ;;  %4238 = vmatprep.subr.mxu1 %v12065_v63 }
 0x8d8   : > { %4168 = vmatpush1.msra.mxu0 %v12066_v52  ;;  %4239 = vmatpush1.msra.mxu1 %v12067_v43 }
 0x8d9   : > { %4169 = vmatprep.subr.mxu0 %v12523_v24  ;;  %4240 = vmatprep.subr.mxu1 %v12524_v33 }
 0x8da   : > { %4170 = vmatpush1.msra.mxu0 %v12525_v20  ;;  %4241 = vmatpush1.msra.mxu1 %v12526_v57 }
 0x8db   : > { %4171 = vmatprep.subr.mxu0 %v12527_v1  ;;  %4242 = vmatprep.subr.mxu1 %v12528_v59 }
 0x8dc   : > { %4172 = vmatpush1.msra.mxu0 %v12529_v31  ;;  %4243 = vmatpush1.msra.mxu1 %v12530_v55  ;;  %v12746_v31 = vld [vmem:[#allocation303_spill] sm:$0xff] }
 0x8dd   : > { %4173 = vmatprep.subr.mxu0 %v12531_v10  ;;  %4244 = vmatprep.subr.mxu1 %v12532_v18  ;;  %v12744_v10 = vld [vmem:[#allocation302_spill] sm:$0xff] }
 0x8de   : > { %4174 = vmatpush1.msra.mxu0 %v12533_v54  ;;  %4245 = vmatpush1.msra.mxu1 %v12534_v47  ;;  %v12544_v54 = vld [vmem:[#allocation214_spill] sm:$0xff]  ;;  %v12545_v47 = vld [vmem:[#allocation215_spill] sm:$0xff] }
 0x8df   : > { %4175 = vmatprep.subr.mxu0 %v12535_v5  ;;  %4246 = vmatprep.subr.mxu1 %v12536_v27  ;;  %v12546_v5 = vld [vmem:[#allocation216_spill] sm:$0xff]  ;;  %v12547_v27 = vld [vmem:[#allocation217_spill] sm:$0xff] }
 0x8e0   : > { %4176 = vmatpush1.msra.mxu0 %v12537_v4  ;;  %4247 = vmatpush1.msra.mxu1 %v12538_v60  ;;  %v12548_v4 = vld [vmem:[#allocation218_spill] sm:$0xff]  ;;  %v12549_v60 = vld [vmem:[#allocation219_spill] sm:$0xff] }
 0x8e1   : > { %4177 = vmatprep.subr.mxu0 %v12539_v2  ;;  %4248 = vmatprep.subr.mxu1 %v12540_v34  ;;  %v12550_v2 = vld [vmem:[#allocation220_spill] sm:$0xff]  ;;  %v12551_v34 = vld [vmem:[#allocation221_spill] sm:$0xff] }
 0x8e2   : > { %4178 = vmatpush1.msra.mxu0 %v12541_v30  ;;  %4249 = vmatpush1.msra.mxu1 %v12542_v50  ;;  %v12552_v30 = vld [vmem:[#allocation222_spill] sm:$0xff]  ;;  %v12553_v50 = vld [vmem:[#allocation223_spill] sm:$0xff] }
 0x8e3   : > { %4179 = vmatprep.subr.mxu0 %v12543_v36  ;;  %4250 = vmatprep.subr.mxu1 %v12544_v54  ;;  %v12554_v36 = vld [vmem:[#allocation224_spill] sm:$0xff]  ;;  %v12555_v54 = vld [vmem:[#allocation225_spill] sm:$0xff] }
 0x8e4   : > { %4180 = vmatpush1.msra.mxu0 %v12545_v47  ;;  %4251 = vmatpush1.msra.mxu1 %v12546_v5  ;;  %v12556_v47 = vld [vmem:[#allocation226_spill] sm:$0xff]  ;;  %v12557_v5 = vld [vmem:[#allocation227_spill] sm:$0xff] }
 0x8e5   : > { %4181 = vmatprep.subr.mxu0 %v12547_v27  ;;  %4252 = vmatprep.subr.mxu1 %v12548_v4  ;;  %v12558_v27 = vld [vmem:[#allocation228_spill] sm:$0xff]  ;;  %v12559_v4 = vld [vmem:[#allocation229_spill] sm:$0xff] }
 0x8e6   : > { %4182 = vmatpush2.msra.mxu0 %v12549_v60  ;;  %4253 = vmatpush2.msra.mxu1 %v12550_v2  ;;  %v12560_v60 = vld [vmem:[#allocation230_spill] sm:$0xff]  ;;  %v12561_v2 = vld [vmem:[#allocation231_spill] sm:$0xff] }
 0x8e7   : > { %4183 = vmatprep.subr.mxu0 %v12551_v34  ;;  %4254 = vmatprep.subr.mxu1 %v12552_v30  ;;  %v12562_v34 = vld [vmem:[#allocation232_spill] sm:$0xff]  ;;  %v12563_v30 = vld [vmem:[#allocation233_spill] sm:$0xff] }
 0x8e8   : > { %4184 = vmatpush2.msra.mxu0 %v12553_v50  ;;  %4255 = vmatpush2.msra.mxu1 %v12554_v36  ;;  %v12564_v50 = vld [vmem:[#allocation234_spill] sm:$0xff]  ;;  %v12565_v36 = vld [vmem:[#allocation235_spill] sm:$0xff] }
 0x8e9   : > { %4185 = vmatprep.subr.mxu0 %v12555_v54  ;;  %4256 = vmatprep.subr.mxu1 %v12556_v47  ;;  %v12566_v54 = vld [vmem:[#allocation236_spill] sm:$0xff]  ;;  %v12567_v47 = vld [vmem:[#allocation237_spill] sm:$0xff] }
 0x8ea   : > { %4186 = vmatpush2.msra.mxu0 %v12557_v5  ;;  %4257 = vmatpush2.msra.mxu1 %v12558_v27  ;;  %v12568_v5 = vld [vmem:[#allocation238_spill] sm:$0xff]  ;;  %v12569_v27 = vld [vmem:[#allocation239_spill] sm:$0xff] }
 0x8eb   : > { %4187 = vmatprep.subr.mxu0 %v12559_v4  ;;  %4258 = vmatprep.subr.mxu1 %v12560_v60  ;;  %v12570_v4 = vld [vmem:[#allocation240_spill] sm:$0xff]  ;;  %v12571_v60 = vld [vmem:[#allocation241_spill] sm:$0xff] }
 0x8ec   : > { %4188 = vmatpush2.msra.mxu0 %v12561_v2  ;;  %4259 = vmatpush2.msra.mxu1 %v12562_v34  ;;  %v12572_v2 = vld [vmem:[#allocation242_spill] sm:$0xff]  ;;  %v12573_v34 = vld [vmem:[#allocation243_spill] sm:$0xff] }
 0x8ed   : > { %4189 = vmatprep.subr.mxu0 %v12563_v30  ;;  %4260 = vmatprep.subr.mxu1 %v12564_v50  ;;  %v12574_v30 = vld [vmem:[#allocation244_spill] sm:$0xff]  ;;  %v12575_v50 = vld [vmem:[#allocation245_spill] sm:$0xff] }
 0x8ee   : > { %4190 = vmatpush2.msra.mxu0 %v12565_v36  ;;  %4261 = vmatpush2.msra.mxu1 %v12566_v54  ;;  %v12576_v36 = vld [vmem:[#allocation246_spill] sm:$0xff]  ;;  %v12577_v54 = vld [vmem:[#allocation247_spill] sm:$0xff] }
 0x8ef   : > { %4191 = vmatprep.subr.mxu0 %v12567_v47  ;;  %4262 = vmatprep.subr.mxu1 %v12568_v5  ;;  %v12578_v47 = vld [vmem:[#allocation248_spill] sm:$0xff]  ;;  %v12579_v5 = vld [vmem:[#allocation249_spill] sm:$0xff] }
 0x8f0   : > { %4192 = vmatpush2.msra.mxu0 %v12569_v27  ;;  %4263 = vmatpush2.msra.mxu1 %v12570_v4  ;;  %v12580_v27 = vld [vmem:[#allocation250_spill] sm:$0xff]  ;;  %v12581_v4 = vld [vmem:[#allocation251_spill] sm:$0xff] }
 0x8f1   : > { %4193 = vmatprep.subr.mxu0 %v12571_v60  ;;  %4264 = vmatprep.subr.mxu1 %v12572_v2  ;;  %v12582_v60 = vld [vmem:[#allocation252_spill] sm:$0xff]  ;;  %v12583_v2 = vld [vmem:[#allocation253_spill] sm:$0xff] }
 0x8f2   : > { %4194 = vmatpush2.msra.mxu0 %v12573_v34  ;;  %4265 = vmatpush2.msra.mxu1 %v12574_v30  ;;  %v12584_v34 = vld [vmem:[#allocation254_spill] sm:$0xff]  ;;  %v12585_v30 = vld [vmem:[#allocation255_spill] sm:$0xff] }
 0x8f3   : > { %4195 = vmatprep.subr.mxu0 %v12575_v50  ;;  %4266 = vmatprep.subr.mxu1 %v12576_v36  ;;  %v12586_v50 = vld [vmem:[#allocation256_spill] sm:$0xff]  ;;  %v12587_v36 = vld [vmem:[#allocation257_spill] sm:$0xff] }
 0x8f4   : > { %4196 = vmatpush2.msra.mxu0 %v12577_v54  ;;  %4267 = vmatpush2.msra.mxu1 %v12578_v47  ;;  %v12588_v54 = vld [vmem:[#allocation258_spill] sm:$0xff]  ;;  %v12589_v47 = vld [vmem:[#allocation259_spill] sm:$0xff] }
 0x8f5   : > { %4197 = vmatprep.subr.mxu0 %v12579_v5  ;;  %4268 = vmatprep.subr.mxu1 %v12580_v27  ;;  %v12590_v5 = vld [vmem:[#allocation260_spill] sm:$0xff]  ;;  %v12591_v27 = vld [vmem:[#allocation261_spill] sm:$0xff] }
 0x8f6   : > { %4198 = vmatpush2.msra.mxu0 %v12581_v4  ;;  %4269 = vmatpush2.msra.mxu1 %v12582_v60  ;;  %v12592_v4 = vld [vmem:[#allocation262_spill] sm:$0xff]  ;;  %v12593_v60 = vld [vmem:[#allocation263_spill] sm:$0xff] }
 0x8f7   : > { %4199 = vmatprep.subr.mxu0 %v12583_v2  ;;  %4270 = vmatprep.subr.mxu1 %v12584_v34  ;;  %v12594_v2 = vld [vmem:[#allocation264_spill] sm:$0xff]  ;;  %v12595_v34 = vld [vmem:[#allocation265_spill] sm:$0xff] }
 0x8f8   : > { %4200 = vmatpush2.msra.mxu0 %v12585_v30  ;;  %4271 = vmatpush2.msra.mxu1 %v12586_v50  ;;  %v12596_v30 = vld [vmem:[#allocation266_spill] sm:$0xff]  ;;  %v12597_v50 = vld [vmem:[#allocation267_spill] sm:$0xff] }
 0x8f9   : > { %4201 = vmatprep.subr.mxu0 %v12587_v36  ;;  %4272 = vmatprep.subr.mxu1 %v12588_v54  ;;  %v12598_v36 = vld [vmem:[#allocation268_spill] sm:$0xff]  ;;  %v12599_v54 = vld [vmem:[#allocation269_spill] sm:$0xff] }
 0x8fa   : > { %4202 = vmatpush2.msra.mxu0 %v12589_v47  ;;  %4273 = vmatpush2.msra.mxu1 %v12590_v5  ;;  %v12600_v47 = vld [vmem:[#allocation270_spill] sm:$0xff]  ;;  %v12601_v5 = vld [vmem:[#allocation271_spill] sm:$0xff] }
 0x8fb   : > { %4203 = vmatprep.subr.mxu0 %v12591_v27  ;;  %4274 = vmatprep.subr.mxu1 %v12592_v4  ;;  %v12602_v27 = vld [vmem:[#allocation272_spill] sm:$0xff]  ;;  %v12603_v4 = vld [vmem:[#allocation273_spill] sm:$0xff] }
 0x8fc   : > { %4204 = vmatpush2.msra.mxu0 %v12593_v60  ;;  %4275 = vmatpush2.msra.mxu1 %v12594_v2  ;;  %v12604_v60 = vld [vmem:[#allocation274_spill] sm:$0xff]  ;;  %v12605_v2 = vld [vmem:[#allocation275_spill] sm:$0xff] }
 0x8fd   : > { %4205 = vmatprep.subr.mxu0 %v12595_v34  ;;  %4276 = vmatprep.subr.mxu1 %v12596_v30  ;;  %v12606_v34 = vld [vmem:[#allocation276_spill] sm:$0xff]  ;;  %v12607_v30 = vld [vmem:[#allocation277_spill] sm:$0xff] }
 0x8fe   : > { %4206 = vmatpush2.msra.mxu0 %v12597_v50  ;;  %4277 = vmatpush2.msra.mxu1 %v12598_v36  ;;  %v12608_v50 = vld [vmem:[#allocation278_spill] sm:$0xff]  ;;  %v12609_v36 = vld [vmem:[#allocation279_spill] sm:$0xff] }
 0x8ff   : > { %4207 = vmatprep.subr.mxu0 %v12599_v54  ;;  %4278 = vmatprep.subr.mxu1 %v12600_v47  ;;  %v12610_v54 = vld [vmem:[#allocation280_spill] sm:$0xff]  ;;  %v12741_v47 = vld [vmem:[#allocation339_spill] sm:$0xff] }
 0x900   : > { %4208 = vmatpush2.msra.mxu0 %v12601_v5  ;;  %4279 = vmatpush2.msra.mxu1 %v12602_v27  ;;  %v12611_v27 = vld [vmem:[#allocation25_spill] sm:$0xff]  ;;  %v12620_v5 = vld [vmem:[#allocation34_spill] sm:$0xff] }
 0x901   : > { %4209 = vmatprep.subr.mxu0 %v12603_v4  ;;  %4280 = vmatprep.subr.mxu1 %v12604_v60  ;;  %v12612_v4 = vld [vmem:[#allocation26_spill] sm:$0xff]  ;;  %v12613_v60 = vld [vmem:[#allocation27_spill] sm:$0xff] }
 0x902   : > { %4210 = vmatpush2.msra.mxu0 %v12605_v2  ;;  %4281 = vmatpush2.msra.mxu1 %v12606_v34  ;;  %v12614_v2 = vld [vmem:[#allocation28_spill] sm:$0xff]  ;;  %v12615_v34 = vld [vmem:[#allocation29_spill] sm:$0xff] }
 0x903   : > { %4211 = vmatprep.subr.mxu0 %v12607_v30  ;;  %4282 = vmatprep.subr.mxu1 %v12608_v50  ;;  %v12616_v30 = vld [vmem:[#allocation30_spill] sm:$0xff]  ;;  %v12617_v50 = vld [vmem:[#allocation31_spill] sm:$0xff] }
 0x904   : > { %4212 = vmatpush2.msra.mxu0 %v12609_v36  ;;  %4283 = vmatpush2.msra.mxu1 %v12610_v54  ;;  %v12618_v36 = vld [vmem:[#allocation32_spill] sm:$0xff]  ;;  %v12619_v54 = vld [vmem:[#allocation33_spill] sm:$0xff] }
 0x905   : > { %4214 = vmatmul.mubr.f32.vlgmr.msra.gmra.mxu0 %v9770_v51  ;;  %4285 = vmatmul.mubr.f32.vlgmr.msra.gmra.mxu1 %v9770_v51  ;;  %v12621_v51 = vld [vmem:[#allocation35_spill] sm:$0xff] }
 0x906   : > { %4357 = vmatprep.subr.mxu0 %v12611_v27  ;;  %4428 = vmatprep.subr.mxu1 %v12612_v4  ;;  %v12622_v27 = vld [vmem:[#allocation36_spill] sm:$0xff]  ;;  %v12623_v4 = vld [vmem:[#allocation37_spill] sm:$0xff] }
 0x907   : > { %4358 = vmatpush1.msra.mxu0 %v12613_v60  ;;  %4429 = vmatpush1.msra.mxu1 %v12614_v2  ;;  %v12624_v60 = vld [vmem:[#allocation38_spill] sm:$0xff]  ;;  %v12625_v2 = vld [vmem:[#allocation39_spill] sm:$0xff] }
 0x908   : > { %4359 = vmatprep.subr.mxu0 %v12615_v34  ;;  %4430 = vmatprep.subr.mxu1 %v12616_v30  ;;  %v12626_v34 = vld [vmem:[#allocation40_spill] sm:$0xff]  ;;  %v12627_v30 = vld [vmem:[#allocation41_spill] sm:$0xff] }
 0x909   : > { %4360 = vmatpush1.msra.mxu0 %v12617_v50  ;;  %4431 = vmatpush1.msra.mxu1 %v12618_v36  ;;  %v12628_v50 = vld [vmem:[#allocation42_spill] sm:$0xff]  ;;  %v12629_v36 = vld [vmem:[#allocation43_spill] sm:$0xff] }
 0x90a   : > { %4361 = vmatprep.subr.mxu0 %v12619_v54  ;;  %4432 = vmatprep.subr.mxu1 %v12620_v5  ;;  %v12630_v54 = vld [vmem:[#allocation44_spill] sm:$0xff]  ;;  %v12631_v5 = vld [vmem:[#allocation45_spill] sm:$0xff] }
 0x90b   : > { %4362 = vmatpush1.msra.mxu0 %v12621_v51  ;;  %4433 = vmatpush1.msra.mxu1 %v12622_v27  ;;  %v12632_v51 = vld [vmem:[#allocation46_spill] sm:$0xff]  ;;  %v12633_v27 = vld [vmem:[#allocation47_spill] sm:$0xff] }
 0x90c   : > { %4363 = vmatprep.subr.mxu0 %v12623_v4  ;;  %4434 = vmatprep.subr.mxu1 %v12624_v60  ;;  %v12634_v4 = vld [vmem:[#allocation48_spill] sm:$0xff]  ;;  %v12635_v60 = vld [vmem:[#allocation49_spill] sm:$0xff] }
 0x90d   : > { %4364 = vmatpush1.msra.mxu0 %v12625_v2  ;;  %4435 = vmatpush1.msra.mxu1 %v12626_v34  ;;  %v12636_v2 = vld [vmem:[#allocation50_spill] sm:$0xff]  ;;  %v12637_v34 = vld [vmem:[#allocation51_spill] sm:$0xff] }
 0x90e   : > { %4365 = vmatprep.subr.mxu0 %v12627_v30  ;;  %4436 = vmatprep.subr.mxu1 %v12628_v50  ;;  %v12638_v30 = vld [vmem:[#allocation52_spill] sm:$0xff]  ;;  %v12639_v50 = vld [vmem:[#allocation53_spill] sm:$0xff] }
 0x90f   : > { %4366 = vmatpush1.msra.mxu0 %v12629_v36  ;;  %4437 = vmatpush1.msra.mxu1 %v12630_v54  ;;  %v12640_v36 = vld [vmem:[#allocation54_spill] sm:$0xff]  ;;  %v12641_v54 = vld [vmem:[#allocation55_spill] sm:$0xff] }
 0x910   : > { %4367 = vmatprep.subr.mxu0 %v12631_v5  ;;  %4438 = vmatprep.subr.mxu1 %v12632_v51  ;;  %v12642_v5 = vld [vmem:[#allocation56_spill] sm:$0xff]  ;;  %v12643_v51 = vld [vmem:[#allocation57_spill] sm:$0xff] }
 0x911   : > { %4368 = vmatpush1.msra.mxu0 %v12633_v27  ;;  %4439 = vmatpush1.msra.mxu1 %v12634_v4  ;;  %v12644_v27 = vld [vmem:[#allocation58_spill] sm:$0xff]  ;;  %v12645_v4 = vld [vmem:[#allocation59_spill] sm:$0xff] }
 0x912   : > { %4369 = vmatprep.subr.mxu0 %v12635_v60  ;;  %4440 = vmatprep.subr.mxu1 %v12636_v2  ;;  %v12646_v60 = vld [vmem:[#allocation60_spill] sm:$0xff]  ;;  %v12647_v2 = vld [vmem:[#allocation61_spill] sm:$0xff] }
 0x913   : > { %4370 = vmatpush1.msra.mxu0 %v12637_v34  ;;  %4441 = vmatpush1.msra.mxu1 %v12638_v30  ;;  %v12648_v34 = vld [vmem:[#allocation62_spill] sm:$0xff]  ;;  %v12649_v30 = vld [vmem:[#allocation63_spill] sm:$0xff] }
 0x914   : > { %4371 = vmatprep.subr.mxu0 %v12639_v50  ;;  %4442 = vmatprep.subr.mxu1 %v12640_v36  ;;  %v12650_v50 = vld [vmem:[#allocation64_spill] sm:$0xff]  ;;  %v12651_v36 = vld [vmem:[#allocation65_spill] sm:$0xff] }
 0x915   : > { %4372 = vmatpush1.msra.mxu0 %v12641_v54  ;;  %4443 = vmatpush1.msra.mxu1 %v12642_v5  ;;  %v12652_v54 = vld [vmem:[#allocation66_spill] sm:$0xff]  ;;  %v12653_v5 = vld [vmem:[#allocation67_spill] sm:$0xff] }
 0x916   : > { %4373 = vmatprep.subr.mxu0 %v12643_v51  ;;  %4444 = vmatprep.subr.mxu1 %v12644_v27  ;;  %v12654_v51 = vld [vmem:[#allocation68_spill] sm:$0xff]  ;;  %v12655_v27 = vld [vmem:[#allocation69_spill] sm:$0xff] }
 0x917   : > { %4374 = vmatpush1.msra.mxu0 %v12645_v4  ;;  %4445 = vmatpush1.msra.mxu1 %v12646_v60  ;;  %v12656_v4 = vld [vmem:[#allocation70_spill] sm:$0xff]  ;;  %v12657_v60 = vld [vmem:[#allocation71_spill] sm:$0xff] }
 0x918   : > { %4375 = vmatprep.subr.mxu0 %v12647_v2  ;;  %4446 = vmatprep.subr.mxu1 %v12648_v34  ;;  %v12658_v2 = vld [vmem:[#allocation72_spill] sm:$0xff]  ;;  %v12659_v34 = vld [vmem:[#allocation73_spill] sm:$0xff] }
 0x919   : > { %4376 = vmatpush1.msra.mxu0 %v12649_v30  ;;  %4447 = vmatpush1.msra.mxu1 %v12650_v50  ;;  %v12660_v30 = vld [vmem:[#allocation74_spill] sm:$0xff]  ;;  %v12661_v50 = vld [vmem:[#allocation75_spill] sm:$0xff] }
 0x91a   : > { %4377 = vmatprep.subr.mxu0 %v12651_v36  ;;  %4448 = vmatprep.subr.mxu1 %v12652_v54  ;;  %v12662_v36 = vld [vmem:[#allocation76_spill] sm:$0xff]  ;;  %v12663_v54 = vld [vmem:[#allocation77_spill] sm:$0xff] }
 0x91b   : > { %4378 = vmatpush1.msra.mxu0 %v12653_v5  ;;  %4449 = vmatpush1.msra.mxu1 %v12654_v51  ;;  %v12664_v5 = vld [vmem:[#allocation78_spill] sm:$0xff]  ;;  %v12665_v51 = vld [vmem:[#allocation79_spill] sm:$0xff] }
 0x91c   : > { %4379 = vmatprep.subr.mxu0 %v12655_v27  ;;  %4450 = vmatprep.subr.mxu1 %v12656_v4  ;;  %v12666_v27 = vld [vmem:[#allocation80_spill] sm:$0xff]  ;;  %v12667_v4 = vld [vmem:[#allocation81_spill] sm:$0xff] }
 0x91d   : > { %4380 = vmatpush1.msra.mxu0 %v12657_v60  ;;  %4451 = vmatpush1.msra.mxu1 %v12658_v2  ;;  %v12668_v60 = vld [vmem:[#allocation82_spill] sm:$0xff]  ;;  %v12669_v2 = vld [vmem:[#allocation83_spill] sm:$0xff] }
 0x91e   : > { %4381 = vmatprep.subr.mxu0 %v12659_v34  ;;  %4452 = vmatprep.subr.mxu1 %v12660_v30  ;;  %v12670_v34 = vld [vmem:[#allocation84_spill] sm:$0xff]  ;;  %v12671_v30 = vld [vmem:[#allocation85_spill] sm:$0xff] }
 0x91f   : > { %4382 = vmatpush1.msra.mxu0 %v12661_v50  ;;  %4453 = vmatpush1.msra.mxu1 %v12662_v36  ;;  %v12672_v50 = vld [vmem:[#allocation86_spill] sm:$0xff]  ;;  %v12673_v36 = vld [vmem:[#allocation87_spill] sm:$0xff] }
 0x920   : > { %4383 = vmatprep.subr.mxu0 %v12663_v54  ;;  %4454 = vmatprep.subr.mxu1 %v12664_v5  ;;  %v12674_v54 = vld [vmem:[#allocation88_spill] sm:$0xff]  ;;  %v12675_v5 = vld [vmem:[#allocation89_spill] sm:$0xff] }
 0x921   : > { %4384 = vmatpush1.msra.mxu0 %v12665_v51  ;;  %4455 = vmatpush1.msra.mxu1 %v12666_v27  ;;  %v12676_v51 = vld [vmem:[#allocation90_spill] sm:$0xff]  ;;  %v12677_v27 = vld [vmem:[#allocation91_spill] sm:$0xff] }
 0x922   : > { %4385 = vmatprep.subr.mxu0 %v12667_v4  ;;  %4456 = vmatprep.subr.mxu1 %v12668_v60  ;;  %v12678_v4 = vld [vmem:[#allocation92_spill] sm:$0xff]  ;;  %v12679_v60 = vld [vmem:[#allocation93_spill] sm:$0xff] }
 0x923   : > { %4386 = vmatpush1.msra.mxu0 %v12669_v2  ;;  %4457 = vmatpush1.msra.mxu1 %v12670_v34  ;;  %v12680_v2 = vld [vmem:[#allocation94_spill] sm:$0xff]  ;;  %v12681_v34 = vld [vmem:[#allocation95_spill] sm:$0xff] }
 0x924   : > { %4387 = vmatprep.subr.mxu0 %v12671_v30  ;;  %4458 = vmatprep.subr.mxu1 %v12672_v50  ;;  %v12682_v30 = vld [vmem:[#allocation96_spill] sm:$0xff]  ;;  %v12683_v50 = vld [vmem:[#allocation97_spill] sm:$0xff] }
 0x925   : > { %4388 = vmatpush1.msra.mxu0 %v12673_v36  ;;  %4459 = vmatpush1.msra.mxu1 %v12674_v54  ;;  %v12684_v36 = vld [vmem:[#allocation98_spill] sm:$0xff]  ;;  %v12685_v54 = vld [vmem:[#allocation99_spill] sm:$0xff] }
 0x926   : > { %4389 = vmatprep.subr.mxu0 %v12675_v5  ;;  %4460 = vmatprep.subr.mxu1 %v12676_v51  ;;  %v12686_v5 = vld [vmem:[#allocation100_spill] sm:$0xff]  ;;  %v12687_v51 = vld [vmem:[#allocation101_spill] sm:$0xff] }
 0x927   : > { %4390 = vmatpush2.msra.mxu0 %v12677_v27  ;;  %4461 = vmatpush2.msra.mxu1 %v12678_v4  ;;  %v12688_v27 = vld [vmem:[#allocation102_spill] sm:$0xff]  ;;  %v12689_v4 = vld [vmem:[#allocation103_spill] sm:$0xff] }
 0x928   : > { %4391 = vmatprep.subr.mxu0 %v12679_v60  ;;  %4462 = vmatprep.subr.mxu1 %v12680_v2  ;;  %v12690_v60 = vld [vmem:[#allocation104_spill] sm:$0xff]  ;;  %v12691_v2 = vld [vmem:[#allocation105_spill] sm:$0xff] }
 0x929   : > { %4392 = vmatpush2.msra.mxu0 %v12681_v34  ;;  %4463 = vmatpush2.msra.mxu1 %v12682_v30  ;;  %v12692_v34 = vld [vmem:[#allocation106_spill] sm:$0xff]  ;;  %v12693_v30 = vld [vmem:[#allocation107_spill] sm:$0xff] }
 0x92a   : > { %4393 = vmatprep.subr.mxu0 %v12683_v50  ;;  %4464 = vmatprep.subr.mxu1 %v12684_v36  ;;  %v12694_v50 = vld [vmem:[#allocation108_spill] sm:$0xff]  ;;  %v12695_v36 = vld [vmem:[#allocation109_spill] sm:$0xff] }
 0x92b   : > { %4394 = vmatpush2.msra.mxu0 %v12685_v54  ;;  %4465 = vmatpush2.msra.mxu1 %v12686_v5  ;;  %v12696_v54 = vld [vmem:[#allocation110_spill] sm:$0xff]  ;;  %v12697_v5 = vld [vmem:[#allocation111_spill] sm:$0xff] }
 0x92c   : > { %4395 = vmatprep.subr.mxu0 %v12687_v51  ;;  %4466 = vmatprep.subr.mxu1 %v12688_v27  ;;  %v12698_v51 = vld [vmem:[#allocation112_spill] sm:$0xff]  ;;  %v12699_v27 = vld [vmem:[#allocation113_spill] sm:$0xff] }
 0x92d   : > { %4396 = vmatpush2.msra.mxu0 %v12689_v4  ;;  %4467 = vmatpush2.msra.mxu1 %v12690_v60  ;;  %v12700_v4 = vld [vmem:[#allocation114_spill] sm:$0xff]  ;;  %v12701_v60 = vld [vmem:[#allocation115_spill] sm:$0xff] }
 0x92e   : > { %4397 = vmatprep.subr.mxu0 %v12691_v2  ;;  %4468 = vmatprep.subr.mxu1 %v12692_v34  ;;  %v12702_v2 = vld [vmem:[#allocation116_spill] sm:$0xff]  ;;  %v12703_v34 = vld [vmem:[#allocation117_spill] sm:$0xff] }
 0x92f   : > { %4398 = vmatpush2.msra.mxu0 %v12693_v30  ;;  %4469 = vmatpush2.msra.mxu1 %v12694_v50  ;;  %v12704_v30 = vld [vmem:[#allocation118_spill] sm:$0xff]  ;;  %v12705_v50 = vld [vmem:[#allocation119_spill] sm:$0xff] }
 0x930   : > { %4399 = vmatprep.subr.mxu0 %v12695_v36  ;;  %4470 = vmatprep.subr.mxu1 %v12696_v54  ;;  %v12706_v36 = vld [vmem:[#allocation120_spill] sm:$0xff]  ;;  %v12707_v54 = vld [vmem:[#allocation121_spill] sm:$0xff] }
 0x931   : > { %4400 = vmatpush2.msra.mxu0 %v12697_v5  ;;  %4471 = vmatpush2.msra.mxu1 %v12698_v51  ;;  %v12708_v5 = vld [vmem:[#allocation122_spill] sm:$0xff]  ;;  %v12709_v51 = vld [vmem:[#allocation123_spill] sm:$0xff] }
 0x932   : > { %4401 = vmatprep.subr.mxu0 %v12699_v27  ;;  %4472 = vmatprep.subr.mxu1 %v12700_v4  ;;  %v12710_v27 = vld [vmem:[#allocation124_spill] sm:$0xff]  ;;  %v12711_v4 = vld [vmem:[#allocation125_spill] sm:$0xff] }
 0x933   : > { %4402 = vmatpush2.msra.mxu0 %v12701_v60  ;;  %4473 = vmatpush2.msra.mxu1 %v12702_v2  ;;  %v12712_v60 = vld [vmem:[#allocation126_spill] sm:$0xff]  ;;  %v12713_v2 = vld [vmem:[#allocation127_spill] sm:$0xff] }
 0x934   : > { %4403 = vmatprep.subr.mxu0 %v12703_v34  ;;  %4474 = vmatprep.subr.mxu1 %v12704_v30  ;;  %v12714_v34 = vld [vmem:[#allocation128_spill] sm:$0xff]  ;;  %v12715_v30 = vld [vmem:[#allocation129_spill] sm:$0xff] }
 0x935   : > { %4404 = vmatpush2.msra.mxu0 %v12705_v50  ;;  %4475 = vmatpush2.msra.mxu1 %v12706_v36  ;;  %v12716_v50 = vld [vmem:[#allocation130_spill] sm:$0xff]  ;;  %v12717_v36 = vld [vmem:[#allocation131_spill] sm:$0xff] }
 0x936   : > { %4405 = vmatprep.subr.mxu0 %v12707_v54  ;;  %4476 = vmatprep.subr.mxu1 %v12708_v5  ;;  %v12718_v54 = vld [vmem:[#allocation132_spill] sm:$0xff]  ;;  %v12719_v5 = vld [vmem:[#allocation133_spill] sm:$0xff] }
 0x937   : > { %4406 = vmatpush2.msra.mxu0 %v12709_v51  ;;  %4477 = vmatpush2.msra.mxu1 %v12710_v27  ;;  %v12720_v51 = vld [vmem:[#allocation134_spill] sm:$0xff]  ;;  %v12721_v27 = vld [vmem:[#allocation135_spill] sm:$0xff] }
 0x938   : > { %4407 = vmatprep.subr.mxu0 %v12711_v4  ;;  %4478 = vmatprep.subr.mxu1 %v12712_v60  ;;  %v12722_v4 = vld [vmem:[#allocation136_spill] sm:$0xff]  ;;  %v12723_v60 = vld [vmem:[#allocation137_spill] sm:$0xff] }
 0x939   : > { %4408 = vmatpush2.msra.mxu0 %v12713_v2  ;;  %4479 = vmatpush2.msra.mxu1 %v12714_v34  ;;  %v12724_v2 = vld [vmem:[#allocation138_spill] sm:$0xff]  ;;  %v12725_v34 = vld [vmem:[#allocation139_spill] sm:$0xff] }
 0x93a   : > { %4409 = vmatprep.subr.mxu0 %v12715_v30  ;;  %4480 = vmatprep.subr.mxu1 %v12716_v50  ;;  %v12726_v30 = vld [vmem:[#allocation140_spill] sm:$0xff]  ;;  %v12727_v50 = vld [vmem:[#allocation141_spill] sm:$0xff] }
 0x93b   : > { %4410 = vmatpush2.msra.mxu0 %v12717_v36  ;;  %4481 = vmatpush2.msra.mxu1 %v12718_v54  ;;  %v12728_v36 = vld [vmem:[#allocation142_spill] sm:$0xff]  ;;  %v12729_v54 = vld [vmem:[#allocation143_spill] sm:$0xff] }
 0x93c   : > { %4411 = vmatprep.subr.mxu0 %v12719_v5  ;;  %4482 = vmatprep.subr.mxu1 %v12720_v51  ;;  %v12730_v5 = vld [vmem:[#allocation144_spill] sm:$0xff]  ;;  %v12731_v51 = vld [vmem:[#allocation145_spill] sm:$0xff] }
 0x93d   : > { %4412 = vmatpush2.msra.mxu0 %v12721_v27  ;;  %4483 = vmatpush2.msra.mxu1 %v12722_v4  ;;  %v12732_v27 = vld [vmem:[#allocation146_spill] sm:$0xff]  ;;  %v12733_v4 = vld [vmem:[#allocation147_spill] sm:$0xff] }
 0x93e   : > { %4413 = vmatprep.subr.mxu0 %v12723_v60  ;;  %4484 = vmatprep.subr.mxu1 %v12724_v2  ;;  %v12734_v60 = vld [vmem:[#allocation148_spill] sm:$0xff]  ;;  %v12735_v2 = vld [vmem:[#allocation149_spill] sm:$0xff] }
 0x93f   : > { %4414 = vmatpush2.msra.mxu0 %v12725_v34  ;;  %4485 = vmatpush2.msra.mxu1 %v12726_v30  ;;  %v12736_v34 = vld [vmem:[#allocation150_spill] sm:$0xff]  ;;  %v12737_v30 = vld [vmem:[#allocation151_spill] sm:$0xff] }
 0x940   : > { %4415 = vmatprep.subr.mxu0 %v12727_v50  ;;  %4486 = vmatprep.subr.mxu1 %v12728_v36  ;;  %v12738_v50 = vld [vmem:[#allocation152_spill] sm:$0xff]  ;;  %v12739_v36 = vld [vmem:[#allocation153_spill] sm:$0xff] }
 0x941   : > { %4416 = vmatpush2.msra.mxu0 %v12729_v54  ;;  %4487 = vmatpush2.msra.mxu1 %v12730_v5  ;;  %v12740_v54 = vld [vmem:[#allocation154_spill] sm:$0xff] }
 0x942   : > { %4417 = vmatprep.subr.mxu0 %v12731_v51  ;;  %4488 = vmatprep.subr.mxu1 %v12732_v27  ;;  %v12742_v27 = vld [vmem:[#allocation301_spill] sm:$0xff] }
 0x943   : > { %4418 = vmatpush2.msra.mxu0 %v12733_v4  ;;  %4489 = vmatpush2.msra.mxu1 %v12734_v60  ;;  %v1486_v18 = vadd.f32 %v12742_v27, %v12741_v47  ;;  %v12743_v4 = vld [vmem:[#allocation340_spill] sm:$0xff] }
 0x944   : > { %4419 = vmatprep.subr.mxu0 %v12735_v2  ;;  %4490 = vmatprep.subr.mxu1 %v12736_v34  ;;  %v1599_v60 = vadd.f32 %v12744_v10, %v12743_v4  ;;  %v12745_v2 = vld [vmem:[#allocation341_spill] sm:$0xff] }
 0x945   : > { %4420 = vmatpush2.msra.mxu0 %v12737_v30  ;;  %4491 = vmatpush2.msra.mxu1 %v12738_v50  ;;  %v1488_v34 = vadd.f32 %v12746_v31, %v12745_v2  ;;  %v12747_v50 = vld [vmem:[#allocation304_spill] sm:$0xff]  ;;  %v12749_v2 = vld [vmem:[#allocation329_spill] sm:$0xff] }
 0x946   : > { %4499 = vmatprep.subr.mxu0 %v12739_v36  ;;  %4570 = vmatprep.subr.mxu1 %v12740_v54  ;;  %v1601_v36 = vadd.f32 %v12747_v50, %v8305_v37 }
 0x984   : > { %v4073_v5 = vpop.f32.mrf.mxu0  ;;  %v4144_v51 = vpop.f32.mrf.mxu1 }
 0x985   : > { %v4291_v59 = vadd.f32 %v4073_v5, %v1486_v18  ;;  %v4293_v30 = vadd.f32 %v4144_v51, %v1599_v60  ;;  %v12748_v60 = vld [vmem:[#allocation342_spill] sm:$0xff] }
 0x986   : > { %v4075_v55 = vpop.f32.mrf.mxu0  ;;  %v4146_v1 = vpop.f32.mrf.mxu1  ;;  %v1712_v50 = vadd.f32 %v12749_v2, %v12748_v60 }
 0x987   : > { %v4292_v57 = vadd.f32 %v4075_v55, %v1488_v34  ;;  %v5589_v54 = vmul.f32 -1.442695, %v4291_v59  ;;  %v4294_v20 = vadd.f32 %v4146_v1, %v1601_v36  ;;  %v5591_v33 = vmul.f32 -1.442695, %v4293_v30  ;;  %v12750_v55 = vld [vmem:[#allocation343_spill] sm:$0xff]  ;;  %v12751_v59 = vld [vmem:[#allocation330_spill] sm:$0xff] }
 0x988   : > { %v1825_v1 = vadd.f32 %v12751_v59, %v12750_v55  ;;  %v12752_v34 = vld [vmem:[#allocation344_spill] sm:$0xff] }
 0x989   : > { %v5590_v24 = vmul.f32 -1.442695, %v4292_v57  ;;  %6084 = vpow2.f32 %v5589_v54  ;;  %v5592_v27 = vmul.f32 -1.442695, %v4294_v20  ;;  %v12753_v57 = vld [vmem:[#allocation331_spill] sm:$0xff]  ;;  %v12754_v36 = vld [vmem:[#allocation332_spill] sm:$0xff] }
 0x98a   : > { %6086 = vpow2.f32 %v5591_v33  ;;  %v1714_v30 = vadd.f32 %v12753_v57, %v12752_v34  ;;  %v1827_v54 = vadd.f32 %v12754_v36, %v8319_v28 }
 0x98b   : > { %6088 = vpow2.f32 %v5590_v24 }
 0x98c   : > { %6090 = vpow2.f32 %v5592_v27 }
 0x996   : > { %v6085_v10 = vpop.eup %6084 }
 0x997   : > { %v6087_v4 = vpop.eup %6086  ;;  %v4305_v31 = vadd.f32 1.0, %v6085_v10 }
 0x998   : > { %v6089_v47 = vpop.eup %6088  ;;  %v4317_v5 = vadd.f32 1.0, %v6087_v4 }
 0x999   : > { %v6091_v18 = vpop.eup %6090  ;;  %v4306_v51 = vadd.f32 1.0, %v6089_v47  ;;  %6092 = vrcp.f32 %v4305_v31 }
 0x99a   : > { %v4318_v33 = vadd.f32 1.0, %v6091_v18  ;;  %6094 = vrcp.f32 %v4317_v5 }
 0x99b   : > { %6096 = vrcp.f32 %v4306_v51 }
 0x9a6   : > { %v6093_v31 = vpop.eup %6092 }
 0x9a7   : > { %v6095_v18 = vpop.eup %6094 }
 0x9a8   : > { %v6097_v34 = vpop.eup %6096  ;;  %v4337_v5 = vmul.f32 %v6095_v18, %v9763_v61  ;;  %v12798_v18 = vld [vmem:[#allocation236_spill] sm:$0xff] }
 0x9c5   : > { %v4215_v24 = vpop.f32.mrf.mxu0  ;;  %v4286_v20 = vpop.f32.mrf.mxu1 }
 0x9c6   : > { %v4295_v27 = vadd.f32 %v4215_v24, %v1712_v50  ;;  %v4297_v4 = vadd.f32 %v4286_v20, %v1825_v1 }
 0x9c7   : > { %v4217_v47 = vpop.f32.mrf.mxu0  ;;  %v4288_v10 = vpop.f32.mrf.mxu1 }
 0x9c8   : > { %6098 = vtanh.f32 %v4295_v27  ;;  %v5593_v2 = vmul.f32 -1.442695, %v4297_v4  ;;  %v4296_v60 = vadd.f32 %v4217_v47, %v1714_v30  ;;  %v4298_v59 = vadd.f32 %v4288_v10, %v1827_v54 }
 0x9c9   : > { %6100 = vrcp.f32 %v4318_v33 }
 0x9ca   : > { %6102 = vpow2.f32 %v5593_v2  ;;  %v5594_v57 = vmul.f32 -1.442695, %v4298_v59  ;;  %v12795_v59 = vld [vmem:[#allocation233_spill] sm:$0xff] }
 0x9cb   : > { %6104 = vtanh.f32 %v4296_v60 }
 0x9cc   : > { %6106 = vpow2.f32 %v5594_v57  ;;  %v12796_v57 = vld [vmem:[#allocation234_spill] sm:$0xff] }
 0x9d5   : > { %v6099_v55 = vpop.eup %6098 }
 0x9d6   : > { %v6101_v36 = vpop.eup %6100  ;;  %v4339_v50 = vmul.f32 %v6099_v55, %v6093_v31  ;;  %v12797_v31 = vld [vmem:[#allocation235_spill] sm:$0xff] }
 0x9d7   : > { %v6103_v51 = vpop.eup %6102  ;;  %v4338_v33 = vmul.f32 %v6101_v36, %v9767_v23  ;;  %v12793_v23 = vld [vmem:[#allocation231_spill] sm:$0xff]  ;;  %v12799_v36 = vld [vmem:[#allocation237_spill] sm:$0xff] }
 0x9d8   : > { %v6105_v1 = vpop.eup %6104  ;;  %v10050_v24 = vadd.f32 %v4339_v50, %v4337_v5  ;;  %v4331_v20 = vadd.f32 1.0, %v6103_v51  ;;  %v12800_v5 = vld [vmem:[#allocation238_spill] sm:$0xff]  ;;  %v12801_v50 = vld [vmem:[#allocation239_spill] sm:$0xff]  ;;  %v12802_v51 = vld [vmem:[#allocation240_spill] sm:$0xff] }
 0x9d9   : > { %v6107_v30 = vpop.eup %6106  ;;  %v4340_v54 = vmul.f32 %v6105_v1, %v6097_v34  ;;  %v12794_v34 = vld [vmem:[#allocation232_spill] sm:$0xff]  ;;  %v12803_v1 = vld [vmem:[#allocation241_spill] sm:$0xff] }
 0x9da   : > { %6108 = vtanh.f32 %v10050_v24  ;;  %v4332_v60 = vadd.f32 1.0, %v6107_v30  ;;  %v12805_v30 = vld [vmem:[#allocation243_spill] sm:$0xff] }
 0x9db   : > { %6110 = vrcp.f32 %v4331_v20  ;;  %v10054_v27 = vadd.f32 %v4340_v54, %v4338_v33  ;;  %v12804_v20 = vld [vmem:[#allocation242_spill] sm:$0xff]  ;;  %v12806_v33 = vld [vmem:[#allocation244_spill] sm:$0xff]  ;;  %v12807_v54 = vld [vmem:[#allocation245_spill] sm:$0xff] }
 0x9dc   : > { %6112 = vrcp.f32 %v4332_v60  ;;  %v12808_v60 = vld [vmem:[#allocation246_spill] sm:$0xff] }
 0x9dd   : > { %6114 = vtanh.f32 %v10054_v27 }
 0x9e7   : > { %v6109_v61 = vpop.eup %6108 }
 0x9e8   : > { %v6111_v55 = vpop.eup %6110 }
 0x9e9   : > { %v6113_v4 = vpop.eup %6112  ;;  %v10057_v47 = vmul.f32 %v6111_v55, %v6109_v61  ;;  %v12809_v61 = vld [vmem:[#allocation247_spill] sm:$0xff]  ;;  %v12810_v55 = vld [vmem:[#allocation248_spill] sm:$0xff] }
 0x9ea   : > { %v6115_v10 = vpop.eup %6114 }
 0x9eb   : > { %v4346_v2 = vmul.f32 %v6115_v10, %v6113_v4  ;;  %4347 = vst [vmem:[#allocation2 + $0x60] sm:$0xff] %v10057_v47  ;;  %v12811_v4 = vld [vmem:[#allocation249_spill] sm:$0xff]  ;;  %v12812_v10 = vld [vmem:[#allocation250_spill] sm:$0xff] }
 0x9ed   : > { %4348 = vst [vmem:[#allocation2 + $0x70] sm:$0xff] %v4346_v2  ;;  %4421 = vmatprep.mubr.f32.mxu0 %v4346_v2  ;;  %4492 = vmatprep.mubr.f32.mxu1 %v4346_v2 }
 0x9ee   : > { %4422 = vmatmul.mubr.f32.vlgmr.msra.gmra.mxu0 %v10057_v47  ;;  %4493 = vmatmul.mubr.f32.vlgmr.msra.gmra.mxu1 %v10057_v47 }
 0x9ef   : > { %4500 = vmatpush1.msra.mxu0 %v11364_v12  ;;  %4571 = vmatpush1.msra.mxu1 %v11365_v41  ;;  %v12755_v12 = vld [vmem:[#allocation193_spill] sm:$0xff]  ;;  %v12756_v41 = vld [vmem:[#allocation194_spill] sm:$0xff] }
 0x9f0   : > { %4501 = vmatprep.subr.mxu0 %v11366_v46  ;;  %4563 = vmatprep.mubr.f32.mxu0 %v4346_v2  ;;  %v12757_v46 = vld [vmem:[#allocation195_spill] sm:$0xff] }
 0x9f1   : > { %4572 = vmatprep.subr.mxu1 %v11367_v3  ;;  %4634 = vmatprep.mubr.f32.mxu1 %v4346_v2  ;;  %v12758_v3 = vld [vmem:[#allocation196_spill] sm:$0xff]  ;;  %v12813_v2 = vld [vmem:[#allocation251_spill] sm:$0xff] }
 0x9f2   : > { %4502 = vmatpush1.msra.mxu0 %v11368_v35  ;;  %4573 = vmatpush1.msra.mxu1 %v11369_v39  ;;  %v12759_v35 = vld [vmem:[#allocation197_spill] sm:$0xff]  ;;  %v12760_v39 = vld [vmem:[#allocation198_spill] sm:$0xff] }
 0x9f3   : > { %4503 = vmatprep.subr.mxu0 %v11370_v29  ;;  %4574 = vmatprep.subr.mxu1 %v11371_v25  ;;  %v12761_v29 = vld [vmem:[#allocation199_spill] sm:$0xff]  ;;  %v12762_v25 = vld [vmem:[#allocation200_spill] sm:$0xff] }
 0x9f4   : > { %4504 = vmatpush1.msra.mxu0 %v11372_v44  ;;  %4575 = vmatpush1.msra.mxu1 %v11595_v45  ;;  %v12763_v44 = vld [vmem:[#allocation201_spill] sm:$0xff]  ;;  %v12764_v45 = vld [vmem:[#allocation202_spill] sm:$0xff] }
 0x9f5   : > { %4505 = vmatprep.subr.mxu0 %v11596_v56  ;;  %4576 = vmatprep.subr.mxu1 %v11597_v58  ;;  %v12765_v56 = vld [vmem:[#allocation203_spill] sm:$0xff]  ;;  %v12766_v58 = vld [vmem:[#allocation204_spill] sm:$0xff] }
 0x9f6   : > { %4506 = vmatpush1.msra.mxu0 %v11598_v9  ;;  %4577 = vmatpush1.msra.mxu1 %v11599_v17  ;;  %v12767_v9 = vld [vmem:[#allocation205_spill] sm:$0xff]  ;;  %v12768_v17 = vld [vmem:[#allocation206_spill] sm:$0xff] }
 0x9f7   : > { %4507 = vmatprep.subr.mxu0 %v11600_v53  ;;  %4578 = vmatprep.subr.mxu1 %v11601_v11  ;;  %v12769_v53 = vld [vmem:[#allocation207_spill] sm:$0xff]  ;;  %v12770_v11 = vld [vmem:[#allocation208_spill] sm:$0xff] }
 0x9f8   : > { %4508 = vmatpush1.msra.mxu0 %v11602_v21  ;;  %4579 = vmatpush1.msra.mxu1 %v11603_v16  ;;  %v12771_v21 = vld [vmem:[#allocation209_spill] sm:$0xff]  ;;  %v12772_v16 = vld [vmem:[#allocation210_spill] sm:$0xff] }
 0x9f9   : > { %4509 = vmatprep.subr.mxu0 %v11604_v8  ;;  %4580 = vmatprep.subr.mxu1 %v11827_v7  ;;  %v12773_v8 = vld [vmem:[#allocation211_spill] sm:$0xff]  ;;  %v12774_v7 = vld [vmem:[#allocation212_spill] sm:$0xff] }
 0x9fa   : > { %4510 = vmatpush1.msra.mxu0 %v11828_v38  ;;  %4581 = vmatpush1.msra.mxu1 %v11829_v6  ;;  %v12775_v38 = vld [vmem:[#allocation213_spill] sm:$0xff]  ;;  %v12776_v6 = vld [vmem:[#allocation214_spill] sm:$0xff] }
 0x9fb   : > { %4511 = vmatprep.subr.mxu0 %v11830_v62  ;;  %4582 = vmatprep.subr.mxu1 %v11831_v26  ;;  %v12777_v62 = vld [vmem:[#allocation215_spill] sm:$0xff]  ;;  %v12778_v26 = vld [vmem:[#allocation216_spill] sm:$0xff] }
 0x9fc   : > { %4512 = vmatpush1.msra.mxu0 %v11832_v22  ;;  %4583 = vmatpush1.msra.mxu1 %v11833_v13  ;;  %v12779_v22 = vld [vmem:[#allocation217_spill] sm:$0xff]  ;;  %v12780_v13 = vld [vmem:[#allocation218_spill] sm:$0xff] }
 0x9fd   : > { %4513 = vmatprep.subr.mxu0 %v11834_v40  ;;  %4584 = vmatprep.subr.mxu1 %v11835_v48  ;;  %v12781_v40 = vld [vmem:[#allocation219_spill] sm:$0xff]  ;;  %v12782_v48 = vld [vmem:[#allocation220_spill] sm:$0xff] }
 0x9fe   : > { %4514 = vmatpush1.msra.mxu0 %v11836_v32  ;;  %4585 = vmatpush1.msra.mxu1 %v12059_v14  ;;  %v12783_v32 = vld [vmem:[#allocation221_spill] sm:$0xff]  ;;  %v12784_v14 = vld [vmem:[#allocation222_spill] sm:$0xff] }
 0x9ff   : > { %4515 = vmatprep.subr.mxu0 %v12060_v15  ;;  %4586 = vmatprep.subr.mxu1 %v12061_v0  ;;  %v12785_v15 = vld [vmem:[#allocation223_spill] sm:$0xff]  ;;  %v12786_v0 = vld [vmem:[#allocation224_spill] sm:$0xff] }
 0xa00   : > { %4516 = vmatpush1.msra.mxu0 %v12062_v19  ;;  %4587 = vmatpush1.msra.mxu1 %v12063_v49  ;;  %v12787_v19 = vld [vmem:[#allocation225_spill] sm:$0xff]  ;;  %v12788_v49 = vld [vmem:[#allocation226_spill] sm:$0xff] }
 0xa01   : > { %4517 = vmatprep.subr.mxu0 %v12064_v42  ;;  %4588 = vmatprep.subr.mxu1 %v12065_v63  ;;  %v12789_v42 = vld [vmem:[#allocation227_spill] sm:$0xff]  ;;  %v12790_v63 = vld [vmem:[#allocation228_spill] sm:$0xff] }
 0xa02   : > { %4518 = vmatpush1.msra.mxu0 %v12066_v52  ;;  %4589 = vmatpush1.msra.mxu1 %v12067_v43  ;;  %v12791_v52 = vld [vmem:[#allocation229_spill] sm:$0xff]  ;;  %v12792_v43 = vld [vmem:[#allocation230_spill] sm:$0xff] }
 0xa03   : > { %4519 = vmatprep.subr.mxu0 %v12755_v12  ;;  %4590 = vmatprep.subr.mxu1 %v12756_v41  ;;  %v12814_v12 = vld [vmem:[#allocation252_spill] sm:$0xff]  ;;  %v12815_v41 = vld [vmem:[#allocation253_spill] sm:$0xff] }
 0xa04   : > { %4520 = vmatpush1.msra.mxu0 %v12757_v46  ;;  %4591 = vmatpush1.msra.mxu1 %v12758_v3  ;;  %v12816_v46 = vld [vmem:[#allocation254_spill] sm:$0xff]  ;;  %v12817_v3 = vld [vmem:[#allocation255_spill] sm:$0xff] }
 0xa05   : > { %4521 = vmatprep.subr.mxu0 %v12759_v35  ;;  %4592 = vmatprep.subr.mxu1 %v12760_v39  ;;  %v12818_v35 = vld [vmem:[#allocation256_spill] sm:$0xff]  ;;  %v12819_v39 = vld [vmem:[#allocation257_spill] sm:$0xff] }
 0xa06   : > { %4522 = vmatpush1.msra.mxu0 %v12761_v29  ;;  %4593 = vmatpush1.msra.mxu1 %v12762_v25  ;;  %v12820_v29 = vld [vmem:[#allocation258_spill] sm:$0xff]  ;;  %v12821_v25 = vld [vmem:[#allocation259_spill] sm:$0xff] }
 0xa07   : > { %4523 = vmatprep.subr.mxu0 %v12763_v44  ;;  %4594 = vmatprep.subr.mxu1 %v12764_v45  ;;  %v12822_v44 = vld [vmem:[#allocation260_spill] sm:$0xff]  ;;  %v12823_v45 = vld [vmem:[#allocation261_spill] sm:$0xff] }
 0xa08   : > { %4524 = vmatpush1.msra.mxu0 %v12765_v56  ;;  %4595 = vmatpush1.msra.mxu1 %v12766_v58  ;;  %v12824_v56 = vld [vmem:[#allocation262_spill] sm:$0xff]  ;;  %v12825_v58 = vld [vmem:[#allocation263_spill] sm:$0xff] }
 0xa09   : > { %4525 = vmatprep.subr.mxu0 %v12767_v9  ;;  %4596 = vmatprep.subr.mxu1 %v12768_v17  ;;  %v12826_v9 = vld [vmem:[#allocation264_spill] sm:$0xff]  ;;  %v12827_v17 = vld [vmem:[#allocation265_spill] sm:$0xff] }
 0xa0a   : > { %4526 = vmatpush1.msra.mxu0 %v12769_v53  ;;  %4597 = vmatpush1.msra.mxu1 %v12770_v11  ;;  %v12828_v53 = vld [vmem:[#allocation266_spill] sm:$0xff]  ;;  %v12829_v11 = vld [vmem:[#allocation267_spill] sm:$0xff] }
 0xa0b   : > { %4527 = vmatprep.subr.mxu0 %v12771_v21  ;;  %4598 = vmatprep.subr.mxu1 %v12772_v16  ;;  %v12830_v21 = vld [vmem:[#allocation268_spill] sm:$0xff]  ;;  %v12831_v16 = vld [vmem:[#allocation269_spill] sm:$0xff] }
 0xa0c   : > { %4528 = vmatpush1.msra.mxu0 %v12773_v8  ;;  %4599 = vmatpush1.msra.mxu1 %v12774_v7  ;;  %v12832_v8 = vld [vmem:[#allocation270_spill] sm:$0xff]  ;;  %v12833_v7 = vld [vmem:[#allocation271_spill] sm:$0xff] }
 0xa0d   : > { %4529 = vmatprep.subr.mxu0 %v12775_v38  ;;  %4600 = vmatprep.subr.mxu1 %v12776_v6  ;;  %v12834_v38 = vld [vmem:[#allocation272_spill] sm:$0xff]  ;;  %v12835_v6 = vld [vmem:[#allocation273_spill] sm:$0xff] }
 0xa0e   : > { %4530 = vmatpush1.msra.mxu0 %v12777_v62  ;;  %4601 = vmatpush1.msra.mxu1 %v12778_v26  ;;  %v12836_v62 = vld [vmem:[#allocation274_spill] sm:$0xff]  ;;  %v12837_v26 = vld [vmem:[#allocation275_spill] sm:$0xff] }
 0xa0f   : > { %4531 = vmatprep.subr.mxu0 %v12779_v22  ;;  %4602 = vmatprep.subr.mxu1 %v12780_v13  ;;  %v12838_v22 = vld [vmem:[#allocation276_spill] sm:$0xff]  ;;  %v12839_v13 = vld [vmem:[#allocation277_spill] sm:$0xff] }
 0xa10   : > { %4532 = vmatpush2.msra.mxu0 %v12781_v40  ;;  %4603 = vmatpush2.msra.mxu1 %v12782_v48  ;;  %v12840_v40 = vld [vmem:[#allocation278_spill] sm:$0xff]  ;;  %v12841_v48 = vld [vmem:[#allocation279_spill] sm:$0xff] }
 0xa11   : > { %4533 = vmatprep.subr.mxu0 %v12783_v32  ;;  %4604 = vmatprep.subr.mxu1 %v12784_v14  ;;  %v12842_v32 = vld [vmem:[#allocation280_spill] sm:$0xff] }
 0xa12   : > { %4534 = vmatpush2.msra.mxu0 %v12785_v15  ;;  %4605 = vmatpush2.msra.mxu1 %v12786_v0  ;;  %v12843_v0 = vld [vmem:[#allocation339_spill] sm:$0xff] }
 0xa13   : > { %4535 = vmatprep.subr.mxu0 %v12787_v19  ;;  %4606 = vmatprep.subr.mxu1 %v12788_v49  ;;  %v12844_v19 = vld [vmem:[#allocation305_spill] sm:$0xff] }
 0xa14   : > { %4536 = vmatpush2.msra.mxu0 %v12789_v42  ;;  %4607 = vmatpush2.msra.mxu1 %v12790_v63  ;;  %v1492_v49 = vadd.f32 %v12844_v19, %v12843_v0  ;;  %v12845_v42 = vld [vmem:[#allocation340_spill] sm:$0xff]  ;;  %v12846_v63 = vld [vmem:[#allocation306_spill] sm:$0xff] }
 0xa15   : > { %4537 = vmatprep.subr.mxu0 %v12791_v52  ;;  %4608 = vmatprep.subr.mxu1 %v12792_v43  ;;  %v1605_v52 = vadd.f32 %v12846_v63, %v12845_v42 }
 0xa16   : > { %4538 = vmatpush2.msra.mxu0 %v12793_v23  ;;  %4609 = vmatpush2.msra.mxu1 %v12794_v34  ;;  %v12847_v23 = vld [vmem:[#allocation341_spill] sm:$0xff]  ;;  %v12848_v34 = vld [vmem:[#allocation307_spill] sm:$0xff] }
 0xa17   : > { %4539 = vmatprep.subr.mxu0 %v12795_v59  ;;  %4610 = vmatprep.subr.mxu1 %v12796_v57  ;;  %v1494_v59 = vadd.f32 %v12848_v34, %v12847_v23 }
 0xa18   : > { %4540 = vmatpush2.msra.mxu0 %v12797_v31  ;;  %4611 = vmatpush2.msra.mxu1 %v12798_v18 }
 0xa19   : > { %4541 = vmatprep.subr.mxu0 %v12799_v36  ;;  %4612 = vmatprep.subr.mxu1 %v12800_v5  ;;  %v12849_v36 = vld [vmem:[#allocation308_spill] sm:$0xff] }
 0xa1a   : > { %4542 = vmatpush2.msra.mxu0 %v12801_v50  ;;  %4613 = vmatpush2.msra.mxu1 %v12802_v51  ;;  %v1607_v5 = vadd.f32 %v12849_v36, %v8305_v37 }
 0xa1b   : > { %4543 = vmatprep.subr.mxu0 %v12803_v1  ;;  %4614 = vmatprep.subr.mxu1 %v12804_v20 }
 0xa1c   : > { %4544 = vmatpush2.msra.mxu0 %v12805_v30  ;;  %4615 = vmatpush2.msra.mxu1 %v12806_v33 }
 0xa1d   : > { %4545 = vmatprep.subr.mxu0 %v12807_v54  ;;  %4616 = vmatprep.subr.mxu1 %v12808_v60 }
 0xa1e   : > { %4546 = vmatpush2.msra.mxu0 %v12809_v61  ;;  %4617 = vmatpush2.msra.mxu1 %v12810_v55 }
 0xa1f   : > { %4547 = vmatprep.subr.mxu0 %v12811_v4  ;;  %4618 = vmatprep.subr.mxu1 %v12812_v10 }
 0xa20   : > { %4548 = vmatpush2.msra.mxu0 %v12813_v2  ;;  %4619 = vmatpush2.msra.mxu1 %v12814_v12  ;;  %v12850_v2 = vld [vmem:[#allocation342_spill] sm:$0xff]  ;;  %v12851_v12 = vld [vmem:[#allocation333_spill] sm:$0xff] }
 0xa21   : > { %4549 = vmatprep.subr.mxu0 %v12815_v41  ;;  %4620 = vmatprep.subr.mxu1 %v12816_v46  ;;  %v1718_v37 = vadd.f32 %v12851_v12, %v12850_v2  ;;  %v12852_v41 = vld [vmem:[#allocation343_spill] sm:$0xff]  ;;  %v12853_v46 = vld [vmem:[#allocation334_spill] sm:$0xff] }
 0xa22   : > { %4550 = vmatpush2.msra.mxu0 %v12817_v3  ;;  %4621 = vmatpush2.msra.mxu1 %v12818_v35  ;;  %v1831_v3 = vadd.f32 %v12853_v46, %v12852_v41  ;;  %v12854_v35 = vld [vmem:[#allocation344_spill] sm:$0xff] }
 0xa23   : > { %4551 = vmatprep.subr.mxu0 %v12819_v39  ;;  %4622 = vmatprep.subr.mxu1 %v12820_v29  ;;  %v12855_v39 = vld [vmem:[#allocation336_spill] sm:$0xff] }
 0xa24   : > { %4552 = vmatpush2.msra.mxu0 %v12821_v25  ;;  %4623 = vmatpush2.msra.mxu1 %v12822_v44  ;;  %v1720_v29 = vadd.f32 %v12855_v39, %v12854_v35 }
 0xa25   : > { %4553 = vmatprep.subr.mxu0 %v12823_v45  ;;  %4624 = vmatprep.subr.mxu1 %v12824_v56  ;;  %v12856_v56 = vld [vmem:[#allocation338_spill] sm:$0xff] }
 0xa26   : > { %4554 = vmatpush2.msra.mxu0 %v12825_v58  ;;  %4625 = vmatpush2.msra.mxu1 %v12826_v9  ;;  %v1833_v58 = vadd.f32 %v12856_v56, %v8319_v28 }
 0xa27   : > { %4555 = vmatprep.subr.mxu0 %v12827_v17  ;;  %4626 = vmatprep.subr.mxu1 %v12828_v53 }
 0xa28   : > { %4556 = vmatpush2.msra.mxu0 %v12829_v11  ;;  %4627 = vmatpush2.msra.mxu1 %v12830_v21 }
 0xa29   : > { %4557 = vmatprep.subr.mxu0 %v12831_v16  ;;  %4628 = vmatprep.subr.mxu1 %v12832_v8 }
 0xa2a   : > { %4558 = vmatpush2.msra.mxu0 %v12833_v7  ;;  %4629 = vmatpush2.msra.mxu1 %v12834_v38 }
 0xa2b   : > { %4559 = vmatprep.subr.mxu0 %v12835_v6  ;;  %4630 = vmatprep.subr.mxu1 %v12836_v62 }
 0xa2c   : > { %4560 = vmatpush2.msra.mxu0 %v12837_v26  ;;  %4631 = vmatpush2.msra.mxu1 %v12838_v22 }
 0xa2d   : > { %4561 = vmatprep.subr.mxu0 %v12839_v13  ;;  %4632 = vmatprep.subr.mxu1 %v12840_v40 }
 0xa2e   : > { %4562 = vmatpush2.msra.mxu0 %v12841_v48  ;;  %4633 = vmatpush2.msra.mxu1 %v12842_v32 }
 0xa2f   : > { %4564 = vmatmul.mubr.f32.vlgmr.msra.gmra.mxu0 %v10057_v47  ;;  %4635 = vmatmul.mubr.f32.vlgmr.msra.gmra.mxu1 %v10057_v47 }
 0xaae   : > { %v4423_v14 = vpop.f32.mrf.mxu0  ;;  %v4494_v15 = vpop.f32.mrf.mxu1 }
 0xaaf   : > { %v4641_v57 = vadd.f32 %v4423_v14, %v1492_v49  ;;  %v4643_v31 = vadd.f32 %v4494_v15, %v1605_v52 }
 0xab0   : > { %v4425_v43 = vpop.f32.mrf.mxu0  ;;  %v4496_v18 = vpop.f32.mrf.mxu1 }
 0xab1   : > { %v4642_v50 = vadd.f32 %v4425_v43, %v1494_v59  ;;  %v5595_v47 = vmul.f32 -1.442695, %v4641_v57  ;;  %v4644_v51 = vadd.f32 %v4496_v18, %v1607_v5  ;;  %v5597_v1 = vmul.f32 -1.442695, %v4643_v31 }
 0xab3   : > { %v5596_v20 = vmul.f32 -1.442695, %v4642_v50  ;;  %6116 = vpow2.f32 %v5595_v47  ;;  %v5598_v30 = vmul.f32 -1.442695, %v4644_v51 }
 0xab4   : > { %6118 = vpow2.f32 %v5597_v1 }
 0xab5   : > { %6120 = vpow2.f32 %v5596_v20 }
 0xab6   : > { %6122 = vpow2.f32 %v5598_v30 }
 0xac0   : > { %v6117_v33 = vpop.eup %6116 }
 0xac1   : > { %v6119_v54 = vpop.eup %6118  ;;  %v4655_v61 = vadd.f32 1.0, %v6117_v33 }
 0xac2   : > { %v6121_v60 = vpop.eup %6120  ;;  %v4667_v4 = vadd.f32 1.0, %v6119_v54 }
 0xac3   : > { %v6123_v55 = vpop.eup %6122  ;;  %v4656_v10 = vadd.f32 1.0, %v6121_v60  ;;  %6124 = vrcp.f32 %v4655_v61 }
 0xac4   : > { %v4668_v25 = vadd.f32 1.0, %v6123_v55  ;;  %6126 = vrcp.f32 %v4667_v4 }
 0xac5   : > { %6128 = vrcp.f32 %v4656_v10 }
 0xad0   : > { %v6125_v38 = vpop.eup %6124 }
 0xad1   : > { %v6127_v6 = vpop.eup %6126 }
 0xad2   : > { %v6129_v62 = vpop.eup %6128  ;;  %v4687_v22 = vmul.f32 %v6127_v6, %v10050_v24 }
 0xaef   : > { %v4565_v44 = vpop.f32.mrf.mxu0  ;;  %v4636_v45 = vpop.f32.mrf.mxu1 }
 0xaf0   : > { %v4645_v9 = vadd.f32 %v4565_v44, %v1718_v37  ;;  %v4647_v17 = vadd.f32 %v4636_v45, %v1831_v3 }
 0xaf1   : > { %v4567_v53 = vpop.f32.mrf.mxu0  ;;  %v4638_v11 = vpop.f32.mrf.mxu1 }
 0xaf2   : > { %6130 = vtanh.f32 %v4645_v9  ;;  %v5599_v21 = vmul.f32 -1.442695, %v4647_v17  ;;  %v4646_v16 = vadd.f32 %v4567_v53, %v1720_v29  ;;  %v4648_v8 = vadd.f32 %v4638_v11, %v1833_v58 }
 0xaf3   : > { %6132 = vrcp.f32 %v4668_v25 }
 0xaf4   : > { %6134 = vpow2.f32 %v5599_v21  ;;  %v5600_v7 = vmul.f32 -1.442695, %v4648_v8 }
 0xaf5   : > { %6136 = vtanh.f32 %v4646_v16 }
 0xaf6   : > { %6138 = vpow2.f32 %v5600_v7 }
 0xaff   : > { %v6131_v26 = vpop.eup %6130 }
 0xb00   : > { %v6133_v28 = vpop.eup %6132  ;;  %v4689_v13 = vmul.f32 %v6131_v26, %v6125_v38 }
 0xb01   : > { %v6135_v40 = vpop.eup %6134  ;;  %v4688_v0 = vmul.f32 %v6133_v28, %v10054_v27 }
 0xb02   : > { %v6137_v48 = vpop.eup %6136  ;;  %v4691_v32 = vadd.f32 %v4689_v13, %v4687_v22  ;;  %v4681_v14 = vadd.f32 1.0, %v6135_v40 }
 0xb03   : > { %v6139_v15 = vpop.eup %6138  ;;  %v4690_v19 = vmul.f32 %v6137_v48, %v6129_v62 }
 0xb04   : > { %6140 = vtanh.f32 %v4691_v32  ;;  %v4682_v49 = vadd.f32 1.0, %v6139_v15 }
 0xb05   : > { %6142 = vrcp.f32 %v4681_v14  ;;  %v4692_v42 = vadd.f32 %v4690_v19, %v4688_v0 }
 0xb06   : > { %6144 = vrcp.f32 %v4682_v49 }
 0xb07   : > { %6146 = vtanh.f32 %v4692_v42 }
 0xb11   : > { %v6141_v63 = vpop.eup %6140 }
 0xb12   : > { %v6143_v52 = vpop.eup %6142 }
 0xb13   : > { %v6145_v43 = vpop.eup %6144  ;;  %v4695_v23 = vmul.f32 %v6143_v52, %v6141_v63  ;;  %4702 = sbr.rel (%p5601_p10) target bundleno = 3573 (0xdf5), region = 104 }
 0xb14   : > { %v6147_v24 = vpop.eup %6146 }
 0xb15   : > { %4697 = vst [vmem:[#allocation2 + $0x78] sm:$0xff] %v4695_v23  ;;  %v4696_v34 = vmul.f32 %v6147_v24, %v6145_v43 }
 0xb17   : > { %4698 = vst [vmem:[#allocation2 + $0x28] sm:$0xff] %v4696_v34 }
 0xb18   : > { %v4734_v59 = vld [vmem:[#allocation9 + $0x78] sm:$0xff]  ;;  %v4733_v27 = vld [vmem:[#allocation9 + $0x70] sm:$0xff]  ;;  %v4732_v57 = vld [vmem:[#allocation9 + $0x68] sm:$0xff] }
 0xb19   : > { %v4782_v31 = vunpack.c.h.bf16 %v4734_v59  ;;  %v4781_v18 = vunpack.c.l.bf16 %v4734_v59  ;;  %v4780_v36 = vunpack.c.h.bf16 %v4733_v27  ;;  %v4779_v5 = vunpack.c.l.bf16 %v4733_v27  ;;  %v4731_v50 = vld [vmem:[#allocation9 + $0x60] sm:$0xff]  ;;  %v4730_v1 = vld [vmem:[#allocation9 + $0x58] sm:$0xff]  ;;  %v4729_v33 = vld [vmem:[#allocation9 + $0x50] sm:$0xff] }
 0xb1a   : > { %v4778_v47 = vunpack.c.h.bf16 %v4732_v57  ;;  %v4777_v51 = vunpack.c.l.bf16 %v4732_v57  ;;  %v4776_v20 = vunpack.c.h.bf16 %v4731_v50  ;;  %v4775_v30 = vunpack.c.l.bf16 %v4731_v50  ;;  %v4728_v61 = vld [vmem:[#allocation9 + $0x48] sm:$0xff]  ;;  %v4727_v10 = vld [vmem:[#allocation9 + $0x40] sm:$0xff]  ;;  %v4704_v2 = vld [vmem:[#allocation2] sm:$0xff] }
 0xb1b   : > { %4827 = vmatprep.subr.mxu0 %v4782_v31  ;;  %v4774_v54 = vunpack.c.h.bf16 %v4730_v1  ;;  %v4773_v60 = vunpack.c.l.bf16 %v4730_v1  ;;  %v4772_v55 = vunpack.c.h.bf16 %v4729_v33  ;;  %v4771_v4 = vunpack.c.l.bf16 %v4729_v33  ;;  %4891 = vmatprep.mubr.f32.mxu0 %v4704_v2  ;;  %v4726_v41 = vld [vmem:[#allocation9 + $0x38] sm:$0xff]  ;;  %v4725_v35 = vld [vmem:[#allocation9 + $0x30] sm:$0xff]  ;;  %v4724_v29 = vld [vmem:[#allocation9 + $0x28] sm:$0xff] }
 0xb1c   : > { %4828 = vmatpush1.msra.mxu0 %v4781_v18  ;;  %v4770_v12 = vunpack.c.h.bf16 %v4728_v61  ;;  %v4769_v37 = vunpack.c.l.bf16 %v4728_v61  ;;  %v4768_v46 = vunpack.c.h.bf16 %v4727_v10  ;;  %v4767_v3 = vunpack.c.l.bf16 %v4727_v10  ;;  %v4971_v44 = vld [vmem:[#allocation12 + $0x78] sm:$0xff]  ;;  %v4970_v45 = vld [vmem:[#allocation12 + $0x70] sm:$0xff]  ;;  %v4969_v56 = vld [vmem:[#allocation12 + $0x68] sm:$0xff] }
 0xb1d   : > { %4829 = vmatprep.subr.mxu0 %v4780_v36  ;;  %v4766_v39 = vunpack.c.h.bf16 %v4726_v41  ;;  %v4765_v25 = vunpack.c.l.bf16 %v4726_v41  ;;  %v4764_v58 = vunpack.c.h.bf16 %v4725_v35  ;;  %v5019_v9 = vunpack.c.h.bf16 %v4971_v44  ;;  %v4723_v21 = vld [vmem:[#allocation9 + $0x20] sm:$0xff]  ;;  %v4722_v62 = vld [vmem:[#allocation9 + $0x18] sm:$0xff]  ;;  %v4721_v48 = vld [vmem:[#allocation9 + $0x10] sm:$0xff] }
 0xb1e   : > { %4830 = vmatpush1.msra.mxu0 %v4779_v5  ;;  %v5018_v17 = vunpack.c.l.bf16 %v4971_v44  ;;  %v5017_v53 = vunpack.c.h.bf16 %v4970_v45  ;;  %v4763_v11 = vunpack.c.l.bf16 %v4725_v35  ;;  %v5016_v16 = vunpack.c.l.bf16 %v4970_v45  ;;  %v4968_v8 = vld [vmem:[#allocation12 + $0x60] sm:$0xff]  ;;  %v4967_v28 = vld [vmem:[#allocation12 + $0x58] sm:$0xff]  ;;  %v4966_v14 = vld [vmem:[#allocation12 + $0x50] sm:$0xff] }
 0xb1f   : > { %4831 = vmatprep.subr.mxu0 %v4778_v47  ;;  %v4762_v7 = vunpack.c.h.bf16 %v4724_v29  ;;  %5064 = vmatprep.subr.mxu1 %v5019_v9  ;;  %v5015_v38 = vunpack.c.h.bf16 %v4969_v56  ;;  %v4761_v6 = vunpack.c.l.bf16 %v4724_v29  ;;  %v5014_v26 = vunpack.c.l.bf16 %v4969_v56  ;;  %v4720_v49 = vld [vmem:[#allocation9 + $0x8] sm:$0xff]  ;;  %v4719_v24 = vld [vmem:[#allocation9] sm:$0xff]  ;;  %v4750_v18 = vld [vmem:[#allocation9 + $0xf8] sm:$0xff] }
 0xb20   : > { %4832 = vmatpush1.msra.mxu0 %v4777_v51  ;;  %5065 = vmatpush1.msra.mxu1 %v5018_v17  ;;  %v4760_v22 = vunpack.c.h.bf16 %v4723_v21  ;;  %v5013_v13 = vunpack.c.h.bf16 %v4968_v8  ;;  %v4759_v40 = vunpack.c.l.bf16 %v4723_v21  ;;  %v5012_v32 = vunpack.c.l.bf16 %v4968_v8  ;;  %v4965_v63 = vld [vmem:[#allocation12 + $0x48] sm:$0xff]  ;;  %v4964_v59 = vld [vmem:[#allocation12 + $0x40] sm:$0xff]  ;;  %v4963_v5 = vld [vmem:[#allocation12 + $0x38] sm:$0xff] }
 0xb21   : > { %4833 = vmatprep.subr.mxu0 %v4776_v20  ;;  %5066 = vmatprep.subr.mxu1 %v5017_v53  ;;  %v4758_v15 = vunpack.c.h.bf16 %v4722_v62  ;;  %v5011_v0 = vunpack.c.h.bf16 %v4967_v28  ;;  %v4757_v19 = vunpack.c.l.bf16 %v4722_v62  ;;  %v5010_v42 = vunpack.c.l.bf16 %v4967_v28  ;;  %v4749_v1 = vld [vmem:[#allocation9 + $0xf0] sm:$0xff]  ;;  %v4748_v61 = vld [vmem:[#allocation9 + $0xe8] sm:$0xff]  ;;  %v4746_v29 = vld [vmem:[#allocation9 + $0xd8] sm:$0xff] }
 0xb22   : > { %4834 = vmatpush1.msra.mxu0 %v4775_v30  ;;  %5067 = vmatpush1.msra.mxu1 %v5016_v16  ;;  %v4756_v52 = vunpack.c.h.bf16 %v4721_v48  ;;  %v5009_v43 = vunpack.c.h.bf16 %v4966_v14  ;;  %v4755_v23 = vunpack.c.l.bf16 %v4721_v48  ;;  %v5008_v34 = vunpack.c.l.bf16 %v4966_v14  ;;  %v4962_v30 = vld [vmem:[#allocation12 + $0x30] sm:$0xff]  ;;  %v4959_v44 = vld [vmem:[#allocation12 + $0x18] sm:$0xff]  ;;  %v4744_v8 = vld [vmem:[#allocation9 + $0xc8] sm:$0xff] }
 0xb23   : > { %4835 = vmatprep.subr.mxu0 %v4774_v54  ;;  %5068 = vmatprep.subr.mxu1 %v5015_v38  ;;  %v4754_v27 = vunpack.c.h.bf16 %v4720_v49  ;;  %v5007_v57 = vunpack.c.h.bf16 %v4965_v63  ;;  %v4753_v31 = vunpack.c.l.bf16 %v4720_v49  ;;  %v5006_v36 = vunpack.c.l.bf16 %v4965_v63  ;;  %v4745_v9 = vld [vmem:[#allocation9 + $0xd0] sm:$0xff]  ;;  %v4743_v28 = vld [vmem:[#allocation9 + $0xc0] sm:$0xff]  ;;  %v4742_v14 = vld [vmem:[#allocation9 + $0xb8] sm:$0xff] }
 0xb24   : > { %4836 = vmatpush1.msra.mxu0 %v4773_v60  ;;  %5069 = vmatpush1.msra.mxu1 %v5014_v26  ;;  %v4752_v50 = vunpack.c.h.bf16 %v4719_v24  ;;  %v5005_v47 = vunpack.c.h.bf16 %v4964_v59  ;;  %v4751_v51 = vunpack.c.l.bf16 %v4719_v24  ;;  %v5004_v20 = vunpack.c.l.bf16 %v4964_v59  ;;  %v4958_v53 = vld [vmem:[#allocation12 + $0x10] sm:$0xff]  ;;  %v4957_v38 = vld [vmem:[#allocation12 + $0x8] sm:$0xff] }
 0xb25   : > { %4837 = vmatprep.subr.mxu0 %v4772_v55  ;;  %5070 = vmatprep.subr.mxu1 %v5013_v13  ;;  %v4814_v33 = vunpack.c.h.bf16 %v4750_v18  ;;  %v5003_v54 = vunpack.c.h.bf16 %v4963_v5  ;;  %v4813_v60 = vunpack.c.l.bf16 %v4750_v18  ;;  %v5002_v55 = vunpack.c.l.bf16 %v4963_v5  ;;  %v4956_v13 = vld [vmem:[#allocation12] sm:$0xff]  ;;  %v4741_v63 = vld [vmem:[#allocation9 + $0xb0] sm:$0xff] }
 0xb26   : > { %4838 = vmatpush1.msra.mxu0 %v4771_v4  ;;  %5071 = vmatpush1.msra.mxu1 %v5012_v32  ;;  %v4961_v4 = vld [vmem:[#allocation12 + $0x28] sm:$0xff]  ;;  %v4812_v10 = vunpack.c.h.bf16 %v4749_v1  ;;  %v5001_v2 = vunpack.c.h.bf16 %v4962_v30  ;;  %v5000_v41 = vunpack.c.l.bf16 %v4962_v30  ;;  %v4995_v21 = vunpack.c.h.bf16 %v4959_v44  ;;  %v4739_v5 = vld [vmem:[#allocation9 + $0xa0] sm:$0xff]  ;;  %v4738_v30 = vld [vmem:[#allocation9 + $0x98] sm:$0xff] }
 0xb27   : > { %4839 = vmatprep.subr.mxu0 %v4770_v12  ;;  %5072 = vmatprep.subr.mxu1 %v5011_v0  ;;  %v4811_v12 = vunpack.c.l.bf16 %v4749_v1  ;;  %v4999_v35 = vunpack.c.h.bf16 %v4961_v4  ;;  %v4805_v16 = vunpack.c.l.bf16 %v4746_v29  ;;  %v4993_v62 = vunpack.c.h.bf16 %v4958_v53  ;;  %v4987_v0 = vld [vmem:[#allocation12 + $0xf8] sm:$0xff]  ;;  %v4740_v59 = vld [vmem:[#allocation9 + $0xa8] sm:$0xff] }
 0xb28   : > { %4840 = vmatpush1.msra.mxu0 %v4769_v37  ;;  %5073 = vmatpush1.msra.mxu1 %v5010_v42  ;;  %v4747_v37 = vld [vmem:[#allocation9 + $0xe0] sm:$0xff]  ;;  %v4803_v26 = vunpack.c.l.bf16 %v4745_v9  ;;  %v4991_v48 = vunpack.c.h.bf16 %v4957_v38  ;;  %v4801_v32 = vunpack.c.l.bf16 %v4744_v8  ;;  %v4989_v49 = vunpack.c.h.bf16 %v4956_v13 }
 0xb29   : > { %4841 = vmatprep.subr.mxu0 %v4768_v46  ;;  %5074 = vmatprep.subr.mxu1 %v5009_v43  ;;  %v4960_v46 = vld [vmem:[#allocation12 + $0x20] sm:$0xff]  ;;  %v4808_v45 = vunpack.c.h.bf16 %v4747_v37  ;;  %v4799_v42 = vunpack.c.l.bf16 %v4743_v28  ;;  %v4986_v43 = vld [vmem:[#allocation12 + $0xf0] sm:$0xff]  ;;  %v5051_v24 = vunpack.c.h.bf16 %v4987_v0 }
 0xb2a   : > { %4842 = vmatpush1.msra.mxu0 %v4767_v3  ;;  %5075 = vmatpush1.msra.mxu1 %v5008_v34  ;;  %v4810_v3 = vunpack.c.h.bf16 %v4748_v61  ;;  %v4997_v56 = vunpack.c.h.bf16 %v4960_v46  ;;  %v4996_v17 = vunpack.c.l.bf16 %v4960_v46  ;;  %v4797_v34 = vunpack.c.l.bf16 %v4742_v14  ;;  %v4736_v46 = vld [vmem:[#allocation9 + $0x88] sm:$0xff] }
 0xb2b   : > { %4843 = vmatprep.subr.mxu0 %v4766_v39  ;;  %5076 = vmatprep.subr.mxu1 %v5007_v57  ;;  %v4809_v39 = vunpack.c.l.bf16 %v4748_v61  ;;  %v4985_v57 = vld [vmem:[#allocation12 + $0xe8] sm:$0xff]  ;;  %v5049_v18 = vunpack.c.h.bf16 %v4986_v43 }
 0xb2c   : > { %4844 = vmatpush1.msra.mxu0 %v4765_v25  ;;  %5077 = vmatpush1.msra.mxu1 %v5006_v36  ;;  %v4998_v25 = vunpack.c.l.bf16 %v4961_v4  ;;  %v4795_v36 = vunpack.c.l.bf16 %v4741_v63  ;;  %v5047_v1 = vunpack.c.h.bf16 %v4985_v57  ;;  %v4737_v4 = vld [vmem:[#allocation9 + $0x90] sm:$0xff] }
 0xb2d   : > { %4845 = vmatprep.subr.mxu0 %v4764_v58  ;;  %5078 = vmatprep.subr.mxu1 %v5005_v47  ;;  %v4807_v58 = vunpack.c.l.bf16 %v4747_v37  ;;  %v4984_v47 = vld [vmem:[#allocation12 + $0xe0] sm:$0xff] }
 0xb2e   : > { %4846 = vmatpush1.msra.mxu0 %v4763_v11  ;;  %5079 = vmatpush1.msra.mxu1 %v5004_v20  ;;  %v4806_v11 = vunpack.c.h.bf16 %v4746_v29  ;;  %v4793_v20 = vunpack.c.l.bf16 %v4740_v59  ;;  %v5045_v61 = vunpack.c.h.bf16 %v4984_v47  ;;  %v4787_v29 = vunpack.c.l.bf16 %v4737_v4 }
 0xb2f   : > { %4847 = vmatprep.subr.mxu0 %v4762_v7  ;;  %5080 = vmatprep.subr.mxu1 %v5003_v54  ;;  %v4994_v7 = vunpack.c.l.bf16 %v4959_v44  ;;  %v4983_v54 = vld [vmem:[#allocation12 + $0xd8] sm:$0xff] }
 0xb30   : > { %4848 = vmatpush1.msra.mxu0 %v4761_v6  ;;  %5081 = vmatpush1.msra.mxu1 %v5002_v55  ;;  %v4804_v6 = vunpack.c.h.bf16 %v4745_v9  ;;  %v4791_v55 = vunpack.c.l.bf16 %v4739_v5  ;;  %v5043_v37 = vunpack.c.h.bf16 %v4983_v54 }
 0xb31   : > { %4849 = vmatprep.subr.mxu0 %v4760_v22  ;;  %5082 = vmatprep.subr.mxu1 %v5001_v2  ;;  %v4992_v22 = vunpack.c.l.bf16 %v4958_v53  ;;  %v4982_v2 = vld [vmem:[#allocation12 + $0xd0] sm:$0xff]  ;;  %v4706_v53 = vld [vmem:[#allocation2 + $0x18] sm:$0xff] }
 0xb32   : > { %4850 = vmatpush1.msra.mxu0 %v4759_v40  ;;  %5083 = vmatpush1.msra.mxu1 %v5000_v41  ;;  %v4802_v40 = vunpack.c.h.bf16 %v4744_v8  ;;  %v4789_v41 = vunpack.c.l.bf16 %v4738_v30  ;;  %v5040_v44 = vunpack.c.l.bf16 %v4982_v2  ;;  %v4710_v8 = vld [vmem:[#allocation2 + $0x48] sm:$0xff] }
 0xb33   : > { %4851 = vmatprep.subr.mxu0 %v4758_v15  ;;  %5084 = vmatprep.subr.mxu1 %v4999_v35  ;;  %v4990_v15 = vunpack.c.l.bf16 %v4957_v38  ;;  %v4788_v35 = vunpack.c.h.bf16 %v4737_v4  ;;  %v4712_v38 = vld [vmem:[#allocation2 + $0x20] sm:$0xff] }
 0xb34   : > { %4852 = vmatpush1.msra.mxu0 %v4757_v19  ;;  %5085 = vmatpush1.msra.mxu1 %v4998_v25  ;;  %v4800_v19 = vunpack.c.h.bf16 %v4743_v28  ;;  %v4735_v25 = vld [vmem:[#allocation9 + $0x80] sm:$0xff]  ;;  %v10213_v4 = vld [vmem:[#allocation15 + $0x70] sm:$0xff]  }
 0xb35   : > { %4853 = vmatprep.subr.mxu0 %v4756_v52  ;;  %5086 = vmatprep.subr.mxu1 %v4997_v56  ;;  %v4988_v52 = vunpack.c.l.bf16 %v4956_v13  ;;  %v4785_v56 = vunpack.c.l.bf16 %v4736_v46  ;;  %v4783_v9 = vunpack.c.l.bf16 %v4735_v25  ;;  %v4716_v28 = vld [vmem:[#allocation2 + $0x70] sm:$0xff]  ;;  %v4718_v13 = vld [vmem:[#allocation2 + $0x28] sm:$0xff] }
 0xb36   : > { %4854 = vmatpush1.msra.mxu0 %v4755_v23  ;;  %5087 = vmatpush1.msra.mxu1 %v4996_v17  ;;  %v4798_v23 = vunpack.c.h.bf16 %v4742_v14  ;;  %v4703_v17 = vld [vmem:[#allocation2 + $0x30] sm:$0xff] }
 0xb37   : > { %4855 = vmatprep.subr.mxu0 %v4754_v27  ;;  %5088 = vmatprep.subr.mxu1 %v4995_v21  ;;  %v5050_v27 = vunpack.c.l.bf16 %v4987_v0  ;;  %v4708_v21 = vld [vmem:[#allocation2 + $0x68] sm:$0xff] }
 0xb38   : > { %4856 = vmatpush1.msra.mxu0 %v4753_v31  ;;  %5089 = vmatpush1.msra.mxu1 %v4994_v7  ;;  %v4796_v31 = vunpack.c.h.bf16 %v4741_v63  ;;  %v4709_v7 = vld [vmem:[#allocation2 + $0x8] sm:$0xff] }
 0xb39   : > { %4857 = vmatprep.subr.mxu0 %v4752_v50  ;;  %5090 = vmatprep.subr.mxu1 %v4993_v62  ;;  %v5048_v50 = vunpack.c.l.bf16 %v4986_v43  ;;  %v4714_v62 = vld [vmem:[#allocation2 + $0x38] sm:$0xff] }
 0xb3a   : > { %4858 = vmatpush1.msra.mxu0 %v4751_v51  ;;  %5091 = vmatpush1.msra.mxu1 %v4992_v22  ;;  %v4794_v51 = vunpack.c.h.bf16 %v4740_v59  ;;  %v4715_v22 = vld [vmem:[#allocation2 + $0x60] sm:$0xff] }
 0xb3b   : > { %4859 = vmatprep.subr.mxu0 %v4814_v33  ;;  %5092 = vmatprep.subr.mxu1 %v4991_v48  ;;  %v5046_v33 = vunpack.c.l.bf16 %v4985_v57  ;;  %v4981_v48 = vld [vmem:[#allocation12 + $0xc8] sm:$0xff] }
 0xb3c   : > { %4860 = vmatpush2.msra.mxu0 %v4813_v60  ;;  %5093 = vmatpush1.msra.mxu1 %v4990_v15  ;;  %v4792_v60 = vunpack.c.h.bf16 %v4739_v5  ;;  %v5038_v14 = vunpack.c.l.bf16 %v4981_v48  ;;  %v4980_v15 = vld [vmem:[#allocation12 + $0xc0] sm:$0xff] }
 0xb3d   : > { %4861 = vmatprep.subr.mxu0 %v4812_v10  ;;  %5094 = vmatprep.subr.mxu1 %v4989_v49  ;;  %v5044_v10 = vunpack.c.l.bf16 %v4984_v47  ;;  %v5037_v0 = vunpack.c.h.bf16 %v4980_v15  ;;  %v4979_v49 = vld [vmem:[#allocation12 + $0xb8] sm:$0xff] }
 0xb3e   : > { %4862 = vmatpush2.msra.mxu0 %v4811_v12  ;;  %5095 = vmatpush1.msra.mxu1 %v4988_v52  ;;  %v4790_v12 = vunpack.c.h.bf16 %v4738_v30  ;;  %v5034_v63 = vunpack.c.l.bf16 %v4979_v49  ;;  %v4978_v52 = vld [vmem:[#allocation12 + $0xb0] sm:$0xff] }
 0xb3f   : > { %4863 = vmatprep.subr.mxu0 %v4810_v3  ;;  %5096 = vmatprep.subr.mxu1 %v5051_v24  ;;  %v5042_v3 = vunpack.c.l.bf16 %v4983_v54  ;;  %v5033_v43 = vunpack.c.h.bf16 %v4978_v52  ;;  %v4977_v24 = vld [vmem:[#allocation12 + $0xa8] sm:$0xff] }
 0xb40   : > { %4864 = vmatpush2.msra.mxu0 %v4809_v39  ;;  %5097 = vmatpush2.msra.mxu1 %v5050_v27  ;;  %v5041_v39 = vunpack.c.h.bf16 %v4982_v2  ;;  %v5030_v59 = vunpack.c.l.bf16 %v4977_v24  ;;  %v4976_v27 = vld [vmem:[#allocation12 + $0xa0] sm:$0xff] }
 0xb41   : > { %4865 = vmatprep.subr.mxu0 %v4808_v45  ;;  %5098 = vmatprep.subr.mxu1 %v5049_v18  ;;  %v4786_v45 = vunpack.c.h.bf16 %v4736_v46  ;;  %v5029_v57 = vunpack.c.h.bf16 %v4976_v27  ;;  %v4975_v18 = vld [vmem:[#allocation12 + $0x98] sm:$0xff]  ;;  %v5667_v46 = vunpack.c.h.bf16 %v10213_v4 }
 0xb42   : > { %4866 = vmatpush2.msra.mxu0 %v4807_v58  ;;  %5099 = vmatpush2.msra.mxu1 %v5048_v50  ;;  %v4784_v58 = vunpack.c.h.bf16 %v4735_v25  ;;  %v5026_v5 = vunpack.c.l.bf16 %v4975_v18  ;;  %v4974_v50 = vld [vmem:[#allocation12 + $0x90] sm:$0xff] }
 0xb43   : > { %4867 = vmatprep.subr.mxu0 %v4806_v11  ;;  %5100 = vmatprep.subr.mxu1 %v5047_v1  ;;  %v4705_v11 = vld [vmem:[#allocation2 + $0x58] sm:$0xff]  ;;  %v5025_v47 = vunpack.c.h.bf16 %v4974_v50 }
 0xb44   : > { %4868 = vmatpush2.msra.mxu0 %v4805_v16  ;;  %5101 = vmatpush2.msra.mxu1 %v5046_v33  ;;  %v4707_v16 = vld [vmem:[#allocation2 + $0x50] sm:$0xff]  ;;  %v4973_v1 = vld [vmem:[#allocation12 + $0x88] sm:$0xff] }
 0xb45   : > { %4869 = vmatprep.subr.mxu0 %v4804_v6  ;;  %5102 = vmatprep.subr.mxu1 %v5045_v61  ;;  %v4711_v6 = vld [vmem:[#allocation2 + $0x40] sm:$0xff]  ;;  %v5022_v30 = vunpack.c.l.bf16 %v4973_v1  ;;  %v4972_v33 = vld [vmem:[#allocation12 + $0x80] sm:$0xff] }
 0xb46   : > { %4870 = vmatpush2.msra.mxu0 %v4803_v26  ;;  %5103 = vmatpush2.msra.mxu1 %v5044_v10  ;;  %v4713_v26 = vld [vmem:[#allocation2 + $0x10] sm:$0xff]  ;;  %v5021_v54 = vunpack.c.h.bf16 %v4972_v33 }
 0xb47   : > { %4871 = vmatprep.subr.mxu0 %v4802_v40  ;;  %5104 = vmatprep.subr.mxu1 %v5043_v37  ;;  %v4717_v40 = vld [vmem:[#allocation2 + $0x78] sm:$0xff]  ;;  %v10209_v61 = vld [vmem:[#allocation15 + $0x78] sm:$0xff]   ;;  %v10218_v37 = vld [vmem:[#allocation15 + $0x30] sm:$0xff]  }
 0xb48   : > { %4872 = vmatpush2.msra.mxu0 %v4801_v32  ;;  %5105 = vmatpush2.msra.mxu1 %v5042_v3  ;;  %v5039_v32 = vunpack.c.h.bf16 %v4981_v48  ;;  %v5671_v10 = vunpack.c.h.bf16 %v10209_v61  ;;  %v5635_v3 = vunpack.c.h.bf16 %v10218_v37  ;;  %v5634_v25 = vunpack.c.l.bf16 %v10218_v37 }
 0xb49   : > { %4873 = vmatprep.subr.mxu0 %v4800_v19  ;;  %5106 = vmatprep.subr.mxu1 %v5041_v39  ;;  %v5036_v19 = vunpack.c.l.bf16 %v4980_v15  ;;  %v5666_v39 = vunpack.c.l.bf16 %v10213_v4 }
 0xb4a   : > { %4874 = vmatpush2.msra.mxu0 %v4799_v42  ;;  %5107 = vmatpush2.msra.mxu1 %v5040_v44  ;;  %v5035_v42 = vunpack.c.h.bf16 %v4979_v49 }
 0xb4b   : > { %4875 = vmatprep.subr.mxu0 %v4798_v23  ;;  %5108 = vmatprep.subr.mxu1 %v5039_v32  ;;  %v5032_v23 = vunpack.c.l.bf16 %v4978_v52 }
 0xb4c   : > { %4876 = vmatpush2.msra.mxu0 %v4797_v34  ;;  %5109 = vmatpush2.msra.mxu1 %v5038_v14  ;;  %v5031_v34 = vunpack.c.h.bf16 %v4977_v24 }
 0xb4d   : > { %4877 = vmatprep.subr.mxu0 %v4796_v31  ;;  %5110 = vmatprep.subr.mxu1 %v5037_v0  ;;  %v5028_v31 = vunpack.c.l.bf16 %v4976_v27 }
 0xb4e   : > { %4878 = vmatpush2.msra.mxu0 %v4795_v36  ;;  %5111 = vmatpush2.msra.mxu1 %v5036_v19  ;;  %v5027_v36 = vunpack.c.h.bf16 %v4975_v18 }
 0xb4f   : > { %4879 = vmatprep.subr.mxu0 %v4794_v51  ;;  %5112 = vmatprep.subr.mxu1 %v5035_v42  ;;  %v5024_v51 = vunpack.c.l.bf16 %v4974_v50 }
 0xb50   : > { %4880 = vmatpush2.msra.mxu0 %v4793_v20  ;;  %5113 = vmatpush2.msra.mxu1 %v5034_v63  ;;  %v5023_v20 = vunpack.c.h.bf16 %v4973_v1 }
 0xb51   : > { %4881 = vmatprep.subr.mxu0 %v4792_v60  ;;  %5114 = vmatprep.subr.mxu1 %v5033_v43  ;;  %v5020_v60 = vunpack.c.l.bf16 %v4972_v33 }
 0xb52   : > { %4882 = vmatpush2.msra.mxu0 %v4791_v55  ;;  %5115 = vmatpush2.msra.mxu1 %v5032_v23  ;;  %v10211_v55 = vld [vmem:[#allocation15 + $0x38] sm:$0xff]  }
 0xb53   : > { %4883 = vmatprep.subr.mxu0 %v4790_v12  ;;  %5116 = vmatprep.subr.mxu1 %v5031_v34  ;;  %v5639_v2 = vunpack.c.h.bf16 %v10211_v55  ;;  %v5670_v12 = vunpack.c.l.bf16 %v10209_v61 }
 0xb54   : > { %4884 = vmatpush2.msra.mxu0 %v4789_v41  ;;  %5117 = vmatpush2.msra.mxu1 %v5030_v59  ;;  %v5638_v41 = vunpack.c.l.bf16 %v10211_v55 }
 0xb55   : > { %4885 = vmatprep.subr.mxu0 %v4788_v35  ;;  %5118 = vmatprep.subr.mxu1 %v5029_v57  ;;  %v10225_v35 = vld [vmem:[#allocation15 + $0x68] sm:$0xff]  }
 0xb56   : > { %4886 = vmatpush2.msra.mxu0 %v4787_v29  ;;  %5119 = vmatpush2.msra.mxu1 %v5028_v31  ;;  %v10230_v29 = vld [vmem:[#allocation15 + $0x28] sm:$0xff]   ;;  %v5663_v44 = vunpack.c.h.bf16 %v10225_v35 }
 0xb57   : > { %4887 = vmatprep.subr.mxu0 %v4786_v45  ;;  %5120 = vmatprep.subr.mxu1 %v5027_v36  ;;  %v5631_v45 = vunpack.c.h.bf16 %v10230_v29 }
 0xb58   : > { %4888 = vmatpush2.msra.mxu0 %v4785_v56  ;;  %5121 = vmatpush2.msra.mxu1 %v5026_v5  ;;  %v5662_v56 = vunpack.c.l.bf16 %v10225_v35 }
 0xb59   : > { %4889 = vmatprep.subr.mxu0 %v4784_v58  ;;  %5122 = vmatprep.subr.mxu1 %v5025_v47  ;;  %v5630_v58 = vunpack.c.l.bf16 %v10230_v29 }
 0xb5a   : > { %4890 = vmatpush2.msra.mxu0 %v4783_v9  ;;  %5123 = vmatpush2.msra.mxu1 %v5024_v51  ;;  %v4815_v9 = vld [vmem:[#allocation11] sm:$0x3] }
 0xb5b   : > { %4892 = vmatmul.mubr.f32.vlgmr.msra.gmra.mxu0 %v4703_v17  ;;  %5124 = vmatprep.subr.mxu1 %v5023_v20  ;;  %v12857_v17 = vld [vmem:[#allocation335_spill] sm:$0xff] }
 0xb5c   : > { %4897 = vmatprep.mubr.f32.mxu0 %v4706_v53  ;;  %5125 = vmatpush2.msra.mxu1 %v5022_v30  ;;  %v10256_v53 = vrot.slane %v4815_v9, %v12857_v17 }
 0xb5d   : > { %5126 = vmatprep.subr.mxu1 %v5021_v54  ;;  %5687 = vmatprep.subr.mxu0 %v5671_v10 }
 0xb5e   : > { %5127 = vmatpush2.msra.mxu1 %v5020_v60  ;;  %5688 = vmatpush3.msra.mxu0 %v5639_v2 }
 0xb5f   : > { %4898 = vmatmul.mubr.f32.gmra.mxu0 %v4705_v11  ;;  %5743 = vmatprep.subr.mxu1 %v5671_v10  ;;  %v12858_v11 = vld [vmem:[#allocation337_spill] sm:$0xff] }
 0xb60   : > { %4903 = vmatprep.mubr.f32.mxu0 %v4708_v21  ;;  %5689 = vmatprep.subr.mxu0 %v5670_v12  ;;  %v10259_v21 = vrot.slane %v4815_v9, %v12858_v11 }
 0xb61   : > { %5690 = vmatpush3.msra.mxu0 %v5638_v41 }
 0xb62   : > { %5691 = vmatprep.subr.mxu0 %v5667_v46 }
 0xb63   : > { %4904 = vmatmul.mubr.f32.gmra.mxu0 %v4707_v16 }
 0xb64   : > { %4909 = vmatprep.mubr.f32.mxu0 %v4710_v8  ;;  %5692 = vmatpush3.msra.mxu0 %v5635_v3 }
 0xb65   : > { %5693 = vmatprep.subr.mxu0 %v5666_v39 }
 0xb66   : > { %5694 = vmatpush3.msra.mxu0 %v5634_v25 }
 0xb67   : > { %4910 = vmatmul.mubr.f32.gmra.mxu0 %v4709_v7  ;;  %5695 = vmatprep.subr.mxu0 %v5663_v44 }
 0xb68   : > { %4915 = vmatprep.mubr.f32.mxu0 %v4712_v38  ;;  %5696 = vmatpush3.msra.mxu0 %v5631_v45 }
 0xb69   : > { %5697 = vmatprep.subr.mxu0 %v5662_v56 }
 0xb6a   : > { %5698 = vmatpush3.msra.mxu0 %v5630_v58 }
 0xb6b   : > { %4916 = vmatmul.mubr.f32.gmra.mxu0 %v4711_v6 }
 0xb6c   : > { %4921 = vmatprep.mubr.f32.mxu0 %v4714_v62 }
 0xb6f   : > { %4922 = vmatmul.mubr.f32.gmra.mxu0 %v4713_v26 }
 0xb70   : > { %4927 = vmatprep.mubr.f32.mxu0 %v4716_v28 }
 0xb73   : > { %4928 = vmatmul.mubr.f32.gmra.mxu0 %v4715_v22 }
 0xb74   : > { %4933 = vmatprep.mubr.f32.mxu0 %v4718_v13 }
 0xb77   : > { %4934 = vmatmul.mubr.f32.gmra.mxu0 %v4717_v40 }
 0xc1b   : > { %v4893_v16 = vpop.f32.mrf.mxu0 }
 0xc1c   : > { %v4894_v8 = vadd.f32 %v4893_v16, %v10256_v53  ;;  %v5673_v16 = vld [vmem:[#allocation15 + $0x10] sm:$0xff]  }
 0xc1d   : > { %v4895_v7 = vpop.f32.mrf.mxu0 }
 0xc1e   : > { %v4896_v38 = vadd.f32 %v4895_v7, %v10259_v21 }
 0xc1f   : > { %v4899_v6 = vpop.f32.mrf.mxu0 }
 0xc20   : > { %6148 = vtanh.f32 %v4896_v38  ;;  %v4900_v62 = vadd.f32 %v4899_v6, %v10256_v53  ;;  %v5618_v38 = vunpack.c.l.bf16 %v5673_v16  ;;  %v5680_v6 = vld [vmem:[#allocation15 + $0x48] sm:$0xff]  }
 0xc21   : > { %6150 = vtanh.f32 %v4894_v8  ;;  %v4901_v26 = vpop.f32.mrf.mxu0  ;;  %v5619_v8 = vunpack.c.h.bf16 %v5673_v16 }
 0xc22   : > { %v4902_v28 = vadd.f32 %v4901_v26, %v10259_v21  ;;  %v5672_v26 = vld [vmem:[#allocation15 + $0x8] sm:$0xff]  }
 0xc23   : > { %v4905_v22 = vpop.f32.mrf.mxu0 }
 0xc24   : > { %6152 = vtanh.f32 %v4902_v28  ;;  %v4906_v13 = vadd.f32 %v4905_v22, %v10256_v53  ;;  %v5615_v28 = vunpack.c.h.bf16 %v5672_v26  ;;  %v5646_v22 = vunpack.c.l.bf16 %v5680_v6 }
 0xc25   : > { %6154 = vtanh.f32 %v4900_v62  ;;  %v4907_v40 = vpop.f32.mrf.mxu0  ;;  %v5647_v62 = vunpack.c.h.bf16 %v5680_v6  ;;  %v5602_v6 = vld [vmem:[#allocation17] ss:$0 sm:$0xff] }
 0xc26   : > { %v4908_v48 = vadd.f32 %v4907_v40, %v10259_v21  ;;  %v5679_v40 = vld [vmem:[#allocation15 + $0x40] sm:$0xff]  }
 0xc27   : > { %v4911_v32 = vpop.f32.mrf.mxu0 }
 0xc28   : > { %6156 = vtanh.f32 %v4908_v48  ;;  %v4912_v14 = vadd.f32 %v4911_v32, %v10256_v53  ;;  %v5643_v48 = vunpack.c.h.bf16 %v5679_v40  ;;  %v5609_v32 = vld [vmem:[#allocation15] sm:$0xff]  }
 0xc29   : > { %6158 = vtanh.f32 %v4906_v13  ;;  %v4913_v15 = vpop.f32.mrf.mxu0  ;;  %v5614_v13 = vunpack.c.l.bf16 %v5672_v26 }
 0xc2a   : > { %v4914_v0 = vadd.f32 %v4913_v15, %v10259_v21  ;;  %v5642_v15 = vunpack.c.l.bf16 %v5679_v40 }
 0xc2b   : > { %v4917_v19 = vpop.f32.mrf.mxu0 }
 0xc2c   : > { %6160 = vtanh.f32 %v4914_v0  ;;  %v4918_v42 = vadd.f32 %v4917_v19, %v10256_v53  ;;  %v5610_v0 = vunpack.c.l.bf16 %v5609_v32  ;;  %v5052_v19 = vld [vmem:[#allocation14] sm:$0x3] }
 0xc2d   : > { %v6149_v49 = vpop.eup %6148  ;;  %6162 = vtanh.f32 %v4912_v14  ;;  %v4919_v63 = vpop.f32.mrf.mxu0  ;;  %v5611_v14 = vunpack.c.h.bf16 %v5609_v32 }
 0xc2e   : > { %v6151_v52 = vpop.eup %6150  ;;  %v4920_v43 = vadd.f32 %v4919_v63, %v10259_v21  ;;  %5128 = vmatprep.mubr.f32.mxu1 %v6149_v49  ;;  %v5057_v49 = vrot.slane %v5052_v19, %v12857_v17 }
 0xc2f   : > { %v4923_v23 = vpop.f32.mrf.mxu0  ;;  %5129 = vmatmul.mubr.f32.vlgmr.msra.gmra.mxu1 %v6151_v52 }
 0xc30   : > { %6164 = vtanh.f32 %v4920_v43  ;;  %5759 = vmatpush3.msra.mxu1 %v5639_v2  ;;  %v4924_v34 = vadd.f32 %v4923_v23, %v10256_v53 }
 0xc31   : > { %v6153_v24 = vpop.eup %6152  ;;  %6166 = vtanh.f32 %v4918_v42  ;;  %v4925_v59 = vpop.f32.mrf.mxu0  ;;  %5744 = vmatprep.subr.mxu1 %v5670_v12  ;;  %v5061_v42 = vrot.slane %v5052_v19, %v12858_v11 }
 0xc32   : > { %v6155_v27 = vpop.eup %6154  ;;  %v4926_v57 = vadd.f32 %v4925_v59, %v10259_v21  ;;  %5134 = vmatprep.mubr.f32.mxu1 %v6153_v24  ;;  %5760 = vmatpush3.msra.mxu1 %v5638_v41  ;;  %v5683_v41 = vld [vmem:[#allocation15 + $0x60] sm:$0xff]  }
 0xc33   : > { %v4929_v31 = vpop.f32.mrf.mxu0  ;;  %5135 = vmatmul.mubr.f32.gmra.mxu1 %v6155_v27  ;;  %5745 = vmatprep.subr.mxu1 %v5667_v46  ;;  %v5659_v46 = vunpack.c.h.bf16 %v5683_v41 }
 0xc34   : > { %6168 = vtanh.f32 %v4926_v57  ;;  %5761 = vmatpush3.msra.mxu1 %v5635_v3  ;;  %v4930_v36 = vadd.f32 %v4929_v31, %v10256_v53  ;;  %v5675_v3 = vld [vmem:[#allocation15 + $0x20] sm:$0xff]  }
 0xc35   : > { %v6157_v18 = vpop.eup %6156  ;;  %6170 = vtanh.f32 %v4924_v34  ;;  %v4931_v5 = vpop.f32.mrf.mxu0  ;;  %5746 = vmatprep.subr.mxu1 %v5666_v39  ;;  %v5627_v35 = vunpack.c.h.bf16 %v5675_v3  ;;  %5699 = vmatprep.subr.mxu0 %v5659_v46  ;;  %v5658_v39 = vunpack.c.l.bf16 %v5683_v41  ;;  %v5626_v29 = vunpack.c.l.bf16 %v5675_v3 }
 0xc36   : > { %v6159_v50 = vpop.eup %6158  ;;  %v4932_v47 = vadd.f32 %v4931_v5, %v10259_v21  ;;  %5140 = vmatprep.mubr.f32.mxu1 %v6157_v18  ;;  %5762 = vmatpush3.msra.mxu1 %v5634_v25  ;;  %v5682_v25 = vld [vmem:[#allocation15 + $0x58] sm:$0xff]  }
 0xc37   : > { %v4935_v51 = vpop.f32.mrf.mxu0  ;;  %5141 = vmatmul.mubr.f32.gmra.mxu1 %v6159_v50  ;;  %5747 = vmatprep.subr.mxu1 %v5663_v44  ;;  %v5655_v44 = vunpack.c.h.bf16 %v5682_v25 }
 0xc38   : > { %6172 = vtanh.f32 %v4932_v47  ;;  %5763 = vmatpush3.msra.mxu1 %v5631_v45  ;;  %v4936_v20 = vadd.f32 %v4935_v51, %v10256_v53  ;;  %5700 = vmatpush3.msra.mxu0 %v5627_v35  ;;  %v5674_v45 = vld [vmem:[#allocation15 + $0x18] sm:$0xff]   ;;  %v5681_v53 = vld [vmem:[#allocation15 + $0x50] sm:$0xff]  }
 0xc39   : > { %v6161_v1 = vpop.eup %6160  ;;  %6174 = vtanh.f32 %v4930_v36  ;;  %v4937_v30 = vpop.f32.mrf.mxu0  ;;  %5748 = vmatprep.subr.mxu1 %v5662_v56  ;;  %5701 = vmatprep.subr.mxu0 %v5658_v39  ;;  %v5623_v56 = vunpack.c.h.bf16 %v5674_v45  ;;  %v5622_v9 = vunpack.c.l.bf16 %v5674_v45  ;;  %v5650_v7 = vunpack.c.l.bf16 %v5681_v53 }
 0xc3a   : > { %v6163_v33 = vpop.eup %6162  ;;  %v4938_v54 = vadd.f32 %v4937_v30, %v10259_v21  ;;  %5146 = vmatprep.mubr.f32.mxu1 %v6161_v1  ;;  %5764 = vmatpush3.msra.mxu1 %v5630_v58  ;;  %v5654_v58 = vunpack.c.l.bf16 %v5682_v25  ;;  %v5651_v21 = vunpack.c.h.bf16 %v5681_v53 }
 0xc3b   : > { %5147 = vmatmul.mubr.f32.gmra.mxu1 %v6163_v33  ;;  %5749 = vmatprep.subr.mxu1 %v5659_v46 }
 0xc3c   : > { %6176 = vtanh.f32 %v4938_v54  ;;  %5765 = vmatpush3.msra.mxu1 %v5627_v35  ;;  %5702 = vmatpush3.msra.mxu0 %v5626_v29 }
 0xc3d   : > { %v6165_v60 = vpop.eup %6164  ;;  %6178 = vtanh.f32 %v4936_v20  ;;  %5750 = vmatprep.subr.mxu1 %v5658_v39  ;;  %5703 = vmatprep.subr.mxu0 %v5655_v44 }
 0xc3e   : > { %v6167_v61 = vpop.eup %6166  ;;  %5152 = vmatprep.mubr.f32.mxu1 %v6165_v60  ;;  %5766 = vmatpush3.msra.mxu1 %v5626_v29 }
 0xc3f   : > { %5153 = vmatmul.mubr.f32.gmra.mxu1 %v6167_v61  ;;  %5751 = vmatprep.subr.mxu1 %v5655_v44 }
 0xc40   : > { %5704 = vmatpush3.msra.mxu0 %v5623_v56  ;;  %5767 = vmatpush3.msra.mxu1 %v5623_v56 }
 0xc41   : > { %v6169_v55 = vpop.eup %6168  ;;  %5705 = vmatprep.subr.mxu0 %v5654_v58  ;;  %5752 = vmatprep.subr.mxu1 %v5654_v58 }
 0xc42   : > { %v6171_v4 = vpop.eup %6170  ;;  %5158 = vmatprep.mubr.f32.mxu1 %v6169_v55  ;;  %5706 = vmatpush3.msra.mxu0 %v5622_v9 }
 0xc43   : > { %5159 = vmatmul.mubr.f32.gmra.mxu1 %v6171_v4  ;;  %5707 = vmatprep.subr.mxu0 %v5651_v21 }
 0xc44   : > { %5768 = vmatpush3.msra.mxu1 %v5622_v9  ;;  %5708 = vmatpush3.msra.mxu0 %v5619_v8 }
 0xc45   : > { %v6173_v10 = vpop.eup %6172  ;;  %5753 = vmatprep.subr.mxu1 %v5651_v21  ;;  %5709 = vmatprep.subr.mxu0 %v5650_v7 }
 0xc46   : > { %v6175_v2 = vpop.eup %6174  ;;  %5164 = vmatprep.mubr.f32.mxu1 %v6173_v10  ;;  %5769 = vmatpush3.msra.mxu1 %v5619_v8 }
 0xc47   : > { %5165 = vmatmul.mubr.f32.gmra.mxu1 %v6175_v2  ;;  %5754 = vmatprep.subr.mxu1 %v5650_v7 }
 0xc48   : > { %5710 = vmatpush3.msra.mxu0 %v5618_v38  ;;  %5770 = vmatpush3.msra.mxu1 %v5618_v38 }
 0xc49   : > { %v6177_v12 = vpop.eup %6176  ;;  %5711 = vmatprep.subr.mxu0 %v5647_v62  ;;  %5755 = vmatprep.subr.mxu1 %v5647_v62 }
 0xc4a   : > { %v6179_v37 = vpop.eup %6178  ;;  %5170 = vmatprep.mubr.f32.mxu1 %v6177_v12  ;;  %5712 = vmatpush3.msra.mxu0 %v5615_v28 }
 0xc4b   : > { %5171 = vmatmul.mubr.f32.gmra.mxu1 %v6179_v37  ;;  %5713 = vmatprep.subr.mxu0 %v5646_v22 }
 0xc4c   : > { %5771 = vmatpush3.msra.mxu1 %v5615_v28  ;;  %5714 = vmatpush3.msra.mxu0 %v5614_v13 }
 0xc4d   : > { %5756 = vmatprep.subr.mxu1 %v5646_v22  ;;  %5715 = vmatprep.subr.mxu0 %v5643_v48 }
 0xc4e   : > { %5772 = vmatpush3.msra.mxu1 %v5614_v13  ;;  %5716 = vmatpush3.msra.mxu0 %v5611_v14 }
 0xc4f   : > { %5757 = vmatprep.subr.mxu1 %v5643_v48  ;;  %5717 = vmatprep.subr.mxu0 %v5642_v15 }
 0xc50   : > { %5773 = vmatpush3.msra.mxu1 %v5611_v14  ;;  %5718 = vmatpush3.msra.mxu0 %v5610_v0 }
 0xc51   : > { %5758 = vmatprep.subr.mxu1 %v5642_v15 }
 0xc52   : > { %5774 = vmatpush3.msra.mxu1 %v5610_v0 }
 0xcef   : > { %v5130_v63 = vpop.f32.mrf.mxu1 }
 0xcf0   : > { %v5131_v52 = vadd.f32 %v5130_v63, %v5057_v49 }
 0xcf1   : > { %v5132_v43 = vpop.f32.mrf.mxu1 }
 0xcf2   : > { %v5133_v23 = vadd.f32 %v5132_v43, %v5061_v42 }
 0xcf3   : > { %v5136_v24 = vpop.f32.mrf.mxu1 }
 0xcf4   : > { %6180 = vtanh.f32 %v5133_v23  ;;  %v5137_v34 = vadd.f32 %v5136_v24, %v5057_v49 }
 0xcf5   : > { %6182 = vtanh.f32 %v5131_v52  ;;  %v5138_v59 = vpop.f32.mrf.mxu1 }
 0xcf6   : > { %v5139_v27 = vadd.f32 %v5138_v59, %v5061_v42 }
 0xcf7   : > { %v5142_v57 = vpop.f32.mrf.mxu1 }
 0xcf8   : > { %6184 = vtanh.f32 %v5139_v27  ;;  %v5143_v31 = vadd.f32 %v5142_v57, %v5057_v49 }
 0xcf9   : > { %6186 = vtanh.f32 %v5137_v34  ;;  %v5144_v18 = vpop.f32.mrf.mxu1 }
 0xcfa   : > { %v5145_v36 = vadd.f32 %v5144_v18, %v5061_v42 }
 0xcfb   : > { %v5148_v5 = vpop.f32.mrf.mxu1 }
 0xcfc   : > { %6188 = vtanh.f32 %v5145_v36  ;;  %v5149_v17 = vadd.f32 %v5148_v5, %v5057_v49 }
 0xcfd   : > { %6190 = vtanh.f32 %v5143_v31  ;;  %v5150_v11 = vpop.f32.mrf.mxu1 }
 0xcfe   : > { %v5151_v50 = vadd.f32 %v5150_v11, %v5061_v42 }
 0xcff   : > { %v5154_v47 = vpop.f32.mrf.mxu1 }
 0xd00   : > { %6192 = vtanh.f32 %v5151_v50  ;;  %v5155_v1 = vadd.f32 %v5154_v47, %v5057_v49 }
 0xd01   : > { %v6181_v51 = vpop.eup %6180  ;;  %6194 = vtanh.f32 %v5149_v17  ;;  %v5156_v20 = vpop.f32.mrf.mxu1 }
 0xd02   : > { %v6183_v30 = vpop.eup %6182  ;;  %v5157_v33 = vadd.f32 %v5156_v20, %v5061_v42  ;;  %5328 = vmatprep.mubr.f32.mxu0 %v6181_v51 }
 0xd03   : > { %v5160_v54 = vpop.f32.mrf.mxu1  ;;  %5329 = vmatmul.mubr.f32.vlgmr.msra.gmra.mxu0 %v6183_v30 }
 0xd04   : > { %6196 = vtanh.f32 %v5157_v33  ;;  %v5161_v61 = vadd.f32 %v5160_v54, %v5057_v49 }
 0xd05   : > { %v6185_v60 = vpop.eup %6184  ;;  %6198 = vtanh.f32 %v5155_v1  ;;  %v5162_v55 = vpop.f32.mrf.mxu1 }
 0xd06   : > { %v6187_v4 = vpop.eup %6186  ;;  %v5163_v10 = vadd.f32 %v5162_v55, %v5061_v42  ;;  %5333 = vmatprep.mubr.f32.mxu0 %v6185_v60 }
 0xd07   : > { %v5166_v2 = vpop.f32.mrf.mxu1  ;;  %5334 = vmatmul.mubr.f32.gmra.mxu0 %v6187_v4 }
 0xd08   : > { %6200 = vtanh.f32 %v5163_v10  ;;  %v5167_v37 = vadd.f32 %v5166_v2, %v5057_v49 }
 0xd09   : > { %v6189_v12 = vpop.eup %6188  ;;  %6202 = vtanh.f32 %v5161_v61  ;;  %v5168_v41 = vpop.f32.mrf.mxu1 }
 0xd0a   : > { %v6191_v46 = vpop.eup %6190  ;;  %v5169_v3 = vadd.f32 %v5168_v41, %v5061_v42  ;;  %5338 = vmatprep.mubr.f32.mxu0 %v6189_v12 }
 0xd0b   : > { %v5172_v35 = vpop.f32.mrf.mxu1  ;;  %5339 = vmatmul.mubr.f32.gmra.mxu0 %v6191_v46 }
 0xd0c   : > { %6204 = vtanh.f32 %v5169_v3  ;;  %v5173_v29 = vadd.f32 %v5172_v35, %v5057_v49 }
 0xd0d   : > { %v6193_v39 = vpop.eup %6192  ;;  %6206 = vtanh.f32 %v5167_v37  ;;  %v5174_v25 = vpop.f32.mrf.mxu1 }
 0xd0e   : > { %v6195_v44 = vpop.eup %6194  ;;  %v5175_v45 = vadd.f32 %v5174_v25, %v5061_v42  ;;  %5343 = vmatprep.mubr.f32.mxu0 %v6193_v39 }
 0xd0f   : > { %5344 = vmatmul.mubr.f32.gmra.mxu0 %v6195_v44 }
 0xd10   : > { %6208 = vtanh.f32 %v5175_v45 }
 0xd11   : > { %v6197_v56 = vpop.eup %6196  ;;  %6210 = vtanh.f32 %v5173_v29 }
 0xd12   : > { %v6199_v58 = vpop.eup %6198  ;;  %5348 = vmatprep.mubr.f32.mxu1 %v6197_v56 }
 0xd13   : > { %5349 = vmatmul.mubr.f32.vlgmr.msra.gmra.mxu1 %v6199_v58 }
 0xd15   : > { %v6201_v9 = vpop.eup %6200 }
 0xd16   : > { %v6203_v53 = vpop.eup %6202  ;;  %5353 = vmatprep.mubr.f32.mxu1 %v6201_v9 }
 0xd17   : > { %5354 = vmatmul.mubr.f32.gmra.mxu1 %v6203_v53 }
 0xd19   : > { %v6205_v21 = vpop.eup %6204 }
 0xd1a   : > { %v6207_v16 = vpop.eup %6206  ;;  %5358 = vmatprep.mubr.f32.mxu1 %v6205_v21 }
 0xd1b   : > { %5359 = vmatmul.mubr.f32.gmra.mxu1 %v6207_v16 }
 0xd1d   : > { %v6209_v8 = vpop.eup %6208 }
 0xd1e   : > { %v6211_v7 = vpop.eup %6210  ;;  %5363 = vmatprep.mubr.f32.mxu1 %v6209_v8 }
 0xd1f   : > { %5364 = vmatmul.mubr.f32.gmra.mxu1 %v6211_v7 }
 0xdc3   : > { %v5719_v38 = vpop.f32.mrf.mxu0 }
 0xdc5   : > { %v5720_v62 = vpop.f32.mrf.mxu0 }
 0xdc6   : > { %v5721_v26 = vadd.f32 %v5720_v62, %v5719_v38 }
 0xdc7   : > { %v5722_v28 = vpop.f32.mrf.mxu0 }
 0xdc8   : > { %v5331_v22 = vadd.f32 %v5721_v26, %v5602_v6 }
 0xdc9   : > { %v5723_v13 = vpop.f32.mrf.mxu0 }
 0xdca   : > { %6212 = vtanh.f32 %v5331_v22  ;;  %v5724_v40 = vadd.f32 %v5723_v13, %v5722_v28 }
 0xdcb   : > { %v5725_v48 = vpop.f32.mrf.mxu0 }
 0xdcc   : > { %v5336_v32 = vadd.f32 %v5724_v40, %v5602_v6 }
 0xdcd   : > { %v5726_v14 = vpop.f32.mrf.mxu0 }
 0xdce   : > { %6214 = vtanh.f32 %v5336_v32  ;;  %v5727_v15 = vadd.f32 %v5726_v14, %v5725_v48 }
 0xdcf   : > { %v5728_v0 = vpop.f32.mrf.mxu0 }
 0xdd0   : > { %v5341_v19 = vadd.f32 %v5727_v15, %v5602_v6 }
 0xdd1   : > { %v5729_v49 = vpop.f32.mrf.mxu0 }
 0xdd2   : > { %6216 = vtanh.f32 %v5341_v19  ;;  %v5730_v42 = vadd.f32 %v5729_v49, %v5728_v0 }
 0xdd3   : > { %v5731_v63 = vpop.f32.mrf.mxu1 }
 0xdd4   : > { %v5346_v52 = vadd.f32 %v5730_v42, %v5602_v6 }
 0xdd5   : > { %v5732_v43 = vpop.f32.mrf.mxu1 }
 0xdd6   : > { %6218 = vtanh.f32 %v5346_v52  ;;  %v5733_v23 = vadd.f32 %v5732_v43, %v5731_v63 }
 0xdd7   : > { %v6213_v24 = vpop.eup %6212  ;;  %v5734_v34 = vpop.f32.mrf.mxu1 }
 0xdd8   : > { %5377 = vst [vmem:[%s10348_s10] sm:$0xff] %v6213_v24  ;;  %v5351_v59 = vadd.f32 %v5733_v23, %v5602_v6 }
 0xdd9   : > { %v5735_v27 = vpop.f32.mrf.mxu1 }
 0xdda   : > { %6220 = vtanh.f32 %v5351_v59  ;;  %v5736_v57 = vadd.f32 %v5735_v27, %v5734_v34 }
 0xddb   : > { %v6215_v31 = vpop.eup %6214  ;;  %v5737_v18 = vpop.f32.mrf.mxu1 }
 0xddc   : > { %5378 = vst [vmem:[%s10348_s10 + $0x8] sm:$0xff] %v6215_v31  ;;  %v5356_v36 = vadd.f32 %v5736_v57, %v5602_v6 }
 0xddd   : > { %v5738_v5 = vpop.f32.mrf.mxu1 }
 0xdde   : > { %6222 = vtanh.f32 %v5356_v36  ;;  %v5739_v17 = vadd.f32 %v5738_v5, %v5737_v18 }
 0xddf   : > { %v6217_v11 = vpop.eup %6216  ;;  %v5740_v50 = vpop.f32.mrf.mxu1 }
 0xde0   : > { %5379 = vst [vmem:[%s10348_s10 + $0x10] sm:$0xff] %v6217_v11  ;;  %v5361_v47 = vadd.f32 %v5739_v17, %v5602_v6 }
 0xde1   : > { %v5741_v51 = vpop.f32.mrf.mxu1 }
 0xde2   : > { %6224 = vtanh.f32 %v5361_v47  ;;  %v5742_v1 = vadd.f32 %v5741_v51, %v5740_v50 }
 0xde3   : > { %v6219_v20 = vpop.eup %6218 }
 0xde4   : > { %5380 = vst [vmem:[%s10348_s10 + $0x18] sm:$0xff] %v6219_v20  ;;  %v5366_v30 = vadd.f32 %v5742_v1, %v5602_v6 }
 0xde6   : > { %6226 = vtanh.f32 %v5366_v30 }
 0xde7   : > { %v6221_v33 = vpop.eup %6220 }
 0xde8   : > { %5381 = vst [vmem:[%s10348_s10 + $0x20] sm:$0xff] %v6221_v33 }
 0xdeb   : > { %v6223_v54 = vpop.eup %6222 }
 0xdec   : > { %5382 = vst [vmem:[%s10348_s10 + $0x28] sm:$0xff] %v6223_v54 }
 0xdef   : > { %v6225_v60 = vpop.eup %6224 }
 0xdf0   : > { %5383 = vst [vmem:[%s10348_s10 + $0x30] sm:$0xff] %v6225_v60 }
 0xdf3   : > { %v6227_v61 = vpop.eup %6226 }
 0xdf4   : > { %5384 = vst [vmem:[%s10348_s10 + $0x38] sm:$0xff] %v6227_v61 }
 0xdf5 PF: > { %s12859_s11 = sld [smem:[#allocation23_spill]]  ;;  %p26_p1 = scmp.ge.s32.totalorder %s6672_s29, 8  }
 0xdf6   : > { %s12860_s15 = sld [smem:[#allocation24_spill]]  ;;  %s12861_s13 = smov %s6510_s14 }
 0xdf7   : > { %s12863_s16 = smov %s6672_s29  ;;  %28 = sbr.rel (!%p26_p1) target bundleno = 16 (0x10), region = 152 }
 0xdfb   : > { %s12862_s14 = smov %s12859_s11 }
 0xdfc   :  { %5396 = vsyncpa [#allocation5], 1 }
 0xdfd   :  { %5398 = vsyncpa [#allocation5 + $0x1], 1 }
 0xdfe   :  { %5399 = vsyncpa [#allocation7], 1 }
 0xdff   :  { %5401 = vsyncpa [#allocation7 + $0x1], 1 }
 0xe00   :  { %5402 = vsyncpa [#allocation10], 1 }
 0xe01   :  { %5403 = vsyncpa [#allocation13], 1 }
 0xe02   :  { %5404 = vsyncpa [#allocation16], 1 }

</bundles_post_ra>
